<compile_context>
chip_gen: v6e
topology: v6e:2x2x1
jax: 0.10.0
libtpu: 0.0.40
codegen_flags: <defaults>
</compile_context>

<pallas_src>
import jax
import jax.numpy as jnp
from jax.experimental import pallas as pl
from jax.experimental.pallas import tpu as pltpu

BN_EPS = 1e-5
EXPANSION = 4


# ----------------------------------------------------------------------------
# Fused kernels
# ----------------------------------------------------------------------------
def _make_head_kernel(H, W, Cin, Cout):
    """3x3 conv (stride 1, pad 1) + folded BN + ReLU, im2col done in-kernel."""
    def kernel(x_ref, w_ref, s_ref, b_ref, o_ref, xpad_ref):
        xpad_ref[...] = jnp.zeros_like(xpad_ref)
        xpad_ref[1:H + 1, 1:W + 1, :] = x_ref[0, :, :, :]
        w = w_ref[...]                                   # (3, 3, Cin, Cout) bf16
        acc = jnp.zeros((H * W, Cout), jnp.float32)
        for dy in range(3):
            for dx in range(3):
                tap = xpad_ref[dy:dy + H, dx:dx + W, :].reshape(H * W, Cin)
                acc = acc + jnp.dot(tap.astype(jnp.bfloat16), w[dy, dx],
                                    preferred_element_type=jnp.float32)
        y = jnp.maximum(acc * s_ref[...] + b_ref[...], 0.0)
        o_ref[0, :, :, :] = y.reshape(H, W, Cout).astype(o_ref.dtype)
    return kernel


def head_forward(p, x):
    B, H, W_, Cin = x.shape
    Cout = p['w'].shape[-1]
    return pl.pallas_call(
        _make_head_kernel(H, W_, Cin, Cout),
        out_shape=jax.ShapeDtypeStruct((B, H, W_, Cout), jnp.float32),
        grid=(B,),
        in_specs=[
            pl.BlockSpec((1, H, W_, Cin), lambda b: (b, 0, 0, 0)),
            pl.BlockSpec((3, 3, Cin, Cout), lambda b: (0, 0, 0, 0)),
            pl.BlockSpec((1, Cout), lambda b: (0, 0)),
            pl.BlockSpec((1, Cout), lambda b: (0, 0)),
        ],
        out_specs=pl.BlockSpec((1, H, W_, Cout), lambda b: (b, 0, 0, 0)),
        scratch_shapes=[pltpu.VMEM((H + 2, W_ + 2, Cin), jnp.float32)],
        compiler_params=pltpu.CompilerParams(dimension_semantics=("parallel",)),
    )(x.astype(jnp.float32), p['w'].astype(jnp.bfloat16),
      p['s'].reshape(1, Cout).astype(jnp.float32),
      p['b'].reshape(1, Cout).astype(jnp.float32))


def _make_block_stride1_kernel(H, W, Cin, Cmid, out_C):
    """Fused bottleneck, stride 1: conv1->dw3x3->conv3 + residual, all in VMEM."""
    def kernel(x_ref, w1_ref, s1_ref, b1_ref, w2_ref, s2_ref, b2_ref,
               w3_ref, s3_ref, b3_ref, o_ref, ypad_ref):
        xf = x_ref[0, :, :, :].reshape(H * W, Cin)                     # f32
        # conv1 (grouped 1x1, shuffle folded into w1 columns) + BN1 + ReLU
        y1 = jnp.dot(xf.astype(jnp.bfloat16), w1_ref[...],
                     preferred_element_type=jnp.float32)
        y1 = jnp.maximum(y1 * s1_ref[...] + b1_ref[...], 0.0)
        # depthwise 3x3, stride 1, pad 1 -- zero-padded VMEM scratch, 9 VPU taps
        ypad_ref[...] = jnp.zeros_like(ypad_ref)
        ypad_ref[1:H + 1, 1:W + 1, :] = y1.reshape(H, W, Cmid)
        w2 = w2_ref[...]                                               # (3, 3, Cmid)
        acc = jnp.zeros((H, W, Cmid), jnp.float32)
        for dy in range(3):
            for dx in range(3):
                acc = acc + ypad_ref[dy:dy + H, dx:dx + W, :] * w2[dy, dx]
        y2 = jnp.maximum(acc.reshape(H * W, Cmid) * s2_ref[...] + b2_ref[...], 0.0)
        # conv3 + BN3 + residual + ReLU
        out = jnp.dot(y2.astype(jnp.bfloat16), w3_ref[...],
                      preferred_element_type=jnp.float32)
        out = jnp.maximum(out * s3_ref[...] + b3_ref[...] + xf, 0.0)
        o_ref[0, :, :, :] = out.reshape(H, W, out_C).astype(o_ref.dtype)
    return kernel


def _make_block_stride2_kernel(H, W, Cin, Cmid, main_C, out_C, Ho, Wo):
    """Fused bottleneck, stride 2: conv1->dw3x3(stride 2)->conv3 || avgpool concat."""
    def kernel(x_ref, w1_ref, s1_ref, b1_ref, w2_ref, s2_ref, b2_ref,
               w3_ref, s3_ref, b3_ref, S_ref, o_ref, ypad_ref, xpad_ref):
        xf = x_ref[0, :, :, :].reshape(H * W, Cin)                     # f32
        S = S_ref[...]                                                 # (Ho*Wo, H*W) 0/1
        # conv1 + BN1 + ReLU (shuffle folded into w1)
        y1 = jnp.dot(xf.astype(jnp.bfloat16), w1_ref[...],
                     preferred_element_type=jnp.float32)
        y1 = jnp.maximum(y1 * s1_ref[...] + b1_ref[...], 0.0)
        # depthwise 3x3: dense taps on the VPU, then exact stride-2 row selection
        # via a tiny 0/1 matmul on the MXU (keeps everything in VMEM).
        ypad_ref[...] = jnp.zeros_like(ypad_ref)
        ypad_ref[1:H + 1, 1:W + 1, :] = y1.reshape(H, W, Cmid)
        w2 = w2_ref[...]
        acc = jnp.zeros((H, W, Cmid), jnp.float32)
        for dy in range(3):
            for dx in range(3):
                acc = acc + ypad_ref[dy:dy + H, dx:dx + W, :] * w2[dy, dx]
        sub = jnp.dot(S, acc.reshape(H * W, Cmid), preferred_element_type=jnp.float32)
        y2 = jnp.maximum(sub * s2_ref[...] + b2_ref[...], 0.0)
        # conv3 + BN3 + ReLU (main branch)
        main = jnp.dot(y2.astype(jnp.bfloat16), w3_ref[...],
                       preferred_element_type=jnp.float32)
        main = jnp.maximum(main * s3_ref[...] + b3_ref[...], 0.0)
        # shortcut: AvgPool2d(3, stride=2, pad=1, count_include_pad) then ReLU
        xpad_ref[...] = jnp.zeros_like(xpad_ref)
        xpad_ref[1:H + 1, 1:W + 1, :] = xf.reshape(H, W, Cin)
        pacc = jnp.zeros((H, W, Cin), jnp.float32)
        for dy in range(3):
            for dx in range(3):
                pacc = pacc + xpad_ref[dy:dy + H, dx:dx + W, :]
        pool = jnp.dot(S, pacc.reshape(H * W, Cin),
                       preferred_element_type=jnp.float32) * (1.0 / 9.0)
        short = jnp.maximum(pool, 0.0)
        out = jnp.concatenate([main, short], axis=-1)                  # (Ho*Wo, out_C)
        o_ref[0, :, :, :] = out.reshape(Ho, Wo, out_C).astype(o_ref.dtype)
    return kernel


def bottleneck_block(x, p, stride):
    B, H, W_, Cin = x.shape
    Cmid = p['w1'].shape[1]
    main_C = p['w3'].shape[1]
    Ho, Wo = H // stride, W_ // stride
    out_C = main_C + (Cin if stride > 1 else 0)

    w1 = p['w1'].astype(jnp.bfloat16)
    w3 = p['w3'].astype(jnp.bfloat16)
    w2 = p['w2'].astype(jnp.float32)
    s1 = p['bn1_s'].reshape(1, Cmid).astype(jnp.float32)
    b1 = p['bn1_b'].reshape(1, Cmid).astype(jnp.float32)
    s2 = p['bn2_s'].reshape(1, Cmid).astype(jnp.float32)
    b2 = p['bn2_b'].reshape(1, Cmid).astype(jnp.float32)
    s3 = p['bn3_s'].reshape(1, main_C).astype(jnp.float32)
    b3 = p['bn3_b'].reshape(1, main_C).astype(jnp.float32)

    args = [x.astype(jnp.float32), w1, s1, b1, w2, s2, b2, w3, s3, b3]
    in_specs = [
        pl.BlockSpec((1, H, W_, Cin), lambda b: (b, 0, 0, 0)),
        pl.BlockSpec((Cin, Cmid), lambda b: (0, 0)),
        pl.BlockSpec((1, Cmid), lambda b: (0, 0)),
        pl.BlockSpec((1, Cmid), lambda b: (0, 0)),
        pl.BlockSpec((3, 3, Cmid), lambda b: (0, 0, 0)),
        pl.BlockSpec((1, Cmid), lambda b: (0, 0)),
        pl.BlockSpec((1, Cmid), lambda b: (0, 0)),
        pl.BlockSpec((Cmid, main_C), lambda b: (0, 0)),
        pl.BlockSpec((1, main_C), lambda b: (0, 0)),
        pl.BlockSpec((1, main_C), lambda b: (0, 0)),
    ]
    scratch = [pltpu.VMEM((H + 2, W_ + 2, Cmid), jnp.float32)]

    if stride > 1:
        # 0/1 selection matrix picking the stride-2 output grid from the dense grid.
        rows = (stride * jnp.arange(Ho)[:, None] * W_
                + stride * jnp.arange(Wo)[None, :]).reshape(-1)
        S = (rows[:, None] == jnp.arange(H * W_)[None, :]).astype(jnp.float32)
        args.append(S)
        in_specs.append(pl.BlockSpec((Ho * Wo, H * W_), lambda b: (0, 0)))
        scratch.append(pltpu.VMEM((H + 2, W_ + 2, Cin), jnp.float32))
        kernel = _make_block_stride2_kernel(H, W_, Cin, Cmid, main_C, out_C, Ho, Wo)
    else:
        kernel = _make_block_stride1_kernel(H, W_, Cin, Cmid, out_C)

    return pl.pallas_call(
        kernel,
        out_shape=jax.ShapeDtypeStruct((B, Ho, Wo, out_C), jnp.float32),
        grid=(B,),
        in_specs=in_specs,
        out_specs=pl.BlockSpec((1, Ho, Wo, out_C), lambda b: (b, 0, 0, 0)),
        scratch_shapes=scratch,
        compiler_params=pltpu.CompilerParams(dimension_semantics=("parallel",)),
    )(*args)


def pool_linear(x, w, b):
    """Global average pool over (H, W) followed by Linear, in one kernel."""
    B, H, W_, C = x.shape
    nc = w.shape[1]

    def kernel(x_ref, w_ref, b_ref, o_ref):
        pooled = jnp.mean(x_ref[...], axis=(1, 2))                       # (B, C) f32
        y = jnp.dot(pooled.astype(jnp.bfloat16), w_ref[...],
                    preferred_element_type=jnp.float32)
        o_ref[...] = (y + b_ref[...]).astype(o_ref.dtype)

    return pl.pallas_call(
        kernel,
        out_shape=jax.ShapeDtypeStruct((B, nc), jnp.float32),
        grid=(1,),
        in_specs=[
            pl.BlockSpec((B, H, W_, C), lambda i: (0, 0, 0, 0)),
            pl.BlockSpec((C, nc), lambda i: (0, 0)),
            pl.BlockSpec((1, nc), lambda i: (0, 0)),
        ],
        out_specs=pl.BlockSpec((B, nc), lambda i: (0, 0)),
        compiler_params=pltpu.CompilerParams(dimension_semantics=("arbitrary",)),
    )(x.astype(jnp.float32), w.astype(jnp.bfloat16),
      b.reshape(1, nc).astype(jnp.float32))


# ----------------------------------------------------------------------------
# Parameter initialization (deterministic, synthetic)
# ----------------------------------------------------------------------------
def _bn_scale_bias(key, C):
    k1, k2 = jax.random.split(key)
    gamma = 1.0 + 0.1 * jax.random.normal(k1, (C,), jnp.float32)
    beta = 0.1 * jax.random.normal(k2, (C,), jnp.float32)
    running_mean = jnp.zeros((C,), jnp.float32)
    running_var = jnp.ones((C,), jnp.float32)
    scale = gamma / jnp.sqrt(running_var + BN_EPS)
    bias = beta - running_mean * scale
    return scale, bias


def _group_conv1x1_dense(key, cin, cout, groups):
    """Dense (Cin, Cout) block-diagonal weight equivalent to a grouped 1x1 conv."""
    cin_g, cout_g = cin // groups, cout // groups
    w = 0.1 * jax.random.normal(key, (groups, cin_g, cout_g), jnp.float32)
    dense = jnp.zeros((cin, cout), jnp.float32)
    for g in range(groups):
        dense = dense.at[g * cin_g:(g + 1) * cin_g,
                         g * cout_g:(g + 1) * cout_g].set(w[g])
    return dense


def init_params(key, cfg, num_classes=10):
    groups = cfg['groups']
    in_C = cfg['in_C']
    keys = iter(jax.random.split(key, 256))

    params = {}
    head_s, head_b = _bn_scale_bias(next(keys), in_C)
    params['head'] = {
        'w': 0.1 * jax.random.normal(next(keys), (3, 3, 3, in_C), jnp.float32),
        's': head_s, 'b': head_b,
    }

    blocks, block_cfgs = [], []
    cur = in_C
    for out_C, nb in zip(cfg['out_C'], cfg['num_blocks']):
        for i in range(nb):
            stride = 1 if i else 2
            mod_out = out_C if i else out_C - cur
            C = mod_out // EXPANSION
            w1 = _group_conv1x1_dense(next(keys), cur, C, groups)
            w2 = 0.1 * jax.random.normal(next(keys), (3, 3, C), jnp.float32)
            w3 = _group_conv1x1_dense(next(keys), C, mod_out, groups)
            bn1_s, bn1_b = _bn_scale_bias(next(keys), C)
            bn2_s, bn2_b = _bn_scale_bias(next(keys), C)
            bn3_s, bn3_b = _bn_scale_bias(next(keys), mod_out)
            # Fold the channel shuffle (a static permutation of conv1's output
            # channels) into the weight columns and bn1 params: shuffled channel
            # k = b*g + a corresponds to original channel a*(C//g) + b.
            perm = jnp.arange(C).reshape(groups, C // groups).T.reshape(-1)
            blocks.append({
                'w1': w1[:, perm], 'bn1_s': bn1_s[perm], 'bn1_b': bn1_b[perm],
                'w2': w2, 'bn2_s': bn2_s, 'bn2_b': bn2_b,
                'w3': w3, 'bn3_s': bn3_s, 'bn3_b': bn3_b,
            })
            block_cfgs.append({'stride': stride, 'mid_C': C})
            cur = out_C
    params['blocks'] = blocks

    params['classifier'] = {
        'w': 0.1 * jax.random.normal(next(keys), (cur, num_classes), jnp.float32),
        'b': 0.1 * jax.random.normal(next(keys), (num_classes,), jnp.float32),
    }
    return params, block_cfgs


# ----------------------------------------------------------------------------
# Model forward
# ----------------------------------------------------------------------------
def shufflenet_forward(params, block_cfgs, x_nchw):
    # layout: convert PyTorch NCHW input to NHWC for all kernels.
    x = jnp.transpose(x_nchw, (0, 2, 3, 1)).astype(jnp.float32)
    x = head_forward(params['head'], x)
    for bp, bc in zip(params['blocks'], block_cfgs):
        x = bottleneck_block(x, bp, bc['stride'])
    return pool_linear(x, params['classifier']['w'], params['classifier']['b'])


# ----------------------------------------------------------------------------
if __name__ == "__main__":
    cfg = {'groups': 2, 'in_C': 16, 'out_C': [32, 48, 64], 'num_blocks': [2, 1, 1]}
    key = jax.random.PRNGKey(0)
    kp, kx = jax.random.split(key)

    params, block_cfgs = init_params(kp, cfg, num_classes=10)
    x = jax.random.normal(kx, (2, 3, 16, 16), jnp.float32)   # NCHW, like PyTorch

    fwd = jax.jit(lambda inp: shufflenet_forward(params, block_cfgs, inp))
    out = jax.block_until_ready(fwd(x))
    assert out.shape == (2, 10), out.shape
    assert bool(jnp.all(jnp.isfinite(out)))
    print("KERNEL_OK")
</pallas_src>

<mosaic_0001>
module attributes {stable_mosaic.version = 11 : i64} {
  func.func @kernel(%arg0: i32, %arg1: memref<1x16x16x3xf32, #tpu.memory_space<vmem>>, %arg2: memref<3x3x3x16xbf16, #tpu.memory_space<vmem>>, %arg3: memref<1x16xf32, #tpu.memory_space<vmem>>, %arg4: memref<1x16xf32, #tpu.memory_space<vmem>>, %arg5: memref<1x16x16x16xf32, #tpu.memory_space<vmem>>, %arg6: memref<18x18x3xf32, #tpu.memory_space<vmem>>) attributes {dimension_semantics = [#tpu.dimension_semantics<parallel>], iteration_bounds = array<i64: 2>, scalar_prefetch = 0 : i64, scratch_operands = 1 : i64, tpu.core_type = #tpu.core_type<tc>, window_params = [{transform_indices = @transform_0, window_bounds = array<i64: 1, 16, 16, 3>}, {pipeline_mode = #tpu.pipeline_mode<synchronous>, transform_indices = @transform_1, window_bounds = array<i64: 3, 3, 3, 16>}, {pipeline_mode = #tpu.pipeline_mode<synchronous>, transform_indices = @transform_2, window_bounds = array<i64: 1, 16>}, {pipeline_mode = #tpu.pipeline_mode<synchronous>, transform_indices = @transform_3, window_bounds = array<i64: 1, 16>}, {transform_indices = @transform_4, window_bounds = array<i64: 1, 16, 16, 16>}]} {
    %cst = arith.constant 0.000000e+00 : f32
    %0 = vector.broadcast %cst : f32 to vector<18x18x3xf32>
    %c0 = arith.constant 0 : index
    %c0_0 = arith.constant 0 : index
    %c0_1 = arith.constant 0 : index
    %1 = vector.load %arg6[%c0, %c0_0, %c0_1] : memref<18x18x3xf32, #tpu.memory_space<vmem>>, vector<18x18x3xf32>
    tpu.vector_store %arg6[%c0, %c0_0, %c0_1], %0 {strides = array<i32>} : memref<18x18x3xf32, #tpu.memory_space<vmem>>, vector<18x18x3xf32>,
    %c0_2 = arith.constant 0 : index
    %c0_3 = arith.constant 0 : index
    %c0_4 = arith.constant 0 : index
    %c0_5 = arith.constant 0 : index
    %2 = vector.load %arg1[%c0_2, %c0_3, %c0_4, %c0_5] : memref<1x16x16x3xf32, #tpu.memory_space<vmem>>, vector<1x16x16x3xf32>
    %3 = vector.shape_cast %2 : vector<1x16x16x3xf32> to vector<16x16x3xf32>
    %c1 = arith.constant 1 : index
    %c1_6 = arith.constant 1 : index
    %c0_7 = arith.constant 0 : index
    %4 = vector.load %arg6[%c1, %c1_6, %c0_7] : memref<18x18x3xf32, #tpu.memory_space<vmem>>, vector<16x16x3xf32>
    tpu.vector_store %arg6[%c1, %c1_6, %c0_7], %3 {strides = array<i32>} : memref<18x18x3xf32, #tpu.memory_space<vmem>>, vector<16x16x3xf32>,
    %c0_8 = arith.constant 0 : index
    %c0_9 = arith.constant 0 : index
    %c0_10 = arith.constant 0 : index
    %c0_11 = arith.constant 0 : index
    %5 = vector.load %arg2[%c0_8, %c0_9, %c0_10, %c0_11] : memref<3x3x3x16xbf16, #tpu.memory_space<vmem>>, vector<3x3x3x16xbf16>
    %cst_12 = arith.constant 0.000000e+00 : f32
    %6 = vector.broadcast %cst_12 : f32 to vector<256x16xf32>
    %c0_13 = arith.constant 0 : index
    %c0_14 = arith.constant 0 : index
    %c0_15 = arith.constant 0 : index
    %7 = vector.load %arg6[%c0_13, %c0_14, %c0_15] : memref<18x18x3xf32, #tpu.memory_space<vmem>>, vector<16x16x3xf32>
    %8 = vector.shape_cast %7 : vector<16x16x3xf32> to vector<256x3xf32>
    %9 = arith.truncf %8 : vector<256x3xf32> to vector<256x3xbf16>
    %10 = vector.extract_strided_slice %5 {offsets = [0, 0, 0, 0], sizes = [1, 1, 3, 16], strides = [1, 1, 1, 1]} : vector<3x3x3x16xbf16> to vector<1x1x3x16xbf16>
    %11 = vector.shape_cast %10 : vector<1x1x3x16xbf16> to vector<3x16xbf16>
    %cst_16 = arith.constant dense<0.000000e+00> : vector<256x16xf32>
    %12 = tpu.matmul %9, %11, %cst_16 {dimension_numbers = #tpu.dot_dimension_numbers<[1], [0], [0], [1], [0, 0, 1, 1], [], []>} : vector<256x3xbf16>, vector<3x16xbf16>, vector<256x16xf32> -> vector<256x16xf32>
    %13 = arith.addf %6, %12 : vector<256x16xf32>
    %c0_17 = arith.constant 0 : index
    %c1_18 = arith.constant 1 : index
    %c0_19 = arith.constant 0 : index
    %14 = vector.load %arg6[%c0_17, %c1_18, %c0_19] : memref<18x18x3xf32, #tpu.memory_space<vmem>>, vector<16x16x3xf32>
    %15 = vector.shape_cast %14 : vector<16x16x3xf32> to vector<256x3xf32>
    %16 = arith.truncf %15 : vector<256x3xf32> to vector<256x3xbf16>
    %17 = vector.extract_strided_slice %5 {offsets = [0, 1, 0, 0], sizes = [1, 1, 3, 16], strides = [1, 1, 1, 1]} : vector<3x3x3x16xbf16> to vector<1x1x3x16xbf16>
    %18 = vector.shape_cast %17 : vector<1x1x3x16xbf16> to vector<3x16xbf16>
    %cst_20 = arith.constant dense<0.000000e+00> : vector<256x16xf32>
    %19 = tpu.matmul %16, %18, %cst_20 {dimension_numbers = #tpu.dot_dimension_numbers<[1], [0], [0], [1], [0, 0, 1, 1], [], []>} : vector<256x3xbf16>, vector<3x16xbf16>, vector<256x16xf32> -> vector<256x16xf32>
    %20 = arith.addf %13, %19 : vector<256x16xf32>
    %c0_21 = arith.constant 0 : index
    %c2 = arith.constant 2 : index
    %c0_22 = arith.constant 0 : index
    %21 = vector.load %arg6[%c0_21, %c2, %c0_22] : memref<18x18x3xf32, #tpu.memory_space<vmem>>, vector<16x16x3xf32>
    %22 = vector.shape_cast %21 : vector<16x16x3xf32> to vector<256x3xf32>
    %23 = arith.truncf %22 : vector<256x3xf32> to vector<256x3xbf16>
    %24 = vector.extract_strided_slice %5 {offsets = [0, 2, 0, 0], sizes = [1, 1, 3, 16], strides = [1, 1, 1, 1]} : vector<3x3x3x16xbf16> to vector<1x1x3x16xbf16>
    %25 = vector.shape_cast %24 : vector<1x1x3x16xbf16> to vector<3x16xbf16>
    %cst_23 = arith.constant dense<0.000000e+00> : vector<256x16xf32>
    %26 = tpu.matmul %23, %25, %cst_23 {dimension_numbers = #tpu.dot_dimension_numbers<[1], [0], [0], [1], [0, 0, 1, 1], [], []>} : vector<256x3xbf16>, vector<3x16xbf16>, vector<256x16xf32> -> vector<256x16xf32>
    %27 = arith.addf %20, %26 : vector<256x16xf32>
    %c1_24 = arith.constant 1 : index
    %c0_25 = arith.constant 0 : index
    %c0_26 = arith.constant 0 : index
    %28 = vector.load %arg6[%c1_24, %c0_25, %c0_26] : memref<18x18x3xf32, #tpu.memory_space<vmem>>, vector<16x16x3xf32>
    %29 = vector.shape_cast %28 : vector<16x16x3xf32> to vector<256x3xf32>
    %30 = arith.truncf %29 : vector<256x3xf32> to vector<256x3xbf16>
    %31 = vector.extract_strided_slice %5 {offsets = [1, 0, 0, 0], sizes = [1, 1, 3, 16], strides = [1, 1, 1, 1]} : vector<3x3x3x16xbf16> to vector<1x1x3x16xbf16>
    %32 = vector.shape_cast %31 : vector<1x1x3x16xbf16> to vector<3x16xbf16>
    %cst_27 = arith.constant dense<0.000000e+00> : vector<256x16xf32>
    %33 = tpu.matmul %30, %32, %cst_27 {dimension_numbers = #tpu.dot_dimension_numbers<[1], [0], [0], [1], [0, 0, 1, 1], [], []>} : vector<256x3xbf16>, vector<3x16xbf16>, vector<256x16xf32> -> vector<256x16xf32>
    %34 = arith.addf %27, %33 : vector<256x16xf32>
    %c1_28 = arith.constant 1 : index
    %c1_29 = arith.constant 1 : index
    %c0_30 = arith.constant 0 : index
    %35 = vector.load %arg6[%c1_28, %c1_29, %c0_30] : memref<18x18x3xf32, #tpu.memory_space<vmem>>, vector<16x16x3xf32>
    %36 = vector.shape_cast %35 : vector<16x16x3xf32> to vector<256x3xf32>
    %37 = arith.truncf %36 : vector<256x3xf32> to vector<256x3xbf16>
    %38 = vector.extract_strided_slice %5 {offsets = [1, 1, 0, 0], sizes = [1, 1, 3, 16], strides = [1, 1, 1, 1]} : vector<3x3x3x16xbf16> to vector<1x1x3x16xbf16>
    %39 = vector.shape_cast %38 : vector<1x1x3x16xbf16> to vector<3x16xbf16>
    %cst_31 = arith.constant dense<0.000000e+00> : vector<256x16xf32>
    %40 = tpu.matmul %37, %39, %cst_31 {dimension_numbers = #tpu.dot_dimension_numbers<[1], [0], [0], [1], [0, 0, 1, 1], [], []>} : vector<256x3xbf16>, vector<3x16xbf16>, vector<256x16xf32> -> vector<256x16xf32>
    %41 = arith.addf %34, %40 : vector<256x16xf32>
    %c1_32 = arith.constant 1 : index
    %c2_33 = arith.constant 2 : index
    %c0_34 = arith.constant 0 : index
    %42 = vector.load %arg6[%c1_32, %c2_33, %c0_34] : memref<18x18x3xf32, #tpu.memory_space<vmem>>, vector<16x16x3xf32>
    %43 = vector.shape_cast %42 : vector<16x16x3xf32> to vector<256x3xf32>
    %44 = arith.truncf %43 : vector<256x3xf32> to vector<256x3xbf16>
    %45 = vector.extract_strided_slice %5 {offsets = [1, 2, 0, 0], sizes = [1, 1, 3, 16], strides = [1, 1, 1, 1]} : vector<3x3x3x16xbf16> to vector<1x1x3x16xbf16>
    %46 = vector.shape_cast %45 : vector<1x1x3x16xbf16> to vector<3x16xbf16>
    %cst_35 = arith.constant dense<0.000000e+00> : vector<256x16xf32>
    %47 = tpu.matmul %44, %46, %cst_35 {dimension_numbers = #tpu.dot_dimension_numbers<[1], [0], [0], [1], [0, 0, 1, 1], [], []>} : vector<256x3xbf16>, vector<3x16xbf16>, vector<256x16xf32> -> vector<256x16xf32>
    %48 = arith.addf %41, %47 : vector<256x16xf32>
    %c2_36 = arith.constant 2 : index
    %c0_37 = arith.constant 0 : index
    %c0_38 = arith.constant 0 : index
    %49 = vector.load %arg6[%c2_36, %c0_37, %c0_38] : memref<18x18x3xf32, #tpu.memory_space<vmem>>, vector<16x16x3xf32>
    %50 = vector.shape_cast %49 : vector<16x16x3xf32> to vector<256x3xf32>
    %51 = arith.truncf %50 : vector<256x3xf32> to vector<256x3xbf16>
    %52 = vector.extract_strided_slice %5 {offsets = [2, 0, 0, 0], sizes = [1, 1, 3, 16], strides = [1, 1, 1, 1]} : vector<3x3x3x16xbf16> to vector<1x1x3x16xbf16>
    %53 = vector.shape_cast %52 : vector<1x1x3x16xbf16> to vector<3x16xbf16>
    %cst_39 = arith.constant dense<0.000000e+00> : vector<256x16xf32>
    %54 = tpu.matmul %51, %53, %cst_39 {dimension_numbers = #tpu.dot_dimension_numbers<[1], [0], [0], [1], [0, 0, 1, 1], [], []>} : vector<256x3xbf16>, vector<3x16xbf16>, vector<256x16xf32> -> vector<256x16xf32>
    %55 = arith.addf %48, %54 : vector<256x16xf32>
    %c2_40 = arith.constant 2 : index
    %c1_41 = arith.constant 1 : index
    %c0_42 = arith.constant 0 : index
    %56 = vector.load %arg6[%c2_40, %c1_41, %c0_42] : memref<18x18x3xf32, #tpu.memory_space<vmem>>, vector<16x16x3xf32>
    %57 = vector.shape_cast %56 : vector<16x16x3xf32> to vector<256x3xf32>
    %58 = arith.truncf %57 : vector<256x3xf32> to vector<256x3xbf16>
    %59 = vector.extract_strided_slice %5 {offsets = [2, 1, 0, 0], sizes = [1, 1, 3, 16], strides = [1, 1, 1, 1]} : vector<3x3x3x16xbf16> to vector<1x1x3x16xbf16>
    %60 = vector.shape_cast %59 : vector<1x1x3x16xbf16> to vector<3x16xbf16>
    %cst_43 = arith.constant dense<0.000000e+00> : vector<256x16xf32>
    %61 = tpu.matmul %58, %60, %cst_43 {dimension_numbers = #tpu.dot_dimension_numbers<[1], [0], [0], [1], [0, 0, 1, 1], [], []>} : vector<256x3xbf16>, vector<3x16xbf16>, vector<256x16xf32> -> vector<256x16xf32>
    %62 = arith.addf %55, %61 : vector<256x16xf32>
    %c2_44 = arith.constant 2 : index
    %c2_45 = arith.constant 2 : index
    %c0_46 = arith.constant 0 : index
    %63 = vector.load %arg6[%c2_44, %c2_45, %c0_46] : memref<18x18x3xf32, #tpu.memory_space<vmem>>, vector<16x16x3xf32>
    %64 = vector.shape_cast %63 : vector<16x16x3xf32> to vector<256x3xf32>
    %65 = arith.truncf %64 : vector<256x3xf32> to vector<256x3xbf16>
    %66 = vector.extract_strided_slice %5 {offsets = [2, 2, 0, 0], sizes = [1, 1, 3, 16], strides = [1, 1, 1, 1]} : vector<3x3x3x16xbf16> to vector<1x1x3x16xbf16>
    %67 = vector.shape_cast %66 : vector<1x1x3x16xbf16> to vector<3x16xbf16>
    %cst_47 = arith.constant dense<0.000000e+00> : vector<256x16xf32>
    %68 = tpu.matmul %65, %67, %cst_47 {dimension_numbers = #tpu.dot_dimension_numbers<[1], [0], [0], [1], [0, 0, 1, 1], [], []>} : vector<256x3xbf16>, vector<3x16xbf16>, vector<256x16xf32> -> vector<256x16xf32>
    %69 = arith.addf %62, %68 : vector<256x16xf32>
    %c0_48 = arith.constant 0 : index
    %c0_49 = arith.constant 0 : index
    %70 = vector.load %arg3[%c0_48, %c0_49] : memref<1x16xf32, #tpu.memory_space<vmem>>, vector<1x16xf32>
    %71 = vector.broadcast %70 : vector<1x16xf32> to vector<256x16xf32>
    %72 = arith.mulf %69, %71 : vector<256x16xf32>
    %c0_50 = arith.constant 0 : index
    %c0_51 = arith.constant 0 : index
    %73 = vector.load %arg4[%c0_50, %c0_51] : memref<1x16xf32, #tpu.memory_space<vmem>>, vector<1x16xf32>
    %74 = vector.broadcast %73 : vector<1x16xf32> to vector<256x16xf32>
    %75 = arith.addf %72, %74 : vector<256x16xf32>
    %cst_52 = arith.constant 0.000000e+00 : f32
    %76 = vector.broadcast %cst_52 : f32 to vector<256x16xf32>
    %77 = arith.maximumf %75, %76 : vector<256x16xf32>
    %78 = vector.shape_cast %77 : vector<256x16xf32> to vector<16x16x16xf32>
    %c0_53 = arith.constant 0 : index
    %c0_54 = arith.constant 0 : index
    %c0_55 = arith.constant 0 : index
    %c0_56 = arith.constant 0 : index
    %79 = vector.load %arg5[%c0_53, %c0_54, %c0_55, %c0_56] : memref<1x16x16x16xf32, #tpu.memory_space<vmem>>, vector<1x16x16x16xf32>
    %80 = vector.shape_cast %79 : vector<1x16x16x16xf32> to vector<16x16x16xf32>
    %81 = vector.shape_cast %78 : vector<16x16x16xf32> to vector<1x16x16x16xf32>
    tpu.vector_store %arg5[%c0_53, %c0_54, %c0_55, %c0_56], %81 {strides = array<i32>} : memref<1x16x16x16xf32, #tpu.memory_space<vmem>>, vector<1x16x16x16xf32>,
    return
  }
  func.func @transform_0(%arg0: i32) -> (i32, i32, i32, i32) {
    %c0_i32 = arith.constant 0 : i32
    %c0_i32_0 = arith.constant 0 : i32
    %c0_i32_1 = arith.constant 0 : i32
    %c0_i32_2 = arith.constant 0 : i32
    return %arg0, %c0_i32, %c0_i32_0, %c0_i32_1 : i32, i32, i32, i32
  }
  func.func @transform_1(%arg0: i32) -> (i32, i32, i32, i32) {
    %c0_i32 = arith.constant 0 : i32
    %c0_i32_0 = arith.constant 0 : i32
    %c0_i32_1 = arith.constant 0 : i32
    %c0_i32_2 = arith.constant 0 : i32
    %c0_i32_3 = arith.constant 0 : i32
    return %c0_i32, %c0_i32_0, %c0_i32_1, %c0_i32_2 : i32, i32, i32, i32
  }
  func.func @transform_2(%arg0: i32) -> (i32, i32) {
    %c0_i32 = arith.constant 0 : i32
    %c0_i32_0 = arith.constant 0 : i32
    %c0_i32_1 = arith.constant 0 : i32
    return %c0_i32, %c0_i32_0 : i32, i32
  }
  func.func @transform_3(%arg0: i32) -> (i32, i32) {
    %c0_i32 = arith.constant 0 : i32
    %c0_i32_0 = arith.constant 0 : i32
    %c0_i32_1 = arith.constant 0 : i32
    return %c0_i32, %c0_i32_0 : i32, i32
  }
  func.func @transform_4(%arg0: i32) -> (i32, i32, i32, i32) {
    %c0_i32 = arith.constant 0 : i32
    %c0_i32_0 = arith.constant 0 : i32
    %c0_i32_1 = arith.constant 0 : i32
    %c0_i32_2 = arith.constant 0 : i32
    return %arg0, %c0_i32, %c0_i32_0, %c0_i32_1 : i32, i32, i32, i32
  }
}

module attributes {stable_mosaic.version = 11 : i64} {
  func.func @kernel(%arg0: i32, %arg1: memref<1x8x8x32xf32, #tpu.memory_space<vmem>>, %arg2: memref<32x8xbf16, #tpu.memory_space<vmem>>, %arg3: memref<1x8xf32, #tpu.memory_space<vmem>>, %arg4: memref<1x8xf32, #tpu.memory_space<vmem>>, %arg5: memref<3x3x8xf32, #tpu.memory_space<vmem>>, %arg6: memref<1x8xf32, #tpu.memory_space<vmem>>, %arg7: memref<1x8xf32, #tpu.memory_space<vmem>>, %arg8: memref<8x32xbf16, #tpu.memory_space<vmem>>, %arg9: memref<1x32xf32, #tpu.memory_space<vmem>>, %arg10: memref<1x32xf32, #tpu.memory_space<vmem>>, %arg11: memref<1x8x8x32xf32, #tpu.memory_space<vmem>>, %arg12: memref<10x10x8xf32, #tpu.memory_space<vmem>>) attributes {dimension_semantics = [#tpu.dimension_semantics<parallel>], iteration_bounds = array<i64: 2>, scalar_prefetch = 0 : i64, scratch_operands = 1 : i64, tpu.core_type = #tpu.core_type<tc>, window_params = [{transform_indices = @transform_0, window_bounds = array<i64: 1, 8, 8, 32>}, {pipeline_mode = #tpu.pipeline_mode<synchronous>, transform_indices = @transform_1, window_bounds = array<i64: 32, 8>}, {pipeline_mode = #tpu.pipeline_mode<synchronous>, transform_indices = @transform_2, window_bounds = array<i64: 1, 8>}, {pipeline_mode = #tpu.pipeline_mode<synchronous>, transform_indices = @transform_3, window_bounds = array<i64: 1, 8>}, {pipeline_mode = #tpu.pipeline_mode<synchronous>, transform_indices = @transform_4, window_bounds = array<i64: 3, 3, 8>}, {pipeline_mode = #tpu.pipeline_mode<synchronous>, transform_indices = @transform_5, window_bounds = array<i64: 1, 8>}, {pipeline_mode = #tpu.pipeline_mode<synchronous>, transform_indices = @transform_6, window_bounds = array<i64: 1, 8>}, {pipeline_mode = #tpu.pipeline_mode<synchronous>, transform_indices = @transform_7, window_bounds = array<i64: 8, 32>}, {pipeline_mode = #tpu.pipeline_mode<synchronous>, transform_indices = @transform_8, window_bounds = array<i64: 1, 32>}, {pipeline_mode = #tpu.pipeline_mode<synchronous>, transform_indices = @transform_9, window_bounds = array<i64: 1, 32>}, {transform_indices = @transform_10, window_bounds = array<i64: 1, 8, 8, 32>}]} {
    %c0 = arith.constant 0 : index
    %c0_0 = arith.constant 0 : index
    %c0_1 = arith.constant 0 : index
    %c0_2 = arith.constant 0 : index
    %0 = vector.load %arg1[%c0, %c0_0, %c0_1, %c0_2] : memref<1x8x8x32xf32, #tpu.memory_space<vmem>>, vector<1x8x8x32xf32>
    %1 = vector.shape_cast %0 : vector<1x8x8x32xf32> to vector<8x8x32xf32>
    %2 = vector.shape_cast %1 : vector<8x8x32xf32> to vector<64x32xf32>
    %3 = arith.truncf %2 : vector<64x32xf32> to vector<64x32xbf16>
    %c0_3 = arith.constant 0 : index
    %c0_4 = arith.constant 0 : index
    %4 = vector.load %arg2[%c0_3, %c0_4] : memref<32x8xbf16, #tpu.memory_space<vmem>>, vector<32x8xbf16>
    %cst = arith.constant dense<0.000000e+00> : vector<64x8xf32>
    %5 = tpu.matmul %3, %4, %cst {dimension_numbers = #tpu.dot_dimension_numbers<[1], [0], [0], [1], [0, 0, 1, 1], [], []>} : vector<64x32xbf16>, vector<32x8xbf16>, vector<64x8xf32> -> vector<64x8xf32>
    %c0_5 = arith.constant 0 : index
    %c0_6 = arith.constant 0 : index
    %6 = vector.load %arg3[%c0_5, %c0_6] : memref<1x8xf32, #tpu.memory_space<vmem>>, vector<1x8xf32>
    %7 = vector.broadcast %6 : vector<1x8xf32> to vector<64x8xf32>
    %8 = arith.mulf %5, %7 : vector<64x8xf32>
    %c0_7 = arith.constant 0 : index
    %c0_8 = arith.constant 0 : index
    %9 = vector.load %arg4[%c0_7, %c0_8] : memref<1x8xf32, #tpu.memory_space<vmem>>, vector<1x8xf32>
    %10 = vector.broadcast %9 : vector<1x8xf32> to vector<64x8xf32>
    %11 = arith.addf %8, %10 : vector<64x8xf32>
    %cst_9 = arith.constant 0.000000e+00 : f32
    %12 = vector.broadcast %cst_9 : f32 to vector<64x8xf32>
    %13 = arith.maximumf %11, %12 : vector<64x8xf32>
    %cst_10 = arith.constant 0.000000e+00 : f32
    %14 = vector.broadcast %cst_10 : f32 to vector<10x10x8xf32>
    %c0_11 = arith.constant 0 : index
    %c0_12 = arith.constant 0 : index
    %c0_13 = arith.constant 0 : index
    %15 = vector.load %arg12[%c0_11, %c0_12, %c0_13] : memref<10x10x8xf32, #tpu.memory_space<vmem>>, vector<10x10x8xf32>
    tpu.vector_store %arg12[%c0_11, %c0_12, %c0_13], %14 {strides = array<i32>} : memref<10x10x8xf32, #tpu.memory_space<vmem>>, vector<10x10x8xf32>,
    %16 = vector.shape_cast %13 : vector<64x8xf32> to vector<8x8x8xf32>
    %c1 = arith.constant 1 : index
    %c1_14 = arith.constant 1 : index
    %c0_15 = arith.constant 0 : index
    %17 = vector.load %arg12[%c1, %c1_14, %c0_15] : memref<10x10x8xf32, #tpu.memory_space<vmem>>, vector<8x8x8xf32>
    tpu.vector_store %arg12[%c1, %c1_14, %c0_15], %16 {strides = array<i32>} : memref<10x10x8xf32, #tpu.memory_space<vmem>>, vector<8x8x8xf32>,
    %c0_16 = arith.constant 0 : index
    %c0_17 = arith.constant 0 : index
    %c0_18 = arith.constant 0 : index
    %18 = vector.load %arg5[%c0_16, %c0_17, %c0_18] : memref<3x3x8xf32, #tpu.memory_space<vmem>>, vector<3x3x8xf32>
    %cst_19 = arith.constant 0.000000e+00 : f32
    %19 = vector.broadcast %cst_19 : f32 to vector<8x8x8xf32>
    %c0_20 = arith.constant 0 : index
    %c0_21 = arith.constant 0 : index
    %c0_22 = arith.constant 0 : index
    %20 = vector.load %arg12[%c0_20, %c0_21, %c0_22] : memref<10x10x8xf32, #tpu.memory_space<vmem>>, vector<8x8x8xf32>
    %21 = vector.extract_strided_slice %18 {offsets = [0, 0, 0], sizes = [1, 1, 8], strides = [1, 1, 1]} : vector<3x3x8xf32> to vector<1x1x8xf32>
    %22 = vector.shape_cast %21 : vector<1x1x8xf32> to vector<8xf32>
    %23 = vector.shape_cast %22 : vector<8xf32> to vector<1x1x8xf32>
    %24 = vector.broadcast %23 : vector<1x1x8xf32> to vector<8x8x8xf32>
    %25 = arith.mulf %20, %24 : vector<8x8x8xf32>
    %26 = arith.addf %19, %25 : vector<8x8x8xf32>
    %c0_23 = arith.constant 0 : index
    %c1_24 = arith.constant 1 : index
    %c0_25 = arith.constant 0 : index
    %27 = vector.load %arg12[%c0_23, %c1_24, %c0_25] : memref<10x10x8xf32, #tpu.memory_space<vmem>>, vector<8x8x8xf32>
    %28 = vector.extract_strided_slice %18 {offsets = [0, 1, 0], sizes = [1, 1, 8], strides = [1, 1, 1]} : vector<3x3x8xf32> to vector<1x1x8xf32>
    %29 = vector.shape_cast %28 : vector<1x1x8xf32> to vector<8xf32>
    %30 = vector.shape_cast %29 : vector<8xf32> to vector<1x1x8xf32>
    %31 = vector.broadcast %30 : vector<1x1x8xf32> to vector<8x8x8xf32>
    %32 = arith.mulf %27, %31 : vector<8x8x8xf32>
    %33 = arith.addf %26, %32 : vector<8x8x8xf32>
    %c0_26 = arith.constant 0 : index
    %c2 = arith.constant 2 : index
    %c0_27 = arith.constant 0 : index
    %34 = vector.load %arg12[%c0_26, %c2, %c0_27] : memref<10x10x8xf32, #tpu.memory_space<vmem>>, vector<8x8x8xf32>
    %35 = vector.extract_strided_slice %18 {offsets = [0, 2, 0], sizes = [1, 1, 8], strides = [1, 1, 1]} : vector<3x3x8xf32> to vector<1x1x8xf32>
    %36 = vector.shape_cast %35 : vector<1x1x8xf32> to vector<8xf32>
    %37 = vector.shape_cast %36 : vector<8xf32> to vector<1x1x8xf32>
    %38 = vector.broadcast %37 : vector<1x1x8xf32> to vector<8x8x8xf32>
    %39 = arith.mulf %34, %38 : vector<8x8x8xf32>
    %40 = arith.addf %33, %39 : vector<8x8x8xf32>
    %c1_28 = arith.constant 1 : index
    %c0_29 = arith.constant 0 : index
    %c0_30 = arith.constant 0 : index
    %41 = vector.load %arg12[%c1_28, %c0_29, %c0_30] : memref<10x10x8xf32, #tpu.memory_space<vmem>>, vector<8x8x8xf32>
    %42 = vector.extract_strided_slice %18 {offsets = [1, 0, 0], sizes = [1, 1, 8], strides = [1, 1, 1]} : vector<3x3x8xf32> to vector<1x1x8xf32>
    %43 = vector.shape_cast %42 : vector<1x1x8xf32> to vector<8xf32>
    %44 = vector.shape_cast %43 : vector<8xf32> to vector<1x1x8xf32>
    %45 = vector.broadcast %44 : vector<1x1x8xf32> to vector<8x8x8xf32>
    %46 = arith.mulf %41, %45 : vector<8x8x8xf32>
    %47 = arith.addf %40, %46 : vector<8x8x8xf32>
    %c1_31 = arith.constant 1 : index
    %c1_32 = arith.constant 1 : index
    %c0_33 = arith.constant 0 : index
    %48 = vector.load %arg12[%c1_31, %c1_32, %c0_33] : memref<10x10x8xf32, #tpu.memory_space<vmem>>, vector<8x8x8xf32>
    %49 = vector.extract_strided_slice %18 {offsets = [1, 1, 0], sizes = [1, 1, 8], strides = [1, 1, 1]} : vector<3x3x8xf32> to vector<1x1x8xf32>
    %50 = vector.shape_cast %49 : vector<1x1x8xf32> to vector<8xf32>
    %51 = vector.shape_cast %50 : vector<8xf32> to vector<1x1x8xf32>
    %52 = vector.broadcast %51 : vector<1x1x8xf32> to vector<8x8x8xf32>
    %53 = arith.mulf %48, %52 : vector<8x8x8xf32>
    %54 = arith.addf %47, %53 : vector<8x8x8xf32>
    %c1_34 = arith.constant 1 : index
    %c2_35 = arith.constant 2 : index
    %c0_36 = arith.constant 0 : index
    %55 = vector.load %arg12[%c1_34, %c2_35, %c0_36] : memref<10x10x8xf32, #tpu.memory_space<vmem>>, vector<8x8x8xf32>
    %56 = vector.extract_strided_slice %18 {offsets = [1, 2, 0], sizes = [1, 1, 8], strides = [1, 1, 1]} : vector<3x3x8xf32> to vector<1x1x8xf32>
    %57 = vector.shape_cast %56 : vector<1x1x8xf32> to vector<8xf32>
    %58 = vector.shape_cast %57 : vector<8xf32> to vector<1x1x8xf32>
    %59 = vector.broadcast %58 : vector<1x1x8xf32> to vector<8x8x8xf32>
    %60 = arith.mulf %55, %59 : vector<8x8x8xf32>
    %61 = arith.addf %54, %60 : vector<8x8x8xf32>
    %c2_37 = arith.constant 2 : index
    %c0_38 = arith.constant 0 : index
    %c0_39 = arith.constant 0 : index
    %62 = vector.load %arg12[%c2_37, %c0_38, %c0_39] : memref<10x10x8xf32, #tpu.memory_space<vmem>>, vector<8x8x8xf32>
    %63 = vector.extract_strided_slice %18 {offsets = [2, 0, 0], sizes = [1, 1, 8], strides = [1, 1, 1]} : vector<3x3x8xf32> to vector<1x1x8xf32>
    %64 = vector.shape_cast %63 : vector<1x1x8xf32> to vector<8xf32>
    %65 = vector.shape_cast %64 : vector<8xf32> to vector<1x1x8xf32>
    %66 = vector.broadcast %65 : vector<1x1x8xf32> to vector<8x8x8xf32>
    %67 = arith.mulf %62, %66 : vector<8x8x8xf32>
    %68 = arith.addf %61, %67 : vector<8x8x8xf32>
    %c2_40 = arith.constant 2 : index
    %c1_41 = arith.constant 1 : index
    %c0_42 = arith.constant 0 : index
    %69 = vector.load %arg12[%c2_40, %c1_41, %c0_42] : memref<10x10x8xf32, #tpu.memory_space<vmem>>, vector<8x8x8xf32>
    %70 = vector.extract_strided_slice %18 {offsets = [2, 1, 0], sizes = [1, 1, 8], strides = [1, 1, 1]} : vector<3x3x8xf32> to vector<1x1x8xf32>
    %71 = vector.shape_cast %70 : vector<1x1x8xf32> to vector<8xf32>
    %72 = vector.shape_cast %71 : vector<8xf32> to vector<1x1x8xf32>
    %73 = vector.broadcast %72 : vector<1x1x8xf32> to vector<8x8x8xf32>
    %74 = arith.mulf %69, %73 : vector<8x8x8xf32>
    %75 = arith.addf %68, %74 : vector<8x8x8xf32>
    %c2_43 = arith.constant 2 : index
    %c2_44 = arith.constant 2 : index
    %c0_45 = arith.constant 0 : index
    %76 = vector.load %arg12[%c2_43, %c2_44, %c0_45] : memref<10x10x8xf32, #tpu.memory_space<vmem>>, vector<8x8x8xf32>
    %77 = vector.extract_strided_slice %18 {offsets = [2, 2, 0], sizes = [1, 1, 8], strides = [1, 1, 1]} : vector<3x3x8xf32> to vector<1x1x8xf32>
    %78 = vector.shape_cast %77 : vector<1x1x8xf32> to vector<8xf32>
    %79 = vector.shape_cast %78 : vector<8xf32> to vector<1x1x8xf32>
    %80 = vector.broadcast %79 : vector<1x1x8xf32> to vector<8x8x8xf32>
    %81 = arith.mulf %76, %80 : vector<8x8x8xf32>
    %82 = arith.addf %75, %81 : vector<8x8x8xf32>
    %83 = vector.shape_cast %82 : vector<8x8x8xf32> to vector<64x8xf32>
    %c0_46 = arith.constant 0 : index
    %c0_47 = arith.constant 0 : index
    %84 = vector.load %arg6[%c0_46, %c0_47] : memref<1x8xf32, #tpu.memory_space<vmem>>, vector<1x8xf32>
    %85 = vector.broadcast %84 : vector<1x8xf32> to vector<64x8xf32>
    %86 = arith.mulf %83, %85 : vector<64x8xf32>
    %c0_48 = arith.constant 0 : index
    %c0_49 = arith.constant 0 : index
    %87 = vector.load %arg7[%c0_48, %c0_49] : memref<1x8xf32, #tpu.memory_space<vmem>>, vector<1x8xf32>
    %88 = vector.broadcast %87 : vector<1x8xf32> to vector<64x8xf32>
    %89 = arith.addf %86, %88 : vector<64x8xf32>
    %cst_50 = arith.constant 0.000000e+00 : f32
    %90 = vector.broadcast %cst_50 : f32 to vector<64x8xf32>
    %91 = arith.maximumf %89, %90 : vector<64x8xf32>
    %92 = arith.truncf %91 : vector<64x8xf32> to vector<64x8xbf16>
    %c0_51 = arith.constant 0 : index
    %c0_52 = arith.constant 0 : index
    %93 = vector.load %arg8[%c0_51, %c0_52] : memref<8x32xbf16, #tpu.memory_space<vmem>>, vector<8x32xbf16>
    %cst_53 = arith.constant dense<0.000000e+00> : vector<64x32xf32>
    %94 = tpu.matmul %92, %93, %cst_53 {dimension_numbers = #tpu.dot_dimension_numbers<[1], [0], [0], [1], [0, 0, 1, 1], [], []>} : vector<64x8xbf16>, vector<8x32xbf16>, vector<64x32xf32> -> vector<64x32xf32>
    %c0_54 = arith.constant 0 : index
    %c0_55 = arith.constant 0 : index
    %95 = vector.load %arg9[%c0_54, %c0_55] : memref<1x32xf32, #tpu.memory_space<vmem>>, vector<1x32xf32>
    %96 = vector.broadcast %95 : vector<1x32xf32> to vector<64x32xf32>
    %97 = arith.mulf %94, %96 : vector<64x32xf32>
    %c0_56 = arith.constant 0 : index
    %c0_57 = arith.constant 0 : index
    %98 = vector.load %arg10[%c0_56, %c0_57] : memref<1x32xf32, #tpu.memory_space<vmem>>, vector<1x32xf32>
    %99 = vector.broadcast %98 : vector<1x32xf32> to vector<64x32xf32>
    %100 = arith.addf %97, %99 : vector<64x32xf32>
    %101 = arith.addf %100, %2 : vector<64x32xf32>
    %cst_58 = arith.constant 0.000000e+00 : f32
    %102 = vector.broadcast %cst_58 : f32 to vector<64x32xf32>
    %103 = arith.maximumf %101, %102 : vector<64x32xf32>
    %104 = vector.shape_cast %103 : vector<64x32xf32> to vector<8x8x32xf32>
    %c0_59 = arith.constant 0 : index
    %c0_60 = arith.constant 0 : index
    %c0_61 = arith.constant 0 : index
    %c0_62 = arith.constant 0 : index
    %105 = vector.load %arg11[%c0_59, %c0_60, %c0_61, %c0_62] : memref<1x8x8x32xf32, #tpu.memory_space<vmem>>, vector<1x8x8x32xf32>
    %106 = vector.shape_cast %105 : vector<1x8x8x32xf32> to vector<8x8x32xf32>
    %107 = vector.shape_cast %104 : vector<8x8x32xf32> to vector<1x8x8x32xf32>
    tpu.vector_store %arg11[%c0_59, %c0_60, %c0_61, %c0_62], %107 {strides = array<i32>} : memref<1x8x8x32xf32, #tpu.memory_space<vmem>>, vector<1x8x8x32xf32>,
    return
  }
  func.func @transform_0(%arg0: i32) -> (i32, i32, i32, i32) {
    %c0_i32 = arith.constant 0 : i32
    %c0_i32_0 = arith.constant 0 : i32
    %c0_i32_1 = arith.constant 0 : i32
    %c0_i32_2 = arith.constant 0 : i32
    return %arg0, %c0_i32, %c0_i32_0, %c0_i32_1 : i32, i32, i32, i32
  }
  func.func @transform_1(%arg0: i32) -> (i32, i32) {
    %c0_i32 = arith.constant 0 : i32
    %c0_i32_0 = arith.constant 0 : i32
    %c0_i32_1 = arith.constant 0 : i32
    return %c0_i32, %c0_i32_0 : i32, i32
  }
  func.func @transform_2(%arg0: i32) -> (i32, i32) {
    %c0_i32 = arith.constant 0 : i32
    %c0_i32_0 = arith.constant 0 : i32
    %c0_i32_1 = arith.constant 0 : i32
    return %c0_i32, %c0_i32_0 : i32, i32
  }
  func.func @transform_3(%arg0: i32) -> (i32, i32) {
    %c0_i32 = arith.constant 0 : i32
    %c0_i32_0 = arith.constant 0 : i32
    %c0_i32_1 = arith.constant 0 : i32
    return %c0_i32, %c0_i32_0 : i32, i32
  }
  func.func @transform_4(%arg0: i32) -> (i32, i32, i32) {
    %c0_i32 = arith.constant 0 : i32
    %c0_i32_0 = arith.constant 0 : i32
    %c0_i32_1 = arith.constant 0 : i32
    %c0_i32_2 = arith.constant 0 : i32
    return %c0_i32, %c0_i32_0, %c0_i32_1 : i32, i32, i32
  }
  func.func @transform_5(%arg0: i32) -> (i32, i32) {
    %c0_i32 = arith.constant 0 : i32
    %c0_i32_0 = arith.constant 0 : i32
    %c0_i32_1 = arith.constant 0 : i32
    return %c0_i32, %c0_i32_0 : i32, i32
  }
  func.func @transform_6(%arg0: i32) -> (i32, i32) {
    %c0_i32 = arith.constant 0 : i32
    %c0_i32_0 = arith.constant 0 : i32
    %c0_i32_1 = arith.constant 0 : i32
    return %c0_i32, %c0_i32_0 : i32, i32
  }
  func.func @transform_7(%arg0: i32) -> (i32, i32) {
    %c0_i32 = arith.constant 0 : i32
    %c0_i32_0 = arith.constant 0 : i32
    %c0_i32_1 = arith.constant 0 : i32
    return %c0_i32, %c0_i32_0 : i32, i32
  }
  func.func @transform_8(%arg0: i32) -> (i32, i32) {
    %c0_i32 = arith.constant 0 : i32
    %c0_i32_0 = arith.constant 0 : i32
    %c0_i32_1 = arith.constant 0 : i32
    return %c0_i32, %c0_i32_0 : i32, i32
  }
  func.func @transform_9(%arg0: i32) -> (i32, i32) {
    %c0_i32 = arith.constant 0 : i32
    %c0_i32_0 = arith.constant 0 : i32
    %c0_i32_1 = arith.constant 0 : i32
    return %c0_i32, %c0_i32_0 : i32, i32
  }
  func.func @transform_10(%arg0: i32) -> (i32, i32, i32, i32) {
    %c0_i32 = arith.constant 0 : i32
    %c0_i32_0 = arith.constant 0 : i32
    %c0_i32_1 = arith.constant 0 : i32
    %c0_i32_2 = arith.constant 0 : i32
    return %arg0, %c0_i32, %c0_i32_0, %c0_i32_1 : i32, i32, i32, i32
  }
}

module attributes {stable_mosaic.version = 11 : i64} {
  func.func @kernel(%arg0: i32, %arg1: memref<1x16x16x16xf32, #tpu.memory_space<vmem>>, %arg2: memref<16x4xbf16, #tpu.memory_space<vmem>>, %arg3: memref<1x4xf32, #tpu.memory_space<vmem>>, %arg4: memref<1x4xf32, #tpu.memory_space<vmem>>, %arg5: memref<3x3x4xf32, #tpu.memory_space<vmem>>, %arg6: memref<1x4xf32, #tpu.memory_space<vmem>>, %arg7: memref<1x4xf32, #tpu.memory_space<vmem>>, %arg8: memref<4x16xbf16, #tpu.memory_space<vmem>>, %arg9: memref<1x16xf32, #tpu.memory_space<vmem>>, %arg10: memref<1x16xf32, #tpu.memory_space<vmem>>, %arg11: memref<64x256xf32, #tpu.memory_space<vmem>>, %arg12: memref<1x8x8x32xf32, #tpu.memory_space<vmem>>, %arg13: memref<18x18x4xf32, #tpu.memory_space<vmem>>, %arg14: memref<18x18x16xf32, #tpu.memory_space<vmem>>) attributes {dimension_semantics = [#tpu.dimension_semantics<parallel>], iteration_bounds = array<i64: 2>, scalar_prefetch = 0 : i64, scratch_operands = 2 : i64, tpu.core_type = #tpu.core_type<tc>, window_params = [{transform_indices = @transform_0, window_bounds = array<i64: 1, 16, 16, 16>}, {pipeline_mode = #tpu.pipeline_mode<synchronous>, transform_indices = @transform_1, window_bounds = array<i64: 16, 4>}, {pipeline_mode = #tpu.pipeline_mode<synchronous>, transform_indices = @transform_2, window_bounds = array<i64: 1, 4>}, {pipeline_mode = #tpu.pipeline_mode<synchronous>, transform_indices = @transform_3, window_bounds = array<i64: 1, 4>}, {pipeline_mode = #tpu.pipeline_mode<synchronous>, transform_indices = @transform_4, window_bounds = array<i64: 3, 3, 4>}, {pipeline_mode = #tpu.pipeline_mode<synchronous>, transform_indices = @transform_5, window_bounds = array<i64: 1, 4>}, {pipeline_mode = #tpu.pipeline_mode<synchronous>, transform_indices = @transform_6, window_bounds = array<i64: 1, 4>}, {pipeline_mode = #tpu.pipeline_mode<synchronous>, transform_indices = @transform_7, window_bounds = array<i64: 4, 16>}, {pipeline_mode = #tpu.pipeline_mode<synchronous>, transform_indices = @transform_8, window_bounds = array<i64: 1, 16>}, {pipeline_mode = #tpu.pipeline_mode<synchronous>, transform_indices = @transform_9, window_bounds = array<i64: 1, 16>}, {pipeline_mode = #tpu.pipeline_mode<synchronous>, transform_indices = @transform_10, window_bounds = array<i64: 64, 256>}, {transform_indices = @transform_11, window_bounds = array<i64: 1, 8, 8, 32>}]} {
    %c0 = arith.constant 0 : index
    %c0_0 = arith.constant 0 : index
    %c0_1 = arith.constant 0 : index
    %c0_2 = arith.constant 0 : index
    %0 = vector.load %arg1[%c0, %c0_0, %c0_1, %c0_2] : memref<1x16x16x16xf32, #tpu.memory_space<vmem>>, vector<1x16x16x16xf32>
    %1 = vector.shape_cast %0 : vector<1x16x16x16xf32> to vector<16x16x16xf32>
    %2 = vector.shape_cast %1 : vector<16x16x16xf32> to vector<256x16xf32>
    %c0_3 = arith.constant 0 : index
    %c0_4 = arith.constant 0 : index
    %3 = vector.load %arg11[%c0_3, %c0_4] : memref<64x256xf32, #tpu.memory_space<vmem>>, vector<64x256xf32>
    %4 = arith.truncf %2 : vector<256x16xf32> to vector<256x16xbf16>
    %c0_5 = arith.constant 0 : index
    %c0_6 = arith.constant 0 : index
    %5 = vector.load %arg2[%c0_5, %c0_6] : memref<16x4xbf16, #tpu.memory_space<vmem>>, vector<16x4xbf16>
    %cst = arith.constant dense<0.000000e+00> : vector<256x4xf32>
    %6 = tpu.matmul %4, %5, %cst {dimension_numbers = #tpu.dot_dimension_numbers<[1], [0], [0], [1], [0, 0, 1, 1], [], []>} : vector<256x16xbf16>, vector<16x4xbf16>, vector<256x4xf32> -> vector<256x4xf32>
    %c0_7 = arith.constant 0 : index
    %c0_8 = arith.constant 0 : index
    %7 = vector.load %arg3[%c0_7, %c0_8] : memref<1x4xf32, #tpu.memory_space<vmem>>, vector<1x4xf32>
    %8 = vector.broadcast %7 : vector<1x4xf32> to vector<256x4xf32>
    %9 = arith.mulf %6, %8 : vector<256x4xf32>
    %c0_9 = arith.constant 0 : index
    %c0_10 = arith.constant 0 : index
    %10 = vector.load %arg4[%c0_9, %c0_10] : memref<1x4xf32, #tpu.memory_space<vmem>>, vector<1x4xf32>
    %11 = vector.broadcast %10 : vector<1x4xf32> to vector<256x4xf32>
    %12 = arith.addf %9, %11 : vector<256x4xf32>
    %cst_11 = arith.constant 0.000000e+00 : f32
    %13 = vector.broadcast %cst_11 : f32 to vector<256x4xf32>
    %14 = arith.maximumf %12, %13 : vector<256x4xf32>
    %cst_12 = arith.constant 0.000000e+00 : f32
    %15 = vector.broadcast %cst_12 : f32 to vector<18x18x4xf32>
    %c0_13 = arith.constant 0 : index
    %c0_14 = arith.constant 0 : index
    %c0_15 = arith.constant 0 : index
    %16 = vector.load %arg13[%c0_13, %c0_14, %c0_15] : memref<18x18x4xf32, #tpu.memory_space<vmem>>, vector<18x18x4xf32>
    tpu.vector_store %arg13[%c0_13, %c0_14, %c0_15], %15 {strides = array<i32>} : memref<18x18x4xf32, #tpu.memory_space<vmem>>, vector<18x18x4xf32>,
    %17 = vector.shape_cast %14 : vector<256x4xf32> to vector<16x16x4xf32>
    %c1 = arith.constant 1 : index
    %c1_16 = arith.constant 1 : index
    %c0_17 = arith.constant 0 : index
    %18 = vector.load %arg13[%c1, %c1_16, %c0_17] : memref<18x18x4xf32, #tpu.memory_space<vmem>>, vector<16x16x4xf32>
    tpu.vector_store %arg13[%c1, %c1_16, %c0_17], %17 {strides = array<i32>} : memref<18x18x4xf32, #tpu.memory_space<vmem>>, vector<16x16x4xf32>,
    %c0_18 = arith.constant 0 : index
    %c0_19 = arith.constant 0 : index
    %c0_20 = arith.constant 0 : index
    %19 = vector.load %arg5[%c0_18, %c0_19, %c0_20] : memref<3x3x4xf32, #tpu.memory_space<vmem>>, vector<3x3x4xf32>
    %cst_21 = arith.constant 0.000000e+00 : f32
    %20 = vector.broadcast %cst_21 : f32 to vector<16x16x4xf32>
    %c0_22 = arith.constant 0 : index
    %c0_23 = arith.constant 0 : index
    %c0_24 = arith.constant 0 : index
    %21 = vector.load %arg13[%c0_22, %c0_23, %c0_24] : memref<18x18x4xf32, #tpu.memory_space<vmem>>, vector<16x16x4xf32>
    %22 = vector.extract_strided_slice %19 {offsets = [0, 0, 0], sizes = [1, 1, 4], strides = [1, 1, 1]} : vector<3x3x4xf32> to vector<1x1x4xf32>
    %23 = vector.shape_cast %22 : vector<1x1x4xf32> to vector<4xf32>
    %24 = vector.shape_cast %23 : vector<4xf32> to vector<1x1x4xf32>
    %25 = vector.broadcast %24 : vector<1x1x4xf32> to vector<16x16x4xf32>
    %26 = arith.mulf %21, %25 : vector<16x16x4xf32>
    %27 = arith.addf %20, %26 : vector<16x16x4xf32>
    %c0_25 = arith.constant 0 : index
    %c1_26 = arith.constant 1 : index
    %c0_27 = arith.constant 0 : index
    %28 = vector.load %arg13[%c0_25, %c1_26, %c0_27] : memref<18x18x4xf32, #tpu.memory_space<vmem>>, vector<16x16x4xf32>
    %29 = vector.extract_strided_slice %19 {offsets = [0, 1, 0], sizes = [1, 1, 4], strides = [1, 1, 1]} : vector<3x3x4xf32> to vector<1x1x4xf32>
    %30 = vector.shape_cast %29 : vector<1x1x4xf32> to vector<4xf32>
    %31 = vector.shape_cast %30 : vector<4xf32> to vector<1x1x4xf32>
    %32 = vector.broadcast %31 : vector<1x1x4xf32> to vector<16x16x4xf32>
    %33 = arith.mulf %28, %32 : vector<16x16x4xf32>
    %34 = arith.addf %27, %33 : vector<16x16x4xf32>
    %c0_28 = arith.constant 0 : index
    %c2 = arith.constant 2 : index
    %c0_29 = arith.constant 0 : index
    %35 = vector.load %arg13[%c0_28, %c2, %c0_29] : memref<18x18x4xf32, #tpu.memory_space<vmem>>, vector<16x16x4xf32>
    %36 = vector.extract_strided_slice %19 {offsets = [0, 2, 0], sizes = [1, 1, 4], strides = [1, 1, 1]} : vector<3x3x4xf32> to vector<1x1x4xf32>
    %37 = vector.shape_cast %36 : vector<1x1x4xf32> to vector<4xf32>
    %38 = vector.shape_cast %37 : vector<4xf32> to vector<1x1x4xf32>
    %39 = vector.broadcast %38 : vector<1x1x4xf32> to vector<16x16x4xf32>
    %40 = arith.mulf %35, %39 : vector<16x16x4xf32>
    %41 = arith.addf %34, %40 : vector<16x16x4xf32>
    %c1_30 = arith.constant 1 : index
    %c0_31 = arith.constant 0 : index
    %c0_32 = arith.constant 0 : index
    %42 = vector.load %arg13[%c1_30, %c0_31, %c0_32] : memref<18x18x4xf32, #tpu.memory_space<vmem>>, vector<16x16x4xf32>
    %43 = vector.extract_strided_slice %19 {offsets = [1, 0, 0], sizes = [1, 1, 4], strides = [1, 1, 1]} : vector<3x3x4xf32> to vector<1x1x4xf32>
    %44 = vector.shape_cast %43 : vector<1x1x4xf32> to vector<4xf32>
    %45 = vector.shape_cast %44 : vector<4xf32> to vector<1x1x4xf32>
    %46 = vector.broadcast %45 : vector<1x1x4xf32> to vector<16x16x4xf32>
    %47 = arith.mulf %42, %46 : vector<16x16x4xf32>
    %48 = arith.addf %41, %47 : vector<16x16x4xf32>
    %c1_33 = arith.constant 1 : index
    %c1_34 = arith.constant 1 : index
    %c0_35 = arith.constant 0 : index
    %49 = vector.load %arg13[%c1_33, %c1_34, %c0_35] : memref<18x18x4xf32, #tpu.memory_space<vmem>>, vector<16x16x4xf32>
    %50 = vector.extract_strided_slice %19 {offsets = [1, 1, 0], sizes = [1, 1, 4], strides = [1, 1, 1]} : vector<3x3x4xf32> to vector<1x1x4xf32>
    %51 = vector.shape_cast %50 : vector<1x1x4xf32> to vector<4xf32>
    %52 = vector.shape_cast %51 : vector<4xf32> to vector<1x1x4xf32>
    %53 = vector.broadcast %52 : vector<1x1x4xf32> to vector<16x16x4xf32>
    %54 = arith.mulf %49, %53 : vector<16x16x4xf32>
    %55 = arith.addf %48, %54 : vector<16x16x4xf32>
    %c1_36 = arith.constant 1 : index
    %c2_37 = arith.constant 2 : index
    %c0_38 = arith.constant 0 : index
    %56 = vector.load %arg13[%c1_36, %c2_37, %c0_38] : memref<18x18x4xf32, #tpu.memory_space<vmem>>, vector<16x16x4xf32>
    %57 = vector.extract_strided_slice %19 {offsets = [1, 2, 0], sizes = [1, 1, 4], strides = [1, 1, 1]} : vector<3x3x4xf32> to vector<1x1x4xf32>
    %58 = vector.shape_cast %57 : vector<1x1x4xf32> to vector<4xf32>
    %59 = vector.shape_cast %58 : vector<4xf32> to vector<1x1x4xf32>
    %60 = vector.broadcast %59 : vector<1x1x4xf32> to vector<16x16x4xf32>
    %61 = arith.mulf %56, %60 : vector<16x16x4xf32>
    %62 = arith.addf %55, %61 : vector<16x16x4xf32>
    %c2_39 = arith.constant 2 : index
    %c0_40 = arith.constant 0 : index
    %c0_41 = arith.constant 0 : index
    %63 = vector.load %arg13[%c2_39, %c0_40, %c0_41] : memref<18x18x4xf32, #tpu.memory_space<vmem>>, vector<16x16x4xf32>
    %64 = vector.extract_strided_slice %19 {offsets = [2, 0, 0], sizes = [1, 1, 4], strides = [1, 1, 1]} : vector<3x3x4xf32> to vector<1x1x4xf32>
    %65 = vector.shape_cast %64 : vector<1x1x4xf32> to vector<4xf32>
    %66 = vector.shape_cast %65 : vector<4xf32> to vector<1x1x4xf32>
    %67 = vector.broadcast %66 : vector<1x1x4xf32> to vector<16x16x4xf32>
    %68 = arith.mulf %63, %67 : vector<16x16x4xf32>
    %69 = arith.addf %62, %68 : vector<16x16x4xf32>
    %c2_42 = arith.constant 2 : index
    %c1_43 = arith.constant 1 : index
    %c0_44 = arith.constant 0 : index
    %70 = vector.load %arg13[%c2_42, %c1_43, %c0_44] : memref<18x18x4xf32, #tpu.memory_space<vmem>>, vector<16x16x4xf32>
    %71 = vector.extract_strided_slice %19 {offsets = [2, 1, 0], sizes = [1, 1, 4], strides = [1, 1, 1]} : vector<3x3x4xf32> to vector<1x1x4xf32>
    %72 = vector.shape_cast %71 : vector<1x1x4xf32> to vector<4xf32>
    %73 = vector.shape_cast %72 : vector<4xf32> to vector<1x1x4xf32>
    %74 = vector.broadcast %73 : vector<1x1x4xf32> to vector<16x16x4xf32>
    %75 = arith.mulf %70, %74 : vector<16x16x4xf32>
    %76 = arith.addf %69, %75 : vector<16x16x4xf32>
    %c2_45 = arith.constant 2 : index
    %c2_46 = arith.constant 2 : index
    %c0_47 = arith.constant 0 : index
    %77 = vector.load %arg13[%c2_45, %c2_46, %c0_47] : memref<18x18x4xf32, #tpu.memory_space<vmem>>, vector<16x16x4xf32>
    %78 = vector.extract_strided_slice %19 {offsets = [2, 2, 0], sizes = [1, 1, 4], strides = [1, 1, 1]} : vector<3x3x4xf32> to vector<1x1x4xf32>
    %79 = vector.shape_cast %78 : vector<1x1x4xf32> to vector<4xf32>
    %80 = vector.shape_cast %79 : vector<4xf32> to vector<1x1x4xf32>
    %81 = vector.broadcast %80 : vector<1x1x4xf32> to vector<16x16x4xf32>
    %82 = arith.mulf %77, %81 : vector<16x16x4xf32>
    %83 = arith.addf %76, %82 : vector<16x16x4xf32>
    %84 = vector.shape_cast %83 : vector<16x16x4xf32> to vector<256x4xf32>
    %cst_48 = arith.constant dense<0.000000e+00> : vector<64x4xf32>
    %85 = tpu.matmul %3, %84, %cst_48 {dimension_numbers = #tpu.dot_dimension_numbers<[1], [0], [0], [1], [0, 0, 1, 1], [], []>} : vector<64x256xf32>, vector<256x4xf32>, vector<64x4xf32> -> vector<64x4xf32>
    %c0_49 = arith.constant 0 : index
    %c0_50 = arith.constant 0 : index
    %86 = vector.load %arg6[%c0_49, %c0_50] : memref<1x4xf32, #tpu.memory_space<vmem>>, vector<1x4xf32>
    %87 = vector.broadcast %86 : vector<1x4xf32> to vector<64x4xf32>
    %88 = arith.mulf %85, %87 : vector<64x4xf32>
    %c0_51 = arith.constant 0 : index
    %c0_52 = arith.constant 0 : index
    %89 = vector.load %arg7[%c0_51, %c0_52] : memref<1x4xf32, #tpu.memory_space<vmem>>, vector<1x4xf32>
    %90 = vector.broadcast %89 : vector<1x4xf32> to vector<64x4xf32>
    %91 = arith.addf %88, %90 : vector<64x4xf32>
    %cst_53 = arith.constant 0.000000e+00 : f32
    %92 = vector.broadcast %cst_53 : f32 to vector<64x4xf32>
    %93 = arith.maximumf %91, %92 : vector<64x4xf32>
    %94 = arith.truncf %93 : vector<64x4xf32> to vector<64x4xbf16>
    %c0_54 = arith.constant 0 : index
    %c0_55 = arith.constant 0 : index
    %95 = vector.load %arg8[%c0_54, %c0_55] : memref<4x16xbf16, #tpu.memory_space<vmem>>, vector<4x16xbf16>
    %cst_56 = arith.constant dense<0.000000e+00> : vector<64x16xf32>
    %96 = tpu.matmul %94, %95, %cst_56 {dimension_numbers = #tpu.dot_dimension_numbers<[1], [0], [0], [1], [0, 0, 1, 1], [], []>} : vector<64x4xbf16>, vector<4x16xbf16>, vector<64x16xf32> -> vector<64x16xf32>
    %c0_57 = arith.constant 0 : index
    %c0_58 = arith.constant 0 : index
    %97 = vector.load %arg9[%c0_57, %c0_58] : memref<1x16xf32, #tpu.memory_space<vmem>>, vector<1x16xf32>
    %98 = vector.broadcast %97 : vector<1x16xf32> to vector<64x16xf32>
    %99 = arith.mulf %96, %98 : vector<64x16xf32>
    %c0_59 = arith.constant 0 : index
    %c0_60 = arith.constant 0 : index
    %100 = vector.load %arg10[%c0_59, %c0_60] : memref<1x16xf32, #tpu.memory_space<vmem>>, vector<1x16xf32>
    %101 = vector.broadcast %100 : vector<1x16xf32> to vector<64x16xf32>
    %102 = arith.addf %99, %101 : vector<64x16xf32>
    %cst_61 = arith.constant 0.000000e+00 : f32
    %103 = vector.broadcast %cst_61 : f32 to vector<64x16xf32>
    %104 = arith.maximumf %102, %103 : vector<64x16xf32>
    %cst_62 = arith.constant 0.000000e+00 : f32
    %105 = vector.broadcast %cst_62 : f32 to vector<18x18x16xf32>
    %c0_63 = arith.constant 0 : index
    %c0_64 = arith.constant 0 : index
    %c0_65 = arith.constant 0 : index
    %106 = vector.load %arg14[%c0_63, %c0_64, %c0_65] : memref<18x18x16xf32, #tpu.memory_space<vmem>>, vector<18x18x16xf32>
    tpu.vector_store %arg14[%c0_63, %c0_64, %c0_65], %105 {strides = array<i32>} : memref<18x18x16xf32, #tpu.memory_space<vmem>>, vector<18x18x16xf32>,
    %107 = vector.shape_cast %2 : vector<256x16xf32> to vector<16x16x16xf32>
    %c1_66 = arith.constant 1 : index
    %c1_67 = arith.constant 1 : index
    %c0_68 = arith.constant 0 : index
    %108 = vector.load %arg14[%c1_66, %c1_67, %c0_68] : memref<18x18x16xf32, #tpu.memory_space<vmem>>, vector<16x16x16xf32>
    tpu.vector_store %arg14[%c1_66, %c1_67, %c0_68], %107 {strides = array<i32>} : memref<18x18x16xf32, #tpu.memory_space<vmem>>, vector<16x16x16xf32>,
    %cst_69 = arith.constant 0.000000e+00 : f32
    %109 = vector.broadcast %cst_69 : f32 to vector<16x16x16xf32>
    %c0_70 = arith.constant 0 : index
    %c0_71 = arith.constant 0 : index
    %c0_72 = arith.constant 0 : index
    %110 = vector.load %arg14[%c0_70, %c0_71, %c0_72] : memref<18x18x16xf32, #tpu.memory_space<vmem>>, vector<16x16x16xf32>
    %111 = arith.addf %109, %110 : vector<16x16x16xf32>
    %c0_73 = arith.constant 0 : index
    %c1_74 = arith.constant 1 : index
    %c0_75 = arith.constant 0 : index
    %112 = vector.load %arg14[%c0_73, %c1_74, %c0_75] : memref<18x18x16xf32, #tpu.memory_space<vmem>>, vector<16x16x16xf32>
    %113 = arith.addf %111, %112 : vector<16x16x16xf32>
    %c0_76 = arith.constant 0 : index
    %c2_77 = arith.constant 2 : index
    %c0_78 = arith.constant 0 : index
    %114 = vector.load %arg14[%c0_76, %c2_77, %c0_78] : memref<18x18x16xf32, #tpu.memory_space<vmem>>, vector<16x16x16xf32>
    %115 = arith.addf %113, %114 : vector<16x16x16xf32>
    %c1_79 = arith.constant 1 : index
    %c0_80 = arith.constant 0 : index
    %c0_81 = arith.constant 0 : index
    %116 = vector.load %arg14[%c1_79, %c0_80, %c0_81] : memref<18x18x16xf32, #tpu.memory_space<vmem>>, vector<16x16x16xf32>
    %117 = arith.addf %115, %116 : vector<16x16x16xf32>
    %c1_82 = arith.constant 1 : index
    %c1_83 = arith.constant 1 : index
    %c0_84 = arith.constant 0 : index
    %118 = vector.load %arg14[%c1_82, %c1_83, %c0_84] : memref<18x18x16xf32, #tpu.memory_space<vmem>>, vector<16x16x16xf32>
    %119 = arith.addf %117, %118 : vector<16x16x16xf32>
    %c1_85 = arith.constant 1 : index
    %c2_86 = arith.constant 2 : index
    %c0_87 = arith.constant 0 : index
    %120 = vector.load %arg14[%c1_85, %c2_86, %c0_87] : memref<18x18x16xf32, #tpu.memory_space<vmem>>, vector<16x16x16xf32>
    %121 = arith.addf %119, %120 : vector<16x16x16xf32>
    %c2_88 = arith.constant 2 : index
    %c0_89 = arith.constant 0 : index
    %c0_90 = arith.constant 0 : index
    %122 = vector.load %arg14[%c2_88, %c0_89, %c0_90] : memref<18x18x16xf32, #tpu.memory_space<vmem>>, vector<16x16x16xf32>
    %123 = arith.addf %121, %122 : vector<16x16x16xf32>
    %c2_91 = arith.constant 2 : index
    %c1_92 = arith.constant 1 : index
    %c0_93 = arith.constant 0 : index
    %124 = vector.load %arg14[%c2_91, %c1_92, %c0_93] : memref<18x18x16xf32, #tpu.memory_space<vmem>>, vector<16x16x16xf32>
    %125 = arith.addf %123, %124 : vector<16x16x16xf32>
    %c2_94 = arith.constant 2 : index
    %c2_95 = arith.constant 2 : index
    %c0_96 = arith.constant 0 : index
    %126 = vector.load %arg14[%c2_94, %c2_95, %c0_96] : memref<18x18x16xf32, #tpu.memory_space<vmem>>, vector<16x16x16xf32>
    %127 = arith.addf %125, %126 : vector<16x16x16xf32>
    %128 = vector.shape_cast %127 : vector<16x16x16xf32> to vector<256x16xf32>
    %cst_97 = arith.constant dense<0.000000e+00> : vector<64x16xf32>
    %129 = tpu.matmul %3, %128, %cst_97 {dimension_numbers = #tpu.dot_dimension_numbers<[1], [0], [0], [1], [0, 0, 1, 1], [], []>} : vector<64x256xf32>, vector<256x16xf32>, vector<64x16xf32> -> vector<64x16xf32>
    %cst_98 = arith.constant 0.111111112 : f32
    %130 = vector.broadcast %cst_98 : f32 to vector<64x16xf32>
    %131 = arith.mulf %129, %130 : vector<64x16xf32>
    %cst_99 = arith.constant 0.000000e+00 : f32
    %132 = vector.broadcast %cst_99 : f32 to vector<64x16xf32>
    %133 = arith.maximumf %131, %132 : vector<64x16xf32>
    %134 = tpu.concatenate %104, %133 in 1 : vector<64x16xf32>, vector<64x16xf32> -> vector<64x32xf32>
    %135 = vector.shape_cast %134 : vector<64x32xf32> to vector<8x8x32xf32>
    %c0_100 = arith.constant 0 : index
    %c0_101 = arith.constant 0 : index
    %c0_102 = arith.constant 0 : index
    %c0_103 = arith.constant 0 : index
    %136 = vector.load %arg12[%c0_100, %c0_101, %c0_102, %c0_103] : memref<1x8x8x32xf32, #tpu.memory_space<vmem>>, vector<1x8x8x32xf32>
    %137 = vector.shape_cast %136 : vector<1x8x8x32xf32> to vector<8x8x32xf32>
    %138 = vector.shape_cast %135 : vector<8x8x32xf32> to vector<1x8x8x32xf32>
    tpu.vector_store %arg12[%c0_100, %c0_101, %c0_102, %c0_103], %138 {strides = array<i32>} : memref<1x8x8x32xf32, #tpu.memory_space<vmem>>, vector<1x8x8x32xf32>,
    return
  }
  func.func @transform_0(%arg0: i32) -> (i32, i32, i32, i32) {
    %c0_i32 = arith.constant 0 : i32
    %c0_i32_0 = arith.constant 0 : i32
    %c0_i32_1 = arith.constant 0 : i32
    %c0_i32_2 = arith.constant 0 : i32
    return %arg0, %c0_i32, %c0_i32_0, %c0_i32_1 : i32, i32, i32, i32
  }
  func.func @transform_1(%arg0: i32) -> (i32, i32) {
    %c0_i32 = arith.constant 0 : i32
    %c0_i32_0 = arith.constant 0 : i32
    %c0_i32_1 = arith.constant 0 : i32
    return %c0_i32, %c0_i32_0 : i32, i32
  }
  func.func @transform_2(%arg0: i32) -> (i32, i32) {
    %c0_i32 = arith.constant 0 : i32
    %c0_i32_0 = arith.constant 0 : i32
    %c0_i32_1 = arith.constant 0 : i32
    return %c0_i32, %c0_i32_0 : i32, i32
  }
  func.func @transform_3(%arg0: i32) -> (i32, i32) {
    %c0_i32 = arith.constant 0 : i32
    %c0_i32_0 = arith.constant 0 : i32
    %c0_i32_1 = arith.constant 0 : i32
    return %c0_i32, %c0_i32_0 : i32, i32
  }
  func.func @transform_4(%arg0: i32) -> (i32, i32, i32) {
    %c0_i32 = arith.constant 0 : i32
    %c0_i32_0 = arith.constant 0 : i32
    %c0_i32_1 = arith.constant 0 : i32
    %c0_i32_2 = arith.constant 0 : i32
    return %c0_i32, %c0_i32_0, %c0_i32_1 : i32, i32, i32
  }
  func.func @transform_5(%arg0: i32) -> (i32, i32) {
    %c0_i32 = arith.constant 0 : i32
    %c0_i32_0 = arith.constant 0 : i32
    %c0_i32_1 = arith.constant 0 : i32
    return %c0_i32, %c0_i32_0 : i32, i32
  }
  func.func @transform_6(%arg0: i32) -> (i32, i32) {
    %c0_i32 = arith.constant 0 : i32
    %c0_i32_0 = arith.constant 0 : i32
    %c0_i32_1 = arith.constant 0 : i32
    return %c0_i32, %c0_i32_0 : i32, i32
  }
  func.func @transform_7(%arg0: i32) -> (i32, i32) {
    %c0_i32 = arith.constant 0 : i32
    %c0_i32_0 = arith.constant 0 : i32
    %c0_i32_1 = arith.constant 0 : i32
    return %c0_i32, %c0_i32_0 : i32, i32
  }
  func.func @transform_8(%arg0: i32) -> (i32, i32) {
    %c0_i32 = arith.constant 0 : i32
    %c0_i32_0 = arith.constant 0 : i32
    %c0_i32_1 = arith.constant 0 : i32
    return %c0_i32, %c0_i32_0 : i32, i32
  }
  func.func @transform_9(%arg0: i32) -> (i32, i32) {
    %c0_i32 = arith.constant 0 : i32
    %c0_i32_0 = arith.constant 0 : i32
    %c0_i32_1 = arith.constant 0 : i32
    return %c0_i32, %c0_i32_0 : i32, i32
  }
  func.func @transform_10(%arg0: i32) -> (i32, i32) {
    %c0_i32 = arith.constant 0 : i32
    %c0_i32_0 = arith.constant 0 : i32
    %c0_i32_1 = arith.constant 0 : i32
    return %c0_i32, %c0_i32_0 : i32, i32
  }
  func.func @transform_11(%arg0: i32) -> (i32, i32, i32, i32) {
    %c0_i32 = arith.constant 0 : i32
    %c0_i32_0 = arith.constant 0 : i32
    %c0_i32_1 = arith.constant 0 : i32
    %c0_i32_2 = arith.constant 0 : i32
    return %arg0, %c0_i32, %c0_i32_0, %c0_i32_1 : i32, i32, i32, i32
  }
}

module attributes {stable_mosaic.version = 11 : i64} {
  func.func @kernel(%arg0: i32, %arg1: memref<1x8x8x32xf32, #tpu.memory_space<vmem>>, %arg2: memref<32x4xbf16, #tpu.memory_space<vmem>>, %arg3: memref<1x4xf32, #tpu.memory_space<vmem>>, %arg4: memref<1x4xf32, #tpu.memory_space<vmem>>, %arg5: memref<3x3x4xf32, #tpu.memory_space<vmem>>, %arg6: memref<1x4xf32, #tpu.memory_space<vmem>>, %arg7: memref<1x4xf32, #tpu.memory_space<vmem>>, %arg8: memref<4x16xbf16, #tpu.memory_space<vmem>>, %arg9: memref<1x16xf32, #tpu.memory_space<vmem>>, %arg10: memref<1x16xf32, #tpu.memory_space<vmem>>, %arg11: memref<16x64xf32, #tpu.memory_space<vmem>>, %arg12: memref<1x4x4x48xf32, #tpu.memory_space<vmem>>, %arg13: memref<10x10x4xf32, #tpu.memory_space<vmem>>, %arg14: memref<10x10x32xf32, #tpu.memory_space<vmem>>) attributes {dimension_semantics = [#tpu.dimension_semantics<parallel>], iteration_bounds = array<i64: 2>, scalar_prefetch = 0 : i64, scratch_operands = 2 : i64, tpu.core_type = #tpu.core_type<tc>, window_params = [{transform_indices = @transform_0, window_bounds = array<i64: 1, 8, 8, 32>}, {pipeline_mode = #tpu.pipeline_mode<synchronous>, transform_indices = @transform_1, window_bounds = array<i64: 32, 4>}, {pipeline_mode = #tpu.pipeline_mode<synchronous>, transform_indices = @transform_2, window_bounds = array<i64: 1, 4>}, {pipeline_mode = #tpu.pipeline_mode<synchronous>, transform_indices = @transform_3, window_bounds = array<i64: 1, 4>}, {pipeline_mode = #tpu.pipeline_mode<synchronous>, transform_indices = @transform_4, window_bounds = array<i64: 3, 3, 4>}, {pipeline_mode = #tpu.pipeline_mode<synchronous>, transform_indices = @transform_5, window_bounds = array<i64: 1, 4>}, {pipeline_mode = #tpu.pipeline_mode<synchronous>, transform_indices = @transform_6, window_bounds = array<i64: 1, 4>}, {pipeline_mode = #tpu.pipeline_mode<synchronous>, transform_indices = @transform_7, window_bounds = array<i64: 4, 16>}, {pipeline_mode = #tpu.pipeline_mode<synchronous>, transform_indices = @transform_8, window_bounds = array<i64: 1, 16>}, {pipeline_mode = #tpu.pipeline_mode<synchronous>, transform_indices = @transform_9, window_bounds = array<i64: 1, 16>}, {pipeline_mode = #tpu.pipeline_mode<synchronous>, transform_indices = @transform_10, window_bounds = array<i64: 16, 64>}, {transform_indices = @transform_11, window_bounds = array<i64: 1, 4, 4, 48>}]} {
    %c0 = arith.constant 0 : index
    %c0_0 = arith.constant 0 : index
    %c0_1 = arith.constant 0 : index
    %c0_2 = arith.constant 0 : index
    %0 = vector.load %arg1[%c0, %c0_0, %c0_1, %c0_2] : memref<1x8x8x32xf32, #tpu.memory_space<vmem>>, vector<1x8x8x32xf32>
    %1 = vector.shape_cast %0 : vector<1x8x8x32xf32> to vector<8x8x32xf32>
    %2 = vector.shape_cast %1 : vector<8x8x32xf32> to vector<64x32xf32>
    %c0_3 = arith.constant 0 : index
    %c0_4 = arith.constant 0 : index
    %3 = vector.load %arg11[%c0_3, %c0_4] : memref<16x64xf32, #tpu.memory_space<vmem>>, vector<16x64xf32>
    %4 = arith.truncf %2 : vector<64x32xf32> to vector<64x32xbf16>
    %c0_5 = arith.constant 0 : index
    %c0_6 = arith.constant 0 : index
    %5 = vector.load %arg2[%c0_5, %c0_6] : memref<32x4xbf16, #tpu.memory_space<vmem>>, vector<32x4xbf16>
    %cst = arith.constant dense<0.000000e+00> : vector<64x4xf32>
    %6 = tpu.matmul %4, %5, %cst {dimension_numbers = #tpu.dot_dimension_numbers<[1], [0], [0], [1], [0, 0, 1, 1], [], []>} : vector<64x32xbf16>, vector<32x4xbf16>, vector<64x4xf32> -> vector<64x4xf32>
    %c0_7 = arith.constant 0 : index
    %c0_8 = arith.constant 0 : index
    %7 = vector.load %arg3[%c0_7, %c0_8] : memref<1x4xf32, #tpu.memory_space<vmem>>, vector<1x4xf32>
    %8 = vector.broadcast %7 : vector<1x4xf32> to vector<64x4xf32>
    %9 = arith.mulf %6, %8 : vector<64x4xf32>
    %c0_9 = arith.constant 0 : index
    %c0_10 = arith.constant 0 : index
    %10 = vector.load %arg4[%c0_9, %c0_10] : memref<1x4xf32, #tpu.memory_space<vmem>>, vector<1x4xf32>
    %11 = vector.broadcast %10 : vector<1x4xf32> to vector<64x4xf32>
    %12 = arith.addf %9, %11 : vector<64x4xf32>
    %cst_11 = arith.constant 0.000000e+00 : f32
    %13 = vector.broadcast %cst_11 : f32 to vector<64x4xf32>
    %14 = arith.maximumf %12, %13 : vector<64x4xf32>
    %cst_12 = arith.constant 0.000000e+00 : f32
    %15 = vector.broadcast %cst_12 : f32 to vector<10x10x4xf32>
    %c0_13 = arith.constant 0 : index
    %c0_14 = arith.constant 0 : index
    %c0_15 = arith.constant 0 : index
    %16 = vector.load %arg13[%c0_13, %c0_14, %c0_15] : memref<10x10x4xf32, #tpu.memory_space<vmem>>, vector<10x10x4xf32>
    tpu.vector_store %arg13[%c0_13, %c0_14, %c0_15], %15 {strides = array<i32>} : memref<10x10x4xf32, #tpu.memory_space<vmem>>, vector<10x10x4xf32>,
    %17 = vector.shape_cast %14 : vector<64x4xf32> to vector<8x8x4xf32>
    %c1 = arith.constant 1 : index
    %c1_16 = arith.constant 1 : index
    %c0_17 = arith.constant 0 : index
    %18 = vector.load %arg13[%c1, %c1_16, %c0_17] : memref<10x10x4xf32, #tpu.memory_space<vmem>>, vector<8x8x4xf32>
    tpu.vector_store %arg13[%c1, %c1_16, %c0_17], %17 {strides = array<i32>} : memref<10x10x4xf32, #tpu.memory_space<vmem>>, vector<8x8x4xf32>,
    %c0_18 = arith.constant 0 : index
    %c0_19 = arith.constant 0 : index
    %c0_20 = arith.constant 0 : index
    %19 = vector.load %arg5[%c0_18, %c0_19, %c0_20] : memref<3x3x4xf32, #tpu.memory_space<vmem>>, vector<3x3x4xf32>
    %cst_21 = arith.constant 0.000000e+00 : f32
    %20 = vector.broadcast %cst_21 : f32 to vector<8x8x4xf32>
    %c0_22 = arith.constant 0 : index
    %c0_23 = arith.constant 0 : index
    %c0_24 = arith.constant 0 : index
    %21 = vector.load %arg13[%c0_22, %c0_23, %c0_24] : memref<10x10x4xf32, #tpu.memory_space<vmem>>, vector<8x8x4xf32>
    %22 = vector.extract_strided_slice %19 {offsets = [0, 0, 0], sizes = [1, 1, 4], strides = [1, 1, 1]} : vector<3x3x4xf32> to vector<1x1x4xf32>
    %23 = vector.shape_cast %22 : vector<1x1x4xf32> to vector<4xf32>
    %24 = vector.shape_cast %23 : vector<4xf32> to vector<1x1x4xf32>
    %25 = vector.broadcast %24 : vector<1x1x4xf32> to vector<8x8x4xf32>
    %26 = arith.mulf %21, %25 : vector<8x8x4xf32>
    %27 = arith.addf %20, %26 : vector<8x8x4xf32>
    %c0_25 = arith.constant 0 : index
    %c1_26 = arith.constant 1 : index
    %c0_27 = arith.constant 0 : index
    %28 = vector.load %arg13[%c0_25, %c1_26, %c0_27] : memref<10x10x4xf32, #tpu.memory_space<vmem>>, vector<8x8x4xf32>
    %29 = vector.extract_strided_slice %19 {offsets = [0, 1, 0], sizes = [1, 1, 4], strides = [1, 1, 1]} : vector<3x3x4xf32> to vector<1x1x4xf32>
    %30 = vector.shape_cast %29 : vector<1x1x4xf32> to vector<4xf32>
    %31 = vector.shape_cast %30 : vector<4xf32> to vector<1x1x4xf32>
    %32 = vector.broadcast %31 : vector<1x1x4xf32> to vector<8x8x4xf32>
    %33 = arith.mulf %28, %32 : vector<8x8x4xf32>
    %34 = arith.addf %27, %33 : vector<8x8x4xf32>
    %c0_28 = arith.constant 0 : index
    %c2 = arith.constant 2 : index
    %c0_29 = arith.constant 0 : index
    %35 = vector.load %arg13[%c0_28, %c2, %c0_29] : memref<10x10x4xf32, #tpu.memory_space<vmem>>, vector<8x8x4xf32>
    %36 = vector.extract_strided_slice %19 {offsets = [0, 2, 0], sizes = [1, 1, 4], strides = [1, 1, 1]} : vector<3x3x4xf32> to vector<1x1x4xf32>
    %37 = vector.shape_cast %36 : vector<1x1x4xf32> to vector<4xf32>
    %38 = vector.shape_cast %37 : vector<4xf32> to vector<1x1x4xf32>
    %39 = vector.broadcast %38 : vector<1x1x4xf32> to vector<8x8x4xf32>
    %40 = arith.mulf %35, %39 : vector<8x8x4xf32>
    %41 = arith.addf %34, %40 : vector<8x8x4xf32>
    %c1_30 = arith.constant 1 : index
    %c0_31 = arith.constant 0 : index
    %c0_32 = arith.constant 0 : index
    %42 = vector.load %arg13[%c1_30, %c0_31, %c0_32] : memref<10x10x4xf32, #tpu.memory_space<vmem>>, vector<8x8x4xf32>
    %43 = vector.extract_strided_slice %19 {offsets = [1, 0, 0], sizes = [1, 1, 4], strides = [1, 1, 1]} : vector<3x3x4xf32> to vector<1x1x4xf32>
    %44 = vector.shape_cast %43 : vector<1x1x4xf32> to vector<4xf32>
    %45 = vector.shape_cast %44 : vector<4xf32> to vector<1x1x4xf32>
    %46 = vector.broadcast %45 : vector<1x1x4xf32> to vector<8x8x4xf32>
    %47 = arith.mulf %42, %46 : vector<8x8x4xf32>
    %48 = arith.addf %41, %47 : vector<8x8x4xf32>
    %c1_33 = arith.constant 1 : index
    %c1_34 = arith.constant 1 : index
    %c0_35 = arith.constant 0 : index
    %49 = vector.load %arg13[%c1_33, %c1_34, %c0_35] : memref<10x10x4xf32, #tpu.memory_space<vmem>>, vector<8x8x4xf32>
    %50 = vector.extract_strided_slice %19 {offsets = [1, 1, 0], sizes = [1, 1, 4], strides = [1, 1, 1]} : vector<3x3x4xf32> to vector<1x1x4xf32>
    %51 = vector.shape_cast %50 : vector<1x1x4xf32> to vector<4xf32>
    %52 = vector.shape_cast %51 : vector<4xf32> to vector<1x1x4xf32>
    %53 = vector.broadcast %52 : vector<1x1x4xf32> to vector<8x8x4xf32>
    %54 = arith.mulf %49, %53 : vector<8x8x4xf32>
    %55 = arith.addf %48, %54 : vector<8x8x4xf32>
    %c1_36 = arith.constant 1 : index
    %c2_37 = arith.constant 2 : index
    %c0_38 = arith.constant 0 : index
    %56 = vector.load %arg13[%c1_36, %c2_37, %c0_38] : memref<10x10x4xf32, #tpu.memory_space<vmem>>, vector<8x8x4xf32>
    %57 = vector.extract_strided_slice %19 {offsets = [1, 2, 0], sizes = [1, 1, 4], strides = [1, 1, 1]} : vector<3x3x4xf32> to vector<1x1x4xf32>
    %58 = vector.shape_cast %57 : vector<1x1x4xf32> to vector<4xf32>
    %59 = vector.shape_cast %58 : vector<4xf32> to vector<1x1x4xf32>
    %60 = vector.broadcast %59 : vector<1x1x4xf32> to vector<8x8x4xf32>
    %61 = arith.mulf %56, %60 : vector<8x8x4xf32>
    %62 = arith.addf %55, %61 : vector<8x8x4xf32>
    %c2_39 = arith.constant 2 : index
    %c0_40 = arith.constant 0 : index
    %c0_41 = arith.constant 0 : index
    %63 = vector.load %arg13[%c2_39, %c0_40, %c0_41] : memref<10x10x4xf32, #tpu.memory_space<vmem>>, vector<8x8x4xf32>
    %64 = vector.extract_strided_slice %19 {offsets = [2, 0, 0], sizes = [1, 1, 4], strides = [1, 1, 1]} : vector<3x3x4xf32> to vector<1x1x4xf32>
    %65 = vector.shape_cast %64 : vector<1x1x4xf32> to vector<4xf32>
    %66 = vector.shape_cast %65 : vector<4xf32> to vector<1x1x4xf32>
    %67 = vector.broadcast %66 : vector<1x1x4xf32> to vector<8x8x4xf32>
    %68 = arith.mulf %63, %67 : vector<8x8x4xf32>
    %69 = arith.addf %62, %68 : vector<8x8x4xf32>
    %c2_42 = arith.constant 2 : index
    %c1_43 = arith.constant 1 : index
    %c0_44 = arith.constant 0 : index
    %70 = vector.load %arg13[%c2_42, %c1_43, %c0_44] : memref<10x10x4xf32, #tpu.memory_space<vmem>>, vector<8x8x4xf32>
    %71 = vector.extract_strided_slice %19 {offsets = [2, 1, 0], sizes = [1, 1, 4], strides = [1, 1, 1]} : vector<3x3x4xf32> to vector<1x1x4xf32>
    %72 = vector.shape_cast %71 : vector<1x1x4xf32> to vector<4xf32>
    %73 = vector.shape_cast %72 : vector<4xf32> to vector<1x1x4xf32>
    %74 = vector.broadcast %73 : vector<1x1x4xf32> to vector<8x8x4xf32>
    %75 = arith.mulf %70, %74 : vector<8x8x4xf32>
    %76 = arith.addf %69, %75 : vector<8x8x4xf32>
    %c2_45 = arith.constant 2 : index
    %c2_46 = arith.constant 2 : index
    %c0_47 = arith.constant 0 : index
    %77 = vector.load %arg13[%c2_45, %c2_46, %c0_47] : memref<10x10x4xf32, #tpu.memory_space<vmem>>, vector<8x8x4xf32>
    %78 = vector.extract_strided_slice %19 {offsets = [2, 2, 0], sizes = [1, 1, 4], strides = [1, 1, 1]} : vector<3x3x4xf32> to vector<1x1x4xf32>
    %79 = vector.shape_cast %78 : vector<1x1x4xf32> to vector<4xf32>
    %80 = vector.shape_cast %79 : vector<4xf32> to vector<1x1x4xf32>
    %81 = vector.broadcast %80 : vector<1x1x4xf32> to vector<8x8x4xf32>
    %82 = arith.mulf %77, %81 : vector<8x8x4xf32>
    %83 = arith.addf %76, %82 : vector<8x8x4xf32>
    %84 = vector.shape_cast %83 : vector<8x8x4xf32> to vector<64x4xf32>
    %cst_48 = arith.constant dense<0.000000e+00> : vector<16x4xf32>
    %85 = tpu.matmul %3, %84, %cst_48 {dimension_numbers = #tpu.dot_dimension_numbers<[1], [0], [0], [1], [0, 0, 1, 1], [], []>} : vector<16x64xf32>, vector<64x4xf32>, vector<16x4xf32> -> vector<16x4xf32>
    %c0_49 = arith.constant 0 : index
    %c0_50 = arith.constant 0 : index
    %86 = vector.load %arg6[%c0_49, %c0_50] : memref<1x4xf32, #tpu.memory_space<vmem>>, vector<1x4xf32>
    %87 = vector.broadcast %86 : vector<1x4xf32> to vector<16x4xf32>
    %88 = arith.mulf %85, %87 : vector<16x4xf32>
    %c0_51 = arith.constant 0 : index
    %c0_52 = arith.constant 0 : index
    %89 = vector.load %arg7[%c0_51, %c0_52] : memref<1x4xf32, #tpu.memory_space<vmem>>, vector<1x4xf32>
    %90 = vector.broadcast %89 : vector<1x4xf32> to vector<16x4xf32>
    %91 = arith.addf %88, %90 : vector<16x4xf32>
    %cst_53 = arith.constant 0.000000e+00 : f32
    %92 = vector.broadcast %cst_53 : f32 to vector<16x4xf32>
    %93 = arith.maximumf %91, %92 : vector<16x4xf32>
    %94 = arith.truncf %93 : vector<16x4xf32> to vector<16x4xbf16>
    %c0_54 = arith.constant 0 : index
    %c0_55 = arith.constant 0 : index
    %95 = vector.load %arg8[%c0_54, %c0_55] : memref<4x16xbf16, #tpu.memory_space<vmem>>, vector<4x16xbf16>
    %cst_56 = arith.constant dense<0.000000e+00> : vector<16x16xf32>
    %96 = tpu.matmul %94, %95, %cst_56 {dimension_numbers = #tpu.dot_dimension_numbers<[1], [0], [0], [1], [0, 0, 1, 1], [], []>} : vector<16x4xbf16>, vector<4x16xbf16>, vector<16x16xf32> -> vector<16x16xf32>
    %c0_57 = arith.constant 0 : index
    %c0_58 = arith.constant 0 : index
    %97 = vector.load %arg9[%c0_57, %c0_58] : memref<1x16xf32, #tpu.memory_space<vmem>>, vector<1x16xf32>
    %98 = vector.broadcast %97 : vector<1x16xf32> to vector<16x16xf32>
    %99 = arith.mulf %96, %98 : vector<16x16xf32>
    %c0_59 = arith.constant 0 : index
    %c0_60 = arith.constant 0 : index
    %100 = vector.load %arg10[%c0_59, %c0_60] : memref<1x16xf32, #tpu.memory_space<vmem>>, vector<1x16xf32>
    %101 = vector.broadcast %100 : vector<1x16xf32> to vector<16x16xf32>
    %102 = arith.addf %99, %101 : vector<16x16xf32>
    %cst_61 = arith.constant 0.000000e+00 : f32
    %103 = vector.broadcast %cst_61 : f32 to vector<16x16xf32>
    %104 = arith.maximumf %102, %103 : vector<16x16xf32>
    %cst_62 = arith.constant 0.000000e+00 : f32
    %105 = vector.broadcast %cst_62 : f32 to vector<10x10x32xf32>
    %c0_63 = arith.constant 0 : index
    %c0_64 = arith.constant 0 : index
    %c0_65 = arith.constant 0 : index
    %106 = vector.load %arg14[%c0_63, %c0_64, %c0_65] : memref<10x10x32xf32, #tpu.memory_space<vmem>>, vector<10x10x32xf32>
    tpu.vector_store %arg14[%c0_63, %c0_64, %c0_65], %105 {strides = array<i32>} : memref<10x10x32xf32, #tpu.memory_space<vmem>>, vector<10x10x32xf32>,
    %107 = vector.shape_cast %2 : vector<64x32xf32> to vector<8x8x32xf32>
    %c1_66 = arith.constant 1 : index
    %c1_67 = arith.constant 1 : index
    %c0_68 = arith.constant 0 : index
    %108 = vector.load %arg14[%c1_66, %c1_67, %c0_68] : memref<10x10x32xf32, #tpu.memory_space<vmem>>, vector<8x8x32xf32>
    tpu.vector_store %arg14[%c1_66, %c1_67, %c0_68], %107 {strides = array<i32>} : memref<10x10x32xf32, #tpu.memory_space<vmem>>, vector<8x8x32xf32>,
    %cst_69 = arith.constant 0.000000e+00 : f32
    %109 = vector.broadcast %cst_69 : f32 to vector<8x8x32xf32>
    %c0_70 = arith.constant 0 : index
    %c0_71 = arith.constant 0 : index
    %c0_72 = arith.constant 0 : index
    %110 = vector.load %arg14[%c0_70, %c0_71, %c0_72] : memref<10x10x32xf32, #tpu.memory_space<vmem>>, vector<8x8x32xf32>
    %111 = arith.addf %109, %110 : vector<8x8x32xf32>
    %c0_73 = arith.constant 0 : index
    %c1_74 = arith.constant 1 : index
    %c0_75 = arith.constant 0 : index
    %112 = vector.load %arg14[%c0_73, %c1_74, %c0_75] : memref<10x10x32xf32, #tpu.memory_space<vmem>>, vector<8x8x32xf32>
    %113 = arith.addf %111, %112 : vector<8x8x32xf32>
    %c0_76 = arith.constant 0 : index
    %c2_77 = arith.constant 2 : index
    %c0_78 = arith.constant 0 : index
    %114 = vector.load %arg14[%c0_76, %c2_77, %c0_78] : memref<10x10x32xf32, #tpu.memory_space<vmem>>, vector<8x8x32xf32>
    %115 = arith.addf %113, %114 : vector<8x8x32xf32>
    %c1_79 = arith.constant 1 : index
    %c0_80 = arith.constant 0 : index
    %c0_81 = arith.constant 0 : index
    %116 = vector.load %arg14[%c1_79, %c0_80, %c0_81] : memref<10x10x32xf32, #tpu.memory_space<vmem>>, vector<8x8x32xf32>
    %117 = arith.addf %115, %116 : vector<8x8x32xf32>
    %c1_82 = arith.constant 1 : index
    %c1_83 = arith.constant 1 : index
    %c0_84 = arith.constant 0 : index
    %118 = vector.load %arg14[%c1_82, %c1_83, %c0_84] : memref<10x10x32xf32, #tpu.memory_space<vmem>>, vector<8x8x32xf32>
    %119 = arith.addf %117, %118 : vector<8x8x32xf32>
    %c1_85 = arith.constant 1 : index
    %c2_86 = arith.constant 2 : index
    %c0_87 = arith.constant 0 : index
    %120 = vector.load %arg14[%c1_85, %c2_86, %c0_87] : memref<10x10x32xf32, #tpu.memory_space<vmem>>, vector<8x8x32xf32>
    %121 = arith.addf %119, %120 : vector<8x8x32xf32>
    %c2_88 = arith.constant 2 : index
    %c0_89 = arith.constant 0 : index
    %c0_90 = arith.constant 0 : index
    %122 = vector.load %arg14[%c2_88, %c0_89, %c0_90] : memref<10x10x32xf32, #tpu.memory_space<vmem>>, vector<8x8x32xf32>
    %123 = arith.addf %121, %122 : vector<8x8x32xf32>
    %c2_91 = arith.constant 2 : index
    %c1_92 = arith.constant 1 : index
    %c0_93 = arith.constant 0 : index
    %124 = vector.load %arg14[%c2_91, %c1_92, %c0_93] : memref<10x10x32xf32, #tpu.memory_space<vmem>>, vector<8x8x32xf32>
    %125 = arith.addf %123, %124 : vector<8x8x32xf32>
    %c2_94 = arith.constant 2 : index
    %c2_95 = arith.constant 2 : index
    %c0_96 = arith.constant 0 : index
    %126 = vector.load %arg14[%c2_94, %c2_95, %c0_96] : memref<10x10x32xf32, #tpu.memory_space<vmem>>, vector<8x8x32xf32>
    %127 = arith.addf %125, %126 : vector<8x8x32xf32>
    %128 = vector.shape_cast %127 : vector<8x8x32xf32> to vector<64x32xf32>
    %cst_97 = arith.constant dense<0.000000e+00> : vector<16x32xf32>
    %129 = tpu.matmul %3, %128, %cst_97 {dimension_numbers = #tpu.dot_dimension_numbers<[1], [0], [0], [1], [0, 0, 1, 1], [], []>} : vector<16x64xf32>, vector<64x32xf32>, vector<16x32xf32> -> vector<16x32xf32>
    %cst_98 = arith.constant 0.111111112 : f32
    %130 = vector.broadcast %cst_98 : f32 to vector<16x32xf32>
    %131 = arith.mulf %129, %130 : vector<16x32xf32>
    %cst_99 = arith.constant 0.000000e+00 : f32
    %132 = vector.broadcast %cst_99 : f32 to vector<16x32xf32>
    %133 = arith.maximumf %131, %132 : vector<16x32xf32>
    %134 = tpu.concatenate %104, %133 in 1 : vector<16x16xf32>, vector<16x32xf32> -> vector<16x48xf32>
    %135 = vector.shape_cast %134 : vector<16x48xf32> to vector<4x4x48xf32>
    %c0_100 = arith.constant 0 : index
    %c0_101 = arith.constant 0 : index
    %c0_102 = arith.constant 0 : index
    %c0_103 = arith.constant 0 : index
    %136 = vector.load %arg12[%c0_100, %c0_101, %c0_102, %c0_103] : memref<1x4x4x48xf32, #tpu.memory_space<vmem>>, vector<1x4x4x48xf32>
    %137 = vector.shape_cast %136 : vector<1x4x4x48xf32> to vector<4x4x48xf32>
    %138 = vector.shape_cast %135 : vector<4x4x48xf32> to vector<1x4x4x48xf32>
    tpu.vector_store %arg12[%c0_100, %c0_101, %c0_102, %c0_103], %138 {strides = array<i32>} : memref<1x4x4x48xf32, #tpu.memory_space<vmem>>, vector<1x4x4x48xf32>,
    return
  }
  func.func @transform_0(%arg0: i32) -> (i32, i32, i32, i32) {
    %c0_i32 = arith.constant 0 : i32
    %c0_i32_0 = arith.constant 0 : i32
    %c0_i32_1 = arith.constant 0 : i32
    %c0_i32_2 = arith.constant 0 : i32
    return %arg0, %c0_i32, %c0_i32_0, %c0_i32_1 : i32, i32, i32, i32
  }
  func.func @transform_1(%arg0: i32) -> (i32, i32) {
    %c0_i32 = arith.constant 0 : i32
    %c0_i32_0 = arith.constant 0 : i32
    %c0_i32_1 = arith.constant 0 : i32
    return %c0_i32, %c0_i32_0 : i32, i32
  }
  func.func @transform_2(%arg0: i32) -> (i32, i32) {
    %c0_i32 = arith.constant 0 : i32
    %c0_i32_0 = arith.constant 0 : i32
    %c0_i32_1 = arith.constant 0 : i32
    return %c0_i32, %c0_i32_0 : i32, i32
  }
  func.func @transform_3(%arg0: i32) -> (i32, i32) {
    %c0_i32 = arith.constant 0 : i32
    %c0_i32_0 = arith.constant 0 : i32
    %c0_i32_1 = arith.constant 0 : i32
    return %c0_i32, %c0_i32_0 : i32, i32
  }
  func.func @transform_4(%arg0: i32) -> (i32, i32, i32) {
    %c0_i32 = arith.constant 0 : i32
    %c0_i32_0 = arith.constant 0 : i32
    %c0_i32_1 = arith.constant 0 : i32
    %c0_i32_2 = arith.constant 0 : i32
    return %c0_i32, %c0_i32_0, %c0_i32_1 : i32, i32, i32
  }
  func.func @transform_5(%arg0: i32) -> (i32, i32) {
    %c0_i32 = arith.constant 0 : i32
    %c0_i32_0 = arith.constant 0 : i32
    %c0_i32_1 = arith.constant 0 : i32
    return %c0_i32, %c0_i32_0 : i32, i32
  }
  func.func @transform_6(%arg0: i32) -> (i32, i32) {
    %c0_i32 = arith.constant 0 : i32
    %c0_i32_0 = arith.constant 0 : i32
    %c0_i32_1 = arith.constant 0 : i32
    return %c0_i32, %c0_i32_0 : i32, i32
  }
  func.func @transform_7(%arg0: i32) -> (i32, i32) {
    %c0_i32 = arith.constant 0 : i32
    %c0_i32_0 = arith.constant 0 : i32
    %c0_i32_1 = arith.constant 0 : i32
    return %c0_i32, %c0_i32_0 : i32, i32
  }
  func.func @transform_8(%arg0: i32) -> (i32, i32) {
    %c0_i32 = arith.constant 0 : i32
    %c0_i32_0 = arith.constant 0 : i32
    %c0_i32_1 = arith.constant 0 : i32
    return %c0_i32, %c0_i32_0 : i32, i32
  }
  func.func @transform_9(%arg0: i32) -> (i32, i32) {
    %c0_i32 = arith.constant 0 : i32
    %c0_i32_0 = arith.constant 0 : i32
    %c0_i32_1 = arith.constant 0 : i32
    return %c0_i32, %c0_i32_0 : i32, i32
  }
  func.func @transform_10(%arg0: i32) -> (i32, i32) {
    %c0_i32 = arith.constant 0 : i32
    %c0_i32_0 = arith.constant 0 : i32
    %c0_i32_1 = arith.constant 0 : i32
    return %c0_i32, %c0_i32_0 : i32, i32
  }
  func.func @transform_11(%arg0: i32) -> (i32, i32, i32, i32) {
    %c0_i32 = arith.constant 0 : i32
    %c0_i32_0 = arith.constant 0 : i32
    %c0_i32_1 = arith.constant 0 : i32
    %c0_i32_2 = arith.constant 0 : i32
    return %arg0, %c0_i32, %c0_i32_0, %c0_i32_1 : i32, i32, i32, i32
  }
}

module attributes {stable_mosaic.version = 11 : i64} {
  func.func @kernel(%arg0: i32, %arg1: memref<1x4x4x48xf32, #tpu.memory_space<vmem>>, %arg2: memref<48x4xbf16, #tpu.memory_space<vmem>>, %arg3: memref<1x4xf32, #tpu.memory_space<vmem>>, %arg4: memref<1x4xf32, #tpu.memory_space<vmem>>, %arg5: memref<3x3x4xf32, #tpu.memory_space<vmem>>, %arg6: memref<1x4xf32, #tpu.memory_space<vmem>>, %arg7: memref<1x4xf32, #tpu.memory_space<vmem>>, %arg8: memref<4x16xbf16, #tpu.memory_space<vmem>>, %arg9: memref<1x16xf32, #tpu.memory_space<vmem>>, %arg10: memref<1x16xf32, #tpu.memory_space<vmem>>, %arg11: memref<4x16xf32, #tpu.memory_space<vmem>>, %arg12: memref<1x2x2x64xf32, #tpu.memory_space<vmem>>, %arg13: memref<6x6x4xf32, #tpu.memory_space<vmem>>, %arg14: memref<6x6x48xf32, #tpu.memory_space<vmem>>) attributes {dimension_semantics = [#tpu.dimension_semantics<parallel>], iteration_bounds = array<i64: 2>, scalar_prefetch = 0 : i64, scratch_operands = 2 : i64, tpu.core_type = #tpu.core_type<tc>, window_params = [{transform_indices = @transform_0, window_bounds = array<i64: 1, 4, 4, 48>}, {pipeline_mode = #tpu.pipeline_mode<synchronous>, transform_indices = @transform_1, window_bounds = array<i64: 48, 4>}, {pipeline_mode = #tpu.pipeline_mode<synchronous>, transform_indices = @transform_2, window_bounds = array<i64: 1, 4>}, {pipeline_mode = #tpu.pipeline_mode<synchronous>, transform_indices = @transform_3, window_bounds = array<i64: 1, 4>}, {pipeline_mode = #tpu.pipeline_mode<synchronous>, transform_indices = @transform_4, window_bounds = array<i64: 3, 3, 4>}, {pipeline_mode = #tpu.pipeline_mode<synchronous>, transform_indices = @transform_5, window_bounds = array<i64: 1, 4>}, {pipeline_mode = #tpu.pipeline_mode<synchronous>, transform_indices = @transform_6, window_bounds = array<i64: 1, 4>}, {pipeline_mode = #tpu.pipeline_mode<synchronous>, transform_indices = @transform_7, window_bounds = array<i64: 4, 16>}, {pipeline_mode = #tpu.pipeline_mode<synchronous>, transform_indices = @transform_8, window_bounds = array<i64: 1, 16>}, {pipeline_mode = #tpu.pipeline_mode<synchronous>, transform_indices = @transform_9, window_bounds = array<i64: 1, 16>}, {pipeline_mode = #tpu.pipeline_mode<synchronous>, transform_indices = @transform_10, window_bounds = array<i64: 4, 16>}, {transform_indices = @transform_11, window_bounds = array<i64: 1, 2, 2, 64>}]} {
    %c0 = arith.constant 0 : index
    %c0_0 = arith.constant 0 : index
    %c0_1 = arith.constant 0 : index
    %c0_2 = arith.constant 0 : index
    %0 = vector.load %arg1[%c0, %c0_0, %c0_1, %c0_2] : memref<1x4x4x48xf32, #tpu.memory_space<vmem>>, vector<1x4x4x48xf32>
    %1 = vector.shape_cast %0 : vector<1x4x4x48xf32> to vector<4x4x48xf32>
    %2 = vector.shape_cast %1 : vector<4x4x48xf32> to vector<16x48xf32>
    %c0_3 = arith.constant 0 : index
    %c0_4 = arith.constant 0 : index
    %3 = vector.load %arg11[%c0_3, %c0_4] : memref<4x16xf32, #tpu.memory_space<vmem>>, vector<4x16xf32>
    %4 = arith.truncf %2 : vector<16x48xf32> to vector<16x48xbf16>
    %c0_5 = arith.constant 0 : index
    %c0_6 = arith.constant 0 : index
    %5 = vector.load %arg2[%c0_5, %c0_6] : memref<48x4xbf16, #tpu.memory_space<vmem>>, vector<48x4xbf16>
    %cst = arith.constant dense<0.000000e+00> : vector<16x4xf32>
    %6 = tpu.matmul %4, %5, %cst {dimension_numbers = #tpu.dot_dimension_numbers<[1], [0], [0], [1], [0, 0, 1, 1], [], []>} : vector<16x48xbf16>, vector<48x4xbf16>, vector<16x4xf32> -> vector<16x4xf32>
    %c0_7 = arith.constant 0 : index
    %c0_8 = arith.constant 0 : index
    %7 = vector.load %arg3[%c0_7, %c0_8] : memref<1x4xf32, #tpu.memory_space<vmem>>, vector<1x4xf32>
    %8 = vector.broadcast %7 : vector<1x4xf32> to vector<16x4xf32>
    %9 = arith.mulf %6, %8 : vector<16x4xf32>
    %c0_9 = arith.constant 0 : index
    %c0_10 = arith.constant 0 : index
    %10 = vector.load %arg4[%c0_9, %c0_10] : memref<1x4xf32, #tpu.memory_space<vmem>>, vector<1x4xf32>
    %11 = vector.broadcast %10 : vector<1x4xf32> to vector<16x4xf32>
    %12 = arith.addf %9, %11 : vector<16x4xf32>
    %cst_11 = arith.constant 0.000000e+00 : f32
    %13 = vector.broadcast %cst_11 : f32 to vector<16x4xf32>
    %14 = arith.maximumf %12, %13 : vector<16x4xf32>
    %cst_12 = arith.constant 0.000000e+00 : f32
    %15 = vector.broadcast %cst_12 : f32 to vector<6x6x4xf32>
    %c0_13 = arith.constant 0 : index
    %c0_14 = arith.constant 0 : index
    %c0_15 = arith.constant 0 : index
    %16 = vector.load %arg13[%c0_13, %c0_14, %c0_15] : memref<6x6x4xf32, #tpu.memory_space<vmem>>, vector<6x6x4xf32>
    tpu.vector_store %arg13[%c0_13, %c0_14, %c0_15], %15 {strides = array<i32>} : memref<6x6x4xf32, #tpu.memory_space<vmem>>, vector<6x6x4xf32>,
    %17 = vector.shape_cast %14 : vector<16x4xf32> to vector<4x4x4xf32>
    %c1 = arith.constant 1 : index
    %c1_16 = arith.constant 1 : index
    %c0_17 = arith.constant 0 : index
    %18 = vector.load %arg13[%c1, %c1_16, %c0_17] : memref<6x6x4xf32, #tpu.memory_space<vmem>>, vector<4x4x4xf32>
    tpu.vector_store %arg13[%c1, %c1_16, %c0_17], %17 {strides = array<i32>} : memref<6x6x4xf32, #tpu.memory_space<vmem>>, vector<4x4x4xf32>,
    %c0_18 = arith.constant 0 : index
    %c0_19 = arith.constant 0 : index
    %c0_20 = arith.constant 0 : index
    %19 = vector.load %arg5[%c0_18, %c0_19, %c0_20] : memref<3x3x4xf32, #tpu.memory_space<vmem>>, vector<3x3x4xf32>
    %cst_21 = arith.constant 0.000000e+00 : f32
    %20 = vector.broadcast %cst_21 : f32 to vector<4x4x4xf32>
    %c0_22 = arith.constant 0 : index
    %c0_23 = arith.constant 0 : index
    %c0_24 = arith.constant 0 : index
    %21 = vector.load %arg13[%c0_22, %c0_23, %c0_24] : memref<6x6x4xf32, #tpu.memory_space<vmem>>, vector<4x4x4xf32>
    %22 = vector.extract_strided_slice %19 {offsets = [0, 0, 0], sizes = [1, 1, 4], strides = [1, 1, 1]} : vector<3x3x4xf32> to vector<1x1x4xf32>
    %23 = vector.shape_cast %22 : vector<1x1x4xf32> to vector<4xf32>
    %24 = vector.shape_cast %23 : vector<4xf32> to vector<1x1x4xf32>
    %25 = vector.broadcast %24 : vector<1x1x4xf32> to vector<4x4x4xf32>
    %26 = arith.mulf %21, %25 : vector<4x4x4xf32>
    %27 = arith.addf %20, %26 : vector<4x4x4xf32>
    %c0_25 = arith.constant 0 : index
    %c1_26 = arith.constant 1 : index
    %c0_27 = arith.constant 0 : index
    %28 = vector.load %arg13[%c0_25, %c1_26, %c0_27] : memref<6x6x4xf32, #tpu.memory_space<vmem>>, vector<4x4x4xf32>
    %29 = vector.extract_strided_slice %19 {offsets = [0, 1, 0], sizes = [1, 1, 4], strides = [1, 1, 1]} : vector<3x3x4xf32> to vector<1x1x4xf32>
    %30 = vector.shape_cast %29 : vector<1x1x4xf32> to vector<4xf32>
    %31 = vector.shape_cast %30 : vector<4xf32> to vector<1x1x4xf32>
    %32 = vector.broadcast %31 : vector<1x1x4xf32> to vector<4x4x4xf32>
    %33 = arith.mulf %28, %32 : vector<4x4x4xf32>
    %34 = arith.addf %27, %33 : vector<4x4x4xf32>
    %c0_28 = arith.constant 0 : index
    %c2 = arith.constant 2 : index
    %c0_29 = arith.constant 0 : index
    %35 = vector.load %arg13[%c0_28, %c2, %c0_29] : memref<6x6x4xf32, #tpu.memory_space<vmem>>, vector<4x4x4xf32>
    %36 = vector.extract_strided_slice %19 {offsets = [0, 2, 0], sizes = [1, 1, 4], strides = [1, 1, 1]} : vector<3x3x4xf32> to vector<1x1x4xf32>
    %37 = vector.shape_cast %36 : vector<1x1x4xf32> to vector<4xf32>
    %38 = vector.shape_cast %37 : vector<4xf32> to vector<1x1x4xf32>
    %39 = vector.broadcast %38 : vector<1x1x4xf32> to vector<4x4x4xf32>
    %40 = arith.mulf %35, %39 : vector<4x4x4xf32>
    %41 = arith.addf %34, %40 : vector<4x4x4xf32>
    %c1_30 = arith.constant 1 : index
    %c0_31 = arith.constant 0 : index
    %c0_32 = arith.constant 0 : index
    %42 = vector.load %arg13[%c1_30, %c0_31, %c0_32] : memref<6x6x4xf32, #tpu.memory_space<vmem>>, vector<4x4x4xf32>
    %43 = vector.extract_strided_slice %19 {offsets = [1, 0, 0], sizes = [1, 1, 4], strides = [1, 1, 1]} : vector<3x3x4xf32> to vector<1x1x4xf32>
    %44 = vector.shape_cast %43 : vector<1x1x4xf32> to vector<4xf32>
    %45 = vector.shape_cast %44 : vector<4xf32> to vector<1x1x4xf32>
    %46 = vector.broadcast %45 : vector<1x1x4xf32> to vector<4x4x4xf32>
    %47 = arith.mulf %42, %46 : vector<4x4x4xf32>
    %48 = arith.addf %41, %47 : vector<4x4x4xf32>
    %c1_33 = arith.constant 1 : index
    %c1_34 = arith.constant 1 : index
    %c0_35 = arith.constant 0 : index
    %49 = vector.load %arg13[%c1_33, %c1_34, %c0_35] : memref<6x6x4xf32, #tpu.memory_space<vmem>>, vector<4x4x4xf32>
    %50 = vector.extract_strided_slice %19 {offsets = [1, 1, 0], sizes = [1, 1, 4], strides = [1, 1, 1]} : vector<3x3x4xf32> to vector<1x1x4xf32>
    %51 = vector.shape_cast %50 : vector<1x1x4xf32> to vector<4xf32>
    %52 = vector.shape_cast %51 : vector<4xf32> to vector<1x1x4xf32>
    %53 = vector.broadcast %52 : vector<1x1x4xf32> to vector<4x4x4xf32>
    %54 = arith.mulf %49, %53 : vector<4x4x4xf32>
    %55 = arith.addf %48, %54 : vector<4x4x4xf32>
    %c1_36 = arith.constant 1 : index
    %c2_37 = arith.constant 2 : index
    %c0_38 = arith.constant 0 : index
    %56 = vector.load %arg13[%c1_36, %c2_37, %c0_38] : memref<6x6x4xf32, #tpu.memory_space<vmem>>, vector<4x4x4xf32>
    %57 = vector.extract_strided_slice %19 {offsets = [1, 2, 0], sizes = [1, 1, 4], strides = [1, 1, 1]} : vector<3x3x4xf32> to vector<1x1x4xf32>
    %58 = vector.shape_cast %57 : vector<1x1x4xf32> to vector<4xf32>
    %59 = vector.shape_cast %58 : vector<4xf32> to vector<1x1x4xf32>
    %60 = vector.broadcast %59 : vector<1x1x4xf32> to vector<4x4x4xf32>
    %61 = arith.mulf %56, %60 : vector<4x4x4xf32>
    %62 = arith.addf %55, %61 : vector<4x4x4xf32>
    %c2_39 = arith.constant 2 : index
    %c0_40 = arith.constant 0 : index
    %c0_41 = arith.constant 0 : index
    %63 = vector.load %arg13[%c2_39, %c0_40, %c0_41] : memref<6x6x4xf32, #tpu.memory_space<vmem>>, vector<4x4x4xf32>
    %64 = vector.extract_strided_slice %19 {offsets = [2, 0, 0], sizes = [1, 1, 4], strides = [1, 1, 1]} : vector<3x3x4xf32> to vector<1x1x4xf32>
    %65 = vector.shape_cast %64 : vector<1x1x4xf32> to vector<4xf32>
    %66 = vector.shape_cast %65 : vector<4xf32> to vector<1x1x4xf32>
    %67 = vector.broadcast %66 : vector<1x1x4xf32> to vector<4x4x4xf32>
    %68 = arith.mulf %63, %67 : vector<4x4x4xf32>
    %69 = arith.addf %62, %68 : vector<4x4x4xf32>
    %c2_42 = arith.constant 2 : index
    %c1_43 = arith.constant 1 : index
    %c0_44 = arith.constant 0 : index
    %70 = vector.load %arg13[%c2_42, %c1_43, %c0_44] : memref<6x6x4xf32, #tpu.memory_space<vmem>>, vector<4x4x4xf32>
    %71 = vector.extract_strided_slice %19 {offsets = [2, 1, 0], sizes = [1, 1, 4], strides = [1, 1, 1]} : vector<3x3x4xf32> to vector<1x1x4xf32>
    %72 = vector.shape_cast %71 : vector<1x1x4xf32> to vector<4xf32>
    %73 = vector.shape_cast %72 : vector<4xf32> to vector<1x1x4xf32>
    %74 = vector.broadcast %73 : vector<1x1x4xf32> to vector<4x4x4xf32>
    %75 = arith.mulf %70, %74 : vector<4x4x4xf32>
    %76 = arith.addf %69, %75 : vector<4x4x4xf32>
    %c2_45 = arith.constant 2 : index
    %c2_46 = arith.constant 2 : index
    %c0_47 = arith.constant 0 : index
    %77 = vector.load %arg13[%c2_45, %c2_46, %c0_47] : memref<6x6x4xf32, #tpu.memory_space<vmem>>, vector<4x4x4xf32>
    %78 = vector.extract_strided_slice %19 {offsets = [2, 2, 0], sizes = [1, 1, 4], strides = [1, 1, 1]} : vector<3x3x4xf32> to vector<1x1x4xf32>
    %79 = vector.shape_cast %78 : vector<1x1x4xf32> to vector<4xf32>
    %80 = vector.shape_cast %79 : vector<4xf32> to vector<1x1x4xf32>
    %81 = vector.broadcast %80 : vector<1x1x4xf32> to vector<4x4x4xf32>
    %82 = arith.mulf %77, %81 : vector<4x4x4xf32>
    %83 = arith.addf %76, %82 : vector<4x4x4xf32>
    %84 = vector.shape_cast %83 : vector<4x4x4xf32> to vector<16x4xf32>
    %cst_48 = arith.constant dense<0.000000e+00> : vector<4x4xf32>
    %85 = tpu.matmul %3, %84, %cst_48 {dimension_numbers = #tpu.dot_dimension_numbers<[1], [0], [0], [1], [0, 0, 1, 1], [], []>} : vector<4x16xf32>, vector<16x4xf32>, vector<4x4xf32> -> vector<4x4xf32>
    %c0_49 = arith.constant 0 : index
    %c0_50 = arith.constant 0 : index
    %86 = vector.load %arg6[%c0_49, %c0_50] : memref<1x4xf32, #tpu.memory_space<vmem>>, vector<1x4xf32>
    %87 = vector.broadcast %86 : vector<1x4xf32> to vector<4x4xf32>
    %88 = arith.mulf %85, %87 : vector<4x4xf32>
    %c0_51 = arith.constant 0 : index
    %c0_52 = arith.constant 0 : index
    %89 = vector.load %arg7[%c0_51, %c0_52] : memref<1x4xf32, #tpu.memory_space<vmem>>, vector<1x4xf32>
    %90 = vector.broadcast %89 : vector<1x4xf32> to vector<4x4xf32>
    %91 = arith.addf %88, %90 : vector<4x4xf32>
    %cst_53 = arith.constant 0.000000e+00 : f32
    %92 = vector.broadcast %cst_53 : f32 to vector<4x4xf32>
    %93 = arith.maximumf %91, %92 : vector<4x4xf32>
    %94 = arith.truncf %93 : vector<4x4xf32> to vector<4x4xbf16>
    %c0_54 = arith.constant 0 : index
    %c0_55 = arith.constant 0 : index
    %95 = vector.load %arg8[%c0_54, %c0_55] : memref<4x16xbf16, #tpu.memory_space<vmem>>, vector<4x16xbf16>
    %cst_56 = arith.constant dense<0.000000e+00> : vector<4x16xf32>
    %96 = tpu.matmul %94, %95, %cst_56 {dimension_numbers = #tpu.dot_dimension_numbers<[1], [0], [0], [1], [0, 0, 1, 1], [], []>} : vector<4x4xbf16>, vector<4x16xbf16>, vector<4x16xf32> -> vector<4x16xf32>
    %c0_57 = arith.constant 0 : index
    %c0_58 = arith.constant 0 : index
    %97 = vector.load %arg9[%c0_57, %c0_58] : memref<1x16xf32, #tpu.memory_space<vmem>>, vector<1x16xf32>
    %98 = vector.broadcast %97 : vector<1x16xf32> to vector<4x16xf32>
    %99 = arith.mulf %96, %98 : vector<4x16xf32>
    %c0_59 = arith.constant 0 : index
    %c0_60 = arith.constant 0 : index
    %100 = vector.load %arg10[%c0_59, %c0_60] : memref<1x16xf32, #tpu.memory_space<vmem>>, vector<1x16xf32>
    %101 = vector.broadcast %100 : vector<1x16xf32> to vector<4x16xf32>
    %102 = arith.addf %99, %101 : vector<4x16xf32>
    %cst_61 = arith.constant 0.000000e+00 : f32
    %103 = vector.broadcast %cst_61 : f32 to vector<4x16xf32>
    %104 = arith.maximumf %102, %103 : vector<4x16xf32>
    %cst_62 = arith.constant 0.000000e+00 : f32
    %105 = vector.broadcast %cst_62 : f32 to vector<6x6x48xf32>
    %c0_63 = arith.constant 0 : index
    %c0_64 = arith.constant 0 : index
    %c0_65 = arith.constant 0 : index
    %106 = vector.load %arg14[%c0_63, %c0_64, %c0_65] : memref<6x6x48xf32, #tpu.memory_space<vmem>>, vector<6x6x48xf32>
    tpu.vector_store %arg14[%c0_63, %c0_64, %c0_65], %105 {strides = array<i32>} : memref<6x6x48xf32, #tpu.memory_space<vmem>>, vector<6x6x48xf32>,
    %107 = vector.shape_cast %2 : vector<16x48xf32> to vector<4x4x48xf32>
    %c1_66 = arith.constant 1 : index
    %c1_67 = arith.constant 1 : index
    %c0_68 = arith.constant 0 : index
    %108 = vector.load %arg14[%c1_66, %c1_67, %c0_68] : memref<6x6x48xf32, #tpu.memory_space<vmem>>, vector<4x4x48xf32>
    tpu.vector_store %arg14[%c1_66, %c1_67, %c0_68], %107 {strides = array<i32>} : memref<6x6x48xf32, #tpu.memory_space<vmem>>, vector<4x4x48xf32>,
    %cst_69 = arith.constant 0.000000e+00 : f32
    %109 = vector.broadcast %cst_69 : f32 to vector<4x4x48xf32>
    %c0_70 = arith.constant 0 : index
    %c0_71 = arith.constant 0 : index
    %c0_72 = arith.constant 0 : index
    %110 = vector.load %arg14[%c0_70, %c0_71, %c0_72] : memref<6x6x48xf32, #tpu.memory_space<vmem>>, vector<4x4x48xf32>
    %111 = arith.addf %109, %110 : vector<4x4x48xf32>
    %c0_73 = arith.constant 0 : index
    %c1_74 = arith.constant 1 : index
    %c0_75 = arith.constant 0 : index
    %112 = vector.load %arg14[%c0_73, %c1_74, %c0_75] : memref<6x6x48xf32, #tpu.memory_space<vmem>>, vector<4x4x48xf32>
    %113 = arith.addf %111, %112 : vector<4x4x48xf32>
    %c0_76 = arith.constant 0 : index
    %c2_77 = arith.constant 2 : index
    %c0_78 = arith.constant 0 : index
    %114 = vector.load %arg14[%c0_76, %c2_77, %c0_78] : memref<6x6x48xf32, #tpu.memory_space<vmem>>, vector<4x4x48xf32>
    %115 = arith.addf %113, %114 : vector<4x4x48xf32>
    %c1_79 = arith.constant 1 : index
    %c0_80 = arith.constant 0 : index
    %c0_81 = arith.constant 0 : index
    %116 = vector.load %arg14[%c1_79, %c0_80, %c0_81] : memref<6x6x48xf32, #tpu.memory_space<vmem>>, vector<4x4x48xf32>
    %117 = arith.addf %115, %116 : vector<4x4x48xf32>
    %c1_82 = arith.constant 1 : index
    %c1_83 = arith.constant 1 : index
    %c0_84 = arith.constant 0 : index
    %118 = vector.load %arg14[%c1_82, %c1_83, %c0_84] : memref<6x6x48xf32, #tpu.memory_space<vmem>>, vector<4x4x48xf32>
    %119 = arith.addf %117, %118 : vector<4x4x48xf32>
    %c1_85 = arith.constant 1 : index
    %c2_86 = arith.constant 2 : index
    %c0_87 = arith.constant 0 : index
    %120 = vector.load %arg14[%c1_85, %c2_86, %c0_87] : memref<6x6x48xf32, #tpu.memory_space<vmem>>, vector<4x4x48xf32>
    %121 = arith.addf %119, %120 : vector<4x4x48xf32>
    %c2_88 = arith.constant 2 : index
    %c0_89 = arith.constant 0 : index
    %c0_90 = arith.constant 0 : index
    %122 = vector.load %arg14[%c2_88, %c0_89, %c0_90] : memref<6x6x48xf32, #tpu.memory_space<vmem>>, vector<4x4x48xf32>
    %123 = arith.addf %121, %122 : vector<4x4x48xf32>
    %c2_91 = arith.constant 2 : index
    %c1_92 = arith.constant 1 : index
    %c0_93 = arith.constant 0 : index
    %124 = vector.load %arg14[%c2_91, %c1_92, %c0_93] : memref<6x6x48xf32, #tpu.memory_space<vmem>>, vector<4x4x48xf32>
    %125 = arith.addf %123, %124 : vector<4x4x48xf32>
    %c2_94 = arith.constant 2 : index
    %c2_95 = arith.constant 2 : index
    %c0_96 = arith.constant 0 : index
    %126 = vector.load %arg14[%c2_94, %c2_95, %c0_96] : memref<6x6x48xf32, #tpu.memory_space<vmem>>, vector<4x4x48xf32>
    %127 = arith.addf %125, %126 : vector<4x4x48xf32>
    %128 = vector.shape_cast %127 : vector<4x4x48xf32> to vector<16x48xf32>
    %cst_97 = arith.constant dense<0.000000e+00> : vector<4x48xf32>
    %129 = tpu.matmul %3, %128, %cst_97 {dimension_numbers = #tpu.dot_dimension_numbers<[1], [0], [0], [1], [0, 0, 1, 1], [], []>} : vector<4x16xf32>, vector<16x48xf32>, vector<4x48xf32> -> vector<4x48xf32>
    %cst_98 = arith.constant 0.111111112 : f32
    %130 = vector.broadcast %cst_98 : f32 to vector<4x48xf32>
    %131 = arith.mulf %129, %130 : vector<4x48xf32>
    %cst_99 = arith.constant 0.000000e+00 : f32
    %132 = vector.broadcast %cst_99 : f32 to vector<4x48xf32>
    %133 = arith.maximumf %131, %132 : vector<4x48xf32>
    %134 = tpu.concatenate %104, %133 in 1 : vector<4x16xf32>, vector<4x48xf32> -> vector<4x64xf32>
    %135 = vector.shape_cast %134 : vector<4x64xf32> to vector<2x2x64xf32>
    %c0_100 = arith.constant 0 : index
    %c0_101 = arith.constant 0 : index
    %c0_102 = arith.constant 0 : index
    %c0_103 = arith.constant 0 : index
    %136 = vector.load %arg12[%c0_100, %c0_101, %c0_102, %c0_103] : memref<1x2x2x64xf32, #tpu.memory_space<vmem>>, vector<1x2x2x64xf32>
    %137 = vector.shape_cast %136 : vector<1x2x2x64xf32> to vector<2x2x64xf32>
    %138 = vector.shape_cast %135 : vector<2x2x64xf32> to vector<1x2x2x64xf32>
    tpu.vector_store %arg12[%c0_100, %c0_101, %c0_102, %c0_103], %138 {strides = array<i32>} : memref<1x2x2x64xf32, #tpu.memory_space<vmem>>, vector<1x2x2x64xf32>,
    return
  }
  func.func @transform_0(%arg0: i32) -> (i32, i32, i32, i32) {
    %c0_i32 = arith.constant 0 : i32
    %c0_i32_0 = arith.constant 0 : i32
    %c0_i32_1 = arith.constant 0 : i32
    %c0_i32_2 = arith.constant 0 : i32
    return %arg0, %c0_i32, %c0_i32_0, %c0_i32_1 : i32, i32, i32, i32
  }
  func.func @transform_1(%arg0: i32) -> (i32, i32) {
    %c0_i32 = arith.constant 0 : i32
    %c0_i32_0 = arith.constant 0 : i32
    %c0_i32_1 = arith.constant 0 : i32
    return %c0_i32, %c0_i32_0 : i32, i32
  }
  func.func @transform_2(%arg0: i32) -> (i32, i32) {
    %c0_i32 = arith.constant 0 : i32
    %c0_i32_0 = arith.constant 0 : i32
    %c0_i32_1 = arith.constant 0 : i32
    return %c0_i32, %c0_i32_0 : i32, i32
  }
  func.func @transform_3(%arg0: i32) -> (i32, i32) {
    %c0_i32 = arith.constant 0 : i32
    %c0_i32_0 = arith.constant 0 : i32
    %c0_i32_1 = arith.constant 0 : i32
    return %c0_i32, %c0_i32_0 : i32, i32
  }
  func.func @transform_4(%arg0: i32) -> (i32, i32, i32) {
    %c0_i32 = arith.constant 0 : i32
    %c0_i32_0 = arith.constant 0 : i32
    %c0_i32_1 = arith.constant 0 : i32
    %c0_i32_2 = arith.constant 0 : i32
    return %c0_i32, %c0_i32_0, %c0_i32_1 : i32, i32, i32
  }
  func.func @transform_5(%arg0: i32) -> (i32, i32) {
    %c0_i32 = arith.constant 0 : i32
    %c0_i32_0 = arith.constant 0 : i32
    %c0_i32_1 = arith.constant 0 : i32
    return %c0_i32, %c0_i32_0 : i32, i32
  }
  func.func @transform_6(%arg0: i32) -> (i32, i32) {
    %c0_i32 = arith.constant 0 : i32
    %c0_i32_0 = arith.constant 0 : i32
    %c0_i32_1 = arith.constant 0 : i32
    return %c0_i32, %c0_i32_0 : i32, i32
  }
  func.func @transform_7(%arg0: i32) -> (i32, i32) {
    %c0_i32 = arith.constant 0 : i32
    %c0_i32_0 = arith.constant 0 : i32
    %c0_i32_1 = arith.constant 0 : i32
    return %c0_i32, %c0_i32_0 : i32, i32
  }
  func.func @transform_8(%arg0: i32) -> (i32, i32) {
    %c0_i32 = arith.constant 0 : i32
    %c0_i32_0 = arith.constant 0 : i32
    %c0_i32_1 = arith.constant 0 : i32
    return %c0_i32, %c0_i32_0 : i32, i32
  }
  func.func @transform_9(%arg0: i32) -> (i32, i32) {
    %c0_i32 = arith.constant 0 : i32
    %c0_i32_0 = arith.constant 0 : i32
    %c0_i32_1 = arith.constant 0 : i32
    return %c0_i32, %c0_i32_0 : i32, i32
  }
  func.func @transform_10(%arg0: i32) -> (i32, i32) {
    %c0_i32 = arith.constant 0 : i32
    %c0_i32_0 = arith.constant 0 : i32
    %c0_i32_1 = arith.constant 0 : i32
    return %c0_i32, %c0_i32_0 : i32, i32
  }
  func.func @transform_11(%arg0: i32) -> (i32, i32, i32, i32) {
    %c0_i32 = arith.constant 0 : i32
    %c0_i32_0 = arith.constant 0 : i32
    %c0_i32_1 = arith.constant 0 : i32
    %c0_i32_2 = arith.constant 0 : i32
    return %arg0, %c0_i32, %c0_i32_0, %c0_i32_1 : i32, i32, i32, i32
  }
}

module attributes {stable_mosaic.version = 11 : i64} {
  func.func @kernel(%arg0: i32, %arg1: memref<2x2x2x64xf32, #tpu.memory_space<vmem>>, %arg2: memref<64x10xbf16, #tpu.memory_space<vmem>>, %arg3: memref<1x10xf32, #tpu.memory_space<vmem>>, %arg4: memref<2x10xf32, #tpu.memory_space<vmem>>) attributes {dimension_semantics = [#tpu.dimension_semantics<arbitrary>], iteration_bounds = array<i64: 1>, scalar_prefetch = 0 : i64, scratch_operands = 0 : i64, tpu.core_type = #tpu.core_type<tc>, window_params = [{pipeline_mode = #tpu.pipeline_mode<synchronous>, transform_indices = @transform_0, window_bounds = array<i64: 2, 2, 2, 64>}, {pipeline_mode = #tpu.pipeline_mode<synchronous>, transform_indices = @transform_1, window_bounds = array<i64: 64, 10>}, {pipeline_mode = #tpu.pipeline_mode<synchronous>, transform_indices = @transform_2, window_bounds = array<i64: 1, 10>}, {pipeline_mode = #tpu.pipeline_mode<synchronous>, transform_indices = @transform_3, window_bounds = array<i64: 2, 10>}]} {
    %c0 = arith.constant 0 : index
    %c0_0 = arith.constant 0 : index
    %c0_1 = arith.constant 0 : index
    %c0_2 = arith.constant 0 : index
    %0 = vector.load %arg1[%c0, %c0_0, %c0_1, %c0_2] : memref<2x2x2x64xf32, #tpu.memory_space<vmem>>, vector<2x2x2x64xf32>
    %cst = arith.constant dense<0.000000e+00> : vector<2x64xf32>
    %1 = vector.multi_reduction <add>, %0, %cst [1, 2] : vector<2x2x2x64xf32> to vector<2x64xf32>
    %cst_3 = arith.constant 4.000000e+00 : f32
    %2 = vector.broadcast %cst_3 : f32 to vector<2x64xf32>
    %3 = arith.divf %1, %2 : vector<2x64xf32>
    %4 = arith.truncf %3 : vector<2x64xf32> to vector<2x64xbf16>
    %c0_4 = arith.constant 0 : index
    %c0_5 = arith.constant 0 : index
    %5 = vector.load %arg2[%c0_4, %c0_5] : memref<64x10xbf16, #tpu.memory_space<vmem>>, vector<64x10xbf16>
    %cst_6 = arith.constant dense<0.000000e+00> : vector<2x10xf32>
    %6 = tpu.matmul %4, %5, %cst_6 {dimension_numbers = #tpu.dot_dimension_numbers<[1], [0], [0], [1], [0, 0, 1, 1], [], []>} : vector<2x64xbf16>, vector<64x10xbf16>, vector<2x10xf32> -> vector<2x10xf32>
    %c0_7 = arith.constant 0 : index
    %c0_8 = arith.constant 0 : index
    %7 = vector.load %arg3[%c0_7, %c0_8] : memref<1x10xf32, #tpu.memory_space<vmem>>, vector<1x10xf32>
    %8 = vector.broadcast %7 : vector<1x10xf32> to vector<2x10xf32>
    %9 = arith.addf %6, %8 : vector<2x10xf32>
    %c0_9 = arith.constant 0 : index
    %c0_10 = arith.constant 0 : index
    %10 = vector.load %arg4[%c0_9, %c0_10] : memref<2x10xf32, #tpu.memory_space<vmem>>, vector<2x10xf32>
    tpu.vector_store %arg4[%c0_9, %c0_10], %9 {strides = array<i32>} : memref<2x10xf32, #tpu.memory_space<vmem>>, vector<2x10xf32>,
    return
  }
  func.func @transform_0(%arg0: i32) -> (i32, i32, i32, i32) {
    %c0_i32 = arith.constant 0 : i32
    %c0_i32_0 = arith.constant 0 : i32
    %c0_i32_1 = arith.constant 0 : i32
    %c0_i32_2 = arith.constant 0 : i32
    %c0_i32_3 = arith.constant 0 : i32
    return %c0_i32, %c0_i32_0, %c0_i32_1, %c0_i32_2 : i32, i32, i32, i32
  }
  func.func @transform_1(%arg0: i32) -> (i32, i32) {
    %c0_i32 = arith.constant 0 : i32
    %c0_i32_0 = arith.constant 0 : i32
    %c0_i32_1 = arith.constant 0 : i32
    return %c0_i32, %c0_i32_0 : i32, i32
  }
  func.func @transform_2(%arg0: i32) -> (i32, i32) {
    %c0_i32 = arith.constant 0 : i32
    %c0_i32_0 = arith.constant 0 : i32
    %c0_i32_1 = arith.constant 0 : i32
    return %c0_i32, %c0_i32_0 : i32, i32
  }
  func.func @transform_3(%arg0: i32) -> (i32, i32) {
    %c0_i32 = arith.constant 0 : i32
    %c0_i32_0 = arith.constant 0 : i32
    %c0_i32_1 = arith.constant 0 : i32
    return %c0_i32, %c0_i32_0 : i32, i32
  }
}

</mosaic_0001>

<bundles_post_ra>
// kernel: _lambda_.8
= control target key start
LH: loop header
LB: loop body
LE: loop exit
PB: predicated region body
PF: predicated region fallthrough
CT: control target
= control target key end

     0   :  { %s1163_s13 = smov 0   ;;  %s1438_s0 = inlined_call_operand.vmem [shape: f32[2,8,8,32], index: 0, kind: input, shape index: {}]   ;;  %s1439_s1 = inlined_call_operand.vmem [shape: bf16[32,8], index: 1, kind: input, shape index: {}]   ;;  %s1440_s2 = inlined_call_operand.vmem [shape: f32[1,8], index: 2, kind: input, shape index: {}]   ;;  %s1441_s3 = inlined_call_operand.vmem [shape: f32[1,8], index: 3, kind: input, shape index: {}]   ;;  %s1442_s4 = inlined_call_operand.vmem [shape: f32[3,3,8], index: 4, kind: input, shape index: {}]   ;;  %s1443_s5 = inlined_call_operand.vmem [shape: f32[1,8], index: 5, kind: input, shape index: {}]   ;;  %s1444_s6 = inlined_call_operand.vmem [shape: f32[1,8], index: 6, kind: input, shape index: {}]   ;;  %s1445_s7 = inlined_call_operand.vmem [shape: bf16[8,32], index: 7, kind: input, shape index: {}]   ;;  %s1446_s8 = inlined_call_operand.vmem [shape: f32[1,32], index: 8, kind: input, shape index: {}]   ;;  %s1447_s9 = inlined_call_operand.vmem [shape: f32[1,32], index: 9, kind: input, shape index: {}]   ;;  %s1448_s10 = inlined_call_operand.vmem [shape: f32[2,8,8,32], index: 10, kind: output, shape index: {}]  }
   0x1 LB: > { %s1025_s14 = sadd.s32 4294967295, %s1105_s13   ;;  %p1029_p0 = scmp.ge.s32.totalorder %s1105_s13, 1  ;;  %s1105_s13 = sphi %s1163_s13, %s20_s13  }
   0x2   : > { %p312_p1 = scmp.lt.s32.totalorder %s1105_s13, 3 }
   0x4   : > { %p313_p2 = pnand %p1029_p0, %p312_p1 }
   0x5   : > { %p350_p3 = scmp.lt.s32.totalorder (!%p313_p2), %s1025_s14, 1 }
   0x6   : > { %316 = sbr.rel (%p313_p2) target bundleno = 489 (0x1e9), region = 60 }
   0xb   : > { %v1097_v0 = vld [vmem:[%s1439_s1 + $0x8] sm:$0xff]   ;;  %v1098_v1 = vld [vmem:[%s1439_s1] sm:$0xff]   ;;  %s1450_s14 = smov (!%p350_p3, %s1025_s14), 1  ;;  %vm389_vm0 = vcmask 261120   ;;  %vm505_vm1 = vcmask 64512   ;;  %vm507_vm2 = vcmask 58368   ;;  %v547_v17 = vlaneseq }
   0xc   : > { %1065 = vmatprep.subr.bf16.mxu0 %v1097_v0  ;;  %s1052_s19 = sshll.u32 %s1450_s14, 6  ;;  %v1107_v14 = vmov 0.0   ;;  %v834_v15 = vld [vmem:[%s1445_s7] sm:$0xf]  ;;  %vm847_vm3 = vcmask 1043456  }
   0xd   : > { %1066 = vmatpush3.bf16.msra.mxu0 %v1097_v0  ;;  %s354_s22 = scalar_lea.vmem %s1438_s0, %s1052_s19  ;;  %513 = vst.msk [vmem:[#allocation2 + $0x30] sm:$0xff] %vm505_vm1, %v1107_v14  ;;  %506 = vst.msk [vmem:[#allocation2] sm:$0xff] %vm505_vm1, %v1107_v14  ;;  %1087 = vmatprep.subr.msk.bf16.mxu1 %vm847_vm3, %v834_v15  ;;  %v849_v16 = vsel %vm847_vm3, %v834_v15, 0  ;;  %v548_v18 = vshrl.u32 %v547_v17, 7  ;;  %v1040_v19 = vld [vmem:[%s1440_s2] ss:$0 sm:$0xff]  ;;  %s1410_s28 = scalar_lea.vmem %s1448_s10, %s1052_s19 }
   0xe   : > { %1067 = vmatprep.subr.bf16.mxu0 %v1098_v1  ;;  %v1185_v2 = vld [vmem:[%s354_s22] sm:$0xff]  ;;  %v1187_v3 = vld [vmem:[%s354_s22 + $0x8] sm:$0xff]  ;;  %v1189_v4 = vld [vmem:[%s354_s22 + $0x10] sm:$0xff]  ;;  %514 = vst.msk [vmem:[#allocation2 + $0x38] sm:$0x3] %vm507_vm2, %v1107_v14  ;;  %1078 = vmatpush3.bf16.msra.mxu1 %v849_v16 }
   0xf   : > { %v369_v5 = vpack.c.bf16 %v1187_v3, %v1185_v2  ;;  %v1193_v6 = vld [vmem:[%s354_s22 + $0x18] sm:$0xff]  ;;  %v1195_v7 = vld [vmem:[%s354_s22 + $0x20] sm:$0xff]  ;;  %v1197_v8 = vld [vmem:[%s354_s22 + $0x28] sm:$0xff]  ;;  %508 = vst.msk [vmem:[#allocation2 + $0x8] sm:$0x3] %vm507_vm2, %v1107_v14  ;;  %v549_v20 = vsub.s32 0, %v548_v18 }
  0x10   : > { %v370_v9 = vpack.c.bf16 %v1193_v6, %v1189_v4  ;;  %v371_v10 = vpack.c.bf16 %v1197_v8, %v1195_v7  ;;  %v1206_v11 = vld [vmem:[%s354_s22 + $0x30] sm:$0xff]  ;;  %v1208_v12 = vld [vmem:[%s354_s22 + $0x38] sm:$0xff]  ;;  %509 = vst.msk [vmem:[#allocation2 + $0x10] sm:$0xff] %vm505_vm1, %v1107_v14  ;;  %511 = vst.msk [vmem:[#allocation2 + $0x20] sm:$0xff] %vm505_vm1, %v1107_v14  ;;  %v577_v22 = vsub.s32 1, %v548_v18  ;;  %v605_v28 = vsub.s32 2, %v548_v18 }
  0x11   : > { %1068 = vmatpush3.bf16.msra.mxu0 %v1098_v1  ;;  %1069 = vmatprep.mubr.msk.bf16.mxu0 %vm389_vm0, %v369_v5  ;;  %v372_v13 = vpack.c.bf16 %v1208_v12, %v1206_v11  ;;  %510 = vst.msk [vmem:[#allocation2 + $0x18] sm:$0x3] %vm507_vm2, %v1107_v14  ;;  %512 = vst.msk [vmem:[#allocation2 + $0x28] sm:$0x3] %vm507_vm2, %v1107_v14  ;;  %v536_v21 = vld [vmem:[%s1442_s4] sm:$0x7] }
  0x12   : > { %515 = vst.msk [vmem:[#allocation2 + $0x40] sm:$0xff] %vm505_vm1, %v1107_v14  ;;  %517 = vst.msk [vmem:[#allocation2 + $0x50] sm:$0xff] %vm505_vm1, %v1107_v14  ;;  %v1245_v24 = vld [vmem:[%s1441_s3] ss:$0 sm:$0xff]  ;;  %v1247_v27 = vrot.slane %v536_v21, %v549_v20  ;;  %v1250_v32 = vrot.slane %v536_v21, %v577_v22  ;;  %v1254_v40 = vrot.slane %v536_v21, %v605_v28  ;;  %v538_v50 = vld [vmem:[%s1442_s4 + $0x8] sm:$0x7] }
  0x13   : > { %516 = vst.msk [vmem:[#allocation2 + $0x48] sm:$0x3] %vm507_vm2, %v1107_v14  ;;  %518 = vst.msk [vmem:[#allocation2 + $0x58] sm:$0x3] %vm507_vm2, %v1107_v14  ;;  %v537_v56 = vld [vmem:[%s1442_s4 + $0x4] sm:$0x7]  ;;  %v1270_v59 = vrot.slane %v538_v50, %v549_v20  ;;  %v1272_v60 = vrot.slane %v538_v50, %v577_v22 }
  0x14   : > { %1070 = vmatmul.mubr.msk.bf16.vlgmr.msra.gmra.mxu0 %vm389_vm0, %v370_v9  ;;  %519 = vst.msk [vmem:[#allocation2 + $0x60] sm:$0xff] %vm505_vm1, %v1107_v14  ;;  %521 = vst.msk [vmem:[#allocation2 + $0x70] sm:$0xff] %vm505_vm1, %v1107_v14  ;;  %v539_v31 = vld [vmem:[#allocation2] sm:$0xff]  ;;  %v1276_v1 = vrot.slane %v537_v56, %v549_v20  ;;  %v1278_v5 = vrot.slane %v537_v56, %v577_v22  ;;  %v1280_v9 = vrot.slane %v537_v56, %v605_v28 }
  0x15   : > { %1073 = vmatprep.mubr.msk.bf16.mxu0 %vm389_vm0, %v371_v10  ;;  %520 = vst.msk [vmem:[#allocation2 + $0x68] sm:$0x3] %vm507_vm2, %v1107_v14  ;;  %522 = vst.msk [vmem:[#allocation2 + $0x78] sm:$0x3] %vm507_vm2, %v1107_v14  ;;  %v551_v39 = vmul.f32 %v1247_v27, %v539_v31 }
  0x16   : > { %523 = vst.msk [vmem:[#allocation2 + $0x80] sm:$0xff] %vm505_vm1, %v1107_v14  ;;  %525 = vst.msk [vmem:[#allocation2 + $0x90] sm:$0xff] %vm505_vm1, %v1107_v14  ;;  %v567_v34 = vld [vmem:[#allocation2 + $0x1] sm:$0xff] }
  0x17   : > { %524 = vst.msk [vmem:[#allocation2 + $0x88] sm:$0x3] %vm507_vm2, %v1107_v14  ;;  %526 = vst.msk [vmem:[#allocation2 + $0x98] sm:$0x3] %vm507_vm2, %v1107_v14  ;;  %v579_v44 = vmul.f32 %v1250_v32, %v567_v34  ;;  %v595_v45 = vld [vmem:[#allocation2 + $0x2] sm:$0xff]  ;;  %v1282_v14 = vrot.slane %v538_v50, %v605_v28 }
  0x18   : > { %v607_v52 = vmul.f32 %v1254_v40, %v595_v45 }
  0x19   : > { %v587_v57 = vadd.f32 %v579_v44, %v551_v39 }
  0x1b   : > { %v615_v18 = vadd.f32 %v607_v52, %v587_v57 }
  0x1c   : > { %1074 = vmatmul.mubr.msk.bf16.gmra.mxu0 %vm389_vm0, %v372_v13 }
  0xd4   : > { %v1071_v23 = vpop.f32.mrf.mxu0 }
  0xd5   : > { %v476_v25 = vmul.f32 %v1071_v23, %v1040_v19 }
  0xd6   : > { %v436_v26 = vpop.f32.mrf.mxu0 }
  0xd7   : > { %v491_v29 = vadd.f32 %v1245_v24, %v476_v25  ;;  %v474_v30 = vmul.f32 %v1040_v19, %v436_v26 }
  0xd8   : > { %v1072_v33 = vpop.f32.mrf.mxu0 }
  0xd9   : > { %v499_v35 = vmax.f32 %v491_v29, 0.0  ;;  %v489_v36 = vadd.f32 %v1245_v24, %v474_v30  ;;  %v477_v37 = vmul.f32 %v1072_v33, %v1040_v19 }
  0xda   : > { %v439_v38 = vpop.f32.mrf.mxu0 }
  0xdb   : > { %530 = vst.msk [vmem:[#allocation2 + $0x31] sm:$0xff] %vm505_vm1, %v499_v35  ;;  %v497_v41 = vmax.f32 %v489_v36, 0.0  ;;  %v492_v42 = vadd.f32 %v1245_v24, %v477_v37  ;;  %v475_v43 = vmul.f32 %v1040_v19, %v439_v38 }
  0xdc   : > { %v1075_v46 = vpop.f32.mrf.mxu0 }
  0xdd   : > { %528 = vst.msk [vmem:[#allocation2 + $0x11] sm:$0xff] %vm505_vm1, %v497_v41  ;;  %v500_v47 = vmax.f32 %v492_v42, 0.0  ;;  %v490_v48 = vadd.f32 %v1245_v24, %v475_v43  ;;  %v480_v49 = vmul.f32 %v1075_v46, %v1040_v19 }
  0xde   : > { %v452_v51 = vpop.f32.mrf.mxu0 }
  0xdf   : > { %531 = vst.msk [vmem:[#allocation2 + $0x41] sm:$0xff] %vm505_vm1, %v500_v47  ;;  %v498_v53 = vmax.f32 %v490_v48, 0.0  ;;  %v495_v54 = vadd.f32 %v1245_v24, %v480_v49  ;;  %v478_v55 = vmul.f32 %v1040_v19, %v452_v51 }
  0xe0   : > { %v1076_v58 = vpop.f32.mrf.mxu0 }
  0xe1   : > { %529 = vst.msk [vmem:[#allocation2 + $0x21] sm:$0xff] %vm505_vm1, %v498_v53  ;;  %v503_v61 = vmax.f32 %v495_v54, 0.0  ;;  %v493_v62 = vadd.f32 %v1245_v24, %v478_v55  ;;  %v481_v63 = vmul.f32 %v1076_v58, %v1040_v19 }
  0xe2   : > { %v455_v0 = vpop.f32.mrf.mxu0  ;;  %v709_v10 = vld [vmem:[#allocation2 + $0x30] sm:$0xff] }
  0xe3   : > { %v737_v13 = vld [vmem:[#allocation2 + $0x31] sm:$0xff]  ;;  %534 = vst.msk [vmem:[#allocation2 + $0x71] sm:$0xff] %vm505_vm1, %v503_v61  ;;  %v501_v15 = vmax.f32 %v493_v62, 0.0  ;;  %v496_v16 = vadd.f32 %v1245_v24, %v481_v63  ;;  %v479_v17 = vmul.f32 %v1040_v19, %v455_v0  ;;  %v1287_v22 = vmul.f32 %v1270_v59, %v709_v10 }
  0xe4   : > { %v765_v21 = vld [vmem:[#allocation2 + $0x32] sm:$0xff]  ;;  %v1290_v26 = vmul.f32 %v1272_v60, %v737_v13  ;;  %v554_v28 = vmul.f32 %v709_v10, %v1247_v27  ;;  %v582_v29 = vmul.f32 %v737_v13, %v1250_v32  ;;  %v637_v48 = vmul.f32 %v709_v10, %v1276_v1 }
  0xe5   : > { %v540_v23 = vld [vmem:[#allocation2 + $0x10] sm:$0xff]  ;;  %532 = vst.msk [vmem:[#allocation2 + $0x51] sm:$0xff] %vm505_vm1, %v501_v15  ;;  %v504_v30 = vmax.f32 %v496_v16, 0.0  ;;  %v494_v19 = vadd.f32 %v1245_v24, %v479_v17  ;;  %v1302_v37 = vmul.f32 %v1282_v14, %v765_v21  ;;  %v610_v47 = vmul.f32 %v765_v21, %v1254_v40 }
  0xe6   : > { %v568_v25 = vld [vmem:[#allocation2 + $0x11] sm:$0xff]  ;;  %v552_v31 = vmul.f32 %v1247_v27, %v540_v23  ;;  %v635_v35 = vmul.f32 %v1276_v1, %v540_v23  ;;  %v626_v38 = vld [vmem:[#allocation2 + $0x40] sm:$0xff]  ;;  %v590_v42 = vadd.f32 %v582_v29, %v554_v28  ;;  %v665_v54 = vmul.f32 %v737_v13, %v1278_v5 }
  0xe7   : > { %v596_v20 = vld [vmem:[#allocation2 + $0x12] sm:$0xff]  ;;  %v580_v33 = vmul.f32 %v1250_v32, %v568_v25  ;;  %v663_v36 = vmul.f32 %v1278_v5, %v568_v25  ;;  %535 = vst.msk [vmem:[#allocation2 + $0x81] sm:$0xff] %vm505_vm1, %v504_v30  ;;  %v502_v39 = vmax.f32 %v494_v19, 0.0  ;;  %v638_v49 = vmul.f32 %v1276_v1, %v626_v38  ;;  %v654_v53 = vld [vmem:[#allocation2 + $0x41] sm:$0xff] }
  0xe8   : > { %v608_v34 = vmul.f32 %v1254_v40, %v596_v20  ;;  %v691_v24 = vmul.f32 %v1280_v9, %v596_v20  ;;  %v624_v43 = vld [vmem:[#allocation2 + $0x20] sm:$0xff]  ;;  %v643_v44 = vadd.f32 %v635_v35, %v615_v18  ;;  %v618_v17 = vadd.f32 %v610_v47, %v590_v42 }
  0xe9   : > { %v588_v41 = vadd.f32 %v580_v33, %v552_v31  ;;  %v652_v45 = vld [vmem:[#allocation2 + $0x21] sm:$0xff]  ;;  %533 = vst.msk [vmem:[#allocation2 + $0x61] sm:$0xff] %vm505_vm1, %v502_v39  ;;  %v636_v51 = vmul.f32 %v1276_v1, %v624_v43  ;;  %v720_v57 = vmul.f32 %v1270_v59, %v624_v43  ;;  %v553_v0 = vmul.f32 %v624_v43, %v1247_v27 }
  0xea   : > { %v680_v46 = vld [vmem:[#allocation2 + $0x22] sm:$0xff]  ;;  %v664_v52 = vmul.f32 %v1278_v5, %v652_v45  ;;  %v671_v55 = vadd.f32 %v663_v36, %v643_v44  ;;  %v748_v58 = vmul.f32 %v1272_v60, %v652_v45  ;;  %v581_v10 = vmul.f32 %v652_v45, %v1250_v32  ;;  %v1333_v45 = vld [vmem:[%s1443_s5] ss:$0 sm:$0xff] }
  0xeb   : > { %v616_v50 = vadd.f32 %v608_v34, %v588_v41  ;;  %v692_v56 = vmul.f32 %v1280_v9, %v680_v46  ;;  %v682_v61 = vld [vmem:[#allocation2 + $0x42] sm:$0xff]  ;;  %v776_v63 = vmul.f32 %v1282_v14, %v680_v46  ;;  %v609_v16 = vmul.f32 %v680_v46, %v1254_v40 }
  0xec   : > { %v699_v15 = vadd.f32 %v691_v24, %v671_v55  ;;  %v666_v13 = vmul.f32 %v1278_v5, %v654_v53  ;;  %v711_v18 = vld [vmem:[#allocation2 + $0x50] sm:$0xff]  ;;  %v589_v20 = vadd.f32 %v581_v10, %v553_v0  ;;  %v693_v28 = vmul.f32 %v765_v21, %v1280_v9 }
  0xed   : > { %v644_v62 = vadd.f32 %v636_v51, %v616_v50  ;;  %v739_v23 = vld [vmem:[#allocation2 + $0x51] sm:$0xff]  ;;  %v694_v29 = vmul.f32 %v1280_v9, %v682_v61  ;;  %v646_v19 = vadd.f32 %v638_v49, %v618_v17  ;;  %v722_v31 = vmul.f32 %v1270_v59, %v626_v38 }
  0xee   : > { %v728_v30 = vadd.f32 %v720_v57, %v699_v15  ;;  %v723_v33 = vmul.f32 %v1270_v59, %v711_v18  ;;  %v617_v35 = vadd.f32 %v609_v16, %v589_v20  ;;  %v750_v36 = vmul.f32 %v1272_v60, %v654_v53  ;;  %v767_v42 = vld [vmem:[#allocation2 + $0x52] sm:$0xff] }
  0xef   : > { %v672_v25 = vadd.f32 %v664_v52, %v644_v62  ;;  %v751_v39 = vmul.f32 %v1272_v60, %v739_v23  ;;  %v674_v24 = vadd.f32 %v666_v13, %v646_v19  ;;  %v778_v43 = vmul.f32 %v1282_v14, %v682_v61 }
  0xf0   : > { %v756_v41 = vadd.f32 %v748_v58, %v728_v30  ;;  %v555_v21 = vmul.f32 %v626_v38, %v1247_v27  ;;  %v645_v46 = vadd.f32 %v637_v48, %v617_v35  ;;  %v556_v47 = vmul.f32 %v711_v18, %v1247_v27  ;;  %v656_v16 = vld [vmem:[#allocation2 + $0x61] sm:$0xff]  ;;  %v713_v35 = vld [vmem:[#allocation2 + $0x70] sm:$0xff] }
  0xf1   : > { %v700_v34 = vadd.f32 %v692_v56, %v672_v25  ;;  %v583_v49 = vmul.f32 %v654_v53, %v1250_v32  ;;  %v702_v51 = vadd.f32 %v694_v29, %v674_v24  ;;  %v584_v52 = vmul.f32 %v739_v23, %v1250_v32  ;;  %v628_v56 = vld [vmem:[#allocation2 + $0x60] sm:$0xff] }
  0xf2   : > { %v784_v50 = vadd.f32 %v776_v63, %v756_v41  ;;  %v611_v55 = vmul.f32 %v682_v61, %v1254_v40  ;;  %v673_v57 = vadd.f32 %v665_v54, %v645_v46  ;;  %v612_v58 = vmul.f32 %v767_v42, %v1254_v40 }
  0xf3   : > { %v729_v44 = vadd.f32 %v1287_v22, %v700_v34  ;;  %v1343_v22 = vld [vmem:[%s1444_s6] ss:$0 sm:$0xff]  ;;  %v591_v48 = vadd.f32 %v583_v49, %v555_v21  ;;  %v731_v62 = vadd.f32 %v723_v33, %v702_v51  ;;  %v592_v63 = vadd.f32 %v584_v52, %v556_v47 }
  0xf4   : > { %v799_v53 = vmul.f32 %v1333_v45, %v784_v50  ;;  %v639_v0 = vmul.f32 %v711_v18, %v1276_v1  ;;  %v701_v10 = vadd.f32 %v693_v28, %v673_v57  ;;  %v779_v54 = vmul.f32 %v1282_v14, %v767_v42  ;;  %v684_v18 = vld [vmem:[#allocation2 + $0x62] sm:$0xff] }
  0xf5   : > { %v757_v38 = vadd.f32 %v1290_v26, %v729_v44  ;;  %v619_v15 = vadd.f32 %v611_v55, %v591_v48  ;;  %v640_v26 = vmul.f32 %v1276_v1, %v628_v56  ;;  %v759_v13 = vadd.f32 %v751_v39, %v731_v62  ;;  %v741_v44 = vld [vmem:[#allocation2 + $0x71] sm:$0xff] }
  0xf6   : > { %v814_v17 = vadd.f32 %v1343_v22, %v799_v53  ;;  %v620_v25 = vadd.f32 %v612_v58, %v592_v63  ;;  %v730_v29 = vadd.f32 %v722_v31, %v701_v10  ;;  %v667_v19 = vmul.f32 %v739_v23, %v1278_v5  ;;  %v769_v55 = vld [vmem:[#allocation2 + $0x72] sm:$0xff] }
  0xf7   : > { %v785_v61 = vadd.f32 %v1302_v37, %v757_v38  ;;  %v647_v30 = vadd.f32 %v639_v0, %v619_v15  ;;  %v787_v37 = vadd.f32 %v779_v54, %v759_v13  ;;  %v668_v34 = vmul.f32 %v1278_v5, %v656_v16  ;;  %v630_v13 = vld [vmem:[#allocation2 + $0x80] sm:$0xff] }
  0xf8   : > { %v822_v33 = vmax.f32 %v814_v17, 0.0  ;;  %v648_v28 = vadd.f32 %v640_v26, %v620_v25  ;;  %v758_v24 = vadd.f32 %v750_v36, %v730_v29  ;;  %v695_v21 = vmul.f32 %v767_v42, %v1280_v9 }
  0xf9   : > { %v800_v20 = vmul.f32 %v1333_v45, %v785_v61  ;;  %v675_v39 = vadd.f32 %v667_v19, %v647_v30  ;;  %v802_v46 = vmul.f32 %v1333_v45, %v787_v37  ;;  %v696_v47 = vmul.f32 %v1280_v9, %v684_v18 }
  0xfa   : > { %v676_v31 = vadd.f32 %v668_v34, %v648_v28  ;;  %v724_v23 = vmul.f32 %v1270_v59, %v628_v56  ;;  %v786_v50 = vadd.f32 %v778_v43, %v758_v24  ;;  %v725_v52 = vmul.f32 %v1270_v59, %v713_v35  ;;  %v658_v34 = vld [vmem:[#allocation2 + $0x81] sm:$0xff] }
  0xfb   : > { %v815_v41 = vadd.f32 %v1343_v22, %v800_v20  ;;  %v703_v51 = vadd.f32 %v695_v21, %v675_v39  ;;  %v817_v38 = vadd.f32 %v1343_v22, %v802_v46  ;;  %v752_v57 = vmul.f32 %v1272_v60, %v656_v16  ;;  %v715_v39 = vld [vmem:[#allocation2 + $0x90] sm:$0xff]  ;;  %v686_v21 = vld [vmem:[#allocation2 + $0x82] sm:$0xff] }
  0xfc   : > { %v704_v36 = vadd.f32 %v696_v47, %v676_v31  ;;  %v753_v42 = vmul.f32 %v1272_v60, %v741_v44  ;;  %v801_v58 = vmul.f32 %v1333_v45, %v786_v50  ;;  %v780_v62 = vmul.f32 %v1282_v14, %v684_v18 }
  0xfd   : > { %v823_v49 = vmax.f32 %v815_v41, 0.0  ;;  %v732_v53 = vadd.f32 %v724_v23, %v703_v51  ;;  %v781_v43 = vmul.f32 %v1282_v14, %v769_v55  ;;  %v557_v0 = vmul.f32 %v628_v56, %v1247_v27 }
  0xfe   : > { %v733_v63 = vadd.f32 %v725_v52, %v704_v36  ;;  %v558_v61 = vmul.f32 %v713_v35, %v1247_v27  ;;  %v816_v10 = vadd.f32 %v1343_v22, %v801_v58  ;;  %v585_v26 = vmul.f32 %v656_v16, %v1250_v32 }
  0xff   : > { %v830_v48 = vpack.c.bf16 %v823_v49, %v822_v33  ;;  %v760_v15 = vadd.f32 %v752_v57, %v732_v53  ;;  %v586_v17 = vmul.f32 %v741_v44, %v1250_v32  ;;  %v825_v54 = vmax.f32 %v817_v38, 0.0  ;;  %v743_v49 = vld [vmem:[#allocation2 + $0x91] sm:$0xff] }
 0x100   : > { %v761_v25 = vadd.f32 %v753_v42, %v733_v63  ;;  %v613_v20 = vmul.f32 %v684_v18, %v1254_v40  ;;  %v614_v29 = vmul.f32 %v769_v55, %v1254_v40  ;;  %v824_v30 = vmax.f32 %v816_v10, 0.0  ;;  %v771_v57 = vld [vmem:[#allocation2 + $0x92] sm:$0xff] }
 0x101   : > { %1079 = vmatprep.mubr.msk.bf16.mxu1 %vm505_vm1, %v830_v48  ;;  %v788_v56 = vadd.f32 %v780_v62, %v760_v15  ;;  %v593_v19 = vadd.f32 %v585_v26, %v557_v0  ;;  %v594_v27 = vadd.f32 %v586_v17, %v558_v61  ;;  %v641_v37 = vmul.f32 %v713_v35, %v1276_v1 }
 0x102   : > { %v789_v33 = vadd.f32 %v781_v43, %v761_v25  ;;  %v642_v28 = vmul.f32 %v1276_v1, %v630_v13  ;;  %v831_v16 = vpack.c.bf16 %v825_v54, %v824_v30  ;;  %v669_v40 = vmul.f32 %v741_v44, %v1278_v5 }
 0x103   : > { %v803_v32 = vmul.f32 %v1333_v45, %v788_v56  ;;  %v621_v41 = vadd.f32 %v613_v20, %v593_v19  ;;  %v622_v24 = vadd.f32 %v614_v29, %v594_v27  ;;  %v670_v1 = vmul.f32 %v1278_v5, %v658_v34  ;;  %v1049_v29 = vld [vmem:[%s1447_s9] ss:$0 sm:$0xff] }
 0x104   : > { %v804_v18 = vmul.f32 %v1333_v45, %v789_v33  ;;  %1080 = vmatmul.mubr.msk.bf16.vlgmr.msra.gmra.mxu1 %vm505_vm1, %v831_v16  ;;  %v727_v23 = vmul.f32 %v1270_v59, %v715_v39  ;;  %v697_v52 = vmul.f32 %v769_v55, %v1280_v9  ;;  %v698_v44 = vmul.f32 %v1280_v9, %v686_v21 }
 0x105   : > { %v818_v46 = vadd.f32 %v1343_v22, %v803_v32  ;;  %v649_v31 = vadd.f32 %v641_v37, %v621_v41  ;;  %v650_v35 = vadd.f32 %v642_v28, %v622_v24  ;;  %v726_v58 = vmul.f32 %v1270_v59, %v630_v13 }
 0x106   : > { %v819_v47 = vadd.f32 %v1343_v22, %v804_v18  ;;  %v755_v5 = vmul.f32 %v1272_v60, %v743_v49  ;;  %v754_v43 = vmul.f32 %v1272_v60, %v658_v34  ;;  %v783_v0 = vmul.f32 %v1282_v14, %v771_v57 }
 0x107   : > { %v677_v50 = vadd.f32 %v669_v40, %v649_v31  ;;  %v678_v51 = vadd.f32 %v670_v1, %v650_v35  ;;  %v826_v38 = vmax.f32 %v818_v46, 0.0  ;;  %v782_v61 = vmul.f32 %v1282_v14, %v686_v21  ;;  %v1048_v14 = vld [vmem:[%s1446_s8] ss:$0 sm:$0xff] }
 0x108   : > { %v827_v36 = vmax.f32 %v819_v47, 0.0 }
 0x109   : > { %v705_v42 = vadd.f32 %v697_v52, %v677_v50  ;;  %v706_v48 = vadd.f32 %v698_v44, %v678_v51 }
 0x10a   : > { %v832_v53 = vpack.c.bf16 %v827_v36, %v826_v38 }
 0x10b   : > { %v734_v62 = vadd.f32 %v726_v58, %v705_v42  ;;  %v735_v63 = vadd.f32 %v727_v23, %v706_v48 }
 0x10c   : > { %1083 = vmatprep.mubr.msk.bf16.mxu1 %vm505_vm1, %v832_v53 }
 0x10d   : > { %v762_v55 = vadd.f32 %v754_v43, %v734_v62  ;;  %v763_v9 = vadd.f32 %v755_v5, %v735_v63 }
 0x10f   : > { %v790_v10 = vadd.f32 %v782_v61, %v762_v55  ;;  %v791_v15 = vadd.f32 %v783_v0, %v763_v9 }
 0x111   : > { %v805_v26 = vmul.f32 %v1333_v45, %v790_v10  ;;  %v806_v59 = vmul.f32 %v1333_v45, %v791_v15 }
 0x113   : > { %v820_v17 = vadd.f32 %v1343_v22, %v805_v26  ;;  %v821_v13 = vadd.f32 %v1343_v22, %v806_v59 }
 0x115   : > { %v828_v60 = vmax.f32 %v820_v17, 0.0  ;;  %v829_v54 = vmax.f32 %v821_v13, 0.0 }
 0x117   : > { %v833_v25 = vpack.c.bf16 %v829_v54, %v828_v60 }
 0x119   : > { %1084 = vmatmul.mubr.msk.bf16.gmra.mxu1 %vm505_vm1, %v833_v25 }
 0x1c4   : > { %v1081_v20 = vpop.f32.mrf.mxu1 }
 0x1c5   : > { %v925_v45 = vmul.f32 %v1081_v20, %v1048_v14 }
 0x1c6   : > { %v885_v30 = vpop.f32.mrf.mxu1 }
 0x1c7   : > { %v940_v56 = vadd.f32 %v1049_v29, %v925_v45  ;;  %v923_v19 = vmul.f32 %v1048_v14, %v885_v30 }
 0x1c8   : > { %v1082_v22 = vpop.f32.mrf.mxu1 }
 0x1c9   : > { %v948_v27 = vadd.f32 %v940_v56, %v1189_v4  ;;  %v938_v33 = vadd.f32 %v1049_v29, %v923_v19  ;;  %v926_v37 = vmul.f32 %v1082_v22, %v1048_v14 }
 0x1ca   : > { %v888_v28 = vpop.f32.mrf.mxu1 }
 0x1cb   : > { %v956_v34 = vmax.f32 %v948_v27, 0.0  ;;  %v946_v16 = vadd.f32 %v938_v33, %v1185_v2  ;;  %v941_v32 = vadd.f32 %v1049_v29, %v926_v37  ;;  %v924_v41 = vmul.f32 %v1048_v14, %v888_v28 }
 0x1cd   : > { %964 = vst.msk [vmem:[%s1410_s28 + $0x10] sm:$0xff] %vm389_vm0, %v956_v34  ;;  %v954_v4 = vmax.f32 %v946_v16, 0.0  ;;  %v949_v24 = vadd.f32 %v941_v32, %v1193_v6  ;;  %v939_v39 = vadd.f32 %v1049_v29, %v924_v41 }
 0x1cf   : > { %962 = vst.msk [vmem:[%s1410_s28] sm:$0xff] %vm389_vm0, %v954_v4  ;;  %v957_v18 = vmax.f32 %v949_v24, 0.0  ;;  %v947_v40 = vadd.f32 %v939_v39, %v1187_v3 }
 0x1d1   : > { %965 = vst.msk [vmem:[%s1410_s28 + $0x18] sm:$0xff] %vm389_vm0, %v957_v18  ;;  %v955_v21 = vmax.f32 %v947_v40, 0.0 }
 0x1d3   : > { %963 = vst.msk [vmem:[%s1410_s28 + $0x8] sm:$0xff] %vm389_vm0, %v955_v21 }
 0x1d9   : > { %v1085_v2 = vpop.f32.mrf.mxu1 }
 0x1da   : > { %v929_v46 = vmul.f32 %v1085_v2, %v1048_v14 }
 0x1db   : > { %v901_v31 = vpop.f32.mrf.mxu1 }
 0x1dc   : > { %v944_v35 = vadd.f32 %v1049_v29, %v929_v46  ;;  %v927_v1 = vmul.f32 %v1048_v14, %v901_v31 }
 0x1dd   : > { %v1086_v47 = vpop.f32.mrf.mxu1 }
 0x1de   : > { %v952_v6 = vadd.f32 %v944_v35, %v1206_v11  ;;  %v942_v23 = vadd.f32 %v1049_v29, %v927_v1  ;;  %v930_v49 = vmul.f32 %v1086_v47, %v1048_v14 }
 0x1df   : > { %v904_v3 = vpop.f32.mrf.mxu1 }
 0x1e0   : > { %v960_v50 = vmax.f32 %v952_v6, 0.0  ;;  %v950_v51 = vadd.f32 %v942_v23, %v1195_v7  ;;  %v945_v52 = vadd.f32 %v1049_v29, %v930_v49  ;;  %v928_v44 = vmul.f32 %v1048_v14, %v904_v3 }
 0x1e2   : > { %968 = vst.msk [vmem:[%s1410_s28 + $0x30] sm:$0xff] %vm389_vm0, %v960_v50  ;;  %v958_v38 = vmax.f32 %v950_v51, 0.0  ;;  %v953_v36 = vadd.f32 %v945_v52, %v1208_v12  ;;  %v943_v57 = vadd.f32 %v1049_v29, %v928_v44 }
 0x1e4   : > { %966 = vst.msk [vmem:[%s1410_s28 + $0x20] sm:$0xff] %vm389_vm0, %v958_v38  ;;  %v961_v42 = vmax.f32 %v953_v36, 0.0  ;;  %v951_v11 = vadd.f32 %v943_v57, %v1197_v8 }
 0x1e6   : > { %969 = vst.msk [vmem:[%s1410_s28 + $0x38] sm:$0xff] %vm389_vm0, %v961_v42  ;;  %v959_v48 = vmax.f32 %v951_v11, 0.0 }
 0x1e8   : > { %967 = vst.msk [vmem:[%s1410_s28 + $0x28] sm:$0xff] %vm389_vm0, %v959_v48 }
 0x1e9 PF: > { %s20_s13 = sadd.s32 1, %s1105_s13  }
 0x1ea   : > { %p17_p4 = scmp.ge.s32.totalorder %s20_s13, 4  }
 0x1ec   :  { %19 = sbr.rel (!%p17_p4) target bundleno = 1 (0x1), region = 92 }

// kernel: _lambda_.9
= control target key start
LH: loop header
LB: loop body
LE: loop exit
PB: predicated region body
PF: predicated region fallthrough
CT: control target
= control target key end

     0   :  { %s1522_s17 = smov 0   ;;  %s2007_s0 = inlined_call_operand.vmem [shape: f32[2,8,8,32], index: 0, kind: input, shape index: {}]   ;;  %s2008_s1 = inlined_call_operand.vmem [shape: bf16[32,4], index: 1, kind: input, shape index: {}]   ;;  %s2009_s2 = inlined_call_operand.vmem [shape: f32[1,4], index: 2, kind: input, shape index: {}]   ;;  %s2010_s3 = inlined_call_operand.vmem [shape: f32[1,4], index: 3, kind: input, shape index: {}]   ;;  %s2011_s4 = inlined_call_operand.vmem [shape: f32[3,3,4], index: 4, kind: input, shape index: {}]   ;;  %s2012_s5 = inlined_call_operand.vmem [shape: f32[1,4], index: 5, kind: input, shape index: {}]   ;;  %s2013_s6 = inlined_call_operand.vmem [shape: f32[1,4], index: 6, kind: input, shape index: {}]   ;;  %s2014_s7 = inlined_call_operand.vmem [shape: bf16[4,16], index: 7, kind: input, shape index: {}]   ;;  %s2015_s8 = inlined_call_operand.vmem [shape: f32[1,16], index: 8, kind: input, shape index: {}]   ;;  %s2016_s9 = inlined_call_operand.vmem [shape: f32[1,16], index: 9, kind: input, shape index: {}]   ;;  %s2017_s10 = inlined_call_operand.vmem [shape: f32[16,64], index: 10, kind: input, shape index: {}]   ;;  %s2018_s11 = inlined_call_operand.vmem [shape: f32[2,4,4,48], index: 11, kind: output, shape index: {}]  }
   0x1 LB: > { %s1324_s18 = sadd.s32 4294967295, %s1457_s17   ;;  %p1328_p0 = scmp.ge.s32.totalorder %s1457_s17, 1  ;;  %s1457_s17 = sphi %s1522_s17, %s21_s17  }
   0x2   : > { %p337_p1 = scmp.lt.s32.totalorder %s1457_s17, 3 }
   0x4   : > { %p338_p2 = pnand %p1328_p0, %p337_p1 }
   0x6   : > { %341 = sbr.rel (%p338_p2) target bundleno = 685 (0x2ad), region = 64 }
   0xb   : > { %v1449_v0 = vld [vmem:[%s2008_s1 + $0x8] sm:$0xff]   ;;  %p377_p3 = scmp.lt.s32.totalorder %s1324_s18, 1  ;;  %v1450_v1 = vld [vmem:[%s2008_s1] sm:$0xff]   ;;  %vm418_vm0 = vcmask 261120   ;;  %vm994_vm1 = vcmask 254976   ;;  %v2019_v2 = vmov 0.0  }
   0xc   : > { %1382 = vmatprep.subr.bf16.mxu0 %v1449_v0  ;;  %996 = vst.msk [vmem:[#allocation3 + $0x10] sm:$0xff] %vm418_vm0, %v2019_v2  ;;  %998 = vst.msk [vmem:[#allocation3 + $0x20] sm:$0xff] %vm418_vm0, %v2019_v2  ;;  %vm534_vm2 = vcmask 31744   ;;  %vm536_vm3 = vcmask 25600   ;;  %v396_v15 = vld [vmem:[%s2017_s10] sm:$0xff]  ;;  %vm821_vm4 = vcmask 523264  }
   0xd   : > { %s2038_s18 = smov (!%p377_p3, %s1324_s18), 1  ;;  %1383 = vmatpush3.bf16.msra.mxu0 %v1449_v0  ;;  %997 = vst.msk [vmem:[#allocation3 + $0x18] sm:$0x3] %vm994_vm1, %v2019_v2  ;;  %999 = vst.msk [vmem:[#allocation3 + $0x28] sm:$0x3] %vm994_vm1, %v2019_v2  ;;  %1410 = vmatprep.mubr.msk.f32.mxu1 %vm821_vm4, %v396_v15  ;;  %vm928_vm5 = vcmask 1041408  }
   0xe   : > { %993 = vst.msk [vmem:[#allocation3] sm:$0xff] %vm418_vm0, %v2019_v2  ;;  %1000 = vst.msk [vmem:[#allocation3 + $0x30] sm:$0xff] %vm418_vm0, %v2019_v2  ;;  %1384 = vmatprep.subr.bf16.mxu0 %v1450_v1  ;;  %s1352_s23 = sshll.u32 %s2038_s18, 6  ;;  %vm1460_vm6 = vmmov 0   ;;  %s1353_s16 = sshll.u32 %s2038_s18, 4  ;;  %vm1255_vm7 = vcmask 130048  }
   0xf   : > { %995 = vst.msk [vmem:[#allocation3 + $0x8] sm:$0x3] %vm994_vm1, %v2019_v2  ;;  %1001 = vst.msk [vmem:[#allocation3 + $0x38] sm:$0x3] %vm994_vm1, %v2019_v2  ;;  %s381_s26 = scalar_lea.vmem %s2007_s0, %s1352_s23  ;;  %s386_s21 = scalar_lea.vmem %s2018_s11, %s1353_s16  ;;  %vm1264_vm8 = vcmask 388096  }
  0x10   : > { %1002 = vst.msk [vmem:[#allocation3 + $0x40] sm:$0xff] %vm418_vm0, %v2019_v2  ;;  %1004 = vst.msk [vmem:[#allocation3 + $0x50] sm:$0xff] %vm418_vm0, %v2019_v2  ;;  %v388_v3 = vld [vmem:[%s381_s26] sm:$0xff]  ;;  %v389_v4 = vld [vmem:[%s381_s26 + $0x8] sm:$0xff] }
  0x11   : > { %1003 = vst.msk [vmem:[#allocation3 + $0x48] sm:$0x3] %vm994_vm1, %v2019_v2  ;;  %1005 = vst.msk [vmem:[#allocation3 + $0x58] sm:$0x3] %vm994_vm1, %v2019_v2  ;;  %v390_v5 = vld [vmem:[%s381_s26 + $0x10] sm:$0xff]  ;;  %1385 = vmatpush3.bf16.msra.mxu0 %v1450_v1  ;;  %v398_v6 = vpack.c.bf16 %v389_v4, %v388_v3  ;;  %v391_v7 = vld [vmem:[%s381_s26 + $0x18] sm:$0xff] }
  0x12   : > { %1006 = vst.msk [vmem:[#allocation3 + $0x60] sm:$0xff] %vm418_vm0, %v2019_v2  ;;  %1008 = vst.msk [vmem:[#allocation3 + $0x70] sm:$0xff] %vm418_vm0, %v2019_v2  ;;  %v392_v8 = vld [vmem:[%s381_s26 + $0x20] sm:$0xff]  ;;  %v393_v9 = vld [vmem:[%s381_s26 + $0x28] sm:$0xff]  ;;  %v399_v10 = vpack.c.bf16 %v391_v7, %v390_v5 }
  0x13   : > { %1007 = vst.msk [vmem:[#allocation3 + $0x68] sm:$0x3] %vm994_vm1, %v2019_v2  ;;  %1009 = vst.msk [vmem:[#allocation3 + $0x78] sm:$0x3] %vm994_vm1, %v2019_v2  ;;  %v400_v11 = vpack.c.bf16 %v393_v9, %v392_v8  ;;  %v394_v12 = vld [vmem:[%s381_s26 + $0x30] sm:$0xff]  ;;  %v395_v13 = vld [vmem:[%s381_s26 + $0x38] sm:$0xff]  ;;  %1386 = vmatprep.mubr.msk.bf16.mxu0 %vm418_vm0, %v398_v6 }
  0x14   : > { %1010 = vst.msk [vmem:[#allocation3 + $0x80] sm:$0xff] %vm418_vm0, %v2019_v2  ;;  %1012 = vst.msk [vmem:[#allocation3 + $0x90] sm:$0xff] %vm418_vm0, %v2019_v2  ;;  %1387 = vmatmul.mubr.msk.bf16.vlgmr.msra.gmra.mxu0 %vm418_vm0, %v399_v10  ;;  %v401_v14 = vpack.c.bf16 %v395_v13, %v394_v12  ;;  %s1461_s26 = smov 16  }
  0x15   : > { %1011 = vst.msk [vmem:[#allocation3 + $0x88] sm:$0x3] %vm994_vm1, %v2019_v2  ;;  %1013 = vst.msk [vmem:[#allocation3 + $0x98] sm:$0x3] %vm994_vm1, %v2019_v2  ;;  %1390 = vmatprep.mubr.msk.bf16.mxu0 %vm418_vm0, %v400_v11  ;;  %v1023_v58 = vld [vmem:[#allocation3] sm:$0xff] }
  0x16   : > { %1015 = vst.msk [vmem:[#allocation3 + $0x11] sm:$0xff] %vm418_vm0, %v388_v3  ;;  %1016 = vst.msk [vmem:[#allocation3 + $0x21] sm:$0xff] %vm418_vm0, %v389_v4  ;;  %v1039_v59 = vld [vmem:[#allocation3 + $0x1] sm:$0xff] }
  0x17   : > { %1017 = vst.msk [vmem:[#allocation3 + $0x31] sm:$0xff] %vm418_vm0, %v390_v5  ;;  %1018 = vst.msk [vmem:[#allocation3 + $0x41] sm:$0xff] %vm418_vm0, %v391_v7  ;;  %v1055_v60 = vld [vmem:[#allocation3 + $0x2] sm:$0xff]  ;;  %v1047_v1 = vadd.f32 %v1039_v59, %v1023_v58 }
  0x18   : > { %1019 = vst.msk [vmem:[#allocation3 + $0x51] sm:$0xff] %vm418_vm0, %v392_v8  ;;  %1020 = vst.msk [vmem:[#allocation3 + $0x61] sm:$0xff] %vm418_vm0, %v393_v9 }
  0x19   : > { %1021 = vst.msk [vmem:[#allocation3 + $0x71] sm:$0xff] %vm418_vm0, %v394_v12  ;;  %1022 = vst.msk [vmem:[#allocation3 + $0x81] sm:$0xff] %vm418_vm0, %v395_v13  ;;  %v1063_v11 = vadd.f32 %v1055_v60, %v1047_v1 }
  0x1a   : > { %542 = vst.msk [vmem:[#allocation2 + $0x30] sm:$0xff] %vm534_vm2, %v2019_v2  ;;  %535 = vst.msk [vmem:[#allocation2] sm:$0xff] %vm534_vm2, %v2019_v2 }
  0x1b   : > { %543 = vst.msk [vmem:[#allocation2 + $0x38] sm:$0x3] %vm536_vm3, %v2019_v2  ;;  %537 = vst.msk [vmem:[#allocation2 + $0x8] sm:$0x3] %vm536_vm3, %v2019_v2  ;;  %v1127_v36 = vld [vmem:[#allocation3 + $0x90] sm:$0xff] }
  0x1c   : > { %1391 = vmatmul.mubr.msk.bf16.gmra.mxu0 %vm418_vm0, %v401_v14  ;;  %538 = vst.msk [vmem:[#allocation2 + $0x10] sm:$0xff] %vm534_vm2, %v2019_v2  ;;  %540 = vst.msk [vmem:[#allocation2 + $0x20] sm:$0xff] %vm534_vm2, %v2019_v2  ;;  %v1143_v61 = vld [vmem:[#allocation3 + $0x91] sm:$0xff] }
  0x1d   : > { %539 = vst.msk [vmem:[#allocation2 + $0x18] sm:$0x3] %vm536_vm3, %v2019_v2  ;;  %541 = vst.msk [vmem:[#allocation2 + $0x28] sm:$0x3] %vm536_vm3, %v2019_v2  ;;  %1435 = vmatprep.mubr.msk.f32.mxu0 %vm821_vm4, %v396_v15  ;;  %v1025_v45 = vld [vmem:[#allocation3 + $0x20] sm:$0xff]  ;;  %v1024_v51 = vld [vmem:[#allocation3 + $0x10] sm:$0xff] }
  0x1e   : > { %544 = vst.msk [vmem:[#allocation2 + $0x40] sm:$0xff] %vm534_vm2, %v2019_v2  ;;  %546 = vst.msk [vmem:[#allocation2 + $0x50] sm:$0xff] %vm534_vm2, %v2019_v2  ;;  %v1668_v33 = vld [vmem:[#allocation3 + $0x40] sm:$0xff]  ;;  %v1677_v39 = vld [vmem:[#allocation3 + $0x30] sm:$0xff] }
  0x1f   : > { %545 = vst.msk [vmem:[#allocation2 + $0x48] sm:$0x3] %vm536_vm3, %v2019_v2  ;;  %547 = vst.msk [vmem:[#allocation2 + $0x58] sm:$0x3] %vm536_vm3, %v2019_v2  ;;  %v1650_v23 = vld [vmem:[#allocation3 + $0x60] sm:$0xff]  ;;  %v1660_v28 = vld [vmem:[#allocation3 + $0x50] sm:$0xff] }
  0x20   : > { %548 = vst.msk [vmem:[#allocation2 + $0x60] sm:$0xff] %vm534_vm2, %v2019_v2  ;;  %550 = vst.msk [vmem:[#allocation2 + $0x70] sm:$0xff] %vm534_vm2, %v2019_v2  ;;  %v1638_v16 = vld [vmem:[#allocation3 + $0x70] sm:$0xff]  ;;  %v1078_v20 = vld [vmem:[#allocation3 + $0x80] sm:$0xff] }
  0x21   : > { %549 = vst.msk [vmem:[#allocation2 + $0x68] sm:$0x3] %vm536_vm3, %v2019_v2  ;;  %551 = vst.msk [vmem:[#allocation2 + $0x78] sm:$0x3] %vm536_vm3, %v2019_v2  ;;  %v1640_v17 = vld [vmem:[#allocation3 + $0x71] sm:$0xff]  ;;  %v1647_v21 = vld [vmem:[#allocation3 + $0x81] sm:$0xff] }
  0x22   : > { %552 = vst.msk [vmem:[#allocation2 + $0x80] sm:$0xff] %vm534_vm2, %v2019_v2  ;;  %554 = vst.msk [vmem:[#allocation2 + $0x90] sm:$0xff] %vm534_vm2, %v2019_v2  ;;  %v1642_v18 = vld [vmem:[#allocation3 + $0x72] sm:$0xff]  ;;  %v1054_v19 = vadd.f32 %v1640_v17, %v1638_v16  ;;  %v1652_v24 = vld [vmem:[#allocation3 + $0x61] sm:$0xff] }
  0x23   : > { %553 = vst.msk [vmem:[#allocation2 + $0x88] sm:$0x3] %vm536_vm3, %v2019_v2  ;;  %555 = vst.msk [vmem:[#allocation2 + $0x98] sm:$0x3] %vm536_vm3, %v2019_v2  ;;  %v1654_v25 = vld [vmem:[#allocation3 + $0x62] sm:$0xff]  ;;  %v1053_v27 = vadd.f32 %v1652_v24, %v1650_v23  ;;  %v1662_v29 = vld [vmem:[#allocation3 + $0x51] sm:$0xff] }
  0x24   : > { %v1070_v22 = vadd.f32 %v1642_v18, %v1054_v19  ;;  %v1656_v26 = vld [vmem:[#allocation3 + $0x82] sm:$0xff]  ;;  %v1664_v30 = vld [vmem:[#allocation3 + $0x52] sm:$0xff]  ;;  %v1052_v32 = vadd.f32 %v1662_v29, %v1660_v28 }
  0x25   : > { %v1670_v34 = vld [vmem:[#allocation3 + $0x41] sm:$0xff]  ;;  %v1069_v37 = vadd.f32 %v1654_v25, %v1053_v27  ;;  %v1679_v40 = vld [vmem:[#allocation3 + $0x31] sm:$0xff] }
  0x26   : > { %v1086_v31 = vadd.f32 %v1078_v20, %v1070_v22  ;;  %v1672_v35 = vld [vmem:[#allocation3 + $0x42] sm:$0xff]  ;;  %v1051_v38 = vadd.f32 %v1670_v34, %v1668_v33  ;;  %v1681_v41 = vld [vmem:[#allocation3 + $0x32] sm:$0xff]  ;;  %v1068_v43 = vadd.f32 %v1664_v30, %v1052_v32  ;;  %v1050_v44 = vadd.f32 %v1679_v40, %v1677_v39 }
  0x27   : > { %v1687_v46 = vld [vmem:[#allocation3 + $0x21] sm:$0xff]  ;;  %v1085_v48 = vadd.f32 %v1069_v37, %v1638_v16  ;;  %v1040_v52 = vld [vmem:[#allocation3 + $0x11] sm:$0xff] }
  0x28   : > { %v1102_v42 = vadd.f32 %v1647_v21, %v1086_v31  ;;  %v1689_v47 = vld [vmem:[#allocation3 + $0x22] sm:$0xff]  ;;  %v1067_v49 = vadd.f32 %v1672_v35, %v1051_v38  ;;  %v1049_v50 = vadd.f32 %v1687_v46, %v1025_v45  ;;  %v1056_v53 = vld [vmem:[#allocation3 + $0x12] sm:$0xff]  ;;  %v1084_v55 = vadd.f32 %v1068_v43, %v1650_v23 }
  0x29   : > { %v1066_v56 = vadd.f32 %v1681_v41, %v1050_v44  ;;  %v1048_v57 = vadd.f32 %v1040_v52, %v1024_v51  ;;  %v1101_v62 = vadd.f32 %v1085_v48, %v1640_v17  ;;  %v1159_v7 = vld [vmem:[#allocation3 + $0x92] sm:$0xff]  ;;  %v1079_v31 = vadd.f32 %v1063_v11, %v1024_v51 }
  0x2a   : > { %v1118_v54 = vadd.f32 %v1656_v26, %v1102_v42  ;;  %v1083_v63 = vadd.f32 %v1067_v49, %v1660_v28  ;;  %v1065_v0 = vadd.f32 %v1689_v47, %v1049_v50  ;;  %v1100_v4 = vadd.f32 %v1084_v55, %v1652_v24 }
  0x2b   : > { %v1082_v5 = vadd.f32 %v1066_v56, %v1668_v33  ;;  %v1064_v6 = vadd.f32 %v1056_v53, %v1048_v57  ;;  %v1117_v8 = vadd.f32 %v1101_v62, %v1642_v18  ;;  %v1095_v48 = vadd.f32 %v1079_v31, %v1040_v52  ;;  %v565_v62 = vld [vmem:[%s2011_s4] sm:$0x7] }
  0x2c   : > { %v1135_v3 = vadd.f32 %v1127_v36, %v1118_v54  ;;  %v1099_v9 = vadd.f32 %v1083_v63, %v1662_v29  ;;  %v1081_v10 = vadd.f32 %v1065_v0, %v1677_v39  ;;  %v1116_v13 = vadd.f32 %v1100_v4, %v1654_v25 }
  0x2d   : > { %v1098_v14 = vadd.f32 %v1082_v5, %v1670_v34  ;;  %v1080_v15 = vadd.f32 %v1064_v6, %v1025_v45  ;;  %v1134_v19 = vadd.f32 %v1117_v8, %v1078_v20 }
  0x2e   : > { %v1151_v12 = vadd.f32 %v1143_v61, %v1135_v3  ;;  %v1115_v22 = vadd.f32 %v1099_v9, %v1664_v30  ;;  %v1097_v27 = vadd.f32 %v1081_v10, %v1679_v40  ;;  %v1133_v36 = vadd.f32 %v1116_v13, %v1638_v16 }
  0x2f   : > { %v1114_v37 = vadd.f32 %v1098_v14, %v1672_v35  ;;  %v1096_v38 = vadd.f32 %v1080_v15, %v1687_v46  ;;  %v1150_v42 = vadd.f32 %v1134_v19, %v1647_v21  ;;  %v1111_v21 = vadd.f32 %v1095_v48, %v1056_v53  ;;  %v596_v14 = vld [vmem:[#allocation2 + $0x1] sm:$0xff] }
  0x30   : > { %v1167_v32 = vadd.f32 %v1159_v7, %v1151_v12  ;;  %v1132_v43 = vadd.f32 %v1115_v22, %v1650_v23  ;;  %v1113_v44 = vadd.f32 %v1097_v27, %v1681_v41  ;;  %v1149_v20 = vadd.f32 %v1133_v36, %v1640_v17  ;;  %v568_v12 = vld [vmem:[#allocation2] sm:$0xff] }
  0x31   : > { %v1131_v49 = vadd.f32 %v1114_v37, %v1660_v28  ;;  %v1112_v50 = vadd.f32 %v1096_v38, %v1689_v47  ;;  %v1166_v16 = vadd.f32 %v1150_v42, %v1656_v26  ;;  %v1128_v56 = vadd.f32 %v1111_v21, %v1025_v45  ;;  %v566_v42 = vld [vmem:[%s2011_s4 + $0x4] sm:$0x7] }
  0x32   : > { %1419 = vmatprep.subr.mxu0 %v1167_v32  ;;  %v1148_v51 = vadd.f32 %v1132_v43, %v1652_v24  ;;  %v1130_v54 = vadd.f32 %v1113_v44, %v1668_v33  ;;  %v1165_v23 = vadd.f32 %v1149_v20, %v1642_v18  ;;  %v567_v43 = vld [vmem:[%s2011_s4 + $0x8] sm:$0x7] }
  0x33   : > { %1420 = vmatpush3.msra.mxu0 %v1167_v32  ;;  %v1147_v55 = vadd.f32 %v1131_v49, %v1662_v29  ;;  %v1129_v52 = vadd.f32 %v1112_v50, %v1677_v39  ;;  %v1144_v29 = vadd.f32 %v1128_v56, %v1687_v46  ;;  %v624_v50 = vld [vmem:[#allocation2 + $0x2] sm:$0xff] }
  0x34   : > { %1421 = vmatprep.subr.mxu0 %v1166_v16  ;;  %v1164_v17 = vadd.f32 %v1148_v51, %v1654_v25  ;;  %v1146_v28 = vadd.f32 %v1130_v54, %v1670_v34  ;;  %v576_v34 = vlaneseq }
  0x35   : > { %1422 = vmatpush3.msra.mxu0 %v1166_v16  ;;  %v1163_v26 = vadd.f32 %v1147_v55, %v1664_v30  ;;  %v1145_v24 = vadd.f32 %v1129_v52, %v1679_v40  ;;  %v1160_v25 = vadd.f32 %v1144_v29, %v1689_v47  ;;  %v1735_v30 = vld [vmem:[%s2017_s10 + $0x8] sm:$0xff]  ;;  %v1340_v40 = vld [vmem:[%s2010_s3] ss:$0 sm:$0xff] }
  0x36   : > { %1423 = vmatprep.subr.mxu0 %v1165_v23  ;;  %v1162_v18 = vadd.f32 %v1146_v28, %v1672_v35  ;;  %2026 = vst [vmem:[#allocation4_spill] sm:$0xff] %v1735_v30  ;;  %v1339_v35 = vld [vmem:[%s2009_s2] ss:$0 sm:$0xff] }
  0x37   : > { %1424 = vmatpush3.msra.mxu0 %v1165_v23  ;;  %v1161_v33 = vadd.f32 %v1145_v24, %v1681_v41  ;;  %v577_v41 = vshrl.u32 %v576_v34, 7  ;;  %v744_v23 = vld [vmem:[#allocation2 + $0x90] sm:$0xff] }
  0x38   : > { %1425 = vmatprep.subr.mxu0 %v1164_v17  ;;  %v800_v24 = vld [vmem:[#allocation2 + $0x92] sm:$0xff] }
  0x39   : > { %1426 = vmatpush3.msra.mxu0 %v1164_v17  ;;  %v578_v58 = vsub.s32 0, %v577_v41  ;;  %v606_v63 = vsub.s32 1, %v577_v41  ;;  %v634_v7 = vsub.s32 2, %v577_v41 }
  0x3a   : > { %1427 = vmatprep.subr.mxu0 %v1163_v26 }
  0x3b   : > { %1428 = vmatpush3.msra.mxu0 %v1163_v26  ;;  %v1749_v6 = vrot.slane %v565_v62, %v578_v58  ;;  %v1752_v11 = vrot.slane %v565_v62, %v606_v63  ;;  %v1755_v31 = vrot.slane %v565_v62, %v634_v7  ;;  %v1769_v21 = vrot.slane %v566_v42, %v578_v58  ;;  %v772_v26 = vld [vmem:[#allocation2 + $0x91] sm:$0xff] }
  0x3c   : > { %1429 = vmatprep.subr.mxu0 %v1162_v18  ;;  %v1771_v55 = vrot.slane %v567_v43, %v578_v58  ;;  %v1782_v34 = vrot.slane %v567_v43, %v606_v63 }
  0x3d   : > { %1430 = vmatpush3.msra.mxu0 %v1162_v18  ;;  %v580_v32 = vmul.f32 %v1749_v6, %v568_v12  ;;  %v608_v44 = vmul.f32 %v1752_v11, %v596_v14  ;;  %v636_v29 = vmul.f32 %v1755_v31, %v624_v50 }
  0x3e   : > { %1431 = vmatprep.subr.mxu0 %v1161_v33 }
  0x3f   : > { %1432 = vmatpush3.msra.mxu0 %v1161_v33  ;;  %v616_v18 = vadd.f32 %v608_v44, %v580_v32  ;;  %v1778_v33 = vrot.slane %v566_v42, %v606_v63 }
  0x40   : > { %1433 = vmatprep.subr.mxu0 %v1160_v25 }
  0x41   : > { %1434 = vmatpush3.msra.mxu0 %v1160_v25  ;;  %v1780_v25 = vrot.slane %v566_v42, %v634_v7 }
  0x42   : > { %1436 = vmatmul.mubr.msk.f32.vlgmr.msra.gmra.mxu0 %vm821_vm4, %v1735_v30 }
  0xd4   : > { %v1388_v39 = vpop.f32.mrf.mxu0 }
  0xd5   : > { %v505_v45 = vmul.f32 %v1388_v39, %v1339_v35 }
  0xd6   : > { %v465_v46 = vpop.f32.mrf.mxu0 }
  0xd7   : > { %v520_v47 = vadd.f32 %v1340_v40, %v505_v45  ;;  %v503_v53 = vmul.f32 %v1339_v35, %v465_v46  ;;  %v1792_v45 = vmul.f32 %v1771_v55, %v744_v23  ;;  %v1794_v46 = vrot.slane %v567_v43, %v634_v7 }
  0xd8   : > { %v1389_v57 = vpop.f32.mrf.mxu0 }
  0xd9   : > { %v528_v59 = vmax.f32 %v520_v47, 0.0  ;;  %v518_v60 = vadd.f32 %v1340_v40, %v503_v53  ;;  %v506_v61 = vmul.f32 %v1389_v57, %v1339_v35  ;;  %v1801_v57 = vmul.f32 %v1782_v34, %v772_v26 }
  0xda   : > { %v468_v0 = vpop.f32.mrf.mxu0  ;;  %v1811_v62 = vmul.f32 %v1794_v46, %v800_v24 }
  0xdb   : > { %559 = vst.msk [vmem:[#allocation2 + $0x31] sm:$0xff] %vm534_vm2, %v528_v59  ;;  %v526_v1 = vmax.f32 %v518_v60, 0.0  ;;  %v521_v3 = vadd.f32 %v1340_v40, %v506_v61  ;;  %v504_v4 = vmul.f32 %v1339_v35, %v468_v0 }
  0xdc   : > { %v1392_v5 = vpop.f32.mrf.mxu0 }
  0xdd   : > { %557 = vst.msk [vmem:[#allocation2 + $0x11] sm:$0xff] %vm534_vm2, %v526_v1  ;;  %v529_v8 = vmax.f32 %v521_v3, 0.0  ;;  %v519_v9 = vadd.f32 %v1340_v40, %v504_v4  ;;  %v509_v10 = vmul.f32 %v1392_v5, %v1339_v35  ;;  %v1820_v3 = vadd.f32 %v636_v29, %v616_v18 }
  0xde   : > { %v481_v13 = vpop.f32.mrf.mxu0 }
  0xdf   : > { %560 = vst.msk [vmem:[#allocation2 + $0x41] sm:$0xff] %vm534_vm2, %v529_v8  ;;  %v527_v15 = vmax.f32 %v519_v9, 0.0  ;;  %v524_v19 = vadd.f32 %v1340_v40, %v509_v10  ;;  %v507_v22 = vmul.f32 %v1339_v35, %v481_v13 }
  0xe0   : > { %v1393_v27 = vpop.f32.mrf.mxu0 }
  0xe1   : > { %558 = vst.msk [vmem:[#allocation2 + $0x21] sm:$0xff] %vm534_vm2, %v527_v15  ;;  %v532_v36 = vmax.f32 %v524_v19, 0.0  ;;  %v522_v37 = vadd.f32 %v1340_v40, %v507_v22  ;;  %v510_v38 = vmul.f32 %v1393_v27, %v1339_v35 }
  0xe2   : > { %v484_v48 = vpop.f32.mrf.mxu0  ;;  %v571_v20 = vld [vmem:[#allocation2 + $0x30] sm:$0xff] }
  0xe3   : > { %v1766_v49 = vld [vmem:[#allocation2 + $0x31] sm:$0xff]  ;;  %563 = vst.msk [vmem:[#allocation2 + $0x71] sm:$0xff] %vm534_vm2, %v532_v36  ;;  %v530_v16 = vmax.f32 %v522_v37, 0.0  ;;  %v525_v51 = vadd.f32 %v1340_v40, %v510_v38  ;;  %v508_v54 = vmul.f32 %v1339_v35, %v484_v48  ;;  %v583_v52 = vmul.f32 %v1749_v6, %v571_v20 }
  0xe4   : > { %2027 = vst [vmem:[#allocation5_spill] sm:$0xff] %v1766_v49  ;;  %v611_v17 = vmul.f32 %v1752_v11, %v1766_v49  ;;  %v1788_v41 = vld [vmem:[#allocation2 + $0x32] sm:$0xff]  ;;  %v1818_v1 = vmul.f32 %v1769_v21, %v571_v20  ;;  %v1830_v8 = vmul.f32 %v1778_v33, %v1766_v49  ;;  %v1857_v27 = vmul.f32 %v1771_v55, %v571_v20 }
  0xe5   : > { %561 = vst.msk [vmem:[#allocation2 + $0x51] sm:$0xff] %vm534_vm2, %v530_v16  ;;  %v533_v28 = vmax.f32 %v525_v51, 0.0  ;;  %v523_v56 = vadd.f32 %v1340_v40, %v508_v54  ;;  %2028 = vst [vmem:[#allocation6_spill] sm:$0xff] %v1788_v41  ;;  %v1796_v47 = vld [vmem:[#allocation2 + $0x10] sm:$0xff]  ;;  %v639_v0 = vmul.f32 %v1755_v31, %v1788_v41  ;;  %v1834_v9 = vmul.f32 %v1780_v25, %v1788_v41 }
  0xe6   : > { %v1784_v35 = vld [vmem:[#allocation2 + $0x40] sm:$0xff]  ;;  %v1798_v53 = vld [vmem:[#allocation2 + $0x11] sm:$0xff]  ;;  %v619_v60 = vadd.f32 %v611_v17, %v583_v52  ;;  %v1838_v10 = vmul.f32 %v1749_v6, %v1796_v47 }
  0xe7   : > { %v1786_v39 = vld [vmem:[#allocation2 + $0x41] sm:$0xff]  ;;  %564 = vst.msk [vmem:[#allocation2 + $0x81] sm:$0xff] %vm534_vm2, %v533_v28  ;;  %v531_v40 = vmax.f32 %v523_v56, 0.0  ;;  %v584_v58 = vmul.f32 %v1749_v6, %v1784_v35  ;;  %v1807_v61 = vld [vmem:[#allocation2 + $0x12] sm:$0xff]  ;;  %v1842_v12 = vmul.f32 %v1752_v11, %v1798_v53  ;;  %v667_v43 = vmul.f32 %v1769_v21, %v1784_v35 }
  0xe8   : > { %v612_v59 = vmul.f32 %v1752_v11, %v1786_v39  ;;  %2029 = vst [vmem:[#allocation7_spill] sm:$0xff] %v1807_v61  ;;  %v1813_v63 = vld [vmem:[#allocation2 + $0x42] sm:$0xff]  ;;  %v1854_v22 = vmul.f32 %v1755_v31, %v1807_v61  ;;  %v647_v42 = vadd.f32 %v639_v0, %v619_v60  ;;  %v695_v52 = vmul.f32 %v1778_v33, %v1786_v39 }
  0xe9   : > { %562 = vst.msk [vmem:[#allocation2 + $0x61] sm:$0xff] %vm534_vm2, %v531_v40  ;;  %2030 = vst [vmem:[#allocation8_spill] sm:$0xff] %v1813_v63  ;;  %v1848_v15 = vld [vmem:[#allocation2 + $0x20] sm:$0xff]  ;;  %v640_v38 = vmul.f32 %v1755_v31, %v1813_v63  ;;  %v723_v17 = vmul.f32 %v1780_v25, %v1813_v63 }
  0xea   : > { %v1822_v4 = vld [vmem:[#allocation2 + $0x70] sm:$0xff]  ;;  %v1850_v19 = vld [vmem:[#allocation2 + $0x21] sm:$0xff]  ;;  %v620_v37 = vadd.f32 %v612_v59, %v584_v58  ;;  %v582_v28 = vmul.f32 %v1749_v6, %v1848_v15 }
  0xeb   : > { %v1824_v5 = vld [vmem:[#allocation2 + $0x71] sm:$0xff]  ;;  %v587_v13 = vmul.f32 %v1749_v6, %v1822_v4  ;;  %v1867_v44 = vld [vmem:[#allocation2 + $0x22] sm:$0xff]  ;;  %v610_v56 = vmul.f32 %v1752_v11, %v1850_v19 }
  0xec   : > { %v1826_v7 = vld [vmem:[#allocation2 + $0x72] sm:$0xff]  ;;  %v615_v14 = vmul.f32 %v1752_v11, %v1824_v5  ;;  %v638_v40 = vmul.f32 %v1755_v31, %v1867_v44 }
  0xed   : > { %v1859_v32 = vld [vmem:[#allocation2 + $0x50] sm:$0xff]  ;;  %v643_v50 = vmul.f32 %v1755_v31, %v1826_v7 }
  0xee   : > { %v1861_v36 = vld [vmem:[#allocation2 + $0x51] sm:$0xff]  ;;  %v623_v48 = vadd.f32 %v615_v14, %v587_v13  ;;  %v585_v20 = vmul.f32 %v1749_v6, %v1859_v32  ;;  %v659_v54 = vld [vmem:[#allocation2 + $0x80] sm:$0xff]  ;;  %v668_v29 = vmul.f32 %v1769_v21, %v1859_v32  ;;  %v648_v14 = vadd.f32 %v640_v38, %v620_v37 }
  0xef   : > { %v613_v16 = vmul.f32 %v1752_v11, %v1861_v36  ;;  %v1875_v51 = vld [vmem:[#allocation2 + $0x52] sm:$0xff]  ;;  %v1877_v23 = vld [vmem:[#allocation2 + $0x81] sm:$0xff]  ;;  %v671_v24 = vmul.f32 %v1769_v21, %v659_v54 }
  0xf0   : > { %v651_v26 = vadd.f32 %v643_v50, %v623_v48  ;;  %v1888_v18 = vld [vmem:[#allocation2 + $0x82] sm:$0xff]  ;;  %v641_v13 = vmul.f32 %v1755_v31, %v1875_v51  ;;  %v675_v48 = vadd.f32 %v667_v43, %v647_v42  ;;  %v699_v2 = vmul.f32 %v1778_v33, %v1877_v23 }
  0xf1   : > { %v574_v58 = vld [vmem:[#allocation2 + $0x60] sm:$0xff]  ;;  %v621_v0 = vadd.f32 %v613_v16, %v585_v20  ;;  %v727_v63 = vmul.f32 %v1780_v25, %v1888_v18  ;;  %v696_v20 = vmul.f32 %v1778_v33, %v1861_v36  ;;  %v676_v42 = vadd.f32 %v668_v29, %v648_v14 }
  0xf2   : > { %v602_v59 = vld [vmem:[#allocation2 + $0x61] sm:$0xff]  ;;  %v679_v50 = vadd.f32 %v671_v24, %v651_v26  ;;  %v586_v30 = vmul.f32 %v1749_v6, %v574_v58  ;;  %v669_v61 = vmul.f32 %v1769_v21, %v574_v58  ;;  %v670_v6 = vmul.f32 %v1769_v21, %v1822_v4 }
  0xf3   : > { %v1894_v60 = vld [vmem:[#allocation2 + $0x62] sm:$0xff]  ;;  %v614_v41 = vmul.f32 %v1752_v11, %v602_v59  ;;  %v649_v49 = vadd.f32 %v641_v13, %v621_v0  ;;  %v697_v11 = vmul.f32 %v1778_v33, %v602_v59  ;;  %v751_v26 = vmul.f32 %v1771_v55, %v1784_v35 }
  0xf4   : > { %v707_v16 = vadd.f32 %v699_v2, %v679_v50  ;;  %v642_v38 = vmul.f32 %v1755_v31, %v1894_v60  ;;  %v704_v13 = vadd.f32 %v696_v20, %v676_v42  ;;  %v724_v2 = vmul.f32 %v1780_v25, %v1875_v51 }
  0xf5   : > { %v622_v37 = vadd.f32 %v614_v41, %v586_v30  ;;  %v677_v43 = vadd.f32 %v669_v61, %v649_v49  ;;  %v698_v30 = vmul.f32 %v1778_v33, %v1824_v5  ;;  %v725_v41 = vmul.f32 %v1780_v25, %v1894_v60 }
  0xf6   : > { %v735_v24 = vadd.f32 %v727_v63, %v707_v16  ;;  %v703_v29 = vadd.f32 %v695_v52, %v675_v48  ;;  %v726_v35 = vmul.f32 %v1780_v25, %v1826_v7  ;;  %v732_v63 = vadd.f32 %v724_v2, %v704_v13 }
  0xf7   : > { %v650_v0 = vadd.f32 %v642_v38, %v622_v37  ;;  %v705_v31 = vadd.f32 %v697_v11, %v677_v43  ;;  %v618_v50 = vadd.f32 %v610_v56, %v582_v28  ;;  %v617_v20 = vadd.f32 %v1842_v12, %v1838_v10 }
  0xf8   : > { %v764_v49 = vadd.f32 %v1792_v45, %v735_v24  ;;  %v665_v16 = vmul.f32 %v1769_v21, %v1848_v15  ;;  %v754_v52 = vmul.f32 %v1771_v55, %v1822_v4  ;;  %v753_v45 = vmul.f32 %v1771_v55, %v574_v58 }
  0xf9   : > { %v678_v61 = vadd.f32 %v670_v6, %v650_v0  ;;  %v733_v14 = vadd.f32 %v725_v41, %v705_v31  ;;  %v731_v48 = vadd.f32 %v723_v17, %v703_v29  ;;  %v752_v42 = vmul.f32 %v1771_v55, %v1859_v32 }
  0xfa   : > { %v792_v37 = vadd.f32 %v1801_v57, %v764_v49  ;;  %v646_v6 = vadd.f32 %v638_v40, %v618_v50  ;;  %v645_v28 = vadd.f32 %v1854_v22, %v617_v20  ;;  %v755_v56 = vmul.f32 %v1771_v55, %v659_v54 }
  0xfb   : > { %v706_v38 = vadd.f32 %v698_v30, %v678_v61  ;;  %v762_v43 = vadd.f32 %v754_v52, %v733_v14  ;;  %v761_v57 = vadd.f32 %v753_v45, %v732_v63  ;;  %v693_v4 = vmul.f32 %v1778_v33, %v1850_v19  ;;  %v2031_v63 = vld [vmem:[#allocation7_spill] sm:$0xff] }
  0xfc   : > { %v820_v10 = vadd.f32 %v1811_v62, %v792_v37  ;;  %v674_v11 = vadd.f32 %v1818_v1, %v646_v6  ;;  %v673_v24 = vadd.f32 %v665_v16, %v645_v28  ;;  %v783_v32 = vmul.f32 %v1782_v34, %v1877_v23 }
  0xfd   : > { %v734_v12 = vadd.f32 %v726_v35, %v706_v38  ;;  %v782_v22 = vmul.f32 %v1782_v34, %v1824_v5  ;;  %v781_v62 = vmul.f32 %v1782_v34, %v602_v59  ;;  %v760_v54 = vadd.f32 %v752_v42, %v731_v48  ;;  %v2034_v38 = vld [vmem:[#allocation6_spill] sm:$0xff]  ;;  %v924_v42 = vld [vmem:[%s2014_s7] sm:$0x3] }
  0xfe   : > { %1394 = vmatprep.subr.mxu1 %v820_v10  ;;  %v702_v40 = vadd.f32 %v1830_v8, %v674_v11  ;;  %v701_v58 = vadd.f32 %v693_v4, %v673_v24  ;;  %v721_v1 = vmul.f32 %v1780_v25, %v1867_v44  ;;  %v811_v13 = vmul.f32 %v1794_v46, %v1888_v18  ;;  %v1344_v11 = vld [vmem:[%s2013_s6] ss:$0 sm:$0xff] }
  0xff   : > { %v763_v17 = vadd.f32 %v755_v56, %v734_v12  ;;  %1395 = vmatpush3.msra.mxu1 %v820_v10  ;;  %v790_v2 = vadd.f32 %v782_v22, %v762_v43  ;;  %v664_v23 = vmul.f32 %v1769_v21, %v1796_v47  ;;  %v789_v30 = vadd.f32 %v781_v62, %v761_v57  ;;  %v1343_v43 = vld [vmem:[%s2012_s5] ss:$0 sm:$0xff] }
 0x100   : > { %v780_v5 = vmul.f32 %v1782_v34, %v1861_v36  ;;  %v730_v59 = vadd.f32 %v1834_v9, %v702_v40  ;;  %v729_v31 = vadd.f32 %v721_v1, %v701_v58  ;;  %v810_v41 = vmul.f32 %v1794_v46, %v1826_v7  ;;  %v1346_v58 = vld [vmem:[%s2015_s8] ss:$0 sm:$0xff] }
 0x101   : > { %v791_v0 = vadd.f32 %v783_v32, %v763_v17  ;;  %v672_v29 = vadd.f32 %v664_v23, %v1820_v3  ;;  %v692_v18 = vmul.f32 %v1778_v33, %v1798_v53  ;;  %v809_v49 = vmul.f32 %v1794_v46, %v1894_v60  ;;  %v2032_v60 = vld [vmem:[#allocation5_spill] sm:$0xff] }
 0x102   : > { %v788_v21 = vadd.f32 %v780_v5, %v760_v54  ;;  %v759_v47 = vadd.f32 %v751_v26, %v730_v59  ;;  %v779_v36 = vmul.f32 %v1782_v34, %v1786_v39  ;;  %v818_v9 = vadd.f32 %v810_v41, %v790_v2 }
 0x103   : > { %v819_v8 = vadd.f32 %v811_v13, %v791_v0  ;;  %v758_v61 = vadd.f32 %v1857_v27, %v729_v31  ;;  %v700_v35 = vadd.f32 %v692_v18, %v672_v29  ;;  %v720_v7 = vmul.f32 %v1780_v25, %v2031_v63  ;;  %v2033_v27 = vld [vmem:[#allocation8_spill] sm:$0xff] }
 0x104   : > { %v817_v3 = vadd.f32 %v809_v49, %v789_v30  ;;  %v808_v33 = vmul.f32 %v1794_v46, %v1875_v51  ;;  %v787_v53 = vadd.f32 %v779_v36, %v759_v47  ;;  %v778_v26 = vmul.f32 %v1782_v34, %v2032_v60  ;;  %v1347_v0 = vld [vmem:[%s2016_s9] ss:$0 sm:$0xff] }
 0x105   : > { %1396 = vmatprep.subr.mxu1 %v819_v8  ;;  %v728_v14 = vadd.f32 %v720_v7, %v700_v35  ;;  %v749_v39 = vmul.f32 %v1771_v55, %v1848_v15  ;;  %v807_v50 = vmul.f32 %v1794_v46, %v2033_v27  ;;  %v777_v51 = vmul.f32 %v1782_v34, %v1850_v19  ;;  %v2035_v34 = vld [vmem:[#allocation4_spill] sm:$0xff] }
 0x106   : > { %1397 = vmatpush3.msra.mxu1 %v819_v8  ;;  %v816_v25 = vadd.f32 %v808_v33, %v788_v21  ;;  %v786_v20 = vadd.f32 %v778_v26, %v758_v61  ;;  %v806_v52 = vmul.f32 %v1794_v46, %v2034_v38  ;;  %v805_v15 = vmul.f32 %v1794_v46, %v1867_v44  ;;  %v1437_v46 = vpop.f32.mrf.mxu0 }
 0x107   : > { %1398 = vmatprep.subr.mxu1 %v818_v9  ;;  %v757_v16 = vadd.f32 %v749_v39, %v728_v14  ;;  %v815_v37 = vadd.f32 %v807_v50, %v787_v53  ;;  %v2036_v19 = vmov 0.0   ;;  %v930_v6 = vsel %vm928_vm5, %v924_v42, 0 }
 0x108   : > { %1399 = vmatpush3.msra.mxu1 %v818_v9  ;;  %v814_v55 = vadd.f32 %v806_v52, %v786_v20  ;;  %v1234_v44 = vpop.f32.mrf.mxu0  ;;  %v1244_v28 = vmul.f32 0.11111111, %v1437_v46 }
 0x109   : > { %1400 = vmatprep.subr.mxu1 %v817_v3  ;;  %v785_v45 = vadd.f32 %v777_v51, %v757_v16  ;;  %v1243_v10 = vmul.f32 0.11111111, %v1234_v44 }
 0x10a   : > { %1401 = vmatpush3.msra.mxu1 %v817_v3  ;;  %v1246_v56 = vmax.f32 %v1244_v28, 0.0 }
 0x10b   : > { %1402 = vmatprep.subr.mxu1 %v816_v25  ;;  %v813_v48 = vadd.f32 %v805_v15, %v785_v45  ;;  %v1245_v12 = vmax.f32 %v1243_v10, 0.0 }
 0x10c   : > { %1403 = vmatpush3.msra.mxu1 %v816_v25 }
 0x10d   : > { %1404 = vmatprep.subr.mxu1 %v815_v37  ;;  %1249 = vrot.lane.b32.xlu0 %v1245_v12, %s1461_s26 }
 0x10e   : > { %1405 = vmatpush3.msra.mxu1 %v815_v37 }
 0x10f   : > { %1406 = vmatprep.subr.mxu1 %v814_v55 }
 0x110   : > { %1407 = vmatpush3.msra.mxu1 %v814_v55 }
 0x111   : > { %1408 = vmatprep.subr.mxu1 %v813_v48  ;;  %1251 = vrot.lane.b32.xlu0 %v1246_v56, %s1461_s26 }
 0x112   : > { %1409 = vmatpush3.msra.mxu1 %v813_v48 }
 0x113   : > { %1411 = vmatmul.mubr.msk.f32.vlgmr.msra.gmra.mxu1 %vm821_vm4, %v2035_v34  ;;  %1413 = vmatprep.subr.bf16.mxu1 %v2036_v19 }
 0x114   : > { %1415 = vmatprep.mubr.msk.bf16.mxu1 %vm1460_vm6, %v2036_v19  ;;  %1414 = vmatpush3.bf16.msra.mxu1 %v930_v6 }
 0x17f   : > { %v1250_v30 = vpop.permute.xlu0 %1249 }
 0x183   : > { %v1252_v21 = vpop.permute.xlu0 %1251 }
 0x1d3   : > { %v1412_v57 = vpop.f32.mrf.mxu1 }
 0x1d4   : > { %v911_v24 = vmul.f32 %v1412_v57, %v1343_v43 }
 0x1d5   : > { %v894_v4 = vpop.f32.mrf.mxu1 }
 0x1d6   : > { %v920_v17 = vadd.f32 %v1344_v11, %v911_v24  ;;  %v910_v32 = vmul.f32 %v1343_v43, %v894_v4 }
 0x1d8   : > { %v919_v22 = vadd.f32 %v1344_v11, %v910_v32  ;;  %v922_v62 = vmax.f32 %v920_v17, 0.0 }
 0x1da   : > { %v921_v54 = vmax.f32 %v919_v22, 0.0 }
 0x1dc   : > { %v923_v40 = vpack.c.bf16 %v922_v62, %v921_v54 }
 0x1de   : > { %1416 = vmatmul.mubr.msk.bf16.vlgmr.msra.gmra.mxu1 %vm534_vm2, %v923_v40 }
 0x29e   : > { %v966_v1 = vpop.f32.mrf.mxu1 }
 0x29f   : > { %v980_v13 = vmul.f32 %v1346_v58, %v966_v1 }
 0x2a0   : > { %v1417_v2 = vpop.f32.mrf.mxu1 }
 0x2a1   : > { %v989_v23 = vadd.f32 %v1347_v0, %v980_v13 }
 0x2a2   : > { %v969_v5 = vpop.f32.mrf.mxu1 }
 0x2a3   : > { %v991_v59 = vmax.f32 %v989_v23, 0.0  ;;  %v981_v31 = vmul.f32 %v1346_v58, %v969_v5 }
 0x2a4   : > { %v1418_v8 = vpop.f32.mrf.mxu1 }
 0x2a5   : > { %v1256_v41 = vsel %vm1255_vm7, %v991_v59, %v1250_v30  ;;  %v990_v29 = vadd.f32 %v1347_v0, %v981_v31 }
 0x2a6   : > { %v1260_v18 = vcombine.high %v1256_v41, %v1256_v41  ;;  %1265 = vst.msk [vmem:[%s386_s21] sm:$0xf] %vm1264_vm8, %v1256_v41 }
 0x2a7   : > { %v992_v49 = vmax.f32 %v990_v29, 0.0 }
 0x2a8   : > { %1266 = vst.msk [vmem:[%s386_s21 + $0x4] sm:$0xf] %vm1264_vm8, %v1260_v18 }
 0x2a9   : > { %v1257_v47 = vsel %vm1255_vm7, %v992_v49, %v1252_v21 }
 0x2aa   : > { %v1261_v36 = vcombine.high %v1257_v47, %v1257_v47  ;;  %1267 = vst.msk [vmem:[%s386_s21 + $0x8] sm:$0xf] %vm1264_vm8, %v1257_v47 }
 0x2ac   : > { %1268 = vst.msk [vmem:[%s386_s21 + $0xc] sm:$0xf] %vm1264_vm8, %v1261_v36 }
 0x2ad PF: > { %s21_s17 = sadd.s32 1, %s1457_s17  }
 0x2ae   : > { %p18_p4 = scmp.ge.s32.totalorder %s21_s17, 4  }
 0x2b0   :  { %20 = sbr.rel (!%p18_p4) target bundleno = 1 (0x1), region = 98 }

// kernel: _lambda_.6
= control target key start
LH: loop header
LB: loop body
LE: loop exit
PB: predicated region body
PF: predicated region fallthrough
CT: control target
= control target key end

     0   :  { %s3761_s15 = smov 0   ;;  %s4951_s0 = inlined_call_operand.vmem [shape: f32[2,16,16,3], index: 0, kind: input, shape index: {}]   ;;  %s4952_s1 = inlined_call_operand.vmem [shape: bf16[3,3,3,16], index: 1, kind: input, shape index: {}]   ;;  %s4953_s2 = inlined_call_operand.vmem [shape: f32[1,16], index: 2, kind: input, shape index: {}]   ;;  %s4954_s3 = inlined_call_operand.vmem [shape: f32[1,16], index: 3, kind: input, shape index: {}]   ;;  %s4955_s4 = inlined_call_operand.vmem [shape: f32[2,16,16,16], index: 4, kind: output, shape index: {}]  }
   0x1 LB: > { %s3096_s16 = sadd.s32 4294967295, %s3732_s15   ;;  %p3100_p0 = scmp.ge.s32.totalorder %s3732_s15, 1  ;;  %s3732_s15 = sphi %s3761_s15, %s14_s15  }
   0x2   : > { %p162_p1 = scmp.lt.s32.totalorder %s3732_s15, 3 }
   0x4   : > { %p163_p2 = pnand %p3100_p0, %p162_p1 }
   0x6   : > { %166 = sbr.rel (%p163_p2) target bundleno = 542 (0x21e), region = 36 }
   0xb   : > { %v3772_v0 = vld [vmem:[%s4952_s1 + $0x2] sm:$0x3]  ;;  %vm473_vm0 = vcmask 1040384   ;;  %vm474_vm1 = vcmask 1041408   ;;  %vm199_vm2 = vcmask 23552   ;;  %v3734_v1 = vmov 65535  }
   0xc   : > { %v475_v2 = vsel %vm473_vm0, 4294967295, %v3734_v1  ;;  %vm202_vm3 = vcmask 17408   ;;  %p3776_p3 = scmp.lt.s32.totalorder %s3096_s16, 1  ;;  %v320_v3 = vld [vmem:[%s4952_s1] sm:$0x3]  ;;  %v3735_v5 = vmov 0.0  }
   0xd   : > { %v3783_v4 = vsel %vm474_vm1, %v475_v2, 0  ;;  %200 = vst.msk [vmem:[#allocation2] sm:$0xff] %vm199_vm2, %v3735_v5  ;;  %201 = vst.msk [vmem:[#allocation2 + $0x8] sm:$0xff] %vm199_vm2, %v3735_v5  ;;  %v322_v6 = vld [vmem:[%s4952_s1 + $0x4] sm:$0x3]  ;;  %vm3008_vm4 = vcmask 130048  }
   0xe   : > { %203 = vst.msk [vmem:[#allocation2 + $0x10] sm:$0x3] %vm202_vm3, %v3735_v5  ;;  %206 = vst.msk [vmem:[#allocation2 + $0x28] sm:$0x3] %vm202_vm3, %v3735_v5  ;;  %v478_v7 = vand.u32 %v3783_v4, %v3772_v0  ;;  %s5044_s16 = smov (!%p3776_p3, %s3096_s16), 1  ;;  %v3851_v8 = vand.u32 %v3783_v4, %v320_v3  ;;  %v3854_v9 = vand.u32 %v3783_v4, %v322_v6 }
   0xf   : > { %204 = vst.msk [vmem:[#allocation2 + $0x18] sm:$0xff] %vm199_vm2, %v3735_v5  ;;  %205 = vst.msk [vmem:[#allocation2 + $0x20] sm:$0xff] %vm199_vm2, %v3735_v5  ;;  %s3253_s24 = sshll.u32 %s5044_s16, 8  ;;  %v324_v26 = vld [vmem:[%s4952_s1 + $0x8] sm:$0x3] }
  0x10   : > { %207 = vst.msk [vmem:[#allocation2 + $0x30] sm:$0xff] %vm199_vm2, %v3735_v5  ;;  %208 = vst.msk [vmem:[#allocation2 + $0x38] sm:$0xff] %vm199_vm2, %v3735_v5  ;;  %3408 = vmatprep.subr.bf16.mxu0 %v478_v7  ;;  %3714 = vmatprep.subr.bf16.mxu1 %v478_v7  ;;  %s3862_s27 = scalar_lea.vmem %s4951_s0, %s3253_s24  ;;  %v323_v33 = vld [vmem:[%s4952_s1 + $0x6] sm:$0x3]  ;;  %v3920_v44 = vand.u32 %v3783_v4, %v324_v26  ;;  %s4745_s22 = scalar_lea.vmem %s4955_s4, %s3253_s24 }
  0x11   : > { %209 = vst.msk [vmem:[#allocation2 + $0x40] sm:$0x3] %vm202_vm3, %v3735_v5  ;;  %212 = vst.msk [vmem:[#allocation2 + $0x58] sm:$0x3] %vm202_vm3, %v3735_v5  ;;  %3409 = vmatpush3.bf16.msra.mxu0 %v478_v7  ;;  %3715 = vmatpush3.bf16.msra.mxu1 %v478_v7  ;;  %v255_v10 = vld [vmem:[%s3862_s27] sm:$0xff]  ;;  %v256_v11 = vld [vmem:[%s3862_s27 + $0x8] sm:$0xff]  ;;  %v3933_v52 = vand.u32 %v3783_v4, %v323_v33 }
  0x12   : > { %210 = vst.msk [vmem:[#allocation2 + $0x48] sm:$0xff] %vm199_vm2, %v3735_v5  ;;  %211 = vst.msk [vmem:[#allocation2 + $0x50] sm:$0xff] %vm199_vm2, %v3735_v5  ;;  %v269_v12 = vld [vmem:[%s3862_s27 + $0x70] sm:$0xff]  ;;  %3442 = vmatprep.subr.bf16.mxu1 %v3851_v8  ;;  %3476 = vmatprep.subr.bf16.mxu0 %v3854_v9  ;;  %v270_v13 = vld [vmem:[%s3862_s27 + $0x78] sm:$0xff] }
  0x13   : > { %213 = vst.msk [vmem:[#allocation2 + $0x60] sm:$0xff] %vm199_vm2, %v3735_v5  ;;  %214 = vst.msk [vmem:[#allocation2 + $0x68] sm:$0xff] %vm199_vm2, %v3735_v5  ;;  %v271_v14 = vld [vmem:[%s3862_s27 + $0x80] sm:$0xff]  ;;  %v272_v15 = vld [vmem:[%s3862_s27 + $0x88] sm:$0xff] }
  0x14   : > { %215 = vst.msk [vmem:[#allocation2 + $0x70] sm:$0x3] %vm202_vm3, %v3735_v5  ;;  %218 = vst.msk [vmem:[#allocation2 + $0x88] sm:$0x3] %vm202_vm3, %v3735_v5  ;;  %v377_v16 = vld [vmem:[#allocation2 + $0x1] sm:$0xff]  ;;  %v257_v18 = vld [vmem:[%s3862_s27 + $0x10] sm:$0xff] }
  0x15   : > { %216 = vst.msk [vmem:[#allocation2 + $0x78] sm:$0xff] %vm199_vm2, %v3735_v5  ;;  %217 = vst.msk [vmem:[#allocation2 + $0x80] sm:$0xff] %vm199_vm2, %v3735_v5  ;;  %v378_v17 = vld [vmem:[#allocation2 + $0x9] sm:$0xff]  ;;  %v258_v20 = vld [vmem:[%s3862_s27 + $0x18] sm:$0xff] }
  0x16   : > { %219 = vst.msk [vmem:[#allocation2 + $0x90] sm:$0xff] %vm199_vm2, %v3735_v5  ;;  %220 = vst.msk [vmem:[#allocation2 + $0x98] sm:$0xff] %vm199_vm2, %v3735_v5  ;;  %v409_v19 = vpack.c.bf16 %v378_v17, %v377_v16  ;;  %v259_v21 = vld [vmem:[%s3862_s27 + $0x20] sm:$0xff]  ;;  %v260_v22 = vld [vmem:[%s3862_s27 + $0x28] sm:$0xff] }
  0x17   : > { %221 = vst.msk [vmem:[#allocation2 + $0xa0] sm:$0x3] %vm202_vm3, %v3735_v5  ;;  %224 = vst.msk [vmem:[#allocation2 + $0xb8] sm:$0x3] %vm202_vm3, %v3735_v5  ;;  %v273_v23 = vld [vmem:[%s3862_s27 + $0x90] sm:$0xff]  ;;  %v274_v24 = vld [vmem:[%s3862_s27 + $0x98] sm:$0xff] }
  0x18   : > { %222 = vst.msk [vmem:[#allocation2 + $0xa8] sm:$0xff] %vm199_vm2, %v3735_v5  ;;  %223 = vst.msk [vmem:[#allocation2 + $0xb0] sm:$0xff] %vm199_vm2, %v3735_v5  ;;  %v275_v25 = vld [vmem:[%s3862_s27 + $0xa0] sm:$0xff]  ;;  %3410 = vmatprep.mubr.msk.bf16.mxu0 %vm199_vm2, %v409_v19  ;;  %v276_v27 = vld [vmem:[%s3862_s27 + $0xa8] sm:$0xff] }
  0x19   : > { %225 = vst.msk [vmem:[#allocation2 + $0xc0] sm:$0xff] %vm199_vm2, %v3735_v5  ;;  %226 = vst.msk [vmem:[#allocation2 + $0xc8] sm:$0xff] %vm199_vm2, %v3735_v5  ;;  %v261_v28 = vld [vmem:[%s3862_s27 + $0x30] sm:$0xff]  ;;  %v262_v29 = vld [vmem:[%s3862_s27 + $0x38] sm:$0xff] }
  0x1a   : > { %227 = vst.msk [vmem:[#allocation2 + $0xd0] sm:$0x3] %vm202_vm3, %v3735_v5  ;;  %230 = vst.msk [vmem:[#allocation2 + $0xe8] sm:$0x3] %vm202_vm3, %v3735_v5  ;;  %v263_v30 = vld [vmem:[%s3862_s27 + $0x40] sm:$0xff]  ;;  %v264_v31 = vld [vmem:[%s3862_s27 + $0x48] sm:$0xff] }
  0x1b   : > { %228 = vst.msk [vmem:[#allocation2 + $0xd8] sm:$0xff] %vm199_vm2, %v3735_v5  ;;  %229 = vst.msk [vmem:[#allocation2 + $0xe0] sm:$0xff] %vm199_vm2, %v3735_v5  ;;  %v277_v32 = vld [vmem:[%s3862_s27 + $0xb0] sm:$0xff]  ;;  %v278_v34 = vld [vmem:[%s3862_s27 + $0xb8] sm:$0xff] }
  0x1c   : > { %231 = vst.msk [vmem:[#allocation2 + $0xf0] sm:$0xff] %vm199_vm2, %v3735_v5  ;;  %232 = vst.msk [vmem:[#allocation2 + $0xf8] sm:$0xff] %vm199_vm2, %v3735_v5  ;;  %v279_v35 = vld [vmem:[%s3862_s27 + $0xc0] sm:$0xff]  ;;  %v280_v36 = vld [vmem:[%s3862_s27 + $0xc8] sm:$0xff] }
  0x1d   : > { %233 = vst.msk [vmem:[#allocation2 + $0x100] sm:$0x3] %vm202_vm3, %v3735_v5  ;;  %236 = vst.msk [vmem:[#allocation2 + $0x118] sm:$0x3] %vm202_vm3, %v3735_v5  ;;  %v265_v48 = vld [vmem:[%s3862_s27 + $0x50] sm:$0xff]  ;;  %v266_v49 = vld [vmem:[%s3862_s27 + $0x58] sm:$0xff] }
  0x1e   : > { %234 = vst.msk [vmem:[#allocation2 + $0x108] sm:$0xff] %vm199_vm2, %v3735_v5  ;;  %235 = vst.msk [vmem:[#allocation2 + $0x110] sm:$0xff] %vm199_vm2, %v3735_v5  ;;  %v267_v2 = vld [vmem:[%s3862_s27 + $0x60] sm:$0xff]  ;;  %v268_v3 = vld [vmem:[%s3862_s27 + $0x68] sm:$0xff] }
  0x1f   : > { %237 = vst.msk [vmem:[#allocation2 + $0x120] sm:$0xff] %vm199_vm2, %v3735_v5  ;;  %238 = vst.msk [vmem:[#allocation2 + $0x128] sm:$0xff] %vm199_vm2, %v3735_v5  ;;  %v282_v7 = vld [vmem:[%s3862_s27 + $0xd8] sm:$0xff]  ;;  %v854_v26 = vld [vmem:[#allocation2 + $0xa] sm:$0xff] }
  0x20   : > { %239 = vst.msk [vmem:[#allocation2 + $0x130] sm:$0x3] %vm202_vm3, %v3735_v5  ;;  %242 = vst.msk [vmem:[#allocation2 + $0x148] sm:$0x3] %vm202_vm3, %v3735_v5 }
  0x21   : > { %240 = vst.msk [vmem:[#allocation2 + $0x138] sm:$0xff] %vm199_vm2, %v3735_v5  ;;  %241 = vst.msk [vmem:[#allocation2 + $0x140] sm:$0xff] %vm199_vm2, %v3735_v5 }
  0x22   : > { %243 = vst.msk [vmem:[#allocation2 + $0x150] sm:$0xff] %vm199_vm2, %v3735_v5  ;;  %244 = vst.msk [vmem:[#allocation2 + $0x158] sm:$0xff] %vm199_vm2, %v3735_v5 }
  0x23   : > { %245 = vst.msk [vmem:[#allocation2 + $0x160] sm:$0x3] %vm202_vm3, %v3735_v5  ;;  %248 = vst.msk [vmem:[#allocation2 + $0x178] sm:$0x3] %vm202_vm3, %v3735_v5 }
  0x24   : > { %246 = vst.msk [vmem:[#allocation2 + $0x168] sm:$0xff] %vm199_vm2, %v3735_v5  ;;  %247 = vst.msk [vmem:[#allocation2 + $0x170] sm:$0xff] %vm199_vm2, %v3735_v5 }
  0x25   : > { %249 = vst.msk [vmem:[#allocation2 + $0x180] sm:$0xff] %vm199_vm2, %v3735_v5  ;;  %250 = vst.msk [vmem:[#allocation2 + $0x188] sm:$0xff] %vm199_vm2, %v3735_v5 }
  0x26   : > { %251 = vst.msk [vmem:[#allocation2 + $0x190] sm:$0x3] %vm202_vm3, %v3735_v5  ;;  %254 = vst.msk [vmem:[#allocation2 + $0x1a8] sm:$0x3] %vm202_vm3, %v3735_v5 }
  0x27   : > { %252 = vst.msk [vmem:[#allocation2 + $0x198] sm:$0xff] %vm199_vm2, %v3735_v5  ;;  %253 = vst.msk [vmem:[#allocation2 + $0x1a0] sm:$0xff] %vm199_vm2, %v3735_v5  ;;  %v281_v5 = vld [vmem:[%s3862_s27 + $0xd0] sm:$0xff] }
  0x28   : > { %288 = vst.msk [vmem:[#allocation2 + $0x19] sm:$0xff] %vm199_vm2, %v255_v10  ;;  %289 = vst.msk [vmem:[#allocation2 + $0x21] sm:$0xff] %vm199_vm2, %v256_v11 }
  0x29   : > { %302 = vst.msk [vmem:[#allocation2 + $0xc1] sm:$0xff] %vm199_vm2, %v269_v12  ;;  %303 = vst.msk [vmem:[#allocation2 + $0xc9] sm:$0xff] %vm199_vm2, %v270_v13 }
  0x2a   : > { %304 = vst.msk [vmem:[#allocation2 + $0xd9] sm:$0xff] %vm199_vm2, %v271_v14  ;;  %305 = vst.msk [vmem:[#allocation2 + $0xe1] sm:$0xff] %vm199_vm2, %v272_v15 }
  0x2b   : > { %290 = vst.msk [vmem:[#allocation2 + $0x31] sm:$0xff] %vm199_vm2, %v257_v18  ;;  %291 = vst.msk [vmem:[#allocation2 + $0x39] sm:$0xff] %vm199_vm2, %v258_v20 }
  0x2c   : > { %292 = vst.msk [vmem:[#allocation2 + $0x49] sm:$0xff] %vm199_vm2, %v259_v21  ;;  %293 = vst.msk [vmem:[#allocation2 + $0x51] sm:$0xff] %vm199_vm2, %v260_v22 }
  0x2d   : > { %306 = vst.msk [vmem:[#allocation2 + $0xf1] sm:$0xff] %vm199_vm2, %v273_v23  ;;  %307 = vst.msk [vmem:[#allocation2 + $0xf9] sm:$0xff] %vm199_vm2, %v274_v24 }
  0x2e   : > { %308 = vst.msk [vmem:[#allocation2 + $0x109] sm:$0xff] %vm199_vm2, %v275_v25  ;;  %309 = vst.msk [vmem:[#allocation2 + $0x111] sm:$0xff] %vm199_vm2, %v276_v27  ;;  %v853_v25 = vld [vmem:[#allocation2 + $0x2] sm:$0xff] }
  0x2f   : > { %294 = vst.msk [vmem:[#allocation2 + $0x61] sm:$0xff] %vm199_vm2, %v261_v28  ;;  %295 = vst.msk [vmem:[#allocation2 + $0x69] sm:$0xff] %vm199_vm2, %v262_v29  ;;  %v379_v37 = vld [vmem:[#allocation2 + $0x19] sm:$0xff]  ;;  %v380_v38 = vld [vmem:[#allocation2 + $0x21] sm:$0xff] }
  0x30   : > { %296 = vst.msk [vmem:[#allocation2 + $0x79] sm:$0xff] %vm199_vm2, %v263_v30  ;;  %297 = vst.msk [vmem:[#allocation2 + $0x81] sm:$0xff] %vm199_vm2, %v264_v31  ;;  %v393_v39 = vld [vmem:[#allocation2 + $0xc1] sm:$0xff]  ;;  %v3917_v40 = vpack.c.bf16 %v380_v38, %v379_v37  ;;  %v394_v41 = vld [vmem:[#allocation2 + $0xc9] sm:$0xff] }
  0x31   : > { %310 = vst.msk [vmem:[#allocation2 + $0x121] sm:$0xff] %vm199_vm2, %v277_v32  ;;  %311 = vst.msk [vmem:[#allocation2 + $0x129] sm:$0xff] %vm199_vm2, %v278_v34  ;;  %v395_v42 = vld [vmem:[#allocation2 + $0xd9] sm:$0xff]  ;;  %v396_v43 = vld [vmem:[#allocation2 + $0xe1] sm:$0xff]  ;;  %v3922_v45 = vpack.c.bf16 %v394_v41, %v393_v39  ;;  %v885_v32 = vpack.c.bf16 %v854_v26, %v853_v25 }
  0x32   : > { %312 = vst.msk [vmem:[#allocation2 + $0x139] sm:$0xff] %vm199_vm2, %v279_v35  ;;  %313 = vst.msk [vmem:[#allocation2 + $0x141] sm:$0xff] %vm199_vm2, %v280_v36  ;;  %v3924_v46 = vpack.c.bf16 %v396_v43, %v395_v42  ;;  %v381_v47 = vld [vmem:[#allocation2 + $0x31] sm:$0xff]  ;;  %3411 = vmatmul.mubr.msk.bf16.vlgmr.msra.gmra.mxu0 %vm199_vm2, %v3917_v40  ;;  %v382_v50 = vld [vmem:[#allocation2 + $0x39] sm:$0xff] }
  0x33   : > { %v383_v51 = vld [vmem:[#allocation2 + $0x49] sm:$0xff]  ;;  %298 = vst.msk [vmem:[#allocation2 + $0x91] sm:$0xff] %vm199_vm2, %v265_v48  ;;  %299 = vst.msk [vmem:[#allocation2 + $0x99] sm:$0xff] %vm199_vm2, %v266_v49  ;;  %3426 = vmatprep.mubr.msk.bf16.mxu1 %vm199_vm2, %v3922_v45  ;;  %3477 = vmatpush3.bf16.msra.mxu0 %v3854_v9  ;;  %v3938_v53 = vpack.c.bf16 %v382_v50, %v381_v47  ;;  %v384_v54 = vld [vmem:[#allocation2 + $0x51] sm:$0xff] }
  0x34   : > { %v397_v55 = vld [vmem:[#allocation2 + $0xf1] sm:$0xff]  ;;  %v398_v56 = vld [vmem:[#allocation2 + $0xf9] sm:$0xff]  ;;  %3427 = vmatmul.mubr.msk.bf16.vlgmr.msra.gmra.mxu1 %vm199_vm2, %v3924_v46  ;;  %3544 = vmatprep.subr.bf16.mxu0 %v3920_v44  ;;  %v3948_v62 = vpack.c.bf16 %v384_v54, %v383_v51  ;;  %300 = vst.msk [vmem:[#allocation2 + $0xa9] sm:$0xff] %vm199_vm2, %v267_v2  ;;  %301 = vst.msk [vmem:[#allocation2 + $0xb1] sm:$0xff] %vm199_vm2, %v268_v3 }
  0x35   : > { %v3942_v57 = vpack.c.bf16 %v398_v56, %v397_v55  ;;  %3443 = vmatpush3.bf16.msra.mxu1 %v3851_v8  ;;  %3414 = vmatprep.mubr.msk.bf16.mxu0 %vm199_vm2, %v3938_v53  ;;  %v399_v60 = vld [vmem:[#allocation2 + $0x109] sm:$0xff]  ;;  %v400_v61 = vld [vmem:[#allocation2 + $0x111] sm:$0xff]  ;;  %314 = vst.msk [vmem:[#allocation2 + $0x151] sm:$0xff] %vm199_vm2, %v281_v5  ;;  %v283_v8 = vld [vmem:[%s3862_s27 + $0xe0] sm:$0xff] }
  0x36   : > { %v385_v58 = vld [vmem:[#allocation2 + $0x61] sm:$0xff]  ;;  %v386_v59 = vld [vmem:[#allocation2 + $0x69] sm:$0xff]  ;;  %3510 = vmatprep.subr.bf16.mxu1 %v3933_v52  ;;  %v3958_v6 = vpack.c.bf16 %v400_v61, %v399_v60  ;;  %315 = vst.msk [vmem:[#allocation2 + $0x159] sm:$0xff] %vm199_vm2, %v282_v7  ;;  %316 = vst.msk [vmem:[#allocation2 + $0x169] sm:$0xff] %vm199_vm2, %v283_v8 }
  0x37   : > { %3430 = vmatprep.mubr.msk.bf16.mxu1 %vm199_vm2, %v3942_v57  ;;  %v3953_v1 = vpack.c.bf16 %v386_v59, %v385_v58  ;;  %v284_v9 = vld [vmem:[%s3862_s27 + $0xe8] sm:$0xff]  ;;  %v387_v11 = vld [vmem:[#allocation2 + $0x79] sm:$0xff]  ;;  %v333_v47 = vld [vmem:[#allocation2 + $0x30] sm:$0xff] }
  0x38   : > { %v401_v63 = vld [vmem:[#allocation2 + $0x121] sm:$0xff]  ;;  %v402_v0 = vld [vmem:[#allocation2 + $0x129] sm:$0xff]  ;;  %317 = vst.msk [vmem:[#allocation2 + $0x171] sm:$0xff] %vm199_vm2, %v284_v9  ;;  %v857_v37 = vld [vmem:[#allocation2 + $0x32] sm:$0xff] }
  0x39   : > { %v3966_v10 = vpack.c.bf16 %v402_v0, %v401_v63  ;;  %v388_v12 = vld [vmem:[#allocation2 + $0x81] sm:$0xff]  ;;  %v403_v15 = vld [vmem:[#allocation2 + $0x139] sm:$0xff]  ;;  %v326_v42 = vld [vmem:[%s4952_s1 + $0xc] sm:$0x3] }
  0x3a   : > { %3415 = vmatmul.mubr.msk.bf16.gmra.mxu0 %vm199_vm2, %v3948_v62  ;;  %v389_v13 = vld [vmem:[#allocation2 + $0x91] sm:$0xff]  ;;  %v390_v14 = vld [vmem:[#allocation2 + $0x99] sm:$0xff]  ;;  %v404_v16 = vld [vmem:[#allocation2 + $0x141] sm:$0xff]  ;;  %v3979_v17 = vpack.c.bf16 %v388_v12, %v387_v11  ;;  %v4018_v54 = vand.u32 %v3783_v4, %v326_v42 }
  0x3b   : > { %3418 = vmatprep.mubr.msk.bf16.mxu0 %vm199_vm2, %v3953_v1  ;;  %v3981_v18 = vpack.c.bf16 %v390_v14, %v389_v13  ;;  %v3983_v20 = vpack.c.bf16 %v404_v16, %v403_v15  ;;  %v391_v23 = vld [vmem:[#allocation2 + $0xa9] sm:$0xff]  ;;  %v392_v24 = vld [vmem:[#allocation2 + $0xb1] sm:$0xff]  ;;  %v329_v30 = vld [vmem:[#allocation2] sm:$0xff] }
  0x3c   : > { %3431 = vmatmul.mubr.msk.bf16.gmra.mxu1 %vm199_vm2, %v3958_v6  ;;  %v405_v19 = vld [vmem:[#allocation2 + $0x151] sm:$0xff]  ;;  %v3995_v29 = vpack.c.bf16 %v392_v24, %v391_v23  ;;  %v330_v31 = vld [vmem:[#allocation2 + $0x8] sm:$0xff]  ;;  %v855_v35 = vld [vmem:[#allocation2 + $0x1a] sm:$0xff] }
  0x3d   : > { %3434 = vmatprep.mubr.msk.bf16.mxu1 %vm199_vm2, %v3966_v10  ;;  %v406_v21 = vld [vmem:[#allocation2 + $0x159] sm:$0xff]  ;;  %v407_v27 = vld [vmem:[#allocation2 + $0x169] sm:$0xff]  ;;  %v361_v34 = vpack.c.bf16 %v330_v31, %v329_v30 }
  0x3e   : > { %v3985_v22 = vpack.c.bf16 %v406_v21, %v405_v19  ;;  %v856_v36 = vld [vmem:[#allocation2 + $0x22] sm:$0xff]  ;;  %v858_v38 = vld [vmem:[#allocation2 + $0x3a] sm:$0xff]  ;;  %v325_v50 = vld [vmem:[%s4952_s1 + $0xa] sm:$0x3] }
  0x3f   : > { %v408_v28 = vld [vmem:[#allocation2 + $0x171] sm:$0xff]  ;;  %v332_v41 = vld [vmem:[#allocation2 + $0x20] sm:$0xff]  ;;  %v4008_v43 = vpack.c.bf16 %v856_v36, %v855_v35  ;;  %v4010_v49 = vpack.c.bf16 %v858_v38, %v857_v37  ;;  %v4027_v59 = vand.u32 %v3783_v4, %v325_v50  ;;  %v335_v2 = vld [vmem:[#allocation2 + $0x48] sm:$0xff] }
  0x40   : > { %v3997_v33 = vpack.c.bf16 %v408_v28, %v407_v27  ;;  %v331_v39 = vld [vmem:[#allocation2 + $0x18] sm:$0xff]  ;;  %v285_v56 = vld [vmem:[%s3862_s27 + $0xf0] sm:$0xff]  ;;  %v861_v63 = vld [vmem:[#allocation2 + $0x62] sm:$0xff] }
  0x41   : > { %v334_v48 = vld [vmem:[#allocation2 + $0x38] sm:$0xff]  ;;  %v4015_v51 = vpack.c.bf16 %v332_v41, %v331_v39  ;;  %318 = vst.msk [vmem:[#allocation2 + $0x181] sm:$0xff] %vm199_vm2, %v285_v56  ;;  %v859_v60 = vld [vmem:[#allocation2 + $0x4a] sm:$0xff]  ;;  %v337_v5 = vld [vmem:[#allocation2 + $0x60] sm:$0xff] }
  0x42   : > { %3419 = vmatmul.mubr.msk.bf16.gmra.mxu0 %vm199_vm2, %v3979_v17  ;;  %v4020_v55 = vpack.c.bf16 %v334_v48, %v333_v47  ;;  %v286_v58 = vld [vmem:[%s3862_s27 + $0xf8] sm:$0xff]  ;;  %v862_v0 = vld [vmem:[#allocation2 + $0x6a] sm:$0xff]  ;;  %v864_v12 = vld [vmem:[#allocation2 + $0x82] sm:$0xff] }
  0x43   : > { %3422 = vmatprep.mubr.msk.bf16.mxu0 %vm199_vm2, %v3981_v18  ;;  %319 = vst.msk [vmem:[#allocation2 + $0x189] sm:$0xff] %vm199_vm2, %v286_v58  ;;  %v860_v61 = vld [vmem:[#allocation2 + $0x52] sm:$0xff]  ;;  %v338_v7 = vld [vmem:[#allocation2 + $0x68] sm:$0xff]  ;;  %v4043_v8 = vpack.c.bf16 %v862_v0, %v861_v63  ;;  %v866_v14 = vld [vmem:[#allocation2 + $0x9a] sm:$0xff] }
  0x44   : > { %3435 = vmatmul.mubr.msk.bf16.gmra.mxu1 %vm199_vm2, %v3983_v20  ;;  %v336_v3 = vld [vmem:[#allocation2 + $0x50] sm:$0xff]  ;;  %v4047_v11 = vpack.c.bf16 %v338_v7, %v337_v5  ;;  %v339_v15 = vld [vmem:[#allocation2 + $0x78] sm:$0xff]  ;;  %v340_v16 = vld [vmem:[#allocation2 + $0x80] sm:$0xff] }
  0x45   : > { %3438 = vmatprep.mubr.msk.bf16.mxu1 %vm199_vm2, %v3985_v22  ;;  %v4045_v9 = vpack.c.bf16 %v336_v3, %v335_v2  ;;  %v865_v13 = vld [vmem:[#allocation2 + $0x92] sm:$0xff]  ;;  %v4061_v25 = vpack.c.bf16 %v340_v16, %v339_v15  ;;  %v867_v27 = vld [vmem:[#allocation2 + $0xaa] sm:$0xff]  ;;  %v869_v30 = vld [vmem:[#allocation2 + $0xc2] sm:$0xff] }
  0x46   : > { %v341_v21 = vld [vmem:[#allocation2 + $0x90] sm:$0xff]  ;;  %v342_v23 = vld [vmem:[#allocation2 + $0x98] sm:$0xff]  ;;  %v4059_v24 = vpack.c.bf16 %v866_v14, %v865_v13  ;;  %v345_v36 = vld [vmem:[#allocation2 + $0xc0] sm:$0xff] }
  0x47   : > { %v4063_v26 = vpack.c.bf16 %v342_v23, %v341_v21  ;;  %v868_v28 = vld [vmem:[#allocation2 + $0xb2] sm:$0xff]  ;;  %v870_v31 = vld [vmem:[#allocation2 + $0xca] sm:$0xff]  ;;  %v871_v42 = vld [vmem:[#allocation2 + $0xda] sm:$0xff] }
  0x48   : > { %v4073_v35 = vpack.c.bf16 %v868_v28, %v867_v27  ;;  %v346_v37 = vld [vmem:[#allocation2 + $0xc8] sm:$0xff]  ;;  %v4075_v38 = vpack.c.bf16 %v870_v31, %v869_v30  ;;  %v873_v48 = vld [vmem:[#allocation2 + $0xf2] sm:$0xff]  ;;  %v874_v50 = vld [vmem:[#allocation2 + $0xfa] sm:$0xff] }
  0x49   : > { %v4079_v41 = vpack.c.bf16 %v346_v37, %v345_v36  ;;  %v872_v47 = vld [vmem:[#allocation2 + $0xe2] sm:$0xff]  ;;  %v347_v56 = vld [vmem:[#allocation2 + $0xd8] sm:$0xff]  ;;  %v4091_v0 = vpack.c.bf16 %v874_v50, %v873_v48  ;;  %v875_v5 = vld [vmem:[#allocation2 + $0x10a] sm:$0xff] }
  0x4a   : > { %3423 = vmatmul.mubr.msk.bf16.gmra.mxu0 %vm199_vm2, %v3995_v29  ;;  %v348_v58 = vld [vmem:[#allocation2 + $0xe0] sm:$0xff]  ;;  %v350_v63 = vld [vmem:[#allocation2 + $0xf8] sm:$0xff]  ;;  %v351_v13 = vld [vmem:[#allocation2 + $0x108] sm:$0xff] }
  0x4b   : > { %3478 = vmatprep.mubr.msk.bf16.mxu0 %vm199_vm2, %v885_v32  ;;  %v343_v32 = vld [vmem:[#allocation2 + $0xa8] sm:$0xff]  ;;  %v4093_v2 = vpack.c.bf16 %v348_v58, %v347_v56  ;;  %v876_v7 = vld [vmem:[#allocation2 + $0x112] sm:$0xff]  ;;  %v353_v16 = vld [vmem:[#allocation2 + $0x120] sm:$0xff] }
  0x4c   : > { %3439 = vmatmul.mubr.msk.bf16.gmra.mxu1 %vm199_vm2, %v3997_v33  ;;  %v352_v14 = vld [vmem:[#allocation2 + $0x110] sm:$0xff]  ;;  %v4105_v15 = vpack.c.bf16 %v876_v7, %v875_v5  ;;  %v354_v21 = vld [vmem:[#allocation2 + $0x128] sm:$0xff]  ;;  %v879_v30 = vld [vmem:[#allocation2 + $0x13a] sm:$0xff] }
  0x4d   : > { %3444 = vmatprep.mubr.msk.bf16.mxu1 %vm199_vm2, %v361_v34  ;;  %v344_v34 = vld [vmem:[#allocation2 + $0xb0] sm:$0xff]  ;;  %v4109_v27 = vpack.c.bf16 %v352_v14, %v351_v13  ;;  %v4111_v28 = vpack.c.bf16 %v354_v21, %v353_v16  ;;  %v880_v31 = vld [vmem:[#allocation2 + $0x142] sm:$0xff]  ;;  %v355_v36 = vld [vmem:[#allocation2 + $0x138] sm:$0xff] }
  0x4e   : > { %v4077_v39 = vpack.c.bf16 %v344_v34, %v343_v32  ;;  %v881_v32 = vld [vmem:[#allocation2 + $0x152] sm:$0xff]  ;;  %v882_v34 = vld [vmem:[#allocation2 + $0x15a] sm:$0xff]  ;;  %v359_v5 = vld [vmem:[#allocation2 + $0x168] sm:$0xff] }
  0x4f   : > { %v356_v37 = vld [vmem:[#allocation2 + $0x140] sm:$0xff]  ;;  %v358_v48 = vld [vmem:[#allocation2 + $0x158] sm:$0xff]  ;;  %v4123_v50 = vpack.c.bf16 %v882_v34, %v881_v32  ;;  %v360_v7 = vld [vmem:[#allocation2 + $0x170] sm:$0xff] }
  0x50   : > { %v4125_v56 = vpack.c.bf16 %v356_v37, %v355_v36  ;;  %v328_v13 = vld [vmem:[%s4952_s1 + $0x10] sm:$0x3]  ;;  %v327_v14 = vld [vmem:[%s4952_s1 + $0xe] sm:$0x3]  ;;  %v2315_v32 = vld [vmem:[#allocation2 + $0x39] sm:$0xff] }
  0x51   : > { %v2703_v16 = vand.u32 %v3783_v4, %v328_v13  ;;  %v1760_v21 = vld [vmem:[#allocation2 + $0x18a] sm:$0xff]  ;;  %v2318_v13 = vld [vmem:[#allocation2 + $0x61] sm:$0xff] }
  0x52   : > { %3479 = vmatmul.mubr.msk.bf16.vlgmr.msra.gmra.mxu0 %vm199_vm2, %v4008_v43 }
  0x53   : > { %3545 = vmatpush3.bf16.msra.mxu0 %v3920_v44  ;;  %3482 = vmatprep.mubr.msk.bf16.mxu0 %vm199_vm2, %v4010_v49  ;;  %v4040_v44 = vpack.c.bf16 %v860_v61, %v859_v60  ;;  %v4089_v60 = vpack.c.bf16 %v872_v47, %v871_v42  ;;  %v349_v61 = vld [vmem:[#allocation2 + $0xf0] sm:$0xff]  ;;  %v4121_v42 = vpack.c.bf16 %v880_v31, %v879_v30 }
  0x54   : > { %3445 = vmatmul.mubr.msk.bf16.vlgmr.msra.gmra.mxu1 %vm199_vm2, %v4015_v51  ;;  %3612 = vmatprep.subr.bf16.mxu0 %v4018_v54  ;;  %v4095_v3 = vpack.c.bf16 %v350_v63, %v349_v61  ;;  %v357_v47 = vld [vmem:[#allocation2 + $0x150] sm:$0xff] }
  0x55   : > { %3511 = vmatpush3.bf16.msra.mxu1 %v3933_v52  ;;  %3448 = vmatprep.mubr.msk.bf16.mxu1 %vm199_vm2, %v4020_v55  ;;  %v863_v52 = vld [vmem:[#allocation2 + $0x7a] sm:$0xff]  ;;  %v4127_v58 = vpack.c.bf16 %v358_v48, %v357_v47  ;;  %v883_v61 = vld [vmem:[#allocation2 + $0x16a] sm:$0xff]  ;;  %v884_v63 = vld [vmem:[#allocation2 + $0x172] sm:$0xff] }
  0x56   : > { %3578 = vmatprep.subr.bf16.mxu1 %v4027_v59  ;;  %v4057_v19 = vpack.c.bf16 %v864_v12, %v863_v52  ;;  %v877_v52 = vld [vmem:[#allocation2 + $0x122] sm:$0xff]  ;;  %v878_v12 = vld [vmem:[#allocation2 + $0x12a] sm:$0xff] }
  0x57   : > { %v4107_v23 = vpack.c.bf16 %v878_v12, %v877_v52  ;;  %v4137_v52 = vpack.c.bf16 %v884_v63, %v883_v61  ;;  %v4139_v12 = vpack.c.bf16 %v360_v7, %v359_v5  ;;  %v2314_v31 = vld [vmem:[#allocation2 + $0x31] sm:$0xff]  ;;  %v2316_v63 = vld [vmem:[#allocation2 + $0x49] sm:$0xff] }
  0x58   : > { %v2346_v47 = vpack.c.bf16 %v2315_v32, %v2314_v31  ;;  %v2317_v5 = vld [vmem:[#allocation2 + $0x51] sm:$0xff]  ;;  %v2323_v32 = vld [vmem:[#allocation2 + $0x99] sm:$0xff] }
  0x59   : > { %v2322_v31 = vld [vmem:[#allocation2 + $0x91] sm:$0xff] }
  0x5a   : > { %3483 = vmatmul.mubr.msk.bf16.gmra.mxu0 %vm199_vm2, %v4040_v44 }
  0x5b   : > { %3486 = vmatprep.mubr.msk.bf16.mxu0 %vm199_vm2, %v4043_v8 }
  0x5c   : > { %3449 = vmatmul.mubr.msk.bf16.gmra.mxu1 %vm199_vm2, %v4045_v9 }
  0x5d   : > { %3452 = vmatprep.mubr.msk.bf16.mxu1 %vm199_vm2, %v4047_v11 }
  0x62   : > { %3487 = vmatmul.mubr.msk.bf16.gmra.mxu0 %vm199_vm2, %v4057_v19 }
  0x63   : > { %3490 = vmatprep.mubr.msk.bf16.mxu0 %vm199_vm2, %v4059_v24 }
  0x64   : > { %3453 = vmatmul.mubr.msk.bf16.gmra.mxu1 %vm199_vm2, %v4061_v25 }
  0x65   : > { %3456 = vmatprep.mubr.msk.bf16.mxu1 %vm199_vm2, %v4063_v26 }
  0x6a   : > { %3491 = vmatmul.mubr.msk.bf16.gmra.mxu0 %vm199_vm2, %v4073_v35 }
  0x6b   : > { %3494 = vmatprep.mubr.msk.bf16.mxu0 %vm199_vm2, %v4075_v38 }
  0x6c   : > { %3457 = vmatmul.mubr.msk.bf16.gmra.mxu1 %vm199_vm2, %v4077_v39 }
  0x6d   : > { %3460 = vmatprep.mubr.msk.bf16.mxu1 %vm199_vm2, %v4079_v41 }
  0x72   : > { %3495 = vmatmul.mubr.msk.bf16.gmra.mxu0 %vm199_vm2, %v4089_v60 }
  0x73   : > { %3498 = vmatprep.mubr.msk.bf16.mxu0 %vm199_vm2, %v4091_v0 }
  0x74   : > { %3461 = vmatmul.mubr.msk.bf16.gmra.mxu1 %vm199_vm2, %v4093_v2 }
  0x75   : > { %3464 = vmatprep.mubr.msk.bf16.mxu1 %vm199_vm2, %v4095_v3 }
  0x7a   : > { %3499 = vmatmul.mubr.msk.bf16.gmra.mxu0 %vm199_vm2, %v4105_v15 }
  0x7b   : > { %3502 = vmatprep.mubr.msk.bf16.mxu0 %vm199_vm2, %v4107_v23 }
  0x7c   : > { %3465 = vmatmul.mubr.msk.bf16.gmra.mxu1 %vm199_vm2, %v4109_v27 }
  0x7d   : > { %3468 = vmatprep.mubr.msk.bf16.mxu1 %vm199_vm2, %v4111_v28 }
  0x82   : > { %3503 = vmatmul.mubr.msk.bf16.gmra.mxu0 %vm199_vm2, %v4121_v42 }
  0x83   : > { %3506 = vmatprep.mubr.msk.bf16.mxu0 %vm199_vm2, %v4123_v50 }
  0x84   : > { %3469 = vmatmul.mubr.msk.bf16.gmra.mxu1 %vm199_vm2, %v4125_v56 }
  0x85   : > { %3472 = vmatprep.mubr.msk.bf16.mxu1 %vm199_vm2, %v4127_v58 }
  0x8a   : > { %3507 = vmatmul.mubr.msk.bf16.gmra.mxu0 %vm199_vm2, %v4137_v52 }
  0x8b   : > { %3546 = vmatprep.mubr.msk.bf16.mxu0 %vm199_vm2, %v3917_v40  ;;  %v2411_v40 = vand.u32 %v3783_v4, %v327_v14  ;;  %v1467_v4 = vld [vmem:[#allocation2 + $0x181] sm:$0xff]  ;;  %v2319_v14 = vld [vmem:[#allocation2 + $0x69] sm:$0xff] }
  0x8c   : > { %3473 = vmatmul.mubr.msk.bf16.gmra.mxu1 %vm199_vm2, %v4139_v12 }
  0x8d   : > { %3512 = vmatprep.mubr.msk.bf16.mxu1 %vm199_vm2, %v4015_v51 }
  0x92   : > { %3547 = vmatmul.mubr.msk.bf16.vlgmr.msra.gmra.mxu0 %vm199_vm2, %v3938_v53  ;;  %v1176_v53 = vld [vmem:[#allocation2 + $0x188] sm:$0xff] }
  0x93   : > { %3613 = vmatpush3.bf16.msra.mxu0 %v4018_v54  ;;  %3550 = vmatprep.mubr.msk.bf16.mxu0 %vm199_vm2, %v3948_v62 }
  0x94   : > { %3513 = vmatmul.mubr.msk.bf16.vlgmr.msra.gmra.mxu1 %vm199_vm2, %v4020_v55  ;;  %3680 = vmatprep.subr.bf16.mxu0 %v2703_v16 }
  0x95   : > { %3579 = vmatpush3.bf16.msra.mxu1 %v4027_v59  ;;  %3516 = vmatprep.mubr.msk.bf16.mxu1 %vm199_vm2, %v4045_v9 }
  0x96   : > { %3646 = vmatprep.subr.bf16.mxu1 %v2411_v40 }
  0x9a   : > { %3551 = vmatmul.mubr.msk.bf16.gmra.mxu0 %vm199_vm2, %v3953_v1 }
  0x9b   : > { %3554 = vmatprep.mubr.msk.bf16.mxu0 %vm199_vm2, %v3979_v17 }
  0x9c   : > { %3517 = vmatmul.mubr.msk.bf16.gmra.mxu1 %vm199_vm2, %v4047_v11 }
  0x9d   : > { %3520 = vmatprep.mubr.msk.bf16.mxu1 %vm199_vm2, %v4061_v25 }
  0xa2   : > { %3555 = vmatmul.mubr.msk.bf16.gmra.mxu0 %vm199_vm2, %v3981_v18 }
  0xa3   : > { %3558 = vmatprep.mubr.msk.bf16.mxu0 %vm199_vm2, %v3995_v29 }
  0xa4   : > { %3521 = vmatmul.mubr.msk.bf16.gmra.mxu1 %vm199_vm2, %v4063_v26 }
  0xa5   : > { %3524 = vmatprep.mubr.msk.bf16.mxu1 %vm199_vm2, %v4077_v39 }
  0xaa   : > { %3559 = vmatmul.mubr.msk.bf16.gmra.mxu0 %vm199_vm2, %v3922_v45  ;;  %v1468_v45 = vld [vmem:[#allocation2 + $0x189] sm:$0xff] }
  0xab   : > { %3562 = vmatprep.mubr.msk.bf16.mxu0 %vm199_vm2, %v3924_v46  ;;  %v1175_v46 = vld [vmem:[#allocation2 + $0x180] sm:$0xff] }
  0xac   : > { %3525 = vmatmul.mubr.msk.bf16.gmra.mxu1 %vm199_vm2, %v4079_v41  ;;  %v1192_v62 = vpack.c.bf16 %v1176_v53, %v1175_v46 }
  0xad   : > { %3528 = vmatprep.mubr.msk.bf16.mxu1 %vm199_vm2, %v4093_v2 }
  0xb2   : > { %3563 = vmatmul.mubr.msk.bf16.gmra.mxu0 %vm199_vm2, %v3942_v57  ;;  %v4215_v57 = vpack.c.bf16 %v1468_v45, %v1467_v4  ;;  %v2348_v4 = vpack.c.bf16 %v2319_v14, %v2318_v13  ;;  %v2350_v14 = vpack.c.bf16 %v2323_v32, %v2322_v31  ;;  %v2327_v31 = vld [vmem:[#allocation2 + $0xc9] sm:$0xff] }
  0xb3   : > { %3566 = vmatprep.mubr.msk.bf16.mxu0 %vm199_vm2, %v3958_v6 }
  0xb4   : > { %3529 = vmatmul.mubr.msk.bf16.gmra.mxu1 %vm199_vm2, %v4095_v3 }
  0xb5   : > { %3532 = vmatprep.mubr.msk.bf16.mxu1 %vm199_vm2, %v4109_v27 }
  0xba   : > { %3567 = vmatmul.mubr.msk.bf16.gmra.mxu0 %vm199_vm2, %v3966_v10 }
  0xbb   : > { %3570 = vmatprep.mubr.msk.bf16.mxu0 %vm199_vm2, %v3983_v20 }
  0xbc   : > { %3533 = vmatmul.mubr.msk.bf16.gmra.mxu1 %vm199_vm2, %v4111_v28 }
  0xbd   : > { %3536 = vmatprep.mubr.msk.bf16.mxu1 %vm199_vm2, %v4125_v56 }
  0xc2   : > { %3571 = vmatmul.mubr.msk.bf16.gmra.mxu0 %vm199_vm2, %v3985_v22 }
  0xc3   : > { %3574 = vmatprep.mubr.msk.bf16.mxu0 %vm199_vm2, %v3997_v33 }
  0xc4   : > { %3537 = vmatmul.mubr.msk.bf16.gmra.mxu1 %vm199_vm2, %v4127_v58 }
  0xc5   : > { %3540 = vmatprep.mubr.msk.bf16.mxu1 %vm199_vm2, %v4139_v12 }
  0xca   : > { %3575 = vmatmul.mubr.msk.bf16.gmra.mxu0 %vm199_vm2, %v4215_v57 }
  0xcb   : > { %3614 = vmatprep.mubr.msk.bf16.mxu0 %vm199_vm2, %v4020_v55 }
  0xcc   : > { %3541 = vmatmul.mubr.msk.bf16.gmra.mxu1 %vm199_vm2, %v1192_v62 }
  0xcd   : > { %3580 = vmatprep.mubr.msk.bf16.mxu1 %vm199_vm2, %v4008_v43 }
  0xd2   : > { %3615 = vmatmul.mubr.msk.bf16.vlgmr.msra.gmra.mxu0 %vm199_vm2, %v4045_v9 }
  0xd3   : > { %3681 = vmatpush3.bf16.msra.mxu0 %v2703_v16  ;;  %3618 = vmatprep.mubr.msk.bf16.mxu0 %vm199_vm2, %v4047_v11 }
  0xd4   : > { %3581 = vmatmul.mubr.msk.bf16.vlgmr.msra.gmra.mxu1 %vm199_vm2, %v4010_v49 }
  0xd5   : > { %3647 = vmatpush3.bf16.msra.mxu1 %v2411_v40  ;;  %3584 = vmatprep.mubr.msk.bf16.mxu1 %vm199_vm2, %v4040_v44  ;;  %v2347_v40 = vpack.c.bf16 %v2317_v5, %v2316_v63 }
  0xda   : > { %3619 = vmatmul.mubr.msk.bf16.gmra.mxu0 %vm199_vm2, %v4061_v25 }
  0xdb   : > { %3622 = vmatprep.mubr.msk.bf16.mxu0 %vm199_vm2, %v4063_v26  ;;  %v2052_v26 = vld [vmem:[#allocation2 + $0x198] sm:$0xff] }
  0xdc   : > { %3585 = vmatmul.mubr.msk.bf16.gmra.mxu1 %vm199_vm2, %v4043_v8 }
  0xdd   : > { %3588 = vmatprep.mubr.msk.bf16.mxu1 %vm199_vm2, %v4057_v19 }
  0xe2   : > { %3623 = vmatmul.mubr.msk.bf16.gmra.mxu0 %vm199_vm2, %v4077_v39  ;;  %v2053_v39 = vld [vmem:[#allocation2 + $0x1a0] sm:$0xff] }
  0xe3   : > { %3626 = vmatprep.mubr.msk.bf16.mxu0 %vm199_vm2, %v4079_v41  ;;  %v2069_v30 = vpack.c.bf16 %v2053_v39, %v2052_v26  ;;  %v2320_v39 = vld [vmem:[#allocation2 + $0x79] sm:$0xff] }
  0xe4   : > { %3589 = vmatmul.mubr.msk.bf16.gmra.mxu1 %vm199_vm2, %v4059_v24 }
  0xe5   : > { %3592 = vmatprep.mubr.msk.bf16.mxu1 %vm199_vm2, %v4073_v35 }
  0xea   : > { %3627 = vmatmul.mubr.msk.bf16.gmra.mxu0 %vm199_vm2, %v4093_v2 }
  0xeb   : > { %3630 = vmatprep.mubr.msk.bf16.mxu0 %vm199_vm2, %v4095_v3  ;;  %v1759_v3 = vld [vmem:[#allocation2 + $0x182] sm:$0xff] }
  0xec   : > { %3593 = vmatmul.mubr.msk.bf16.gmra.mxu1 %vm199_vm2, %v4075_v38  ;;  %v4325_v37 = vpack.c.bf16 %v1760_v21, %v1759_v3  ;;  %v2321_v3 = vld [vmem:[#allocation2 + $0x81] sm:$0xff] }
  0xed   : > { %3596 = vmatprep.mubr.msk.bf16.mxu1 %vm199_vm2, %v4089_v60  ;;  %v2349_v5 = vpack.c.bf16 %v2321_v3, %v2320_v39  ;;  %v2325_v39 = vld [vmem:[#allocation2 + $0xb1] sm:$0xff] }
  0xf2   : > { %v4256_v1 = vpop.f32.mrf.mxu0  ;;  %3631 = vmatmul.mubr.msk.bf16.gmra.mxu0 %vm199_vm2, %v4109_v27 }
  0xf3   : > { %3634 = vmatprep.mubr.msk.bf16.mxu0 %vm199_vm2, %v4111_v28 }
  0xf4   : > { %v4262_v6 = vpop.f32.mrf.mxu1  ;;  %3597 = vmatmul.mubr.msk.bf16.gmra.mxu1 %vm199_vm2, %v4091_v0  ;;  %v4266_v10 = vpop.f32.mrf.mxu0 }
  0xf5   : > { %3600 = vmatprep.mubr.msk.bf16.mxu1 %vm199_vm2, %v4105_v15 }
  0xf6   : > { %v4270_v17 = vpop.f32.mrf.mxu1  ;;  %v4272_v18 = vpop.f32.mrf.mxu0 }
  0xf8   : > { %v4274_v20 = vpop.f32.mrf.mxu1  ;;  %v4276_v22 = vpop.f32.mrf.mxu0 }
  0xfa   : > { %v4278_v29 = vpop.f32.mrf.mxu1  ;;  %v4280_v33 = vpop.f32.mrf.mxu0  ;;  %3635 = vmatmul.mubr.msk.bf16.gmra.mxu0 %vm199_vm2, %v4125_v56 }
  0xfb   : > { %3638 = vmatprep.mubr.msk.bf16.mxu0 %vm199_vm2, %v4127_v58 }
  0xfc   : > { %v4286_v43 = vpop.f32.mrf.mxu1  ;;  %3601 = vmatmul.mubr.msk.bf16.gmra.mxu1 %vm199_vm2, %v4107_v23  ;;  %v4290_v51 = vpop.f32.mrf.mxu0 }
  0xfd   : > { %3604 = vmatprep.mubr.msk.bf16.mxu1 %vm199_vm2, %v4121_v42 }
  0xfe   : > { %v4294_v54 = vpop.f32.mrf.mxu1  ;;  %v4296_v55 = vpop.f32.mrf.mxu0 }
 0x100   : > { %v4298_v59 = vpop.f32.mrf.mxu1  ;;  %v4300_v9 = vpop.f32.mrf.mxu0 }
 0x102   : > { %v4302_v11 = vpop.f32.mrf.mxu1  ;;  %v4304_v25 = vpop.f32.mrf.mxu0  ;;  %3639 = vmatmul.mubr.msk.bf16.gmra.mxu0 %vm199_vm2, %v4139_v12 }
 0x103   : > { %3642 = vmatprep.mubr.msk.bf16.mxu0 %vm199_vm2, %v1192_v62 }
 0x104   : > { %v4309_v41 = vpop.f32.mrf.mxu1  ;;  %3605 = vmatmul.mubr.msk.bf16.gmra.mxu1 %vm199_vm2, %v4123_v50  ;;  %v4313_v2 = vpop.f32.mrf.mxu0 }
 0x105   : > { %3608 = vmatprep.mubr.msk.bf16.mxu1 %vm199_vm2, %v4137_v52 }
 0x106   : > { %v4317_v27 = vpop.f32.mrf.mxu1  ;;  %v4319_v28 = vpop.f32.mrf.mxu0 }
 0x108   : > { %v4321_v34 = vpop.f32.mrf.mxu1  ;;  %v4323_v36 = vpop.f32.mrf.mxu0 }
 0x10a   : > { %v4327_v48 = vpop.f32.mrf.mxu1  ;;  %v4329_v56 = vpop.f32.mrf.mxu0  ;;  %3643 = vmatmul.mubr.msk.bf16.gmra.mxu0 %vm199_vm2, %v2069_v30 }
 0x10b   : > { %3682 = vmatprep.mubr.msk.bf16.mxu0 %vm199_vm2, %v4010_v49 }
 0x10c   : > { %v4334_v58 = vpop.f32.mrf.mxu1  ;;  %3609 = vmatmul.mubr.msk.bf16.gmra.mxu1 %vm199_vm2, %v4325_v37  ;;  %v4338_v61 = vpop.f32.mrf.mxu0 }
 0x10d   : > { %3648 = vmatprep.mubr.msk.bf16.mxu1 %vm199_vm2, %v2346_v47 }
 0x10e   : > { %v4341_v7 = vpop.f32.mrf.mxu1  ;;  %v4343_v12 = vpop.f32.mrf.mxu0 }
 0x110   : > { %v4345_v16 = vpop.f32.mrf.mxu1  ;;  %v4347_v49 = vpop.f32.mrf.mxu0 }
 0x112   : > { %v4349_v45 = vpop.f32.mrf.mxu1  ;;  %v3480_v46 = vpop.f32.mrf.mxu0  ;;  %3683 = vmatmul.mubr.msk.bf16.vlgmr.msra.gmra.mxu0 %vm199_vm2, %v4040_v44 }
 0x113   : > { %3686 = vmatprep.mubr.msk.bf16.mxu0 %vm199_vm2, %v4043_v8 }
 0x114   : > { %v3446_v53 = vpop.f32.mrf.mxu1  ;;  %3649 = vmatmul.mubr.msk.bf16.vlgmr.msra.gmra.mxu1 %vm199_vm2, %v2347_v40  ;;  %v986_v62 = vpop.f32.mrf.mxu0 }
 0x115   : > { %v735_v26 = vadd.f32 %v3446_v53, %v4256_v1  ;;  %3652 = vmatprep.mubr.msk.bf16.mxu1 %vm199_vm2, %v2348_v4 }
 0x116   : > { %v726_v21 = vpop.f32.mrf.mxu1  ;;  %v3481_v30 = vpop.f32.mrf.mxu0 }
 0x117   : > { %v727_v47 = vadd.f32 %v726_v21, %v4266_v10  ;;  %v4359_v44 = vadd.f32 %v3480_v46, %v735_v26 }
 0x118   : > { %v3447_v63 = vpop.f32.mrf.mxu1  ;;  %v989_v8 = vpop.f32.mrf.mxu0 }
 0x119   : > { %v738_v13 = vadd.f32 %v3447_v63, %v4272_v18  ;;  %v4362_v40 = vadd.f32 %v986_v62, %v727_v47  ;;  %v2324_v62 = vld [vmem:[#allocation2 + $0xa9] sm:$0xff] }
 0x11a   : > { %v729_v1 = vpop.f32.mrf.mxu1  ;;  %v3484_v4 = vpop.f32.mrf.mxu0  ;;  %3687 = vmatmul.mubr.msk.bf16.gmra.mxu0 %vm199_vm2, %v4057_v19  ;;  %v2351_v63 = vpack.c.bf16 %v2325_v39, %v2324_v62  ;;  %v2331_v39 = vld [vmem:[#allocation2 + $0xf9] sm:$0xff] }
 0x11b   : > { %v730_v53 = vadd.f32 %v729_v1, %v4276_v22  ;;  %3690 = vmatprep.mubr.msk.bf16.mxu0 %vm199_vm2, %v4059_v24  ;;  %v4369_v10 = vadd.f32 %v3481_v30, %v738_v13  ;;  %v2326_v22 = vld [vmem:[#allocation2 + $0xc1] sm:$0xff] }
 0x11c   : > { %v3450_v46 = vpop.f32.mrf.mxu1  ;;  %3653 = vmatmul.mubr.msk.bf16.gmra.mxu1 %vm199_vm2, %v2349_v5  ;;  %v1002_v26 = vpop.f32.mrf.mxu0 }
 0x11d   : > { %v751_v18 = vadd.f32 %v3450_v46, %v4280_v33  ;;  %3656 = vmatprep.mubr.msk.bf16.mxu1 %vm199_vm2, %v2350_v14  ;;  %v4374_v3 = vadd.f32 %v989_v8, %v730_v53  ;;  %v2352_v33 = vpack.c.bf16 %v2327_v31, %v2326_v22  ;;  %v2328_v46 = vld [vmem:[#allocation2 + $0xd9] sm:$0xff] }
 0x11e   : > { %v742_v19 = vpop.f32.mrf.mxu1  ;;  %v3485_v21 = vpop.f32.mrf.mxu0 }
 0x11f   : > { %v743_v24 = vadd.f32 %v742_v19, %v4290_v51  ;;  %v4377_v30 = vadd.f32 %v3484_v4, %v751_v18 }
 0x120   : > { %v3451_v32 = vpop.f32.mrf.mxu1  ;;  %v1005_v47 = vpop.f32.mrf.mxu0 }
 0x121   : > { %v754_v5 = vadd.f32 %v3451_v32, %v4296_v55  ;;  %v4380_v13 = vadd.f32 %v1002_v26, %v743_v24  ;;  %v2329_v26 = vld [vmem:[#allocation2 + $0xe1] sm:$0xff] }
 0x122   : > { %v745_v14 = vpop.f32.mrf.mxu1  ;;  %v3488_v1 = vpop.f32.mrf.mxu0  ;;  %3691 = vmatmul.mubr.msk.bf16.gmra.mxu0 %vm199_vm2, %v4073_v35  ;;  %v2353_v31 = vpack.c.bf16 %v2329_v26, %v2328_v46 }
 0x123   : > { %v746_v8 = vadd.f32 %v745_v14, %v4300_v9  ;;  %3694 = vmatprep.mubr.msk.bf16.mxu0 %vm199_vm2, %v4075_v38  ;;  %v4387_v51 = vadd.f32 %v3485_v21, %v754_v5  ;;  %v2330_v9 = vld [vmem:[#allocation2 + $0xf1] sm:$0xff] }
 0x124   : > { %v3454_v4 = vpop.f32.mrf.mxu1  ;;  %3657 = vmatmul.mubr.msk.bf16.gmra.mxu1 %vm199_vm2, %v2351_v63  ;;  %v1018_v53 = vpop.f32.mrf.mxu0 }
 0x125   : > { %v767_v55 = vadd.f32 %v3454_v4, %v4304_v25  ;;  %3660 = vmatprep.mubr.msk.bf16.mxu1 %vm199_vm2, %v2352_v33  ;;  %v4392_v18 = vadd.f32 %v1005_v47, %v746_v8  ;;  %v2354_v25 = vpack.c.bf16 %v2331_v39, %v2330_v9  ;;  %v2333_v8 = vld [vmem:[#allocation2 + $0x111] sm:$0xff] }
 0x126   : > { %v758_v35 = vpop.f32.mrf.mxu1  ;;  %v3489_v62 = vpop.f32.mrf.mxu0 }
 0x127   : > { %v759_v38 = vadd.f32 %v758_v35, %v4313_v2  ;;  %v4395_v19 = vadd.f32 %v3488_v1, %v767_v55  ;;  %v2332_v1 = vld [vmem:[#allocation2 + $0x109] sm:$0xff] }
 0x128   : > { %v3455_v21 = vpop.f32.mrf.mxu1  ;;  %v1021_v22 = vpop.f32.mrf.mxu0  ;;  %v2335_v55 = vld [vmem:[#allocation2 + $0x129] sm:$0xff] }
 0x129   : > { %v770_v24 = vadd.f32 %v3455_v21, %v4319_v28  ;;  %v4398_v32 = vadd.f32 %v1018_v53, %v759_v38 }
 0x12a   : > { %v761_v63 = vpop.f32.mrf.mxu1  ;;  %v3492_v5 = vpop.f32.mrf.mxu0  ;;  %3695 = vmatmul.mubr.msk.bf16.gmra.mxu0 %vm199_vm2, %v4089_v60 }
 0x12b   : > { %v762_v47 = vadd.f32 %v761_v63, %v4323_v36  ;;  %3698 = vmatprep.mubr.msk.bf16.mxu0 %vm199_vm2, %v4091_v0  ;;  %v4405_v2 = vadd.f32 %v3489_v62, %v770_v24  ;;  %v2334_v36 = vld [vmem:[#allocation2 + $0x121] sm:$0xff]  ;;  %v2355_v62 = vpack.c.bf16 %v2333_v8, %v2332_v1 }
 0x12c   : > { %v3458_v33 = vpop.f32.mrf.mxu1  ;;  %3661 = vmatmul.mubr.msk.bf16.gmra.mxu1 %vm199_vm2, %v2353_v31  ;;  %v1034_v14 = vpop.f32.mrf.mxu0  ;;  %v2337_v63 = vld [vmem:[#allocation2 + $0x141] sm:$0xff] }
 0x12d   : > { %v783_v28 = vadd.f32 %v3458_v33, %v4329_v56  ;;  %3664 = vmatprep.mubr.msk.bf16.mxu1 %vm199_vm2, %v2354_v25  ;;  %v4410_v4 = vadd.f32 %v1021_v22, %v762_v47  ;;  %v2356_v56 = vpack.c.bf16 %v2335_v55, %v2334_v36  ;;  %v2336_v25 = vld [vmem:[#allocation2 + $0x139] sm:$0xff] }
 0x12e   : > { %v774_v60 = vpop.f32.mrf.mxu1  ;;  %v3493_v53 = vpop.f32.mrf.mxu0  ;;  %v2339_v33 = vld [vmem:[#allocation2 + $0x159] sm:$0xff]  ;;  %v2357_v8 = vpack.c.bf16 %v2337_v63, %v2336_v25 }
 0x12f   : > { %v775_v0 = vadd.f32 %v774_v60, %v4338_v61  ;;  %v4413_v46 = vadd.f32 %v3492_v5, %v783_v28 }
 0x130   : > { %v3459_v26 = vpop.f32.mrf.mxu1  ;;  %v1037_v35 = vpop.f32.mrf.mxu0 }
 0x131   : > { %v786_v9 = vadd.f32 %v3459_v26, %v4343_v12  ;;  %v4416_v39 = vadd.f32 %v1034_v14, %v775_v0 }
 0x132   : > { %v777_v38 = vpop.f32.mrf.mxu1  ;;  %v3496_v21 = vpop.f32.mrf.mxu0  ;;  %3699 = vmatmul.mubr.msk.bf16.gmra.mxu0 %vm199_vm2, %v4105_v15 }
 0x133   : > { %v778_v22 = vadd.f32 %v777_v38, %v4347_v49  ;;  %3702 = vmatprep.mubr.msk.bf16.mxu0 %vm199_vm2, %v4107_v23  ;;  %v4423_v61 = vadd.f32 %v3493_v53, %v786_v9  ;;  %v2338_v49 = vld [vmem:[#allocation2 + $0x151] sm:$0xff] }
 0x134   : > { %v3462_v31 = vpop.f32.mrf.mxu1  ;;  %3665 = vmatmul.mubr.msk.bf16.gmra.mxu1 %vm199_vm2, %v2355_v62  ;;  %v1050_v24 = vpop.f32.mrf.mxu0  ;;  %v2340_v62 = vld [vmem:[#allocation2 + $0x169] sm:$0xff]  ;;  %v2341_v9 = vld [vmem:[#allocation2 + $0x171] sm:$0xff] }
 0x135   : > { %v799_v12 = vadd.f32 %v3462_v31, %v4262_v6  ;;  %3668 = vmatprep.mubr.msk.bf16.mxu1 %vm199_vm2, %v2356_v56  ;;  %v4428_v5 = vadd.f32 %v1037_v35, %v778_v22  ;;  %v2358_v6 = vpack.c.bf16 %v2339_v33, %v2338_v49  ;;  %v2359_v31 = vpack.c.bf16 %v2341_v9, %v2340_v62 }
 0x136   : > { %v790_v15 = vpop.f32.mrf.mxu1  ;;  %v3497_v47 = vpop.f32.mrf.mxu0 }
 0x137   : > { %v791_v23 = vadd.f32 %v790_v15, %v4270_v17  ;;  %v4431_v14 = vadd.f32 %v3496_v21, %v799_v12  ;;  %v2637_v15 = vld [vmem:[#allocation2 + $0x1a2] sm:$0xff] }
 0x138   : > { %v3463_v28 = vpop.f32.mrf.mxu1  ;;  %v1053_v1 = vpop.f32.mrf.mxu0 }
 0x139   : > { %v802_v60 = vadd.f32 %v3463_v28, %v4274_v20  ;;  %v4434_v53 = vadd.f32 %v1050_v24, %v791_v23  ;;  %v2344_v23 = vld [vmem:[#allocation2 + $0x199] sm:$0xff] }
 0x13a   : > { %v793_v36 = vpop.f32.mrf.mxu1  ;;  %v3500_v55 = vpop.f32.mrf.mxu0  ;;  %3703 = vmatmul.mubr.msk.bf16.gmra.mxu0 %vm199_vm2, %v4121_v42 }
 0x13b   : > { %v794_v0 = vadd.f32 %v793_v36, %v4278_v29  ;;  %3706 = vmatprep.mubr.msk.bf16.mxu0 %vm199_vm2, %v4123_v50  ;;  %v4441_v17 = vadd.f32 %v3497_v47, %v802_v60 }
 0x13c   : > { %v3466_v26 = vpop.f32.mrf.mxu1  ;;  %3669 = vmatmul.mubr.msk.bf16.gmra.mxu1 %vm199_vm2, %v2357_v8  ;;  %v1066_v35 = vpop.f32.mrf.mxu0 }
 0x13d   : > { %v815_v20 = vadd.f32 %v3466_v26, %v4286_v43  ;;  %3672 = vmatprep.mubr.msk.bf16.mxu1 %vm199_vm2, %v2358_v6  ;;  %v4446_v56 = vadd.f32 %v1053_v1, %v794_v0 }
 0x13e   : > { %v806_v42 = vpop.f32.mrf.mxu1  ;;  %v3501_v38 = vpop.f32.mrf.mxu0 }
 0x13f   : > { %v807_v29 = vadd.f32 %v806_v42, %v4294_v54  ;;  %v4449_v21 = vadd.f32 %v3500_v55, %v815_v20  ;;  %v2636_v54 = vld [vmem:[#allocation2 + $0x19a] sm:$0xff] }
 0x140   : > { %v3467_v50 = vpop.f32.mrf.mxu1  ;;  %v1069_v22 = vpop.f32.mrf.mxu0 }
 0x141   : > { %v818_v24 = vadd.f32 %v3467_v50, %v4298_v59  ;;  %v4452_v12 = vadd.f32 %v1066_v35, %v807_v29 }
 0x142   : > { %v809_v43 = vpop.f32.mrf.mxu1  ;;  %v3504_v25 = vpop.f32.mrf.mxu0  ;;  %3707 = vmatmul.mubr.msk.bf16.gmra.mxu0 %vm199_vm2, %v4137_v52  ;;  %v2345_v52 = vld [vmem:[#allocation2 + $0x1a1] sm:$0xff] }
 0x143   : > { %v810_v63 = vadd.f32 %v809_v43, %v4302_v11  ;;  %3710 = vmatprep.mubr.msk.bf16.mxu0 %vm199_vm2, %v4325_v37  ;;  %v4459_v47 = vadd.f32 %v3501_v38, %v818_v24  ;;  %v2653_v37 = vpack.c.bf16 %v2637_v15, %v2636_v54  ;;  %v2361_v55 = vpack.c.bf16 %v2345_v52, %v2344_v23 }
 0x144   : > { %v3470_v49 = vpop.f32.mrf.mxu1  ;;  %3673 = vmatmul.mubr.msk.bf16.gmra.mxu1 %vm199_vm2, %v2359_v31  ;;  %v1082_v59 = vpop.f32.mrf.mxu0 }
 0x145   : > { %v831_v33 = vadd.f32 %v3470_v49, %v4309_v41  ;;  %3676 = vmatprep.mubr.msk.bf16.mxu1 %vm199_vm2, %v4215_v57  ;;  %v4465_v28 = vadd.f32 %v1069_v22, %v810_v63 }
 0x146   : > { %v822_v11 = vpop.f32.mrf.mxu1  ;;  %v3505_v1 = vpop.f32.mrf.mxu0 }
 0x147   : > { %v823_v8 = vadd.f32 %v822_v11, %v4317_v27  ;;  %v4468_v60 = vadd.f32 %v3504_v25, %v831_v33 }
 0x148   : > { %v3471_v6 = vpop.f32.mrf.mxu1  ;;  %v1085_v36 = vpop.f32.mrf.mxu0 }
 0x149   : > { %v834_v0 = vadd.f32 %v3471_v6, %v4321_v34  ;;  %v4471_v41 = vadd.f32 %v1082_v59, %v823_v8 }
 0x14a   : > { %v825_v26 = vpop.f32.mrf.mxu1  ;;  %v3508_v57 = vpop.f32.mrf.mxu0  ;;  %3711 = vmatmul.mubr.msk.bf16.gmra.mxu0 %vm199_vm2, %v2653_v37 }
 0x14b   : > { %v826_v35 = vadd.f32 %v825_v26, %v4327_v48  ;;  %v4475_v20 = vadd.f32 %v3505_v1, %v834_v0 }
 0x14c   : > { %v3474_v62 = vpop.f32.mrf.mxu1  ;;  %3677 = vmatmul.mubr.msk.bf16.gmra.mxu1 %vm199_vm2, %v2361_v55  ;;  %v1098_v27 = vpop.f32.mrf.mxu0 }
 0x14d   : > { %v847_v9 = vadd.f32 %v3474_v62, %v4334_v58  ;;  %v4479_v42 = vadd.f32 %v1085_v36, %v826_v35 }
 0x14e   : > { %v838_v38 = vpop.f32.mrf.mxu1  ;;  %v3509_v34 = vpop.f32.mrf.mxu0 }
 0x14f   : > { %v839_v29 = vadd.f32 %v838_v38, %v4341_v7  ;;  %v4482_v50 = vadd.f32 %v3508_v57, %v847_v9 }
 0x150   : > { %v3475_v22 = vpop.f32.mrf.mxu1  ;;  %v1101_v31 = vpop.f32.mrf.mxu0 }
 0x151   : > { %v850_v48 = vadd.f32 %v3475_v22, %v4345_v16  ;;  %v4485_v24 = vadd.f32 %v1098_v27, %v839_v29 }
 0x152   : > { %v841_v43 = vpop.f32.mrf.mxu1  ;;  %v3548_v25 = vpop.f32.mrf.mxu0 }
 0x153   : > { %v842_v63 = vadd.f32 %v841_v43, %v4349_v45  ;;  %v4488_v54 = vadd.f32 %v3509_v34, %v850_v48 }
 0x154   : > { %v3514_v58 = vpop.f32.mrf.mxu1  ;;  %v1570_v15 = vpop.f32.mrf.mxu0 }
 0x155   : > { %v1407_v49 = vadd.f32 %v3514_v58, %v4359_v44  ;;  %v4491_v59 = vadd.f32 %v1101_v31, %v842_v63 }
 0x156   : > { %v1278_v7 = vpop.f32.mrf.mxu1  ;;  %v3549_v33 = vpop.f32.mrf.mxu0 }
 0x157   : > { %v1405_v23 = vadd.f32 %v1278_v7, %v4362_v40  ;;  %v4494_v52 = vadd.f32 %v3548_v25, %v1407_v49 }
 0x158   : > { %v3515_v16 = vpop.f32.mrf.mxu1  ;;  %v1573_v11 = vpop.f32.mrf.mxu0 }
 0x159   : > { %v1408_v1 = vadd.f32 %v3515_v16, %v4369_v10  ;;  %v4497_v37 = vadd.f32 %v1570_v15, %v1405_v23 }
 0x15a   : > { %v1281_v45 = vpop.f32.mrf.mxu1  ;;  %v3552_v8 = vpop.f32.mrf.mxu0 }
 0x15b   : > { %v1406_v6 = vadd.f32 %v1281_v45, %v4374_v3  ;;  %v4500_v36 = vadd.f32 %v3549_v33, %v1408_v1 }
 0x15c   : > { %v3518_v44 = vpop.f32.mrf.mxu1  ;;  %v1586_v55 = vpop.f32.mrf.mxu0 }
 0x15d   : > { %v1411_v0 = vadd.f32 %v3518_v44, %v4377_v30  ;;  %v4503_v26 = vadd.f32 %v1573_v11, %v1406_v6 }
 0x15e   : > { %v1294_v40 = vpop.f32.mrf.mxu1  ;;  %v3553_v57 = vpop.f32.mrf.mxu0 }
 0x15f   : > { %v1409_v35 = vadd.f32 %v1294_v40, %v4380_v13  ;;  %v4506_v62 = vadd.f32 %v3552_v8, %v1411_v0 }
 0x160   : > { %v3519_v10 = vpop.f32.mrf.mxu1  ;;  %v1589_v27 = vpop.f32.mrf.mxu0 }
 0x161   : > { %v1412_v9 = vadd.f32 %v3519_v10, %v4387_v51  ;;  %v4509_v38 = vadd.f32 %v1586_v55, %v1409_v35 }
 0x162   : > { %v1297_v3 = vpop.f32.mrf.mxu1  ;;  %v3556_v34 = vpop.f32.mrf.mxu0 }
 0x163   : > { %v1410_v29 = vadd.f32 %v1297_v3, %v4392_v18  ;;  %v4512_v22 = vadd.f32 %v3553_v57, %v1412_v9 }
 0x164   : > { %v3522_v30 = vpop.f32.mrf.mxu1  ;;  %v1602_v31 = vpop.f32.mrf.mxu0 }
 0x165   : > { %v1415_v48 = vadd.f32 %v3522_v30, %v4395_v19  ;;  %v4515_v43 = vadd.f32 %v1589_v27, %v1410_v29 }
 0x166   : > { %v1310_v13 = vpop.f32.mrf.mxu1  ;;  %v3557_v25 = vpop.f32.mrf.mxu0 }
 0x167   : > { %v1413_v63 = vadd.f32 %v1310_v13, %v4398_v32  ;;  %v4518_v58 = vadd.f32 %v3556_v34, %v1415_v48 }
 0x168   : > { %v3523_v51 = vpop.f32.mrf.mxu1  ;;  %v1605_v15 = vpop.f32.mrf.mxu0 }
 0x169   : > { %v1416_v49 = vadd.f32 %v3523_v51, %v4405_v2  ;;  %v4521_v7 = vadd.f32 %v1602_v31, %v1413_v63 }
 0x16a   : > { %v1313_v18 = vpop.f32.mrf.mxu1  ;;  %v3560_v33 = vpop.f32.mrf.mxu0 }
 0x16b   : > { %v1414_v23 = vadd.f32 %v1313_v18, %v4410_v4  ;;  %v4524_v16 = vadd.f32 %v3557_v25, %v1416_v49 }
 0x16c   : > { %v3526_v19 = vpop.f32.mrf.mxu1  ;;  %v1618_v11 = vpop.f32.mrf.mxu0 }
 0x16d   : > { %v1419_v1 = vadd.f32 %v3526_v19, %v4413_v46  ;;  %v4527_v45 = vadd.f32 %v1605_v15, %v1414_v23 }
 0x16e   : > { %v1326_v32 = vpop.f32.mrf.mxu1  ;;  %v3561_v8 = vpop.f32.mrf.mxu0 }
 0x16f   : > { %v1417_v6 = vadd.f32 %v1326_v32, %v4416_v39  ;;  %v4530_v44 = vadd.f32 %v3560_v33, %v1419_v1 }
 0x170   : > { %v3527_v2 = vpop.f32.mrf.mxu1  ;;  %v1621_v55 = vpop.f32.mrf.mxu0 }
 0x171   : > { %v1420_v0 = vadd.f32 %v3527_v2, %v4423_v61  ;;  %v4533_v40 = vadd.f32 %v1618_v11, %v1417_v6 }
 0x172   : > { %v1329_v4 = vpop.f32.mrf.mxu1  ;;  %v3564_v57 = vpop.f32.mrf.mxu0 }
 0x173   : > { %v1418_v35 = vadd.f32 %v1329_v4, %v4428_v5  ;;  %v4536_v10 = vadd.f32 %v3561_v8, %v1420_v0 }
 0x174   : > { %v3530_v46 = vpop.f32.mrf.mxu1  ;;  %v1634_v27 = vpop.f32.mrf.mxu0 }
 0x175   : > { %v1423_v9 = vadd.f32 %v3530_v46, %v4431_v14  ;;  %v4539_v3 = vadd.f32 %v1621_v55, %v1418_v35 }
 0x176   : > { %v1342_v39 = vpop.f32.mrf.mxu1  ;;  %v3565_v34 = vpop.f32.mrf.mxu0 }
 0x177   : > { %v1421_v29 = vadd.f32 %v1342_v39, %v4434_v53  ;;  %v4542_v30 = vadd.f32 %v3564_v57, %v1423_v9 }
 0x178   : > { %v3531_v61 = vpop.f32.mrf.mxu1  ;;  %v1637_v31 = vpop.f32.mrf.mxu0 }
 0x179   : > { %v1424_v48 = vadd.f32 %v3531_v61, %v4441_v17  ;;  %v4545_v13 = vadd.f32 %v1634_v27, %v1421_v29 }
 0x17a   : > { %v1345_v5 = vpop.f32.mrf.mxu1  ;;  %v3568_v25 = vpop.f32.mrf.mxu0 }
 0x17b   : > { %v1422_v63 = vadd.f32 %v1345_v5, %v4446_v56  ;;  %v4548_v51 = vadd.f32 %v3565_v34, %v1424_v48 }
 0x17c   : > { %v3534_v14 = vpop.f32.mrf.mxu1  ;;  %v1650_v15 = vpop.f32.mrf.mxu0 }
 0x17d   : > { %4957 = vst [vmem:[#allocation3_spill] sm:$0xff] %v4548_v51  ;;  %v1427_v49 = vadd.f32 %v3534_v14, %v4449_v21  ;;  %v4551_v18 = vadd.f32 %v1637_v31, %v1422_v63 }
 0x17e   : > { %v1358_v53 = vpop.f32.mrf.mxu1  ;;  %v3569_v33 = vpop.f32.mrf.mxu0 }
 0x17f   : > { %4958 = vst [vmem:[#allocation4_spill] sm:$0xff] %v4551_v18  ;;  %v1425_v23 = vadd.f32 %v1358_v53, %v4452_v12  ;;  %v4554_v19 = vadd.f32 %v3568_v25, %v1427_v49 }
 0x180   : > { %v3535_v17 = vpop.f32.mrf.mxu1  ;;  %v1653_v11 = vpop.f32.mrf.mxu0 }
 0x181   : > { %4959 = vst [vmem:[#allocation5_spill] sm:$0xff] %v4554_v19  ;;  %v1428_v1 = vadd.f32 %v3535_v17, %v4459_v47  ;;  %v4557_v32 = vadd.f32 %v1650_v15, %v1425_v23 }
 0x182   : > { %v1361_v56 = vpop.f32.mrf.mxu1  ;;  %v3572_v8 = vpop.f32.mrf.mxu0 }
 0x183   : > { %4960 = vst [vmem:[#allocation6_spill] sm:$0xff] %v4557_v32  ;;  %v1426_v6 = vadd.f32 %v1361_v56, %v4465_v28  ;;  %v4560_v2 = vadd.f32 %v3569_v33, %v1428_v1 }
 0x184   : > { %v3538_v21 = vpop.f32.mrf.mxu1  ;;  %v1666_v55 = vpop.f32.mrf.mxu0 }
 0x185   : > { %4961 = vst [vmem:[#allocation7_spill] sm:$0xff] %v4560_v2  ;;  %v1431_v0 = vadd.f32 %v3538_v21, %v4468_v60  ;;  %v4563_v4 = vadd.f32 %v1653_v11, %v1426_v6 }
 0x186   : > { %v1374_v12 = vpop.f32.mrf.mxu1  ;;  %v3573_v57 = vpop.f32.mrf.mxu0 }
 0x187   : > { %4962 = vst [vmem:[#allocation8_spill] sm:$0xff] %v4563_v4  ;;  %v1429_v35 = vadd.f32 %v1374_v12, %v4471_v41  ;;  %v4566_v46 = vadd.f32 %v3572_v8, %v1431_v0 }
 0x188   : > { %v3539_v47 = vpop.f32.mrf.mxu1  ;;  %v1669_v27 = vpop.f32.mrf.mxu0 }
 0x189   : > { %4963 = vst [vmem:[#allocation9_spill] sm:$0xff] %v4566_v46  ;;  %v1432_v9 = vadd.f32 %v3539_v47, %v4475_v20  ;;  %v4569_v39 = vadd.f32 %v1666_v55, %v1429_v35 }
 0x18a   : > { %v1377_v28 = vpop.f32.mrf.mxu1  ;;  %v3576_v34 = vpop.f32.mrf.mxu0 }
 0x18b   : > { %4964 = vst [vmem:[#allocation10_spill] sm:$0xff] %v4569_v39  ;;  %v1430_v29 = vadd.f32 %v1377_v28, %v4479_v42  ;;  %v4572_v61 = vadd.f32 %v3573_v57, %v1432_v9 }
 0x18c   : > { %v3542_v60 = vpop.f32.mrf.mxu1  ;;  %v1682_v31 = vpop.f32.mrf.mxu0 }
 0x18d   : > { %4965 = vst [vmem:[#allocation11_spill] sm:$0xff] %v4572_v61  ;;  %v1435_v48 = vadd.f32 %v3542_v60, %v4482_v50  ;;  %v4575_v5 = vadd.f32 %v1669_v27, %v1430_v29 }
 0x18e   : > { %v1390_v41 = vpop.f32.mrf.mxu1  ;;  %v3577_v25 = vpop.f32.mrf.mxu0 }
 0x18f   : > { %4966 = vst [vmem:[#allocation12_spill] sm:$0xff] %v4575_v5  ;;  %v1433_v63 = vadd.f32 %v1390_v41, %v4485_v24  ;;  %v4578_v14 = vadd.f32 %v3576_v34, %v1435_v48 }
 0x190   : > { %v3543_v20 = vpop.f32.mrf.mxu1  ;;  %v1685_v15 = vpop.f32.mrf.mxu0 }
 0x191   : > { %4967 = vst [vmem:[#allocation13_spill] sm:$0xff] %v4578_v14  ;;  %v1436_v49 = vadd.f32 %v3543_v20, %v4488_v54  ;;  %v4581_v53 = vadd.f32 %v1682_v31, %v1433_v63 }
 0x192   : > { %v1393_v42 = vpop.f32.mrf.mxu1  ;;  %v4583_v33 = vpop.f32.mrf.mxu0 }
 0x193   : > { %4968 = vst [vmem:[#allocation14_spill] sm:$0xff] %v4581_v53  ;;  %v1434_v23 = vadd.f32 %v1393_v42, %v4491_v59  ;;  %v4586_v50 = vadd.f32 %v3577_v25, %v1436_v49 }
 0x194   : > { %v3582_v17 = vpop.f32.mrf.mxu1  ;;  %v4588_v11 = vpop.f32.mrf.mxu0 }
 0x195   : > { %4969 = vst [vmem:[#allocation15_spill] sm:$0xff] %v4586_v50  ;;  %v4590_v1 = vadd.f32 %v1685_v15, %v1434_v23 }
 0x196   : > { %v1862_v24 = vpop.f32.mrf.mxu1  ;;  %v4592_v56 = vpop.f32.mrf.mxu0 }
 0x197   : > { %4970 = vst [vmem:[#allocation16_spill] sm:$0xff] %v4590_v1 }
 0x198   : > { %v3583_v8 = vpop.f32.mrf.mxu1  ;;  %v4594_v6 = vpop.f32.mrf.mxu0 }
 0x19a   : > { %v4596_v54 = vpop.f32.mrf.mxu1  ;;  %v4598_v21 = vpop.f32.mrf.mxu0 }
 0x19c   : > { %v4600_v55 = vpop.f32.mrf.mxu1  ;;  %v4602_v59 = vpop.f32.mrf.mxu0 }
 0x19e   : > { %v4604_v0 = vpop.f32.mrf.mxu1  ;;  %v4606_v12 = vpop.f32.mrf.mxu0 }
 0x1a0   : > { %v4608_v57 = vpop.f32.mrf.mxu1  ;;  %v4610_v35 = vpop.f32.mrf.mxu0 }
 0x1a2   : > { %v4612_v47 = vpop.f32.mrf.mxu1  ;;  %v4614_v27 = vpop.f32.mrf.mxu0 }
 0x1a4   : > { %v4616_v9 = vpop.f32.mrf.mxu1  ;;  %v4618_v28 = vpop.f32.mrf.mxu0 }
 0x1a6   : > { %v4620_v34 = vpop.f32.mrf.mxu1  ;;  %v4622_v29 = vpop.f32.mrf.mxu0 }
 0x1a8   : > { %v4624_v60 = vpop.f32.mrf.mxu1  ;;  %v4626_v31 = vpop.f32.mrf.mxu0 }
 0x1aa   : > { %v4628_v48 = vpop.f32.mrf.mxu1  ;;  %v4630_v41 = vpop.f32.mrf.mxu0 }
 0x1ac   : > { %v4632_v25 = vpop.f32.mrf.mxu1  ;;  %v4634_v63 = vpop.f32.mrf.mxu0 }
 0x1ae   : > { %v4636_v20 = vpop.f32.mrf.mxu1  ;;  %v4638_v15 = vpop.f32.mrf.mxu0 }
 0x1b0   : > { %v4640_v49 = vpop.f32.mrf.mxu1  ;;  %v4642_v42 = vpop.f32.mrf.mxu0 }
 0x1b2   : > { %v4644_v23 = vpop.f32.mrf.mxu1  ;;  %v4646_v1 = vpop.f32.mrf.mxu0 }
 0x1b3   : > { %4971 = vst [vmem:[#allocation17_spill] sm:$0xff] %v4646_v1 }
 0x1b4   : > { %v4648_v50 = vpop.f32.mrf.mxu1  ;;  %v4650_v53 = vpop.f32.mrf.mxu0 }
 0x1b5   : > { %4972 = vst [vmem:[#allocation18_spill] sm:$0xff] %v4650_v53 }
 0x1b6   : > { %v4652_v14 = vpop.f32.mrf.mxu1  ;;  %v4654_v5 = vpop.f32.mrf.mxu0 }
 0x1b7   : > { %4973 = vst [vmem:[#allocation19_spill] sm:$0xff] %v4654_v5 }
 0x1b8   : > { %v4656_v61 = vpop.f32.mrf.mxu1  ;;  %v4658_v39 = vpop.f32.mrf.mxu0 }
 0x1b9   : > { %4974 = vst [vmem:[#allocation20_spill] sm:$0xff] %v4656_v61  ;;  %4975 = vst [vmem:[#allocation21_spill] sm:$0xff] %v4658_v39 }
 0x1ba   : > { %v4660_v46 = vpop.f32.mrf.mxu1  ;;  %v4662_v4 = vpop.f32.mrf.mxu0 }
 0x1bb   : > { %4976 = vst [vmem:[#allocation22_spill] sm:$0xff] %v4660_v46  ;;  %4977 = vst [vmem:[#allocation23_spill] sm:$0xff] %v4662_v4 }
 0x1bc   : > { %v4664_v2 = vpop.f32.mrf.mxu1  ;;  %v4666_v32 = vpop.f32.mrf.mxu0 }
 0x1bd   : > { %4978 = vst [vmem:[#allocation24_spill] sm:$0xff] %v4664_v2  ;;  %4979 = vst [vmem:[#allocation25_spill] sm:$0xff] %v4666_v32 }
 0x1be   : > { %v4668_v19 = vpop.f32.mrf.mxu1  ;;  %v4670_v18 = vpop.f32.mrf.mxu0 }
 0x1bf   : > { %4980 = vst [vmem:[#allocation26_spill] sm:$0xff] %v4668_v19  ;;  %4981 = vst [vmem:[#allocation27_spill] sm:$0xff] %v4670_v18 }
 0x1c0   : > { %v4672_v53 = vpop.f32.mrf.mxu1  ;;  %v4674_v1 = vpop.f32.mrf.mxu0 }
 0x1c1   : > { %4982 = vst [vmem:[#allocation28_spill] sm:$0xff] %v4672_v53  ;;  %4983 = vst [vmem:[#allocation29_spill] sm:$0xff] %v4674_v1 }
 0x1c2   : > { %v4676_v5 = vpop.f32.mrf.mxu1  ;;  %v4678_v61 = vpop.f32.mrf.mxu0 }
 0x1c3   : > { %4984 = vst [vmem:[#allocation30_spill] sm:$0xff] %v4676_v5  ;;  %4985 = vst [vmem:[#allocation31_spill] sm:$0xff] %v4678_v61 }
 0x1c4   : > { %v4680_v39 = vpop.f32.mrf.mxu1  ;;  %v4682_v46 = vpop.f32.mrf.mxu0 }
 0x1c5   : > { %4986 = vst [vmem:[#allocation32_spill] sm:$0xff] %v4680_v39  ;;  %4987 = vst [vmem:[#allocation33_spill] sm:$0xff] %v4682_v46  ;;  %v1991_v46 = vadd.f32 %v3582_v17, %v4494_v52  ;;  %v4720_v17 = vld [vmem:[%s4953_s2] ss:$0 sm:$0xff] }
 0x1c6   : > { %v4684_v4 = vpop.f32.mrf.mxu1  ;;  %v4686_v2 = vpop.f32.mrf.mxu0 }
 0x1c7   : > { %4988 = vst [vmem:[#allocation34_spill] sm:$0xff] %v4684_v4  ;;  %4989 = vst [vmem:[#allocation35_spill] sm:$0xff] %v4686_v2 }
 0x1c8   : > { %v4688_v32 = vpop.f32.mrf.mxu1  ;;  %v4690_v19 = vpop.f32.mrf.mxu0 }
 0x1c9   : > { %4990 = vst [vmem:[#allocation36_spill] sm:$0xff] %v4688_v32  ;;  %4991 = vst [vmem:[#allocation37_spill] sm:$0xff] %v4690_v19  ;;  %v1989_v19 = vadd.f32 %v1862_v24, %v4497_v37 }
 0x1ca   : > { %v4692_v18 = vpop.f32.mrf.mxu1  ;;  %v4694_v53 = vpop.f32.mrf.mxu0 }
 0x1cb   : > { %4992 = vst [vmem:[#allocation38_spill] sm:$0xff] %v4692_v18  ;;  %4993 = vst [vmem:[#allocation39_spill] sm:$0xff] %v4694_v53  ;;  %v1992_v53 = vadd.f32 %v3583_v8, %v4500_v36  ;;  %v2282_v52 = vadd.f32 %v4588_v11, %v1989_v19  ;;  %v4730_v19 = vld [vmem:[%s4954_s3] ss:$0 sm:$0xff] }
 0x1cc   : > { %v4696_v1 = vpop.f32.mrf.mxu1  ;;  %v4698_v5 = vpop.f32.mrf.mxu0 }
 0x1cd   : > { %4994 = vst [vmem:[#allocation40_spill] sm:$0xff] %v4696_v1  ;;  %4995 = vst [vmem:[#allocation41_spill] sm:$0xff] %v4698_v5  ;;  %v2284_v1 = vadd.f32 %v4583_v33, %v1991_v46  ;;  %v2285_v36 = vadd.f32 %v4592_v56, %v1992_v53  ;;  %v1995_v46 = vadd.f32 %v4600_v55, %v4506_v62 }
 0x1ce   : > { %v4700_v61 = vpop.f32.mrf.mxu1  ;;  %v4702_v39 = vpop.f32.mrf.mxu0  ;;  %v1996_v62 = vadd.f32 %v4608_v57, %v4512_v22 }
 0x1cf   : > { %4996 = vst [vmem:[#allocation42_spill] sm:$0xff] %v4700_v61  ;;  %4997 = vst [vmem:[#allocation43_spill] sm:$0xff] %v4702_v39  ;;  %v1990_v39 = vadd.f32 %v4596_v54, %v4503_v26  ;;  %v1993_v26 = vadd.f32 %v4604_v0, %v4509_v38  ;;  %v1994_v0 = vadd.f32 %v4612_v47, %v4515_v43 }
 0x1d0   : > { %v4705_v4 = vpop.f32.mrf.mxu1  ;;  %v4707_v2 = vpop.f32.mrf.mxu0  ;;  %v2288_v22 = vadd.f32 %v4598_v21, %v1995_v46  ;;  %v1999_v47 = vadd.f32 %v4616_v9, %v4518_v58 }
 0x1d1   : > { %4998 = vst [vmem:[#allocation44_spill] sm:$0xff] %v4707_v2  ;;  %v2283_v53 = vadd.f32 %v4594_v6, %v1990_v39 }
 0x1d2   : > { %v4710_v32 = vpop.f32.mrf.mxu1  ;;  %v3684_v18 = vpop.f32.mrf.mxu0 }
 0x1d3   : > { %4999 = vst [vmem:[#allocation45_spill] sm:$0xff] %v4710_v32 }
 0x1d4   : > { %v3650_v5 = vpop.f32.mrf.mxu1  ;;  %v2739_v51 = vpop.f32.mrf.mxu0 }
 0x1d5   : > { %v2576_v61 = vadd.f32 %v3650_v5, %v2284_v1 }
 0x1d6   : > { %v2447_v37 = vpop.f32.mrf.mxu1  ;;  %v3685_v24 = vpop.f32.mrf.mxu0 }
 0x1d7   : > { %v2868_v2 = vadd.f32 %v3684_v18, %v2576_v61  ;;  %v2574_v32 = vadd.f32 %v2447_v37, %v2282_v52 }
 0x1d8   : > { %v3651_v5 = vpop.f32.mrf.mxu1  ;;  %v2742_v33 = vpop.f32.mrf.mxu0 }
 0x1d9   : > { %v2907_v11 = vmul.f32 %v4720_v17, %v2868_v2  ;;  %v2866_v18 = vadd.f32 %v2739_v51, %v2574_v32  ;;  %v2577_v61 = vadd.f32 %v3651_v5, %v2285_v36  ;;  %v2286_v2 = vadd.f32 %v4602_v59, %v1993_v26 }
 0x1da   : > { %v2450_v1 = vpop.f32.mrf.mxu1  ;;  %v3688_v56 = vpop.f32.mrf.mxu0  ;;  %v2289_v36 = vadd.f32 %v4606_v12, %v1996_v62  ;;  %v2000_v62 = vadd.f32 %v4624_v60, %v4524_v16 }
 0x1db   : > { %v2946_v38 = vadd.f32 %v4730_v19, %v2907_v11  ;;  %v2905_v8 = vmul.f32 %v4720_v17, %v2866_v18  ;;  %v2869_v54 = vadd.f32 %v3685_v24, %v2577_v61  ;;  %v2575_v55 = vadd.f32 %v2450_v1, %v2283_v53 }
 0x1dc   : > { %v3654_v51 = vpop.f32.mrf.mxu1  ;;  %v2755_v32 = vpop.f32.mrf.mxu0  ;;  %v2287_v18 = vadd.f32 %v4610_v35, %v1994_v0  ;;  %v1997_v53 = vadd.f32 %v4620_v34, %v4521_v7  ;;  %v2292_v35 = vadd.f32 %v4614_v27, %v1999_v47 }
 0x1dd   : > { %v2978_v39 = vmax.f32 %v2946_v38, 0.0  ;;  %v2944_v6 = vadd.f32 %v4730_v19, %v2905_v8  ;;  %v2908_v57 = vmul.f32 %v4720_v17, %v2869_v54  ;;  %v2867_v43 = vadd.f32 %v2742_v33, %v2575_v55 }
 0x1de   : > { %v2580_v52 = vadd.f32 %v3654_v51, %v2288_v22  ;;  %v2463_v37 = vpop.f32.mrf.mxu1  ;;  %v3689_v24 = vpop.f32.mrf.mxu0  ;;  %v1998_v22 = vadd.f32 %v4628_v48, %v4527_v45  ;;  %v2290_v45 = vadd.f32 %v4618_v28, %v1997_v53 }
 0x1df   : > { %3011 = vst.msk [vmem:[%s4745_s22 + $0x10] sm:$0xff] %vm3008_vm4, %v2978_v39  ;;  %v2976_v21 = vmax.f32 %v2944_v6, 0.0  ;;  %v2947_v59 = vadd.f32 %v4730_v19, %v2908_v57  ;;  %v2906_v46 = vmul.f32 %v4720_v17, %v2867_v43  ;;  %v2578_v26 = vadd.f32 %v2463_v37, %v2286_v2 }
 0x1e0   : > { %v2872_v5 = vadd.f32 %v3688_v56, %v2580_v52  ;;  %v3655_v11 = vpop.f32.mrf.mxu1  ;;  %v2758_v33 = vpop.f32.mrf.mxu0  ;;  %v2003_v2 = vadd.f32 %v4632_v25, %v4530_v44  ;;  %v2293_v57 = vadd.f32 %v4622_v29, %v2000_v62  ;;  %v2291_v28 = vadd.f32 %v4626_v31, %v1998_v22 }
 0x1e1   : > { %3009 = vst.msk [vmem:[%s4745_s22] sm:$0xff] %vm3008_vm4, %v2976_v21  ;;  %v2979_v58 = vmax.f32 %v2947_v59, 0.0  ;;  %v2945_v9 = vadd.f32 %v4730_v19, %v2906_v46  ;;  %v2870_v12 = vadd.f32 %v2755_v32, %v2578_v26  ;;  %v2581_v61 = vadd.f32 %v3655_v11, %v2289_v36 }
 0x1e2   : > { %v2911_v1 = vmul.f32 %v4720_v17, %v2872_v5  ;;  %v2466_v56 = vpop.f32.mrf.mxu1  ;;  %v3692_v38 = vpop.f32.mrf.mxu0 }
 0x1e3   : > { %3012 = vst.msk [vmem:[%s4745_s22 + $0x18] sm:$0xff] %vm3008_vm4, %v2979_v58  ;;  %v2977_v8 = vmax.f32 %v2945_v9, 0.0  ;;  %v2909_v54 = vmul.f32 %v4720_v17, %v2870_v12  ;;  %v2873_v55 = vadd.f32 %v3689_v24, %v2581_v61  ;;  %v2579_v0 = vadd.f32 %v2466_v56, %v2287_v18 }
 0x1e4   : > { %v2950_v7 = vadd.f32 %v4730_v19, %v2911_v1  ;;  %v3658_v34 = vpop.f32.mrf.mxu1  ;;  %v2771_v16 = vpop.f32.mrf.mxu0  ;;  %v2001_v24 = vadd.f32 %v4636_v20, %v4533_v40  ;;  %v2296_v40 = vadd.f32 %v4630_v41, %v2003_v2  ;;  %v2004_v58 = vadd.f32 %v4640_v49, %v4536_v10 }
 0x1e5   : > { %3010 = vst.msk [vmem:[%s4745_s22 + $0x8] sm:$0xff] %vm3008_vm4, %v2977_v8  ;;  %v2948_v60 = vadd.f32 %v4730_v19, %v2909_v54  ;;  %v2912_v27 = vmul.f32 %v4720_v17, %v2873_v55  ;;  %v2871_v51 = vadd.f32 %v2758_v33, %v2579_v0  ;;  %v2584_v32 = vadd.f32 %v3658_v34, %v2292_v35 }
 0x1e6   : > { %v2982_v39 = vmax.f32 %v2950_v7, 0.0  ;;  %v2479_v48 = vpop.f32.mrf.mxu1  ;;  %v3693_v6 = vpop.f32.mrf.mxu0  ;;  %v2002_v9 = vadd.f32 %v4644_v23, %v4539_v3  ;;  %v2294_v41 = vadd.f32 %v4634_v63, %v2001_v24  ;;  %v2007_v35 = vadd.f32 %v4648_v50, %v4542_v30 }
 0x1e7   : > { %v2980_v43 = vmax.f32 %v2948_v60, 0.0  ;;  %v2951_v47 = vadd.f32 %v4730_v19, %v2912_v27  ;;  %v2910_v52 = vmul.f32 %v4720_v17, %v2871_v51  ;;  %v2876_v37 = vadd.f32 %v3692_v38, %v2584_v32  ;;  %v5000_v51 = vld [vmem:[#allocation3_spill] sm:$0xff]  ;;  %v5001_v32 = vld [vmem:[#allocation20_spill] sm:$0xff] }
 0x1e8   : > { %3015 = vst.msk [vmem:[%s4745_s22 + $0x30] sm:$0xff] %vm3008_vm4, %v2982_v39  ;;  %v2582_v44 = vadd.f32 %v2479_v48, %v2290_v45  ;;  %v3659_v25 = vpop.f32.mrf.mxu1  ;;  %v2774_v36 = vpop.f32.mrf.mxu0  ;;  %v2005_v55 = vadd.f32 %v4652_v14, %v4545_v13  ;;  %v2297_v30 = vadd.f32 %v4638_v15, %v2004_v58  ;;  %v2295_v7 = vadd.f32 %v4642_v42, %v2002_v9  ;;  %v5002_v15 = vld [vmem:[#allocation17_spill] sm:$0xff] }
 0x1e9   : > { %3013 = vst.msk [vmem:[%s4745_s22 + $0x20] sm:$0xff] %vm3008_vm4, %v2980_v43  ;;  %v2983_v29 = vmax.f32 %v2951_v47, 0.0  ;;  %v2949_v21 = vadd.f32 %v4730_v19, %v2910_v52  ;;  %v2915_v59 = vmul.f32 %v4720_v17, %v2876_v37  ;;  %v2585_v46 = vadd.f32 %v3659_v25, %v2293_v57  ;;  %v5003_v37 = vld [vmem:[#allocation18_spill] sm:$0xff] }
 0x1ea   : > { %v2874_v26 = vadd.f32 %v2771_v16, %v2582_v44  ;;  %v2482_v5 = vpop.f32.mrf.mxu1  ;;  %v3696_v11 = vpop.f32.mrf.mxu0  ;;  %v2008_v2 = vadd.f32 %v5001_v32, %v5000_v51  ;;  %v2300_v45 = vadd.f32 %v5002_v15, %v2007_v35  ;;  %v2298_v24 = vadd.f32 %v5003_v37, %v2005_v55  ;;  %v5016_v51 = vld [vmem:[#allocation30_spill] sm:$0xff] }
 0x1eb   : > { %3016 = vst.msk [vmem:[%s4745_s22 + $0x38] sm:$0xff] %vm3008_vm4, %v2983_v29  ;;  %v2981_v20 = vmax.f32 %v2949_v21, 0.0  ;;  %v2954_v33 = vadd.f32 %v4730_v19, %v2915_v59  ;;  %v2877_v31 = vadd.f32 %v3693_v6, %v2585_v46  ;;  %v2583_v18 = vadd.f32 %v2482_v5, %v2291_v28  ;;  %v5004_v29 = vld [vmem:[#allocation4_spill] sm:$0xff]  ;;  %v5005_v21 = vld [vmem:[#allocation22_spill] sm:$0xff]  ;;  %v5006_v46 = vld [vmem:[#allocation5_spill] sm:$0xff] }
 0x1ec   : > { %v2913_v12 = vmul.f32 %v4720_v17, %v2874_v26  ;;  %v3662_v61 = vpop.f32.mrf.mxu1  ;;  %v2787_v53 = vpop.f32.mrf.mxu0  ;;  %v2006_v59 = vadd.f32 %v5005_v21, %v5004_v29  ;;  %v5007_v26 = vld [vmem:[#allocation24_spill] sm:$0xff] }
 0x1ed   : > { %3014 = vst.msk [vmem:[%s4745_s22 + $0x28] sm:$0xff] %vm3008_vm4, %v2981_v20  ;;  %v2986_v62 = vmax.f32 %v2954_v33, 0.0  ;;  %v2916_v1 = vmul.f32 %v4720_v17, %v2877_v31  ;;  %v2875_v56 = vadd.f32 %v2774_v36, %v2583_v18  ;;  %v2588_v38 = vadd.f32 %v3662_v61, %v2296_v40  ;;  %v5008_v33 = vld [vmem:[#allocation19_spill] sm:$0xff]  ;;  %v5009_v61 = vld [vmem:[#allocation6_spill] sm:$0xff]  ;;  %v5020_v29 = vld [vmem:[#allocation32_spill] sm:$0xff] }
 0x1ee   : > { %v2952_v10 = vadd.f32 %v4730_v19, %v2913_v12  ;;  %v2495_v49 = vpop.f32.mrf.mxu1  ;;  %v3697_v3 = vpop.f32.mrf.mxu0  ;;  %v2011_v5 = vadd.f32 %v5007_v26, %v5006_v46  ;;  %v2301_v31 = vadd.f32 %v5008_v33, %v2008_v2  ;;  %v5022_v46 = vld [vmem:[#allocation34_spill] sm:$0xff] }
 0x1ef   : > { %3019 = vst.msk [vmem:[%s4745_s22 + $0x50] sm:$0xff] %vm3008_vm4, %v2986_v62  ;;  %v2955_v23 = vadd.f32 %v4730_v19, %v2916_v1  ;;  %v2914_v63 = vmul.f32 %v4720_v17, %v2875_v56  ;;  %v2880_v8 = vadd.f32 %v3696_v11, %v2588_v38  ;;  %v2586_v54 = vadd.f32 %v2495_v49, %v2294_v41 }
 0x1f0   : > { %v2984_v0 = vmax.f32 %v2952_v10, 0.0  ;;  %v3663_v50 = vpop.f32.mrf.mxu1  ;;  %v2790_v22 = vpop.f32.mrf.mxu0 }
 0x1f1   : > { %v2987_v34 = vmax.f32 %v2955_v23, 0.0  ;;  %v2953_v16 = vadd.f32 %v4730_v19, %v2914_v63  ;;  %v2919_v60 = vmul.f32 %v4720_v17, %v2880_v8  ;;  %v2878_v27 = vadd.f32 %v2787_v53, %v2586_v54  ;;  %v5010_v53 = vld [vmem:[#allocation26_spill] sm:$0xff]  ;;  %v5012_v23 = vld [vmem:[#allocation28_spill] sm:$0xff]  ;;  %v5013_v54 = vld [vmem:[#allocation21_spill] sm:$0xff] }
 0x1f2   : > { %3017 = vst.msk [vmem:[%s4745_s22 + $0x40] sm:$0xff] %vm3008_vm4, %v2984_v0  ;;  %v2589_v13 = vadd.f32 %v3663_v50, %v2297_v30  ;;  %v2498_v14 = vpop.f32.mrf.mxu1  ;;  %v3700_v39 = vpop.f32.mrf.mxu0  ;;  %v2009_v41 = vadd.f32 %v5010_v53, %v5009_v61  ;;  %v2299_v55 = vadd.f32 %v5013_v54, %v2006_v59  ;;  %v5014_v50 = vld [vmem:[#allocation23_spill] sm:$0xff]  ;;  %v5021_v59 = vld [vmem:[#allocation10_spill] sm:$0xff]  ;;  %v5025_v61 = vld [vmem:[#allocation36_spill] sm:$0xff] }
 0x1f3   : > { %3020 = vst.msk [vmem:[%s4745_s22 + $0x58] sm:$0xff] %vm3008_vm4, %v2987_v34  ;;  %v2985_v42 = vmax.f32 %v2953_v16, 0.0  ;;  %v2958_v48 = vadd.f32 %v4730_v19, %v2919_v60  ;;  %v2917_v6 = vmul.f32 %v4720_v17, %v2878_v27  ;;  %v2587_v57 = vadd.f32 %v2498_v14, %v2295_v7  ;;  %v5015_v27 = vld [vmem:[#allocation8_spill] sm:$0xff] }
 0x1f4   : > { %v2881_v43 = vadd.f32 %v3697_v3, %v2589_v13  ;;  %v3666_v47 = vpop.f32.mrf.mxu1  ;;  %v2803_v52 = vpop.f32.mrf.mxu0  ;;  %v5011_v3 = vld [vmem:[#allocation7_spill] sm:$0xff]  ;;  %v2010_v32 = vadd.f32 %v5016_v51, %v5015_v27  ;;  %v2013_v26 = vadd.f32 %v5022_v46, %v5021_v59  ;;  %v5031_v27 = vld [vmem:[#allocation40_spill] sm:$0xff] }
 0x1f5   : > { %3018 = vst.msk [vmem:[%s4745_s22 + $0x48] sm:$0xff] %vm3008_vm4, %v2985_v42  ;;  %v2990_v44 = vmax.f32 %v2958_v48, 0.0  ;;  %v2956_v25 = vadd.f32 %v4730_v19, %v2917_v6  ;;  %v2879_v36 = vadd.f32 %v2790_v22, %v2587_v57  ;;  %v2592_v28 = vadd.f32 %v3666_v47, %v2300_v45 }
 0x1f6   : > { %v2920_v11 = vmul.f32 %v4720_v17, %v2881_v43  ;;  %v2511_v40 = vpop.f32.mrf.mxu1  ;;  %v3701_v20 = vpop.f32.mrf.mxu0  ;;  %v2012_v63 = vadd.f32 %v5012_v23, %v5011_v3  ;;  %v2304_v22 = vadd.f32 %v5014_v50, %v2011_v5  ;;  %v5027_v3 = vld [vmem:[#allocation38_spill] sm:$0xff] }
 0x1f7   : > { %3023 = vst.msk [vmem:[%s4745_s22 + $0x70] sm:$0xff] %vm3008_vm4, %v2990_v44  ;;  %v2988_v18 = vmax.f32 %v2956_v25, 0.0  ;;  %v2918_v58 = vmul.f32 %v4720_v17, %v2879_v36  ;;  %v2884_v9 = vadd.f32 %v3700_v39, %v2592_v28  ;;  %v2590_v12 = vadd.f32 %v2511_v40, %v2298_v24  ;;  %v5017_v39 = vld [vmem:[#allocation25_spill] sm:$0xff] }
 0x1f8   : > { %v2959_v62 = vadd.f32 %v4730_v19, %v2920_v11  ;;  %v3667_v1 = vpop.f32.mrf.mxu1  ;;  %v2806_v56 = vpop.f32.mrf.mxu0  ;;  %v2302_v15 = vadd.f32 %v5017_v39, %v2009_v41  ;;  %v5019_v28 = vld [vmem:[#allocation9_spill] sm:$0xff] }
 0x1f9   : > { %3021 = vst.msk [vmem:[%s4745_s22 + $0x60] sm:$0xff] %vm3008_vm4, %v2988_v18  ;;  %v2957_v38 = vadd.f32 %v4730_v19, %v2918_v58  ;;  %v2923_v35 = vmul.f32 %v4720_v17, %v2884_v9  ;;  %v2882_v10 = vadd.f32 %v2803_v52, %v2590_v12  ;;  %v2593_v49 = vadd.f32 %v3667_v1, %v2301_v31  ;;  %v5018_v52 = vld [vmem:[#allocation27_spill] sm:$0xff] }
 0x1fa   : > { %v2991_v8 = vmax.f32 %v2959_v62, 0.0  ;;  %v2514_v0 = vpop.f32.mrf.mxu1  ;;  %v3704_v30 = vpop.f32.mrf.mxu0  ;;  %v2305_v37 = vadd.f32 %v5018_v52, %v2012_v63  ;;  %v2015_v21 = vadd.f32 %v5020_v29, %v5019_v28  ;;  %v5024_v12 = vld [vmem:[#allocation11_spill] sm:$0xff]  ;;  %v5035_v28 = vld [vmem:[#allocation42_spill] sm:$0xff] }
 0x1fb   : > { %v2989_v7 = vmax.f32 %v2957_v38, 0.0  ;;  %v2962_v34 = vadd.f32 %v4730_v19, %v2923_v35  ;;  %v2921_v16 = vmul.f32 %v4720_v17, %v2882_v10  ;;  %v2885_v60 = vadd.f32 %v3701_v20, %v2593_v49  ;;  %v5023_v20 = vld [vmem:[#allocation29_spill] sm:$0xff]  ;;  %v5026_v49 = vld [vmem:[#allocation12_spill] sm:$0xff] }
 0x1fc   : > { %3024 = vst.msk [vmem:[%s4745_s22 + $0x78] sm:$0xff] %vm3008_vm4, %v2991_v8  ;;  %v2591_v2 = vadd.f32 %v2514_v0, %v2299_v55  ;;  %v3670_v13 = vpop.f32.mrf.mxu1  ;;  %v2819_v14 = vpop.f32.mrf.mxu0  ;;  %v2303_v33 = vadd.f32 %v5023_v20, %v2010_v32  ;;  %v2016_v53 = vadd.f32 %v5025_v61, %v5024_v12  ;;  %v2014_v23 = vadd.f32 %v5027_v3, %v5026_v49  ;;  %v5028_v8 = vld [vmem:[#allocation31_spill] sm:$0xff] }
 0x1fd   : > { %3022 = vst.msk [vmem:[%s4745_s22 + $0x68] sm:$0xff] %vm3008_vm4, %v2989_v7  ;;  %v2994_v45 = vmax.f32 %v2962_v34, 0.0  ;;  %v2960_v42 = vadd.f32 %v4730_v19, %v2921_v16  ;;  %v2924_v48 = vmul.f32 %v4720_v17, %v2885_v60  ;;  %v2596_v6 = vadd.f32 %v3670_v13, %v2304_v22  ;;  %v5030_v60 = vld [vmem:[#allocation13_spill] sm:$0xff]  ;;  %v5041_v3 = vld [vmem:[#allocation43_spill] sm:$0xff] }
 0x1fe   : > { %v2883_v57 = vadd.f32 %v2806_v56, %v2591_v2  ;;  %v2527_v43 = vpop.f32.mrf.mxu1  ;;  %v3705_v47 = vpop.f32.mrf.mxu0  ;;  %v2308_v54 = vadd.f32 %v5028_v8, %v2015_v21  ;;  %v2019_v51 = vadd.f32 %v5031_v27, %v5030_v60  ;;  %v5036_v21 = vld [vmem:[#allocation15_spill] sm:$0xff] }
 0x1ff   : > { %3027 = vst.msk [vmem:[%s4745_s22 + $0x90] sm:$0xff] %vm3008_vm4, %v2994_v45  ;;  %v2992_v24 = vmax.f32 %v2960_v42, 0.0  ;;  %v2963_v44 = vadd.f32 %v4730_v19, %v2924_v48  ;;  %v2888_v25 = vadd.f32 %v3704_v30, %v2596_v6  ;;  %v2594_v36 = vadd.f32 %v2527_v43, %v2302_v15  ;;  %v5029_v30 = vld [vmem:[#allocation33_spill] sm:$0xff] }
 0x200   : > { %v2922_v5 = vmul.f32 %v4720_v17, %v2883_v57  ;;  %v3671_v11 = vpop.f32.mrf.mxu1  ;;  %v2822_v40 = vpop.f32.mrf.mxu0  ;;  %v2306_v50 = vadd.f32 %v5029_v30, %v2013_v26  ;;  %v2020_v59 = vadd.f32 %v4705_v4, %v5036_v21 }
 0x201   : > { %3025 = vst.msk [vmem:[%s4745_s22 + $0x80] sm:$0xff] %vm3008_vm4, %v2992_v24  ;;  %v2995_v31 = vmax.f32 %v2963_v44, 0.0  ;;  %v2927_v18 = vmul.f32 %v4720_v17, %v2888_v25  ;;  %v2886_v58 = vadd.f32 %v2819_v14, %v2594_v36  ;;  %v2597_v9 = vadd.f32 %v3671_v11, %v2305_v37  ;;  %v5032_v14 = vld [vmem:[#allocation35_spill] sm:$0xff]  ;;  %v5034_v36 = vld [vmem:[#allocation14_spill] sm:$0xff] }
 0x202   : > { %v2961_v41 = vadd.f32 %v4730_v19, %v2922_v5  ;;  %v2530_v62 = vpop.f32.mrf.mxu1  ;;  %v3708_v1 = vpop.f32.mrf.mxu0  ;;  %v2309_v39 = vadd.f32 %v5032_v14, %v2016_v53  ;;  %v2017_v29 = vadd.f32 %v5035_v28, %v5034_v36  ;;  %v5037_v11 = vld [vmem:[#allocation39_spill] sm:$0xff] }
 0x203   : > { %3028 = vst.msk [vmem:[%s4745_s22 + $0x98] sm:$0xff] %vm3008_vm4, %v2995_v31  ;;  %v2966_v56 = vadd.f32 %v4730_v19, %v2927_v18  ;;  %v2925_v38 = vmul.f32 %v4720_v17, %v2886_v58  ;;  %v2889_v35 = vadd.f32 %v3705_v47, %v2597_v9  ;;  %v2595_v10 = vadd.f32 %v2530_v62, %v2303_v33  ;;  %v5033_v47 = vld [vmem:[#allocation37_spill] sm:$0xff]  ;;  %v5038_v58 = vld [vmem:[#allocation16_spill] sm:$0xff] }
 0x204   : > { %v2993_v63 = vmax.f32 %v2961_v41, 0.0  ;;  %v3674_v55 = vpop.f32.mrf.mxu1  ;;  %v2835_v0 = vpop.f32.mrf.mxu0  ;;  %v2307_v52 = vadd.f32 %v5033_v47, %v2014_v23  ;;  %v5039_v9 = vld [vmem:[#allocation45_spill] sm:$0xff]  ;;  %v2313_v23 = vadd.f32 %v5041_v3, %v2020_v59 }
 0x205   : > { %v2998_v22 = vmax.f32 %v2966_v56, 0.0  ;;  %v2964_v7 = vadd.f32 %v4730_v19, %v2925_v38  ;;  %v2928_v34 = vmul.f32 %v4720_v17, %v2889_v35  ;;  %v2887_v16 = vadd.f32 %v2822_v40, %v2595_v10  ;;  %v5040_v35 = vld [vmem:[#allocation41_spill] sm:$0xff] }
 0x206   : > { %3026 = vst.msk [vmem:[%s4745_s22 + $0x88] sm:$0xff] %vm3008_vm4, %v2993_v63  ;;  %v2600_v32 = vadd.f32 %v3674_v55, %v2308_v54  ;;  %v2543_v2 = vpop.f32.mrf.mxu1  ;;  %v3709_v13 = vpop.f32.mrf.mxu0  ;;  %v2312_v40 = vadd.f32 %v5037_v11, %v2019_v51  ;;  %v2018_v12 = vadd.f32 %v5039_v9, %v5038_v58  ;;  %v2310_v10 = vadd.f32 %v5040_v35, %v2017_v29 }
 0x207   : > { %3031 = vst.msk [vmem:[%s4745_s22 + $0xb0] sm:$0xff] %vm3008_vm4, %v2998_v22  ;;  %v2996_v15 = vmax.f32 %v2964_v7, 0.0  ;;  %v2967_v45 = vadd.f32 %v4730_v19, %v2928_v34  ;;  %v2926_v42 = vmul.f32 %v4720_v17, %v2887_v16  ;;  %v2598_v48 = vadd.f32 %v2543_v2, %v2306_v50  ;;  %v5042_v22 = vld [vmem:[#allocation44_spill] sm:$0xff] }
 0x208   : > { %v2892_v6 = vadd.f32 %v3708_v1, %v2600_v32  ;;  %v3675_v57 = vpop.f32.mrf.mxu1  ;;  %v2838_v43 = vpop.f32.mrf.mxu0  ;;  %v2311_v7 = vadd.f32 %v5042_v22, %v2018_v12 }
 0x209   : > { %3029 = vst.msk [vmem:[%s4745_s22 + $0xa0] sm:$0xff] %vm3008_vm4, %v2996_v15  ;;  %v2999_v37 = vmax.f32 %v2967_v45, 0.0  ;;  %v2965_v24 = vadd.f32 %v4730_v19, %v2926_v42  ;;  %v2890_v44 = vadd.f32 %v2835_v0, %v2598_v48  ;;  %v2601_v25 = vadd.f32 %v3675_v57, %v2309_v39 }
 0x20a   : > { %v2931_v46 = vmul.f32 %v4720_v17, %v2892_v6  ;;  %v2546_v26 = vpop.f32.mrf.mxu1  ;;  %v3712_v5 = vpop.f32.mrf.mxu0 }
 0x20b   : > { %3032 = vst.msk [vmem:[%s4745_s22 + $0xb8] sm:$0xff] %vm3008_vm4, %v2999_v37  ;;  %v2997_v20 = vmax.f32 %v2965_v24, 0.0  ;;  %v2929_v33 = vmul.f32 %v4720_v17, %v2890_v44  ;;  %v2893_v31 = vadd.f32 %v3709_v13, %v2601_v25  ;;  %v2599_v18 = vadd.f32 %v2546_v26, %v2307_v52 }
 0x20c   : > { %v2970_v61 = vadd.f32 %v4730_v19, %v2931_v46  ;;  %v3678_v4 = vpop.f32.mrf.mxu1  ;;  %v2851_v53 = vpop.f32.mrf.mxu0 }
 0x20d   : > { %3030 = vst.msk [vmem:[%s4745_s22 + $0xa8] sm:$0xff] %vm3008_vm4, %v2997_v20  ;;  %v2968_v41 = vadd.f32 %v4730_v19, %v2929_v33  ;;  %v2932_v62 = vmul.f32 %v4720_v17, %v2893_v31  ;;  %v2891_v1 = vadd.f32 %v2838_v43, %v2599_v18  ;;  %v2604_v56 = vadd.f32 %v3678_v4, %v2312_v40 }
 0x20e   : > { %v3002_v38 = vmax.f32 %v2970_v61, 0.0  ;;  %v2559_v49 = vpop.f32.mrf.mxu1  ;;  %v3713_v30 = vpop.f32.mrf.mxu0 }
 0x20f   : > { %v3000_v63 = vmax.f32 %v2968_v41, 0.0  ;;  %v2971_v8 = vadd.f32 %v4730_v19, %v2932_v62  ;;  %v2930_v54 = vmul.f32 %v4720_v17, %v2891_v1  ;;  %v2896_v55 = vadd.f32 %v3712_v5, %v2604_v56 }
 0x210   : > { %3035 = vst.msk [vmem:[%s4745_s22 + $0xd0] sm:$0xff] %vm3008_vm4, %v3002_v38  ;;  %v2602_v0 = vadd.f32 %v2559_v49, %v2310_v10  ;;  %v3679_v50 = vpop.f32.mrf.mxu1  ;;  %v2854_v45 = vpop.f32.mrf.mxu0 }
 0x211   : > { %3033 = vst.msk [vmem:[%s4745_s22 + $0xc0] sm:$0xff] %vm3008_vm4, %v3000_v63  ;;  %v3003_v34 = vmax.f32 %v2971_v8, 0.0  ;;  %v2969_v16 = vadd.f32 %v4730_v19, %v2930_v54  ;;  %v2935_v60 = vmul.f32 %v4720_v17, %v2896_v55  ;;  %v2605_v27 = vadd.f32 %v3679_v50, %v2313_v23 }
 0x212   : > { %v2894_v51 = vadd.f32 %v2851_v53, %v2602_v0  ;;  %v2562_v32 = vpop.f32.mrf.mxu1 }
 0x213   : > { %3036 = vst.msk [vmem:[%s4745_s22 + $0xd8] sm:$0xff] %vm3008_vm4, %v3003_v34  ;;  %v3001_v2 = vmax.f32 %v2969_v16, 0.0  ;;  %v2974_v13 = vadd.f32 %v4730_v19, %v2935_v60  ;;  %v2897_v14 = vadd.f32 %v3713_v30, %v2605_v27  ;;  %v2603_v39 = vadd.f32 %v2562_v32, %v2311_v7 }
 0x214   : > { %v2933_v15 = vmul.f32 %v4720_v17, %v2894_v51 }
 0x215   : > { %3034 = vst.msk [vmem:[%s4745_s22 + $0xc8] sm:$0xff] %vm3008_vm4, %v3001_v2  ;;  %v3006_v42 = vmax.f32 %v2974_v13, 0.0  ;;  %v2936_v48 = vmul.f32 %v4720_v17, %v2897_v14  ;;  %v2895_v6 = vadd.f32 %v2854_v45, %v2603_v39 }
 0x216   : > { %v2972_v57 = vadd.f32 %v4730_v19, %v2933_v15 }
 0x217   : > { %3039 = vst.msk [vmem:[%s4745_s22 + $0xf0] sm:$0xff] %vm3008_vm4, %v3006_v42  ;;  %v2975_v43 = vadd.f32 %v4730_v19, %v2936_v48  ;;  %v2934_v47 = vmul.f32 %v4720_v17, %v2895_v6 }
 0x218   : > { %v3004_v52 = vmax.f32 %v2972_v57, 0.0 }
 0x219   : > { %v3007_v37 = vmax.f32 %v2975_v43, 0.0  ;;  %v2973_v24 = vadd.f32 %v4730_v19, %v2934_v47 }
 0x21a   : > { %3037 = vst.msk [vmem:[%s4745_s22 + $0xe0] sm:$0xff] %vm3008_vm4, %v3004_v52 }
 0x21b   : > { %3040 = vst.msk [vmem:[%s4745_s22 + $0xf8] sm:$0xff] %vm3008_vm4, %v3007_v37  ;;  %v3005_v44 = vmax.f32 %v2973_v24, 0.0 }
 0x21d   : > { %3038 = vst.msk [vmem:[%s4745_s22 + $0xe8] sm:$0xff] %vm3008_vm4, %v3005_v44 }
 0x21e PF: > { %s14_s15 = sadd.s32 1, %s3732_s15  }
 0x21f   : > { %p11_p4 = scmp.ge.s32.totalorder %s14_s15, 4  }
 0x221   :  { %13 = sbr.rel (!%p11_p4) target bundleno = 1 (0x1), region = 68 }

// kernel: _lambda_.7
= control target key start
LH: loop header
LB: loop body
LE: loop exit
PB: predicated region body
PF: predicated region fallthrough
CT: control target
= control target key end

     0   :  { %s3238_s17 = smov 0   ;;  %s5188_s0 = inlined_call_operand.vmem [shape: f32[2,16,16,16], index: 0, kind: input, shape index: {}]   ;;  %s5189_s1 = inlined_call_operand.vmem [shape: bf16[16,4], index: 1, kind: input, shape index: {}]   ;;  %s5190_s2 = inlined_call_operand.vmem [shape: f32[1,4], index: 2, kind: input, shape index: {}]   ;;  %s5191_s3 = inlined_call_operand.vmem [shape: f32[1,4], index: 3, kind: input, shape index: {}]   ;;  %s5192_s4 = inlined_call_operand.vmem [shape: f32[3,3,4], index: 4, kind: input, shape index: {}]   ;;  %s5193_s5 = inlined_call_operand.vmem [shape: f32[1,4], index: 5, kind: input, shape index: {}]   ;;  %s5194_s6 = inlined_call_operand.vmem [shape: f32[1,4], index: 6, kind: input, shape index: {}]   ;;  %s5195_s7 = inlined_call_operand.vmem [shape: bf16[4,16], index: 7, kind: input, shape index: {}]   ;;  %s5196_s8 = inlined_call_operand.vmem [shape: f32[1,16], index: 8, kind: input, shape index: {}]   ;;  %s5197_s9 = inlined_call_operand.vmem [shape: f32[1,16], index: 9, kind: input, shape index: {}]   ;;  %s5198_s10 = inlined_call_operand.vmem [shape: f32[64,256], index: 10, kind: input, shape index: {}]   ;;  %s5199_s11 = inlined_call_operand.vmem [shape: f32[2,8,8,32], index: 11, kind: output, shape index: {}]  }
   0x1 LB: > { %s2930_s18 = sadd.s32 4294967295, %s3174_s17   ;;  %p2934_p0 = scmp.ge.s32.totalorder %s3174_s17, 1  ;;  %s3174_s17 = sphi %s3238_s17, %s21_s17  }
   0x2   : > { %p337_p1 = scmp.lt.s32.totalorder %s3174_s17, 3 }
   0x4   : > { %p338_p2 = pnand %p2934_p0, %p337_p1 }
   0x6   : > { %341 = sbr.rel (%p338_p2) target bundleno = 842 (0x34a), region = 64 }
   0xb   : > { %v3161_v0 = vld [vmem:[%s5189_s1] sm:$0xff]   ;;  %p377_p3 = scmp.lt.s32.totalorder %s2930_s18, 1  ;;  %vm460_vm0 = vcmask 130048   ;;  %vm2042_vm1 = vcmask 123904   ;;  %v3176_v1 = vmov 0.0   ;;  %vm780_vm2 = vcmask 31744  }
   0xc   : > { %3104 = vmatprep.subr.bf16.mxu0 %v3161_v0  ;;  %3148 = vmatprep.subr.bf16.mxu1 %v3161_v0  ;;  %2044 = vst.msk [vmem:[#allocation3 + $0x18] sm:$0xff] %vm460_vm0, %v3176_v1  ;;  %2045 = vst.msk [vmem:[#allocation3 + $0x20] sm:$0xff] %vm460_vm0, %v3176_v1  ;;  %vm783_vm3 = vcmask 25600   ;;  %v904_v50 = vlaneseq  ;;  %v3556_v52 = vld [vmem:[%s5190_s2] ss:$0 sm:$0xff]  ;;  %vm1933_vm4 = vcmask 1041408  }
   0xd   : > { %s5502_s18 = smov (!%p377_p3, %s2930_s18), 1  ;;  %2046 = vst.msk [vmem:[#allocation3 + $0x28] sm:$0x3] %vm2042_vm1, %v3176_v1  ;;  %2043 = vst.msk [vmem:[#allocation3 + $0x10] sm:$0x3] %vm2042_vm1, %v3176_v1  ;;  %3105 = vmatpush3.bf16.msra.mxu0 %v3161_v0  ;;  %3149 = vmatpush3.bf16.msra.mxu1 %v3161_v0  ;;  %s3177_s22 = smov 16  }
   0xe   : > { %2040 = vst.msk [vmem:[#allocation3] sm:$0xff] %vm460_vm0, %v3176_v1  ;;  %2041 = vst.msk [vmem:[#allocation3 + $0x8] sm:$0xff] %vm460_vm0, %v3176_v1  ;;  %s2968_s21 = sshll.u32 %s5502_s18, 8  ;;  %v905_v51 = vshrl.u32 %v904_v50, 7  ;;  %v869_v54 = vld [vmem:[%s5192_s4] sm:$0x7] }
   0xf   : > { %2047 = vst.msk [vmem:[#allocation3 + $0x30] sm:$0xff] %vm460_vm0, %v3176_v1  ;;  %2048 = vst.msk [vmem:[#allocation3 + $0x38] sm:$0xff] %vm460_vm0, %v3176_v1  ;;  %s3363_s24 = scalar_lea.vmem %s5188_s0, %s2968_s21  ;;  %v3564_v58 = vld [vmem:[%s5191_s3] ss:$0 sm:$0xff]  ;;  %v870_v61 = vld [vmem:[%s5192_s4 + $0x4] sm:$0x7] }
  0x10   : > { %2049 = vst.msk [vmem:[#allocation3 + $0x40] sm:$0x3] %vm2042_vm1, %v3176_v1  ;;  %2052 = vst.msk [vmem:[#allocation3 + $0x58] sm:$0x3] %vm2042_vm1, %v3176_v1  ;;  %v388_v2 = vld [vmem:[%s3363_s24] sm:$0xff]  ;;  %v389_v3 = vld [vmem:[%s3363_s24 + $0x8] sm:$0xff] }
  0x11   : > { %2050 = vst.msk [vmem:[#allocation3 + $0x48] sm:$0xff] %vm460_vm0, %v3176_v1  ;;  %2051 = vst.msk [vmem:[#allocation3 + $0x50] sm:$0xff] %vm460_vm0, %v3176_v1  ;;  %v404_v4 = vld [vmem:[%s3363_s24 + $0x80] sm:$0xff]  ;;  %v436_v5 = vpack.c.bf16 %v389_v3, %v388_v2  ;;  %v405_v6 = vld [vmem:[%s3363_s24 + $0x88] sm:$0xff]  ;;  %v906_v53 = vsub.s32 0, %v905_v51  ;;  %v1006_v55 = vsub.s32 1, %v905_v51 }
  0x12   : > { %2053 = vst.msk [vmem:[#allocation3 + $0x60] sm:$0xff] %vm460_vm0, %v3176_v1  ;;  %2054 = vst.msk [vmem:[#allocation3 + $0x68] sm:$0xff] %vm460_vm0, %v3176_v1  ;;  %v390_v7 = vld [vmem:[%s3363_s24 + $0x10] sm:$0xff]  ;;  %v391_v8 = vld [vmem:[%s3363_s24 + $0x18] sm:$0xff]  ;;  %v444_v9 = vpack.c.bf16 %v405_v6, %v404_v4  ;;  %v1106_v56 = vsub.s32 2, %v905_v51  ;;  %s2969_s27 = sshll.u32 %s5502_s18, 6 }
  0x13   : > { %2055 = vst.msk [vmem:[#allocation3 + $0x70] sm:$0x3] %vm2042_vm1, %v3176_v1  ;;  %2058 = vst.msk [vmem:[#allocation3 + $0x88] sm:$0x3] %vm2042_vm1, %v3176_v1  ;;  %v437_v10 = vpack.c.bf16 %v391_v8, %v390_v7  ;;  %v406_v11 = vld [vmem:[%s3363_s24 + $0x90] sm:$0xff]  ;;  %v407_v12 = vld [vmem:[%s3363_s24 + $0x98] sm:$0xff]  ;;  %3106 = vmatprep.mubr.msk.bf16.mxu0 %vm460_vm0, %v436_v5  ;;  %v3578_v5 = vrot.slane %v869_v54, %v1006_v55  ;;  %s5159_s30 = scalar_lea.vmem %s5199_s11, %s2969_s27 }
  0x14   : > { %2056 = vst.msk [vmem:[#allocation3 + $0x78] sm:$0xff] %vm460_vm0, %v3176_v1  ;;  %2057 = vst.msk [vmem:[#allocation3 + $0x80] sm:$0xff] %vm460_vm0, %v3176_v1  ;;  %v392_v13 = vld [vmem:[%s3363_s24 + $0x20] sm:$0xff]  ;;  %v445_v14 = vpack.c.bf16 %v407_v12, %v406_v11  ;;  %v393_v15 = vld [vmem:[%s3363_s24 + $0x28] sm:$0xff]  ;;  %3122 = vmatprep.mubr.msk.bf16.mxu1 %vm460_vm0, %v444_v9  ;;  %vm2866_vm5 = vcmask 261120  }
  0x15   : > { %2059 = vst.msk [vmem:[#allocation3 + $0x90] sm:$0xff] %vm460_vm0, %v3176_v1  ;;  %2060 = vst.msk [vmem:[#allocation3 + $0x98] sm:$0xff] %vm460_vm0, %v3176_v1  ;;  %v408_v16 = vld [vmem:[%s3363_s24 + $0xa0] sm:$0xff]  ;;  %v409_v17 = vld [vmem:[%s3363_s24 + $0xa8] sm:$0xff]  ;;  %3107 = vmatmul.mubr.msk.bf16.vlgmr.msra.gmra.mxu0 %vm460_vm0, %v437_v10  ;;  %v438_v18 = vpack.c.bf16 %v393_v15, %v392_v13  ;;  %v3584_v10 = vrot.slane %v870_v61, %v906_v53 }
  0x16   : > { %2061 = vst.msk [vmem:[#allocation3 + $0xa0] sm:$0x3] %vm2042_vm1, %v3176_v1  ;;  %2064 = vst.msk [vmem:[#allocation3 + $0xb8] sm:$0x3] %vm2042_vm1, %v3176_v1  ;;  %v446_v19 = vpack.c.bf16 %v409_v17, %v408_v16  ;;  %v394_v20 = vld [vmem:[%s3363_s24 + $0x30] sm:$0xff]  ;;  %v395_v21 = vld [vmem:[%s3363_s24 + $0x38] sm:$0xff]  ;;  %3123 = vmatmul.mubr.msk.bf16.vlgmr.msra.gmra.mxu1 %vm460_vm0, %v445_v14 }
  0x17   : > { %2062 = vst.msk [vmem:[#allocation3 + $0xa8] sm:$0xff] %vm460_vm0, %v3176_v1  ;;  %2063 = vst.msk [vmem:[#allocation3 + $0xb0] sm:$0xff] %vm460_vm0, %v3176_v1  ;;  %v410_v22 = vld [vmem:[%s3363_s24 + $0xb0] sm:$0xff]  ;;  %v411_v23 = vld [vmem:[%s3363_s24 + $0xb8] sm:$0xff]  ;;  %3110 = vmatprep.mubr.msk.bf16.mxu0 %vm460_vm0, %v438_v18  ;;  %v439_v32 = vpack.c.bf16 %v395_v21, %v394_v20 }
  0x18   : > { %2065 = vst.msk [vmem:[#allocation3 + $0xc0] sm:$0xff] %vm460_vm0, %v3176_v1  ;;  %2066 = vst.msk [vmem:[#allocation3 + $0xc8] sm:$0xff] %vm460_vm0, %v3176_v1  ;;  %v396_v24 = vld [vmem:[%s3363_s24 + $0x40] sm:$0xff]  ;;  %v397_v25 = vld [vmem:[%s3363_s24 + $0x48] sm:$0xff]  ;;  %3126 = vmatprep.mubr.msk.bf16.mxu1 %vm460_vm0, %v446_v19  ;;  %v447_v36 = vpack.c.bf16 %v411_v23, %v410_v22 }
  0x19   : > { %2067 = vst.msk [vmem:[#allocation3 + $0xd0] sm:$0x3] %vm2042_vm1, %v3176_v1  ;;  %2070 = vst.msk [vmem:[#allocation3 + $0xe8] sm:$0x3] %vm2042_vm1, %v3176_v1  ;;  %v412_v26 = vld [vmem:[%s3363_s24 + $0xc0] sm:$0xff]  ;;  %v413_v27 = vld [vmem:[%s3363_s24 + $0xc8] sm:$0xff]  ;;  %v440_v37 = vpack.c.bf16 %v397_v25, %v396_v24 }
  0x1a   : > { %2068 = vst.msk [vmem:[#allocation3 + $0xd8] sm:$0xff] %vm460_vm0, %v3176_v1  ;;  %2069 = vst.msk [vmem:[#allocation3 + $0xe0] sm:$0xff] %vm460_vm0, %v3176_v1  ;;  %v398_v28 = vld [vmem:[%s3363_s24 + $0x50] sm:$0xff]  ;;  %v399_v29 = vld [vmem:[%s3363_s24 + $0x58] sm:$0xff]  ;;  %v448_v41 = vpack.c.bf16 %v413_v27, %v412_v26 }
  0x1b   : > { %2071 = vst.msk [vmem:[#allocation3 + $0xf0] sm:$0xff] %vm460_vm0, %v3176_v1  ;;  %2072 = vst.msk [vmem:[#allocation3 + $0xf8] sm:$0xff] %vm460_vm0, %v3176_v1  ;;  %v414_v30 = vld [vmem:[%s3363_s24 + $0xd0] sm:$0xff]  ;;  %v415_v31 = vld [vmem:[%s3363_s24 + $0xd8] sm:$0xff]  ;;  %v441_v44 = vpack.c.bf16 %v399_v29, %v398_v28 }
  0x1c   : > { %2073 = vst.msk [vmem:[#allocation3 + $0x100] sm:$0x3] %vm2042_vm1, %v3176_v1  ;;  %2076 = vst.msk [vmem:[#allocation3 + $0x118] sm:$0x3] %vm2042_vm1, %v3176_v1  ;;  %v400_v33 = vld [vmem:[%s3363_s24 + $0x60] sm:$0xff]  ;;  %v401_v34 = vld [vmem:[%s3363_s24 + $0x68] sm:$0xff]  ;;  %v449_v45 = vpack.c.bf16 %v415_v31, %v414_v30 }
  0x1d   : > { %2074 = vst.msk [vmem:[#allocation3 + $0x108] sm:$0xff] %vm460_vm0, %v3176_v1  ;;  %2075 = vst.msk [vmem:[#allocation3 + $0x110] sm:$0xff] %vm460_vm0, %v3176_v1  ;;  %v416_v35 = vld [vmem:[%s3363_s24 + $0xe0] sm:$0xff]  ;;  %v417_v38 = vld [vmem:[%s3363_s24 + $0xe8] sm:$0xff]  ;;  %3111 = vmatmul.mubr.msk.bf16.gmra.mxu0 %vm460_vm0, %v439_v32  ;;  %v442_v46 = vpack.c.bf16 %v401_v34, %v400_v33 }
  0x1e   : > { %2077 = vst.msk [vmem:[#allocation3 + $0x120] sm:$0xff] %vm460_vm0, %v3176_v1  ;;  %2078 = vst.msk [vmem:[#allocation3 + $0x128] sm:$0xff] %vm460_vm0, %v3176_v1  ;;  %v402_v39 = vld [vmem:[%s3363_s24 + $0x70] sm:$0xff]  ;;  %v403_v40 = vld [vmem:[%s3363_s24 + $0x78] sm:$0xff]  ;;  %3127 = vmatmul.mubr.msk.bf16.gmra.mxu1 %vm460_vm0, %v447_v36  ;;  %3114 = vmatprep.mubr.msk.bf16.mxu0 %vm460_vm0, %v440_v37  ;;  %v450_v47 = vpack.c.bf16 %v417_v38, %v416_v35 }
  0x1f   : > { %2079 = vst.msk [vmem:[#allocation3 + $0x130] sm:$0x3] %vm2042_vm1, %v3176_v1  ;;  %2082 = vst.msk [vmem:[#allocation3 + $0x148] sm:$0x3] %vm2042_vm1, %v3176_v1  ;;  %v418_v42 = vld [vmem:[%s3363_s24 + $0xf0] sm:$0xff]  ;;  %v419_v43 = vld [vmem:[%s3363_s24 + $0xf8] sm:$0xff]  ;;  %3130 = vmatprep.mubr.msk.bf16.mxu1 %vm460_vm0, %v448_v41  ;;  %v443_v48 = vpack.c.bf16 %v403_v40, %v402_v39 }
  0x20   : > { %2080 = vst.msk [vmem:[#allocation3 + $0x138] sm:$0xff] %vm460_vm0, %v3176_v1  ;;  %2081 = vst.msk [vmem:[#allocation3 + $0x140] sm:$0xff] %vm460_vm0, %v3176_v1  ;;  %v451_v49 = vpack.c.bf16 %v419_v43, %v418_v42  ;;  %v871_v0 = vld [vmem:[%s5192_s4 + $0x8] sm:$0x7] }
  0x21   : > { %2083 = vst.msk [vmem:[#allocation3 + $0x150] sm:$0xff] %vm460_vm0, %v3176_v1  ;;  %2084 = vst.msk [vmem:[#allocation3 + $0x158] sm:$0xff] %vm460_vm0, %v3176_v1 }
  0x22   : > { %2085 = vst.msk [vmem:[#allocation3 + $0x160] sm:$0x3] %vm2042_vm1, %v3176_v1  ;;  %2088 = vst.msk [vmem:[#allocation3 + $0x178] sm:$0x3] %vm2042_vm1, %v3176_v1 }
  0x23   : > { %2086 = vst.msk [vmem:[#allocation3 + $0x168] sm:$0xff] %vm460_vm0, %v3176_v1  ;;  %2087 = vst.msk [vmem:[#allocation3 + $0x170] sm:$0xff] %vm460_vm0, %v3176_v1 }
  0x24   : > { %2089 = vst.msk [vmem:[#allocation3 + $0x180] sm:$0xff] %vm460_vm0, %v3176_v1  ;;  %2090 = vst.msk [vmem:[#allocation3 + $0x188] sm:$0xff] %vm460_vm0, %v3176_v1 }
  0x25   : > { %2091 = vst.msk [vmem:[#allocation3 + $0x190] sm:$0x3] %vm2042_vm1, %v3176_v1  ;;  %2094 = vst.msk [vmem:[#allocation3 + $0x1a8] sm:$0x3] %vm2042_vm1, %v3176_v1  ;;  %3115 = vmatmul.mubr.msk.bf16.gmra.mxu0 %vm460_vm0, %v441_v44 }
  0x26   : > { %2092 = vst.msk [vmem:[#allocation3 + $0x198] sm:$0xff] %vm460_vm0, %v3176_v1  ;;  %2093 = vst.msk [vmem:[#allocation3 + $0x1a0] sm:$0xff] %vm460_vm0, %v3176_v1  ;;  %3131 = vmatmul.mubr.msk.bf16.gmra.mxu1 %vm460_vm0, %v449_v45  ;;  %3118 = vmatprep.mubr.msk.bf16.mxu0 %vm460_vm0, %v442_v46 }
  0x27   : > { %2096 = vst.msk [vmem:[#allocation3 + $0x19] sm:$0xff] %vm460_vm0, %v388_v2  ;;  %2097 = vst.msk [vmem:[#allocation3 + $0x21] sm:$0xff] %vm460_vm0, %v389_v3  ;;  %3134 = vmatprep.mubr.msk.bf16.mxu1 %vm460_vm0, %v450_v47 }
  0x28   : > { %2112 = vst.msk [vmem:[#allocation3 + $0xd9] sm:$0xff] %vm460_vm0, %v404_v4  ;;  %2113 = vst.msk [vmem:[#allocation3 + $0xe1] sm:$0xff] %vm460_vm0, %v405_v6  ;;  %v3580_v6 = vrot.slane %v869_v54, %v1106_v56 }
  0x29   : > { %2098 = vst.msk [vmem:[#allocation3 + $0x31] sm:$0xff] %vm460_vm0, %v390_v7  ;;  %2099 = vst.msk [vmem:[#allocation3 + $0x39] sm:$0xff] %vm460_vm0, %v391_v8 }
  0x2a   : > { %2114 = vst.msk [vmem:[#allocation3 + $0xf1] sm:$0xff] %vm460_vm0, %v406_v11  ;;  %2115 = vst.msk [vmem:[#allocation3 + $0xf9] sm:$0xff] %vm460_vm0, %v407_v12  ;;  %v3586_v11 = vrot.slane %v870_v61, %v1006_v55 }
  0x2b   : > { %2100 = vst.msk [vmem:[#allocation3 + $0x49] sm:$0xff] %vm460_vm0, %v392_v13  ;;  %2101 = vst.msk [vmem:[#allocation3 + $0x51] sm:$0xff] %vm460_vm0, %v393_v15 }
  0x2c   : > { %2116 = vst.msk [vmem:[#allocation3 + $0x109] sm:$0xff] %vm460_vm0, %v408_v16  ;;  %2117 = vst.msk [vmem:[#allocation3 + $0x111] sm:$0xff] %vm460_vm0, %v409_v17  ;;  %v3590_v16 = vrot.slane %v871_v0, %v906_v53 }
  0x2d   : > { %2102 = vst.msk [vmem:[#allocation3 + $0x61] sm:$0xff] %vm460_vm0, %v394_v20  ;;  %2103 = vst.msk [vmem:[#allocation3 + $0x69] sm:$0xff] %vm460_vm0, %v395_v21  ;;  %3119 = vmatmul.mubr.msk.bf16.gmra.mxu0 %vm460_vm0, %v443_v48 }
  0x2e   : > { %2118 = vst.msk [vmem:[#allocation3 + $0x121] sm:$0xff] %vm460_vm0, %v410_v22  ;;  %2119 = vst.msk [vmem:[#allocation3 + $0x129] sm:$0xff] %vm460_vm0, %v411_v23  ;;  %3135 = vmatmul.mubr.msk.bf16.gmra.mxu1 %vm460_vm0, %v451_v49  ;;  %v3594_v22 = vrot.slane %v871_v0, %v1006_v55 }
  0x2f   : > { %2104 = vst.msk [vmem:[#allocation3 + $0x79] sm:$0xff] %vm460_vm0, %v396_v24  ;;  %2105 = vst.msk [vmem:[#allocation3 + $0x81] sm:$0xff] %vm460_vm0, %v397_v25 }
  0x30   : > { %2120 = vst.msk [vmem:[#allocation3 + $0x139] sm:$0xff] %vm460_vm0, %v412_v26  ;;  %2121 = vst.msk [vmem:[#allocation3 + $0x141] sm:$0xff] %vm460_vm0, %v413_v27  ;;  %v3599_v27 = vrot.slane %v870_v61, %v1106_v56 }
  0x31   : > { %2106 = vst.msk [vmem:[#allocation3 + $0x91] sm:$0xff] %vm460_vm0, %v398_v28  ;;  %2107 = vst.msk [vmem:[#allocation3 + $0x99] sm:$0xff] %vm460_vm0, %v399_v29 }
  0x32   : > { %2122 = vst.msk [vmem:[#allocation3 + $0x151] sm:$0xff] %vm460_vm0, %v414_v30  ;;  %2123 = vst.msk [vmem:[#allocation3 + $0x159] sm:$0xff] %vm460_vm0, %v415_v31 }
  0x33   : > { %2108 = vst.msk [vmem:[#allocation3 + $0xa9] sm:$0xff] %vm460_vm0, %v400_v33  ;;  %2109 = vst.msk [vmem:[#allocation3 + $0xb1] sm:$0xff] %vm460_vm0, %v401_v34  ;;  %v3604_v34 = vrot.slane %v871_v0, %v1106_v56 }
  0x34   : > { %2124 = vst.msk [vmem:[#allocation3 + $0x169] sm:$0xff] %vm460_vm0, %v416_v35  ;;  %2125 = vst.msk [vmem:[#allocation3 + $0x171] sm:$0xff] %vm460_vm0, %v417_v38 }
  0x35   : > { %2110 = vst.msk [vmem:[#allocation3 + $0xc1] sm:$0xff] %vm460_vm0, %v402_v39  ;;  %2111 = vst.msk [vmem:[#allocation3 + $0xc9] sm:$0xff] %vm460_vm0, %v403_v40 }
  0x36   : > { %2126 = vst.msk [vmem:[#allocation3 + $0x181] sm:$0xff] %vm460_vm0, %v418_v42  ;;  %2127 = vst.msk [vmem:[#allocation3 + $0x189] sm:$0xff] %vm460_vm0, %v419_v43 }
  0x37   : > { %788 = vst.msk [vmem:[#allocation2 + $0x30] sm:$0xff] %vm780_vm2, %v3176_v1  ;;  %789 = vst.msk [vmem:[#allocation2 + $0x38] sm:$0xff] %vm780_vm2, %v3176_v1 }
  0x38   : > { %781 = vst.msk [vmem:[#allocation2] sm:$0xff] %vm780_vm2, %v3176_v1  ;;  %782 = vst.msk [vmem:[#allocation2 + $0x8] sm:$0xff] %vm780_vm2, %v3176_v1 }
  0x39   : > { %785 = vst.msk [vmem:[#allocation2 + $0x18] sm:$0xff] %vm780_vm2, %v3176_v1  ;;  %786 = vst.msk [vmem:[#allocation2 + $0x20] sm:$0xff] %vm780_vm2, %v3176_v1 }
  0x3a   : > { %791 = vst.msk [vmem:[#allocation2 + $0x48] sm:$0xff] %vm780_vm2, %v3176_v1  ;;  %792 = vst.msk [vmem:[#allocation2 + $0x50] sm:$0xff] %vm780_vm2, %v3176_v1 }
  0x3b   : > { %794 = vst.msk [vmem:[#allocation2 + $0x60] sm:$0xff] %vm780_vm2, %v3176_v1  ;;  %795 = vst.msk [vmem:[#allocation2 + $0x68] sm:$0xff] %vm780_vm2, %v3176_v1 }
  0x3c   : > { %797 = vst.msk [vmem:[#allocation2 + $0x78] sm:$0xff] %vm780_vm2, %v3176_v1  ;;  %798 = vst.msk [vmem:[#allocation2 + $0x80] sm:$0xff] %vm780_vm2, %v3176_v1 }
  0x3d   : > { %800 = vst.msk [vmem:[#allocation2 + $0x90] sm:$0xff] %vm780_vm2, %v3176_v1  ;;  %801 = vst.msk [vmem:[#allocation2 + $0x98] sm:$0xff] %vm780_vm2, %v3176_v1 }
  0x3e   : > { %803 = vst.msk [vmem:[#allocation2 + $0xa8] sm:$0xff] %vm780_vm2, %v3176_v1  ;;  %804 = vst.msk [vmem:[#allocation2 + $0xb0] sm:$0xff] %vm780_vm2, %v3176_v1 }
  0x3f   : > { %806 = vst.msk [vmem:[#allocation2 + $0xc0] sm:$0xff] %vm780_vm2, %v3176_v1  ;;  %807 = vst.msk [vmem:[#allocation2 + $0xc8] sm:$0xff] %vm780_vm2, %v3176_v1 }
  0x40   : > { %809 = vst.msk [vmem:[#allocation2 + $0xd8] sm:$0xff] %vm780_vm2, %v3176_v1  ;;  %810 = vst.msk [vmem:[#allocation2 + $0xe0] sm:$0xff] %vm780_vm2, %v3176_v1 }
  0x41   : > { %812 = vst.msk [vmem:[#allocation2 + $0xf0] sm:$0xff] %vm780_vm2, %v3176_v1  ;;  %813 = vst.msk [vmem:[#allocation2 + $0xf8] sm:$0xff] %vm780_vm2, %v3176_v1 }
  0x42   : > { %815 = vst.msk [vmem:[#allocation2 + $0x108] sm:$0xff] %vm780_vm2, %v3176_v1  ;;  %816 = vst.msk [vmem:[#allocation2 + $0x110] sm:$0xff] %vm780_vm2, %v3176_v1 }
  0x43   : > { %818 = vst.msk [vmem:[#allocation2 + $0x120] sm:$0xff] %vm780_vm2, %v3176_v1  ;;  %819 = vst.msk [vmem:[#allocation2 + $0x128] sm:$0xff] %vm780_vm2, %v3176_v1 }
  0x44   : > { %821 = vst.msk [vmem:[#allocation2 + $0x138] sm:$0xff] %vm780_vm2, %v3176_v1  ;;  %822 = vst.msk [vmem:[#allocation2 + $0x140] sm:$0xff] %vm780_vm2, %v3176_v1 }
  0x45   : > { %824 = vst.msk [vmem:[#allocation2 + $0x150] sm:$0xff] %vm780_vm2, %v3176_v1  ;;  %825 = vst.msk [vmem:[#allocation2 + $0x158] sm:$0xff] %vm780_vm2, %v3176_v1 }
  0x46   : > { %827 = vst.msk [vmem:[#allocation2 + $0x168] sm:$0xff] %vm780_vm2, %v3176_v1  ;;  %828 = vst.msk [vmem:[#allocation2 + $0x170] sm:$0xff] %vm780_vm2, %v3176_v1 }
  0x47   : > { %830 = vst.msk [vmem:[#allocation2 + $0x180] sm:$0xff] %vm780_vm2, %v3176_v1  ;;  %831 = vst.msk [vmem:[#allocation2 + $0x188] sm:$0xff] %vm780_vm2, %v3176_v1 }
  0x48   : > { %833 = vst.msk [vmem:[#allocation2 + $0x198] sm:$0xff] %vm780_vm2, %v3176_v1  ;;  %834 = vst.msk [vmem:[#allocation2 + $0x1a0] sm:$0xff] %vm780_vm2, %v3176_v1 }
  0x49   : > { %790 = vst.msk [vmem:[#allocation2 + $0x40] sm:$0x3] %vm783_vm3, %v3176_v1  ;;  %784 = vst.msk [vmem:[#allocation2 + $0x10] sm:$0x3] %vm783_vm3, %v3176_v1 }
  0x4a   : > { %787 = vst.msk [vmem:[#allocation2 + $0x28] sm:$0x3] %vm783_vm3, %v3176_v1  ;;  %793 = vst.msk [vmem:[#allocation2 + $0x58] sm:$0x3] %vm783_vm3, %v3176_v1 }
  0x4b   : > { %796 = vst.msk [vmem:[#allocation2 + $0x70] sm:$0x3] %vm783_vm3, %v3176_v1  ;;  %799 = vst.msk [vmem:[#allocation2 + $0x88] sm:$0x3] %vm783_vm3, %v3176_v1 }
  0x4c   : > { %802 = vst.msk [vmem:[#allocation2 + $0xa0] sm:$0x3] %vm783_vm3, %v3176_v1  ;;  %805 = vst.msk [vmem:[#allocation2 + $0xb8] sm:$0x3] %vm783_vm3, %v3176_v1 }
  0x4d   : > { %808 = vst.msk [vmem:[#allocation2 + $0xd0] sm:$0x3] %vm783_vm3, %v3176_v1  ;;  %811 = vst.msk [vmem:[#allocation2 + $0xe8] sm:$0x3] %vm783_vm3, %v3176_v1 }
  0x4e   : > { %814 = vst.msk [vmem:[#allocation2 + $0x100] sm:$0x3] %vm783_vm3, %v3176_v1  ;;  %817 = vst.msk [vmem:[#allocation2 + $0x118] sm:$0x3] %vm783_vm3, %v3176_v1 }
  0x4f   : > { %820 = vst.msk [vmem:[#allocation2 + $0x130] sm:$0x3] %vm783_vm3, %v3176_v1  ;;  %823 = vst.msk [vmem:[#allocation2 + $0x148] sm:$0x3] %vm783_vm3, %v3176_v1  ;;  %v1504_v21 = vld [vmem:[#allocation2 + $0x1a0] sm:$0xff]  ;;  %v1503_v28 = vld [vmem:[#allocation2 + $0x198] sm:$0xff] }
  0x50   : > { %826 = vst.msk [vmem:[#allocation2 + $0x160] sm:$0x3] %vm783_vm3, %v3176_v1  ;;  %829 = vst.msk [vmem:[#allocation2 + $0x178] sm:$0x3] %vm783_vm3, %v3176_v1  ;;  %v3610_v39 = vmul.f32 %v3590_v16, %v1504_v21  ;;  %v1603_v40 = vld [vmem:[#allocation2 + $0x199] sm:$0xff]  ;;  %v3616_v46 = vmul.f32 %v3590_v16, %v1503_v28 }
  0x51   : > { %832 = vst.msk [vmem:[#allocation2 + $0x190] sm:$0x3] %vm783_vm3, %v3176_v1  ;;  %835 = vst.msk [vmem:[#allocation2 + $0x1a8] sm:$0x3] %vm783_vm3, %v3176_v1  ;;  %v3574_v1 = vrot.slane %v869_v54, %v906_v53  ;;  %v1703_v53 = vld [vmem:[#allocation2 + $0x19a] sm:$0xff] }
  0x52   : > { %5309 = vst [vmem:[#allocation5_spill] sm:$0xff] %v3578_v5  ;;  %5310 = vst [vmem:[#allocation6_spill] sm:$0xff] %v3580_v6 }
  0x53   : > { %5308 = vst [vmem:[#allocation4_spill] sm:$0xff] %v3574_v1 }
  0x58   : > { %v1604_v33 = vld [vmem:[#allocation2 + $0x1a1] sm:$0xff] }
  0x59   : > { %v1704_v45 = vld [vmem:[#allocation2 + $0x1a2] sm:$0xff]  ;;  %v3622_v51 = vmul.f32 %v3594_v22, %v1604_v33 }
  0x5a   : > { %v3634_v0 = vmul.f32 %v3604_v34, %v1704_v45 }
  0x5b   : > { %5311 = vst [vmem:[#allocation7_spill] sm:$0xff] %v3622_v51 }
  0x5c   : > { %5312 = vst [vmem:[#allocation8_spill] sm:$0xff] %v3634_v0 }
  0xd5   : > { %v3108_v57 = vpop.f32.mrf.mxu0 }
  0xd6   : > { %v679_v59 = vmul.f32 %v3108_v57, %v3556_v52  ;;  %v3124_v60 = vpop.f32.mrf.mxu1 }
  0xd7   : > { %v695_v62 = vmul.f32 %v3124_v60, %v3556_v52  ;;  %v543_v63 = vpop.f32.mrf.mxu0 }
  0xd8   : > { %v718_v2 = vadd.f32 %v3564_v58, %v679_v59  ;;  %v677_v3 = vmul.f32 %v3556_v52, %v543_v63  ;;  %v607_v4 = vpop.f32.mrf.mxu1  ;;  %v3628_v59 = vmul.f32 %v3594_v22, %v1603_v40 }
  0xd9   : > { %v734_v7 = vadd.f32 %v3564_v58, %v695_v62  ;;  %v693_v8 = vmul.f32 %v3556_v52, %v607_v4  ;;  %v3109_v9 = vpop.f32.mrf.mxu0 }
  0xda   : > { %v750_v12 = vmax.f32 %v718_v2, 0.0  ;;  %v716_v13 = vadd.f32 %v3564_v58, %v677_v3  ;;  %v680_v14 = vmul.f32 %v3109_v9, %v3556_v52  ;;  %v3125_v15 = vpop.f32.mrf.mxu1 }
  0xdb   : > { %v766_v17 = vmax.f32 %v734_v7, 0.0  ;;  %v732_v18 = vadd.f32 %v3564_v58, %v693_v8  ;;  %v696_v19 = vmul.f32 %v3125_v15, %v3556_v52  ;;  %v546_v20 = vpop.f32.mrf.mxu0  ;;  %v3640_v8 = vmul.f32 %v3604_v34, %v1703_v53 }
  0xdc   : > { %839 = vst.msk [vmem:[#allocation2 + $0x31] sm:$0xff] %vm780_vm2, %v750_v12  ;;  %v748_v23 = vmax.f32 %v716_v13, 0.0  ;;  %v719_v24 = vadd.f32 %v3564_v58, %v680_v14  ;;  %v678_v25 = vmul.f32 %v3556_v52, %v546_v20  ;;  %v610_v26 = vpop.f32.mrf.mxu1 }
  0xdd   : > { %855 = vst.msk [vmem:[#allocation2 + $0xf1] sm:$0xff] %vm780_vm2, %v766_v17  ;;  %v764_v29 = vmax.f32 %v732_v18, 0.0  ;;  %v735_v30 = vadd.f32 %v3564_v58, %v696_v19  ;;  %v694_v31 = vmul.f32 %v3556_v52, %v610_v26  ;;  %v3112_v32 = vpop.f32.mrf.mxu0  ;;  %5313 = vst [vmem:[#allocation9_spill] sm:$0xff] %v3640_v8 }
  0xde   : > { %837 = vst.msk [vmem:[#allocation2 + $0x19] sm:$0xff] %vm780_vm2, %v748_v23  ;;  %v751_v35 = vmax.f32 %v719_v24, 0.0  ;;  %v717_v36 = vadd.f32 %v3564_v58, %v678_v25  ;;  %v683_v37 = vmul.f32 %v3112_v32, %v3556_v52  ;;  %v3128_v38 = vpop.f32.mrf.mxu1 }
  0xdf   : > { %853 = vst.msk [vmem:[#allocation2 + $0xd9] sm:$0xff] %vm780_vm2, %v764_v29  ;;  %v767_v41 = vmax.f32 %v735_v30, 0.0  ;;  %v733_v42 = vadd.f32 %v3564_v58, %v694_v31  ;;  %v699_v43 = vmul.f32 %v3128_v38, %v3556_v52  ;;  %v559_v44 = vpop.f32.mrf.mxu0 }
  0xe0   : > { %840 = vst.msk [vmem:[#allocation2 + $0x39] sm:$0xff] %vm780_vm2, %v751_v35  ;;  %v749_v47 = vmax.f32 %v717_v36, 0.0  ;;  %v722_v48 = vadd.f32 %v3564_v58, %v683_v37  ;;  %v681_v49 = vmul.f32 %v3556_v52, %v559_v44  ;;  %v623_v50 = vpop.f32.mrf.mxu1 }
  0xe1   : > { %856 = vst.msk [vmem:[#allocation2 + $0xf9] sm:$0xff] %vm780_vm2, %v767_v41  ;;  %v765_v54 = vmax.f32 %v733_v42, 0.0  ;;  %v738_v55 = vadd.f32 %v3564_v58, %v699_v43  ;;  %v697_v56 = vmul.f32 %v3556_v52, %v623_v50  ;;  %v3113_v57 = vpop.f32.mrf.mxu0 }
  0xe2   : > { %838 = vst.msk [vmem:[#allocation2 + $0x21] sm:$0xff] %vm780_vm2, %v749_v47  ;;  %v754_v60 = vmax.f32 %v722_v48, 0.0  ;;  %v720_v61 = vadd.f32 %v3564_v58, %v681_v49  ;;  %v684_v62 = vmul.f32 %v3113_v57, %v3556_v52  ;;  %v3129_v63 = vpop.f32.mrf.mxu1 }
  0xe3   : > { %854 = vst.msk [vmem:[#allocation2 + $0xe1] sm:$0xff] %vm780_vm2, %v765_v54  ;;  %v770_v2 = vmax.f32 %v738_v55, 0.0  ;;  %v736_v3 = vadd.f32 %v3564_v58, %v697_v56  ;;  %v700_v4 = vmul.f32 %v3129_v63, %v3556_v52  ;;  %v562_v7 = vpop.f32.mrf.mxu0  ;;  %v876_v9 = vld [vmem:[#allocation2 + $0x30] sm:$0xff] }
  0xe4   : > { %843 = vst.msk [vmem:[#allocation2 + $0x61] sm:$0xff] %vm780_vm2, %v754_v60  ;;  %v752_v12 = vmax.f32 %v720_v61, 0.0  ;;  %v723_v13 = vadd.f32 %v3564_v58, %v684_v62  ;;  %v682_v14 = vmul.f32 %v3556_v52, %v562_v7  ;;  %v626_v15 = vpop.f32.mrf.mxu1  ;;  %v892_v17 = vld [vmem:[#allocation2 + $0xf0] sm:$0xff]  ;;  %v3646_v19 = vmul.f32 %v3574_v1, %v876_v9 }
  0xe5   : > { %v992_v18 = vld [vmem:[#allocation2 + $0xf1] sm:$0xff]  ;;  %859 = vst.msk [vmem:[#allocation2 + $0x121] sm:$0xff] %vm780_vm2, %v770_v2  ;;  %v768_v20 = vmax.f32 %v736_v3, 0.0  ;;  %v739_v21 = vadd.f32 %v3564_v58, %v700_v4  ;;  %v698_v23 = vmul.f32 %v3556_v52, %v626_v15  ;;  %v3116_v24 = vpop.f32.mrf.mxu0  ;;  %v3652_v25 = vmul.f32 %v3574_v1, %v892_v17 }
  0xe6   : > { %5314 = vst [vmem:[#allocation10_spill] sm:$0xff] %v3646_v19  ;;  %841 = vst.msk [vmem:[#allocation2 + $0x49] sm:$0xff] %vm780_vm2, %v752_v12  ;;  %v755_v26 = vmax.f32 %v723_v13, 0.0  ;;  %v721_v28 = vadd.f32 %v3564_v58, %v682_v14  ;;  %v687_v29 = vmul.f32 %v3116_v24, %v3556_v52  ;;  %v3132_v30 = vpop.f32.mrf.mxu1  ;;  %v1487_v31 = vld [vmem:[#allocation2 + $0xd8] sm:$0xff]  ;;  %v3658_v33 = vmul.f32 %v3578_v5, %v992_v18 }
  0xe7   : > { %5315 = vst [vmem:[#allocation11_spill] sm:$0xff] %v3652_v25  ;;  %v1587_v32 = vld [vmem:[#allocation2 + $0xd9] sm:$0xff]  ;;  %857 = vst.msk [vmem:[#allocation2 + $0x109] sm:$0xff] %vm780_vm2, %v768_v20  ;;  %v771_v35 = vmax.f32 %v739_v21, 0.0  ;;  %v737_v36 = vadd.f32 %v3564_v58, %v698_v23  ;;  %v703_v37 = vmul.f32 %v3132_v30, %v3556_v52  ;;  %v575_v38 = vpop.f32.mrf.mxu0  ;;  %v3664_v40 = vmul.f32 %v3590_v16, %v1487_v31 }
  0xe8   : > { %5316 = vst [vmem:[#allocation12_spill] sm:$0xff] %v3658_v33  ;;  %844 = vst.msk [vmem:[#allocation2 + $0x69] sm:$0xff] %vm780_vm2, %v755_v26  ;;  %v753_v41 = vmax.f32 %v721_v28, 0.0  ;;  %v726_v42 = vadd.f32 %v3564_v58, %v687_v29  ;;  %v685_v43 = vmul.f32 %v3556_v52, %v575_v38  ;;  %v639_v44 = vpop.f32.mrf.mxu1  ;;  %v3670_v45 = vmul.f32 %v3594_v22, %v1587_v32  ;;  %v893_v47 = vld [vmem:[#allocation2 + $0xf8] sm:$0xff] }
  0xe9   : > { %v993_v48 = vld [vmem:[#allocation2 + $0xf9] sm:$0xff]  ;;  %860 = vst.msk [vmem:[#allocation2 + $0x129] sm:$0xff] %vm780_vm2, %v771_v35  ;;  %v769_v49 = vmax.f32 %v737_v36, 0.0  ;;  %v742_v50 = vadd.f32 %v3564_v58, %v703_v37  ;;  %v701_v53 = vmul.f32 %v3556_v52, %v639_v44  ;;  %v3117_v54 = vpop.f32.mrf.mxu0  ;;  %v3676_v55 = vmul.f32 %v3574_v1, %v893_v47 }
  0xea   : > { %5317 = vst [vmem:[#allocation13_spill] sm:$0xff] %v3670_v45  ;;  %842 = vst.msk [vmem:[#allocation2 + $0x51] sm:$0xff] %vm780_vm2, %v753_v41  ;;  %v758_v56 = vmax.f32 %v726_v42, 0.0  ;;  %v724_v57 = vadd.f32 %v3564_v58, %v685_v43  ;;  %v688_v60 = vmul.f32 %v3117_v54, %v3556_v52  ;;  %v3133_v61 = vpop.f32.mrf.mxu1  ;;  %v1488_v62 = vld [vmem:[#allocation2 + $0xe0] sm:$0xff]  ;;  %v3682_v3 = vmul.f32 %v3578_v5, %v993_v48 }
  0xeb   : > { %5318 = vst [vmem:[#allocation14_spill] sm:$0xff] %v3676_v55  ;;  %v1588_v63 = vld [vmem:[#allocation2 + $0xe1] sm:$0xff]  ;;  %858 = vst.msk [vmem:[#allocation2 + $0x111] sm:$0xff] %vm780_vm2, %v769_v49  ;;  %v774_v4 = vmax.f32 %v742_v50, 0.0  ;;  %v740_v7 = vadd.f32 %v3564_v58, %v701_v53  ;;  %v704_v9 = vmul.f32 %v3133_v61, %v3556_v52  ;;  %v578_v12 = vpop.f32.mrf.mxu0  ;;  %v3688_v13 = vmul.f32 %v3590_v16, %v1488_v62 }
  0xec   : > { %v1688_v2 = vld [vmem:[#allocation2 + $0xe2] sm:$0xff]  ;;  %5319 = vst [vmem:[#allocation15_spill] sm:$0xff] %v3682_v3  ;;  %v1687_v14 = vld [vmem:[#allocation2 + $0xda] sm:$0xff]  ;;  %847 = vst.msk [vmem:[#allocation2 + $0x91] sm:$0xff] %vm780_vm2, %v758_v56  ;;  %v756_v15 = vmax.f32 %v724_v57, 0.0  ;;  %v727_v17 = vadd.f32 %v3564_v58, %v688_v60  ;;  %v686_v18 = vmul.f32 %v3556_v52, %v578_v12  ;;  %v642_v20 = vpop.f32.mrf.mxu1  ;;  %v3694_v21 = vmul.f32 %v3594_v22, %v1588_v63 }
  0xed   : > { %v3696_v23 = vld [vmem:[#allocation2 + $0x120] sm:$0xff]  ;;  %863 = vst.msk [vmem:[#allocation2 + $0x151] sm:$0xff] %vm780_vm2, %v774_v4  ;;  %v772_v24 = vmax.f32 %v740_v7, 0.0  ;;  %v743_v26 = vadd.f32 %v3564_v58, %v704_v9  ;;  %v702_v28 = vmul.f32 %v3556_v52, %v642_v20  ;;  %v3120_v29 = vpop.f32.mrf.mxu0  ;;  %v3702_v30 = vmul.f32 %v3604_v34, %v1688_v2 }
  0xee   : > { %5320 = vst [vmem:[#allocation16_spill] sm:$0xff] %v3696_v23  ;;  %845 = vst.msk [vmem:[#allocation2 + $0x79] sm:$0xff] %vm780_vm2, %v756_v15  ;;  %v759_v31 = vmax.f32 %v727_v17, 0.0  ;;  %v725_v32 = vadd.f32 %v3564_v58, %v686_v18  ;;  %v691_v35 = vmul.f32 %v3120_v29, %v3556_v52  ;;  %v3136_v36 = vpop.f32.mrf.mxu1  ;;  %v3708_v37 = vmul.f32 %v3604_v34, %v1687_v14 }
  0xef   : > { %5321 = vst [vmem:[#allocation17_spill] sm:$0xff] %v3702_v30  ;;  %861 = vst.msk [vmem:[#allocation2 + $0x139] sm:$0xff] %vm780_vm2, %v772_v24  ;;  %v775_v38 = vmax.f32 %v743_v26, 0.0  ;;  %v741_v41 = vadd.f32 %v3564_v58, %v702_v28  ;;  %v707_v42 = vmul.f32 %v3136_v36, %v3556_v52  ;;  %v591_v43 = vpop.f32.mrf.mxu0  ;;  %v3713_v44 = vld [vmem:[#allocation2 + $0x68] sm:$0xff]  ;;  %v3717_v47 = vmul.f32 %v3574_v1, %v3696_v23 }
  0xf0   : > { %5322 = vst [vmem:[#allocation18_spill] sm:$0xff] %v3708_v37  ;;  %5323 = vst [vmem:[#allocation19_spill] sm:$0xff] %v3713_v44  ;;  %v757_v48 = vmax.f32 %v725_v32, 0.0  ;;  %v730_v49 = vadd.f32 %v3564_v58, %v691_v35  ;;  %v689_v50 = vmul.f32 %v3556_v52, %v591_v43  ;;  %v655_v53 = vpop.f32.mrf.mxu1  ;;  %v3722_v54 = vld [vmem:[#allocation2 + $0x128] sm:$0xff]  ;;  %v3730_v60 = vmul.f32 %v3574_v1, %v3713_v44 }
  0xf1   : > { %5324 = vst [vmem:[#allocation20_spill] sm:$0xff] %v3717_v47  ;;  %848 = vst.msk [vmem:[#allocation2 + $0x99] sm:$0xff] %vm780_vm2, %v759_v31  ;;  %v3724_v56 = vld [vmem:[#allocation2 + $0x129] sm:$0xff]  ;;  %v773_v61 = vmax.f32 %v741_v41, 0.0  ;;  %v746_v62 = vadd.f32 %v3564_v58, %v707_v42  ;;  %v705_v63 = vmul.f32 %v3556_v52, %v655_v53  ;;  %v3121_v2 = vpop.f32.mrf.mxu0  ;;  %v3737_v4 = vmul.f32 %v3574_v1, %v3722_v54 }
  0xf2   : > { %5325 = vst [vmem:[#allocation21_spill] sm:$0xff] %v3722_v54  ;;  %5326 = vst [vmem:[#allocation22_spill] sm:$0xff] %v3724_v56  ;;  %v3726_v57 = vld [vmem:[#allocation2 + $0x12a] sm:$0xff]  ;;  %v762_v7 = vmax.f32 %v730_v49, 0.0  ;;  %v728_v9 = vadd.f32 %v3564_v58, %v689_v50  ;;  %v692_v12 = vmul.f32 %v3121_v2, %v3556_v52  ;;  %v3137_v14 = vpop.f32.mrf.mxu1  ;;  %v3744_v15 = vmul.f32 %v3578_v5, %v3724_v56 }
  0xf3   : > { %5327 = vst [vmem:[#allocation23_spill] sm:$0xff] %v3726_v57  ;;  %5328 = vst [vmem:[#allocation24_spill] sm:$0xff] %v3730_v60  ;;  %v778_v17 = vmax.f32 %v746_v62, 0.0  ;;  %v744_v18 = vadd.f32 %v3564_v58, %v705_v63  ;;  %v708_v20 = vmul.f32 %v3137_v14, %v3556_v52  ;;  %v594_v24 = vpop.f32.mrf.mxu0  ;;  %v3749_v26 = vld [vmem:[#allocation2 + $0x90] sm:$0xff]  ;;  %v3755_v29 = vmul.f32 %v3580_v6, %v3726_v57 }
  0xf4   : > { %864 = vst.msk [vmem:[#allocation2 + $0x159] sm:$0xff] %vm780_vm2, %v775_v38  ;;  %5329 = vst [vmem:[#allocation25_spill] sm:$0xff] %v3737_v4  ;;  %v3751_v28 = vld [vmem:[#allocation2 + $0x91] sm:$0xff]  ;;  %v760_v31 = vmax.f32 %v728_v9, 0.0  ;;  %v731_v32 = vadd.f32 %v3564_v58, %v692_v12  ;;  %v690_v35 = vmul.f32 %v3556_v52, %v594_v24  ;;  %v658_v36 = vpop.f32.mrf.mxu1  ;;  %v920_v42 = vmul.f32 %v3574_v1, %v3749_v26 }
  0xf5   : > { %846 = vst.msk [vmem:[#allocation2 + $0x81] sm:$0xff] %vm780_vm2, %v757_v48  ;;  %5330 = vst [vmem:[#allocation26_spill] sm:$0xff] %v3744_v15  ;;  %v3760_v38 = vld [vmem:[#allocation2 + $0x150] sm:$0xff]  ;;  %v776_v43 = vmax.f32 %v744_v18, 0.0  ;;  %v747_v48 = vadd.f32 %v3564_v58, %v708_v20  ;;  %v706_v49 = vmul.f32 %v3556_v52, %v658_v36  ;;  %v1020_v63 = vmul.f32 %v3578_v5, %v3751_v28 }
  0xf6   : > { %862 = vst.msk [vmem:[#allocation2 + $0x141] sm:$0xff] %vm780_vm2, %v773_v61  ;;  %5331 = vst [vmem:[#allocation27_spill] sm:$0xff] %v3749_v26  ;;  %v3762_v41 = vld [vmem:[#allocation2 + $0x151] sm:$0xff]  ;;  %v936_v50 = vmul.f32 %v3574_v1, %v3760_v38  ;;  %v763_v53 = vmax.f32 %v731_v32, 0.0  ;;  %v729_v61 = vadd.f32 %v3564_v58, %v690_v35 }
  0xf7   : > { %5332 = vst [vmem:[#allocation28_spill] sm:$0xff] %v3751_v28  ;;  %5333 = vst [vmem:[#allocation29_spill] sm:$0xff] %v3755_v29  ;;  %v1036_v62 = vmul.f32 %v3578_v5, %v3762_v41  ;;  %v3777_v2 = vld [vmem:[#allocation2 + $0x138] sm:$0xff]  ;;  %v779_v52 = vmax.f32 %v747_v48, 0.0  ;;  %v745_v9 = vadd.f32 %v3564_v58, %v706_v49 }
  0xf8   : > { %851 = vst.msk [vmem:[#allocation2 + $0xc1] sm:$0xff] %vm780_vm2, %v762_v7  ;;  %5334 = vst [vmem:[#allocation30_spill] sm:$0xff] %v3760_v38  ;;  %v3779_v7 = vld [vmem:[#allocation2 + $0x139] sm:$0xff]  ;;  %v3791_v18 = vmul.f32 %v3574_v1, %v3777_v2  ;;  %v761_v24 = vmax.f32 %v729_v61, 0.0 }
  0xf9   : > { %5335 = vst [vmem:[#allocation31_spill] sm:$0xff] %v3762_v41  ;;  %867 = vst.msk [vmem:[#allocation2 + $0x181] sm:$0xff] %vm780_vm2, %v778_v17  ;;  %v3783_v12 = vld [vmem:[#allocation2 + $0x98] sm:$0xff]  ;;  %v3795_v20 = vmul.f32 %v3578_v5, %v3779_v7  ;;  %v777_v48 = vmax.f32 %v745_v9, 0.0  ;;  %v1068_v3 = vadd.f32 %v1036_v62, %v936_v50  ;;  %v1052_v9 = vadd.f32 %v1020_v63, %v920_v42 }
  0xfa   : > { %849 = vst.msk [vmem:[#allocation2 + $0xa9] sm:$0xff] %vm780_vm2, %v760_v31  ;;  %5336 = vst [vmem:[#allocation32_spill] sm:$0xff] %v3777_v2  ;;  %v3785_v14 = vld [vmem:[#allocation2 + $0x99] sm:$0xff]  ;;  %v921_v35 = vmul.f32 %v3574_v1, %v3783_v12 }
  0xfb   : > { %5337 = vst [vmem:[#allocation33_spill] sm:$0xff] %v3779_v7  ;;  %865 = vst.msk [vmem:[#allocation2 + $0x169] sm:$0xff] %vm780_vm2, %v776_v43  ;;  %v3787_v17 = vld [vmem:[#allocation2 + $0x9a] sm:$0xff]  ;;  %v1021_v36 = vmul.f32 %v3578_v5, %v3785_v14  ;;  %v3817_v19 = vld [vmem:[#allocation2 + $0x152] sm:$0xff] }
  0xfc   : > { %5338 = vst [vmem:[#allocation34_spill] sm:$0xff] %v3783_v12  ;;  %5339 = vst [vmem:[#allocation35_spill] sm:$0xff] %v3785_v14  ;;  %v3798_v31 = vld [vmem:[#allocation2 + $0x158] sm:$0xff]  ;;  %v1121_v43 = vmul.f32 %v3580_v6, %v3787_v17 }
  0xfd   : > { %5340 = vst [vmem:[#allocation36_spill] sm:$0xff] %v3787_v17  ;;  %5341 = vst [vmem:[#allocation37_spill] sm:$0xff] %v3791_v18  ;;  %v3800_v58 = vld [vmem:[#allocation2 + $0x159] sm:$0xff]  ;;  %v937_v49 = vmul.f32 %v3574_v1, %v3798_v31  ;;  %v1053_v25 = vadd.f32 %v1021_v36, %v921_v35  ;;  %v3826_v23 = vld [vmem:[#allocation2 + $0x141] sm:$0xff] }
  0xfe   : > { %5342 = vst [vmem:[#allocation38_spill] sm:$0xff] %v3795_v20  ;;  %852 = vst.msk [vmem:[#allocation2 + $0xc9] sm:$0xff] %vm780_vm2, %v763_v53  ;;  %v3802_v32 = vld [vmem:[#allocation2 + $0x15a] sm:$0xff]  ;;  %v1037_v53 = vmul.f32 %v3578_v5, %v3800_v58  ;;  %v3819_v33 = vld [vmem:[#allocation2 + $0x92] sm:$0xff]  ;;  %v3841_v42 = vmul.f32 %v3578_v5, %v3826_v23 }
  0xff   : > { %5343 = vst [vmem:[#allocation39_spill] sm:$0xff] %v3798_v31  ;;  %5344 = vst [vmem:[#allocation40_spill] sm:$0xff] %v3800_v58  ;;  %v1137_v61 = vmul.f32 %v3580_v6, %v3802_v32  ;;  %v3824_v55 = vld [vmem:[#allocation2 + $0x140] sm:$0xff] }
 0x100   : > { %5345 = vst [vmem:[#allocation41_spill] sm:$0xff] %v3802_v32  ;;  %868 = vst.msk [vmem:[#allocation2 + $0x189] sm:$0xff] %vm780_vm2, %v779_v52  ;;  %v1136_v52 = vmul.f32 %v3580_v6, %v3817_v19  ;;  %v3829_v44 = vld [vmem:[#allocation2 + $0xc0] sm:$0xff]  ;;  %v1069_v56 = vadd.f32 %v1037_v53, %v937_v49  ;;  %v3837_v50 = vmul.f32 %v3574_v1, %v3824_v55 }
 0x101   : > { %5346 = vst [vmem:[#allocation42_spill] sm:$0xff] %v3817_v19  ;;  %5347 = vst [vmem:[#allocation43_spill] sm:$0xff] %v3819_v33  ;;  %v3831_v57 = vld [vmem:[#allocation2 + $0xc1] sm:$0xff]  ;;  %v3845_v35 = vmul.f32 %v3584_v10, %v3829_v44  ;;  %v3863_v7 = vld [vmem:[#allocation2 + $0xa9] sm:$0xff] }
 0x102   : > { %850 = vst.msk [vmem:[#allocation2 + $0xb1] sm:$0xff] %vm780_vm2, %v761_v24  ;;  %5348 = vst [vmem:[#allocation44_spill] sm:$0xff] %v3824_v55  ;;  %v1120_v24 = vmul.f32 %v3580_v6, %v3819_v33  ;;  %v1202_v62 = vld [vmem:[#allocation2 + $0x180] sm:$0xff]  ;;  %v3849_v36 = vmul.f32 %v3586_v11, %v3831_v57  ;;  %v3853_v49 = vadd.f32 %v1136_v52, %v1068_v3  ;;  %v3861_v47 = vld [vmem:[#allocation2 + $0xa8] sm:$0xff] }
 0x103   : > { %5349 = vst [vmem:[#allocation45_spill] sm:$0xff] %v3826_v23  ;;  %866 = vst.msk [vmem:[#allocation2 + $0x171] sm:$0xff] %vm780_vm2, %v777_v48  ;;  %v1302_v63 = vld [vmem:[#allocation2 + $0x181] sm:$0xff]  ;;  %v3851_v48 = vadd.f32 %v1121_v43, %v1053_v25  ;;  %v3856_v53 = vmul.f32 %v3584_v10, %v1202_v62  ;;  %v1169_v2 = vadd.f32 %v1137_v61, %v1069_v56  ;;  %v3870_v25 = vld [vmem:[#allocation2 + $0x169] sm:$0xff] }
 0x104   : > { %5350 = vst [vmem:[#allocation46_spill] sm:$0xff] %v3829_v44  ;;  %5351 = vst [vmem:[#allocation47_spill] sm:$0xff] %v3831_v57  ;;  %v3859_v54 = vmul.f32 %v3586_v11, %v1302_v63  ;;  %v3866_v60 = vmul.f32 %v3590_v16, %v1202_v62  ;;  %v3868_v29 = vld [vmem:[#allocation2 + $0x168] sm:$0xff]  ;;  %v922_v3 = vmul.f32 %v3574_v1, %v3861_v47 }
 0x105   : > { %5352 = vst [vmem:[#allocation48_spill] sm:$0xff] %v3837_v50  ;;  %5353 = vst [vmem:[#allocation49_spill] sm:$0xff] %v3841_v42  ;;  %v1022_v43 = vmul.f32 %v3578_v5, %v3863_v7  ;;  %v3877_v52 = vmul.f32 %v3594_v22, %v1302_v63  ;;  %v3879_v23 = vadd.f32 %v1120_v24, %v1052_v9  ;;  %v3881_v55 = vld [vmem:[#allocation2 + $0xc8] sm:$0xff] }
 0x106   : > { %5354 = vst [vmem:[#allocation50_spill] sm:$0xff] %v3861_v47  ;;  %5355 = vst [vmem:[#allocation51_spill] sm:$0xff] %v3863_v7  ;;  %v3883_v56 = vld [vmem:[#allocation2 + $0xc9] sm:$0xff]  ;;  %v938_v62 = vmul.f32 %v3574_v1, %v3868_v29  ;;  %v1038_v15 = vmul.f32 %v3578_v5, %v3870_v25  ;;  %v3893_v4 = vmul.f32 %v3584_v10, %v3868_v29 }
 0x107   : > { %5356 = vst [vmem:[#allocation52_spill] sm:$0xff] %v3866_v60  ;;  %5357 = vst [vmem:[#allocation53_spill] sm:$0xff] %v3868_v29  ;;  %v3885_v61 = vld [vmem:[#allocation2 + $0xca] sm:$0xff]  ;;  %v3897_v9 = vmul.f32 %v3586_v11, %v3870_v25  ;;  %v1223_v28 = vmul.f32 %v3584_v10, %v3881_v55  ;;  %v1323_v26 = vmul.f32 %v3586_v11, %v3883_v56  ;;  %v1402_v57 = vld [vmem:[#allocation2 + $0x182] sm:$0xff] }
 0x108   : > { %5358 = vst [vmem:[#allocation54_spill] sm:$0xff] %v3870_v25  ;;  %5359 = vst [vmem:[#allocation55_spill] sm:$0xff] %v3877_v52  ;;  %v1203_v24 = vld [vmem:[#allocation2 + $0x188] sm:$0xff]  ;;  %v1423_v19 = vmul.f32 %v3599_v27, %v3885_v61  ;;  %v1054_v41 = vadd.f32 %v1022_v43, %v922_v3  ;;  %v1070_v14 = vadd.f32 %v1038_v15, %v938_v62 }
 0x109   : > { %5360 = vst [vmem:[#allocation56_spill] sm:$0xff] %v3879_v23  ;;  %v1303_v63 = vld [vmem:[#allocation2 + $0x189] sm:$0xff]  ;;  %v1239_v29 = vmul.f32 %v3584_v10, %v1203_v24  ;;  %v3910_v18 = vld [vmem:[#allocation2 + $0xb1] sm:$0xff]  ;;  %v1538_v42 = vmul.f32 %v3590_v16, %v1203_v24 }
 0x10a   : > { %v1403_v33 = vld [vmem:[#allocation2 + $0x18a] sm:$0xff]  ;;  %v1339_v38 = vmul.f32 %v3586_v11, %v1303_v63  ;;  %v3912_v17 = vld [vmem:[#allocation2 + $0xb2] sm:$0xff]  ;;  %v1023_v43 = vmul.f32 %v3578_v5, %v3910_v18  ;;  %v3944_v60 = vld [vmem:[#allocation2 + $0xc2] sm:$0xff] }
 0x10b   : > { %v1439_v25 = vmul.f32 %v3599_v27, %v1403_v33  ;;  %v3908_v20 = vld [vmem:[#allocation2 + $0xb0] sm:$0xff]  ;;  %v1123_v31 = vmul.f32 %v3580_v6, %v3912_v17  ;;  %v1422_v37 = vmul.f32 %v3599_v27, %v3944_v60 }
 0x10c   : > { %v3914_v12 = vld [vmem:[#allocation2 + $0x170] sm:$0xff]  ;;  %v923_v3 = vmul.f32 %v3574_v1, %v3908_v20 }
 0x10d   : > { %5361 = vst [vmem:[#allocation57_spill] sm:$0xff] %v3914_v12  ;;  %v3916_v32 = vld [vmem:[#allocation2 + $0x171] sm:$0xff]  ;;  %v939_v15 = vmul.f32 %v3574_v1, %v3914_v12  ;;  %v1237_v7 = vmul.f32 %v3584_v10, %v3914_v12  ;;  %v1438_v1 = vmul.f32 %v3599_v27, %v1402_v57 }
 0x10e   : > { %v3918_v58 = vld [vmem:[#allocation2 + $0x172] sm:$0xff]  ;;  %v1039_v62 = vmul.f32 %v3578_v5, %v3916_v32  ;;  %v3933_v52 = vld [vmem:[#allocation2 + $0x16a] sm:$0xff]  ;;  %v1055_v23 = vadd.f32 %v1023_v43, %v923_v3  ;;  %v1337_v30 = vmul.f32 %v3586_v11, %v3916_v32 }
 0x10f   : > { %v1139_v50 = vmul.f32 %v3580_v6, %v3918_v58  ;;  %v3935_v44 = vld [vmem:[#allocation2 + $0xaa] sm:$0xff]  ;;  %v1138_v24 = vmul.f32 %v3580_v6, %v3933_v52  ;;  %v1269_v8 = vadd.f32 %v1237_v7, %v1169_v2  ;;  %v1437_v47 = vmul.f32 %v3599_v27, %v3918_v58 }
 0x110   : > { %5362 = vst [vmem:[#allocation58_spill] sm:$0xff] %v3935_v44  ;;  %v1122_v5 = vmul.f32 %v3580_v6, %v3935_v44  ;;  %v1071_v0 = vadd.f32 %v1039_v62, %v939_v15  ;;  %v1155_v12 = vadd.f32 %v1123_v31, %v1055_v23  ;;  %v1638_v6 = vmul.f32 %v3594_v22, %v1303_v63 }
 0x111   : > { %v1170_v3 = vadd.f32 %v1138_v24, %v1070_v14  ;;  %v1369_v45 = vadd.f32 %v1337_v30, %v1269_v8  ;;  %v1738_v44 = vmul.f32 %v3604_v34, %v1403_v33  ;;  %v1221_v7 = vmul.f32 %v3584_v10, %v3908_v20  ;;  %v421_v8 = vld [vmem:[%s5198_s10 + $0x8] sm:$0xff]  ;;  %v5365_v24 = vld [vmem:[#allocation50_spill] sm:$0xff] }
 0x112   : > { %v1154_v43 = vadd.f32 %v1122_v5, %v1054_v41  ;;  %v1171_v51 = vadd.f32 %v1139_v50, %v1071_v0  ;;  %v1255_v15 = vadd.f32 %v1223_v28, %v1155_v12  ;;  %v1321_v5 = vmul.f32 %v3586_v11, %v3910_v18  ;;  %1837 = vmatprep.mubr.f32.mxu1 %v421_v8 }
 0x113   : > { %v1270_v62 = vadd.f32 %v3856_v53, %v1170_v3  ;;  %v1469_v14 = vadd.f32 %v1437_v47, %v1369_v45  ;;  %v1421_v0 = vmul.f32 %v3599_v27, %v3912_v17  ;;  %v1253_v41 = vadd.f32 %v1221_v7, %v3851_v48  ;;  %2769 = vmatprep.mubr.f32.mxu0 %v421_v8  ;;  %v5367_v3 = vld [vmem:[#allocation9_spill] sm:$0xff]  ;;  %v5370_v7 = vld [vmem:[#allocation52_spill] sm:$0xff] }
 0x114   : > { %v1254_v2 = vadd.f32 %v3845_v35, %v1154_v43  ;;  %v1271_v23 = vadd.f32 %v1239_v29, %v1171_v51  ;;  %v1355_v33 = vadd.f32 %v1323_v26, %v1255_v15  ;;  %v1522_v47 = vmul.f32 %v3590_v16, %v3881_v55  ;;  %v5368_v15 = vld [vmem:[#allocation18_spill] sm:$0xff] }
 0x115   : > { %v1370_v30 = vadd.f32 %v3859_v54, %v1270_v62  ;;  %v1570_v45 = vadd.f32 %v1538_v42, %v1469_v14  ;;  %v1622_v29 = vmul.f32 %v3594_v22, %v3883_v56  ;;  %v1353_v26 = vadd.f32 %v1321_v5, %v1253_v41  ;;  %v5371_v14 = vld [vmem:[#allocation56_spill] sm:$0xff]  ;;  %v5374_v41 = vld [vmem:[#allocation46_spill] sm:$0xff] }
 0x116   : > { %v1354_v28 = vadd.f32 %v3849_v36, %v1254_v2  ;;  %v1371_v51 = vadd.f32 %v1339_v38, %v1271_v23  ;;  %v1455_v12 = vadd.f32 %v1423_v19, %v1355_v33  ;;  %v1722_v36 = vmul.f32 %v3604_v34, %v3885_v61  ;;  %v5364_v61 = vld [vmem:[#allocation7_spill] sm:$0xff]  ;;  %v5369_v2 = vld [vmem:[#allocation8_spill] sm:$0xff] }
 0x117   : > { %v1470_v31 = vadd.f32 %v1438_v1, %v1370_v30  ;;  %v1670_v54 = vadd.f32 %v1638_v6, %v1570_v45  ;;  %v1268_v38 = vadd.f32 %v3893_v4, %v3853_v49  ;;  %v1453_v53 = vadd.f32 %v1421_v0, %v1353_v26  ;;  %v5363_v4 = vld [vmem:[#allocation13_spill] sm:$0xff]  ;;  %v5372_v0 = vld [vmem:[#allocation51_spill] sm:$0xff]  ;;  %v5373_v30 = vld [vmem:[#allocation58_spill] sm:$0xff] }
 0x118   : > { %v1454_v50 = vadd.f32 %v1422_v37, %v1354_v28  ;;  %v1471_v35 = vadd.f32 %v1439_v25, %v1371_v51  ;;  %v1556_v42 = vadd.f32 %v3688_v13, %v1455_v12  ;;  %v1436_v6 = vmul.f32 %v3599_v27, %v3933_v52  ;;  %v5375_v45 = vld [vmem:[#allocation47_spill] sm:$0xff]  ;;  %v5377_v26 = vld [vmem:[#allocation48_spill] sm:$0xff] }
 0x119   : > { %v1571_v55 = vadd.f32 %v3616_v46, %v1470_v31  ;;  %v1770_v1 = vadd.f32 %v1738_v44, %v1670_v54  ;;  %v1368_v37 = vadd.f32 %v3897_v9, %v1268_v38  ;;  %v1554_v13 = vadd.f32 %v1522_v47, %v1453_v53  ;;  %v5366_v44 = vld [vmem:[#allocation17_spill] sm:$0xff] }
 0x11a   : > { %v1555_v48 = vadd.f32 %v3664_v40, %v1454_v50  ;;  %v1572_v19 = vadd.f32 %v3610_v39, %v1471_v35  ;;  %v1656_v25 = vadd.f32 %v3694_v21, %v1556_v42  ;;  %v1737_v40 = vmul.f32 %v3604_v34, %v1402_v57  ;;  %v3998_v57 = vld [vmem:[#allocation2 + $0x142] sm:$0xff]  ;;  %v5379_v42 = vld [vmem:[#allocation6_spill] sm:$0xff] }
 0x11b   : > { %v1671_v56 = vadd.f32 %v3628_v59, %v1571_v55  ;;  %v1468_v63 = vadd.f32 %v1436_v6, %v1368_v37  ;;  %v1220_v39 = vmul.f32 %v3584_v10, %v5365_v24  ;;  %v1654_v21 = vadd.f32 %v1622_v29, %v1554_v13  ;;  %v5376_v29 = vld [vmem:[#allocation55_spill] sm:$0xff]  ;;  %v5378_v35 = vld [vmem:[#allocation49_spill] sm:$0xff] }
 0x11c   : > { %v1655_v49 = vadd.f32 %v5363_v4, %v1555_v48  ;;  %v1672_v46 = vadd.f32 %v5364_v61, %v1572_v19  ;;  %v1756_v9 = vadd.f32 %v5366_v44, %v1656_v25  ;;  %v1320_v8 = vmul.f32 %v3586_v11, %v5372_v0  ;;  %v4013_v38 = vld [vmem:[#allocation2 + $0x81] sm:$0xff]  ;;  %v5380_v48 = vld [vmem:[#allocation39_spill] sm:$0xff] }
 0x11d   : > { %v1771_v43 = vadd.f32 %v5367_v3, %v1671_v56  ;;  %v1569_v23 = vadd.f32 %v5370_v7, %v1468_v63  ;;  %v1252_v5 = vadd.f32 %v1220_v39, %v5371_v14  ;;  %v1754_v33 = vadd.f32 %v1722_v36, %v1654_v21  ;;  %v4011_v36 = vld [vmem:[#allocation2 + $0x80] sm:$0xff]  ;;  %v5382_v6 = vld [vmem:[#allocation41_spill] sm:$0xff] }
 0x11e   : > { %v1755_v62 = vadd.f32 %v5368_v15, %v1655_v49  ;;  %v1772_v59 = vadd.f32 %v5369_v2, %v1672_v46  ;;  %v1420_v28 = vmul.f32 %v3599_v27, %v5373_v30  ;;  %v1521_v51 = vmul.f32 %v3590_v16, %v5374_v41  ;;  %v5381_v19 = vld [vmem:[#allocation40_spill] sm:$0xff]  ;;  %v5383_v49 = vld [vmem:[#allocation57_spill] sm:$0xff]  ;;  %v5386_v15 = vld [vmem:[#allocation34_spill] sm:$0xff] }
 0x11f   : > { %v1621_v47 = vmul.f32 %v3594_v22, %v5375_v45  ;;  %v1669_v12 = vadd.f32 %v5376_v29, %v1569_v23  ;;  %v1352_v31 = vadd.f32 %v1320_v8, %v1252_v5  ;;  %v1721_v50 = vmul.f32 %v3604_v34, %v3944_v60  ;;  %v4023_v25 = vld [vmem:[#allocation2 + $0x82] sm:$0xff]  ;;  %v4041_v2 = vld [vmem:[#allocation2 + $0x13a] sm:$0xff]  ;;  %v5390_v41 = vld [vmem:[#allocation38_spill] sm:$0xff] }
 0x120   : > { %2987 = vmatprep.subr.mxu1 %v1772_v59  ;;  %v1067_v54 = vadd.f32 %v5378_v35, %v5377_v26  ;;  %v1135_v55 = vmul.f32 %v5379_v42, %v3998_v57  ;;  %v1235_v53 = vmul.f32 %v3584_v10, %v5380_v48  ;;  %v1335_v37 = vmul.f32 %v3586_v11, %v5381_v19  ;;  %v5384_v39 = vld [vmem:[#allocation4_spill] sm:$0xff]  ;;  %v5392_v35 = vld [vmem:[#allocation31_spill] sm:$0xff] }
 0x121   : > { %2988 = vmatpush3.msra.mxu1 %v1756_v9  ;;  %v1435_v60 = vmul.f32 %v3599_v27, %v5382_v6  ;;  %v1769_v56 = vadd.f32 %v1737_v40, %v1669_v12  ;;  %v1452_v4 = vadd.f32 %v1420_v28, %v1352_v31  ;;  %v1536_v13 = vmul.f32 %v3590_v16, %v5383_v49  ;;  %v5385_v9 = vld [vmem:[#allocation5_spill] sm:$0xff]  ;;  %v5388_v7 = vld [vmem:[#allocation36_spill] sm:$0xff]  ;;  %v5391_v12 = vld [vmem:[#allocation30_spill] sm:$0xff] }
 0x122   : > { %2989 = vmatprep.subr.mxu1 %v1771_v43  ;;  %v1636_v61 = vmul.f32 %v3594_v22, %v3916_v32  ;;  %v1167_v46 = vadd.f32 %v1135_v55, %v1067_v54  ;;  %v1736_v63 = vmul.f32 %v3604_v34, %v3918_v58  ;;  %v919_v44 = vmul.f32 %v5384_v39, %v4011_v36  ;;  %v5387_v32 = vld [vmem:[#allocation35_spill] sm:$0xff]  ;;  %v5389_v28 = vld [vmem:[#allocation37_spill] sm:$0xff]  ;;  %v5393_v54 = vld [vmem:[#allocation42_spill] sm:$0xff] }
 0x123   : > { %2990 = vmatpush3.msra.mxu1 %v1755_v62  ;;  %v1019_v3 = vmul.f32 %v5385_v9, %v4013_v38  ;;  %v1553_v40 = vadd.f32 %v1521_v51, %v1452_v4  ;;  %v1119_v43 = vmul.f32 %v5379_v42, %v4023_v25  ;;  %v1219_v21 = vmul.f32 %v3584_v10, %v5386_v15  ;;  %v4061_v26 = vld [vmem:[#allocation2 + $0x7a] sm:$0xff] }
 0x124   : > { %2991 = vmatprep.subr.mxu1 %v1770_v1  ;;  %v1319_v62 = vmul.f32 %v3586_v11, %v5387_v32  ;;  %v1267_v58 = vadd.f32 %v1235_v53, %v1167_v46  ;;  %v1419_v23 = vmul.f32 %v3599_v27, %v5388_v7  ;;  %v1520_v1 = vmul.f32 %v3590_v16, %v3908_v20  ;;  %v4057_v20 = vld [vmem:[#allocation2 + $0x78] sm:$0xff]  ;;  %v5394_v53 = vld [vmem:[#allocation53_spill] sm:$0xff]  ;;  %v5395_v46 = vld [vmem:[#allocation54_spill] sm:$0xff] }
 0x125   : > { %2992 = vmatpush3.msra.mxu1 %v1754_v33  ;;  %v1051_v59 = vadd.f32 %v1019_v3, %v919_v44  ;;  %v1653_v14 = vadd.f32 %v1621_v47, %v1553_v40  ;;  %v1620_v5 = vmul.f32 %v3594_v22, %v3910_v18  ;;  %v1720_v8 = vmul.f32 %v3604_v34, %v3912_v17  ;;  %v4059_v47 = vld [vmem:[#allocation2 + $0x79] sm:$0xff] }
 0x126   : > { %2993 = vmatprep.subr.mxu1 %v1769_v56  ;;  %v1066_v51 = vadd.f32 %v5390_v41, %v5389_v28  ;;  %v1367_v33 = vadd.f32 %v1335_v37, %v1267_v58  ;;  %v1134_v29 = vmul.f32 %v5379_v42, %v4041_v2  ;;  %v1234_v31 = vmul.f32 %v3584_v10, %v5391_v12  ;;  %v5397_v41 = vld [vmem:[#allocation28_spill] sm:$0xff] }
 0x127   : > { %v1151_v45 = vadd.f32 %v1119_v43, %v1051_v59  ;;  %v1753_v18 = vadd.f32 %v1721_v50, %v1653_v14  ;;  %v1334_v17 = vmul.f32 %v3586_v11, %v5392_v35  ;;  %v1434_v55 = vmul.f32 %v3599_v27, %v5393_v54  ;;  %v5396_v59 = vld [vmem:[#allocation27_spill] sm:$0xff] }
 0x128   : > { %v1535_v37 = vmul.f32 %v3590_v16, %v5394_v53  ;;  %v1467_v56 = vadd.f32 %v1435_v60, %v1367_v33  ;;  %v1166_v49 = vadd.f32 %v1134_v29, %v1066_v51  ;;  %v1635_v44 = vmul.f32 %v3594_v22, %v5395_v46  ;;  %v5401_v46 = vld [vmem:[#allocation44_spill] sm:$0xff] }
 0x129   : > { %v1251_v4 = vadd.f32 %v1219_v21, %v1151_v45  ;;  %2994 = vmatpush3.msra.mxu1 %v1753_v18  ;;  %v1735_v3 = vmul.f32 %v3604_v34, %v3933_v52  ;;  %v918_v50 = vmul.f32 %v5384_v39, %v4057_v20  ;;  %v1018_v40 = vmul.f32 %v5385_v9, %v4059_v47  ;;  %v5398_v52 = vld [vmem:[#allocation43_spill] sm:$0xff] }
 0x12a   : > { %v1118_v43 = vmul.f32 %v5379_v42, %v4061_v26  ;;  %v1568_v58 = vadd.f32 %v1536_v13, %v1467_v56  ;;  %v1266_v21 = vadd.f32 %v1234_v31, %v1166_v49  ;;  %v1218_v14 = vmul.f32 %v3584_v10, %v5396_v59  ;;  %v5399_v56 = vld [vmem:[#allocation25_spill] sm:$0xff] }
 0x12b   : > { %v1351_v60 = vadd.f32 %v1319_v62, %v1251_v4  ;;  %v1050_v28 = vadd.f32 %v1018_v40, %v918_v50  ;;  %v1318_v51 = vmul.f32 %v3586_v11, %v5397_v41  ;;  %v1418_v33 = vmul.f32 %v3599_v27, %v5398_v52  ;;  %v5400_v4 = vld [vmem:[#allocation26_spill] sm:$0xff] }
 0x12c   : > { %v1519_v45 = vmul.f32 %v3590_v16, %v5365_v24  ;;  %v1668_v29 = vadd.f32 %v1636_v61, %v1568_v58  ;;  %v1366_v53 = vadd.f32 %v1334_v17, %v1266_v21  ;;  %v1619_v13 = vmul.f32 %v3594_v22, %v5372_v0  ;;  %v5402_v24 = vld [vmem:[#allocation45_spill] sm:$0xff] }
 0x12d   : > { %v1451_v18 = vadd.f32 %v1419_v23, %v1351_v60  ;;  %v1150_v62 = vadd.f32 %v1118_v43, %v1050_v28  ;;  %v1719_v31 = vmul.f32 %v3604_v34, %v5373_v30  ;;  %v1065_v49 = vadd.f32 %v5400_v4, %v5399_v56  ;;  %v4097_v23 = vld [vmem:[#allocation2 + $0x69] sm:$0xff] }
 0x12e   : > { %v1233_v50 = vmul.f32 %v3584_v10, %v5401_v46  ;;  %v1768_v40 = vadd.f32 %v1736_v63, %v1668_v29  ;;  %v1466_v41 = vadd.f32 %v1434_v55, %v1366_v53  ;;  %v1333_v61 = vmul.f32 %v3586_v11, %v5402_v24  ;;  %5403 = vst [vmem:[#allocation13_spill] sm:$0xff] %v4097_v23  ;;  %v4099_v17 = vld [vmem:[#allocation2 + $0x6a] sm:$0xff]  ;;  %v4123_v56 = vld [vmem:[#allocation2 + $0x122] sm:$0xff] }
 0x12f   : > { %v1552_v52 = vadd.f32 %v1520_v1, %v1451_v18  ;;  %5404 = vst [vmem:[#allocation7_spill] sm:$0xff] %v4099_v17  ;;  %v1250_v0 = vadd.f32 %v1218_v14, %v1150_v62  ;;  %v5405_v43 = vld [vmem:[#allocation29_spill] sm:$0xff]  ;;  %v1433_v30 = vmul.f32 %v3599_v27, %v3998_v57  ;;  %v1534_v60 = vmul.f32 %v3590_v16, %v5380_v48 }
 0x130   : > { %v1165_v58 = vadd.f32 %v5405_v43, %v1065_v49  ;;  %2995 = vmatprep.subr.mxu1 %v1768_v40  ;;  %v1567_v1 = vadd.f32 %v1535_v37, %v1466_v41  ;;  %v1634_v55 = vmul.f32 %v3594_v22, %v5381_v19  ;;  %v1734_v21 = vmul.f32 %v3604_v34, %v5382_v6  ;;  %v4118_v19 = vld [vmem:[#allocation2 + $0x121] sm:$0xff] }
 0x131   : > { %v1652_v63 = vadd.f32 %v1620_v5, %v1552_v52  ;;  %v1350_v28 = vadd.f32 %v1318_v51, %v1250_v0  ;;  %v1017_v14 = vmul.f32 %v5385_v9, %v4097_v23  ;;  %v1117_v18 = vmul.f32 %v5379_v42, %v4099_v17  ;;  %v5406_v41 = vld [vmem:[#allocation24_spill] sm:$0xff] }
 0x132   : > { %v1265_v29 = vadd.f32 %v1233_v50, %v1165_v58  ;;  %v1667_v62 = vadd.f32 %v1635_v44, %v1567_v1  ;;  %v1217_v48 = vmul.f32 %v3584_v10, %v4011_v36  ;;  %v1317_v5 = vmul.f32 %v3586_v11, %v4013_v38  ;;  %v4133_v0 = vld [vmem:[#allocation2 + $0x60] sm:$0xff]  ;;  %v5408_v58 = vld [vmem:[#allocation33_spill] sm:$0xff] }
 0x133   : > { %v1752_v53 = vadd.f32 %v1720_v8, %v1652_v63  ;;  %v1450_v37 = vadd.f32 %v1418_v33, %v1350_v28  ;;  %v1049_v51 = vadd.f32 %v1017_v14, %v5406_v41  ;;  %v1417_v52 = vmul.f32 %v3599_v27, %v4023_v25  ;;  %v5407_v43 = vld [vmem:[#allocation32_spill] sm:$0xff] }
 0x134   : > { %v1365_v6 = vadd.f32 %v1333_v61, %v1265_v29  ;;  %v1767_v8 = vadd.f32 %v1735_v3, %v1667_v62  ;;  %v1518_v44 = vmul.f32 %v3590_v16, %v5386_v15  ;;  %v1618_v4 = vmul.f32 %v3594_v22, %v5387_v32  ;;  %v5409_v1 = vld [vmem:[#allocation20_spill] sm:$0xff] }
 0x135   : > { %2996 = vmatpush3.msra.mxu1 %v1752_v53  ;;  %v1718_v49 = vmul.f32 %v3604_v34, %v5388_v7  ;;  %v1551_v33 = vadd.f32 %v1519_v45, %v1450_v37  ;;  %v1149_v40 = vadd.f32 %v1117_v18, %v1049_v51  ;;  %v1032_v61 = vmul.f32 %v5385_v9, %v4118_v19  ;;  %v4144_v29 = vld [vmem:[#allocation2 + $0x61] sm:$0xff] }
 0x136   : > { %v1465_v50 = vadd.f32 %v1433_v30, %v1365_v6  ;;  %2997 = vmatprep.subr.mxu1 %v1767_v8  ;;  %v1132_v3 = vmul.f32 %v5379_v42, %v4123_v56  ;;  %v1232_v15 = vmul.f32 %v3584_v10, %v5407_v43  ;;  %v1332_v32 = vmul.f32 %v3586_v11, %v5408_v58  ;;  %v4146_v14 = vld [vmem:[#allocation2 + $0x62] sm:$0xff]  ;;  %v4166_v8 = vld [vmem:[#allocation2 + $0x111] sm:$0xff] }
 0x137   : > { %v1432_v7 = vmul.f32 %v3599_v27, %v4041_v2  ;;  %v1651_v45 = vadd.f32 %v1619_v13, %v1551_v33  ;;  %v1249_v63 = vadd.f32 %v1217_v48, %v1149_v40  ;;  %v1064_v28 = vadd.f32 %v1032_v61, %v5409_v1 }
 0x138   : > { %v1566_v30 = vadd.f32 %v1534_v60, %v1465_v50  ;;  %v1533_v18 = vmul.f32 %v3590_v16, %v5391_v12  ;;  %v1633_v53 = vmul.f32 %v3594_v22, %v5392_v35  ;;  %v1733_v62 = vmul.f32 %v3604_v34, %v5393_v54  ;;  %v4164_v54 = vld [vmem:[#allocation2 + $0x110] sm:$0xff] }
 0x139   : > { %v916_v13 = vmul.f32 %v5384_v39, %v4133_v0  ;;  %v1751_v60 = vadd.f32 %v1719_v31, %v1651_v45  ;;  %v1349_v37 = vadd.f32 %v1317_v5, %v1249_v63  ;;  %v1164_v6 = vadd.f32 %v1132_v3, %v1064_v28  ;;  %v4170_v50 = vld [vmem:[#allocation2 + $0x112] sm:$0xff]  ;;  %v5410_v3 = vld [vmem:[#allocation28_spill] sm:$0xff] }
 0x13a   : > { %v1666_v48 = vadd.f32 %v1634_v55, %v1566_v30  ;;  %v1016_v41 = vmul.f32 %v5385_v9, %v4144_v29  ;;  %v1116_v51 = vmul.f32 %v5379_v42, %v4146_v14  ;;  %v1216_v12 = vmul.f32 %v3584_v10, %v4057_v20  ;;  %v5411_v30 = vld [vmem:[#allocation43_spill] sm:$0xff] }
 0x13b   : > { %v1316_v35 = vmul.f32 %v3586_v11, %v4059_v47  ;;  %2998 = vmatpush3.msra.mxu1 %v1751_v60  ;;  %v1449_v55 = vadd.f32 %v1417_v52, %v1349_v37  ;;  %v1264_v5 = vadd.f32 %v1232_v15, %v1164_v6  ;;  %v1416_v33 = vmul.f32 %v3599_v27, %v4061_v26  ;;  %v4190_v6 = vld [vmem:[#allocation2 + $0x50] sm:$0xff] }
 0x13c   : > { %v1766_v31 = vadd.f32 %v1734_v21, %v1666_v48  ;;  %v1048_v40 = vadd.f32 %v1016_v41, %v916_v13  ;;  %v1517_v61 = vmul.f32 %v3590_v16, %v5396_v59  ;;  %v1617_v45 = vmul.f32 %v3594_v22, %v5410_v3  ;;  %v5412_v13 = vld [vmem:[#allocation21_spill] sm:$0xff]  ;;  %v5413_v48 = vld [vmem:[#allocation22_spill] sm:$0xff] }
 0x13d   : > { %v4178_v63 = vmul.f32 %v3604_v34, %v5411_v30  ;;  %v1550_v21 = vadd.f32 %v1518_v44, %v1449_v55  ;;  %v1364_v52 = vadd.f32 %v1332_v32, %v1264_v5  ;;  %v931_v15 = vmul.f32 %v5384_v39, %v4164_v54  ;;  %v4194_v5 = vld [vmem:[#allocation2 + $0x51] sm:$0xff] }
 0x13e   : > { %2999 = vmatprep.subr.mxu1 %v1766_v31  ;;  %v1031_v1 = vmul.f32 %v5385_v9, %v4166_v8  ;;  %v1148_v28 = vadd.f32 %v1116_v51, %v1048_v40  ;;  %v1131_v59 = vmul.f32 %v5379_v42, %v4170_v50  ;;  %v1231_v60 = vmul.f32 %v3584_v10, %v5412_v13  ;;  %v5414_v31 = vld [vmem:[#allocation23_spill] sm:$0xff] }
 0x13f   : > { %v1331_v37 = vmul.f32 %v3586_v11, %v5413_v48  ;;  %v1650_v44 = vadd.f32 %v1618_v4, %v1550_v21  ;;  %v1464_v32 = vadd.f32 %v1432_v7, %v1364_v52  ;;  %v1431_v55 = vmul.f32 %v3599_v27, %v5414_v31  ;;  %v4196_v51 = vld [vmem:[#allocation2 + $0x52] sm:$0xff] }
 0x140   : > { %v1063_v41 = vadd.f32 %v1031_v1, %v931_v15  ;;  %v1248_v40 = vadd.f32 %v1216_v12, %v1148_v28  ;;  %v1532_v3 = vmul.f32 %v3590_v16, %v5401_v46  ;;  %v1632_v30 = vmul.f32 %v3594_v22, %v5402_v24  ;;  %v5415_v46 = vld [vmem:[#allocation19_spill] sm:$0xff]  ;;  %v4212_v24 = vld [vmem:[#allocation2 + $0x108] sm:$0xff] }
 0x141   : > { %v1732_v48 = vmul.f32 %v3604_v34, %v3998_v57  ;;  %v1750_v4 = vadd.f32 %v1718_v49, %v1650_v44  ;;  %v1565_v7 = vadd.f32 %v1533_v18, %v1464_v32  ;;  %v915_v52 = vmul.f32 %v5384_v39, %v4190_v6  ;;  %v4220_v44 = vld [vmem:[#allocation2 + $0x10a] sm:$0xff] }
 0x142   : > { %v1163_v21 = vadd.f32 %v1131_v59, %v1063_v41  ;;  %v1348_v15 = vadd.f32 %v1316_v35, %v1248_v40  ;;  %v1015_v1 = vmul.f32 %v5385_v9, %v4194_v5  ;;  %v1115_v12 = vmul.f32 %v5379_v42, %v4196_v51  ;;  %v4218_v59 = vld [vmem:[#allocation2 + $0x109] sm:$0xff] }
 0x143   : > { %v1215_v28 = vmul.f32 %v3584_v10, %v5415_v46  ;;  %3000 = vmatpush3.msra.mxu1 %v1750_v4  ;;  %v1665_v57 = vadd.f32 %v1633_v53, %v1565_v7  ;;  %v1315_v18 = vmul.f32 %v3586_v11, %v4097_v23  ;;  %v1415_v35 = vmul.f32 %v3599_v27, %v4099_v17 }
 0x144   : > { %v1263_v49 = vadd.f32 %v1231_v60, %v1163_v21  ;;  %v1448_v32 = vadd.f32 %v1416_v33, %v1348_v15  ;;  %v1047_v41 = vadd.f32 %v1015_v1, %v915_v52  ;;  %v1516_v40 = vmul.f32 %v3590_v16, %v4011_v36  ;;  %v4234_v36 = vld [vmem:[#allocation2 + $0x48] sm:$0xff] }
 0x145   : > { %v1616_v4 = vmul.f32 %v3594_v22, %v4013_v38  ;;  %v1765_v53 = vadd.f32 %v1733_v62, %v1665_v57  ;;  %v1716_v7 = vmul.f32 %v3604_v34, %v4023_v25  ;;  %v930_v21 = vmul.f32 %v5384_v39, %v4212_v24  ;;  %v5416_v62 = vld [vmem:[#allocation16_spill] sm:$0xff]  ;;  %v4242_v15 = vld [vmem:[#allocation2 + $0x49] sm:$0xff] }
 0x146   : > { %v1363_v60 = vadd.f32 %v1331_v37, %v1263_v49  ;;  %v1549_v17 = vadd.f32 %v1517_v61, %v1448_v32  ;;  %v1147_v23 = vadd.f32 %v1115_v12, %v1047_v41  ;;  %v1030_v33 = vmul.f32 %v5385_v9, %v4218_v59  ;;  %v4246_v32 = vld [vmem:[#allocation2 + $0x4a] sm:$0xff] }
 0x147   : > { %v1130_v52 = vmul.f32 %v5379_v42, %v4220_v44  ;;  %3001 = vmatprep.subr.mxu1 %v1765_v53  ;;  %v1230_v37 = vmul.f32 %v3584_v10, %v5416_v62  ;;  %v1330_v25 = vmul.f32 %v3586_v11, %v4118_v19  ;;  %v1430_v61 = vmul.f32 %v3599_v27, %v4123_v56 }
 0x148   : > { %v1463_v38 = vadd.f32 %v1431_v55, %v1363_v60  ;;  %v1649_v1 = vadd.f32 %v1617_v45, %v1549_v17  ;;  %v1247_v12 = vadd.f32 %v1215_v28, %v1147_v23  ;;  %v1062_v57 = vadd.f32 %v1030_v33, %v930_v21 }
 0x149   : > { %v1531_v49 = vmul.f32 %v3590_v16, %v5407_v43  ;;  %v1631_v41 = vmul.f32 %v3594_v22, %v5408_v58  ;;  %v1731_v53 = vmul.f32 %v3604_v34, %v4041_v2  ;;  %v914_v60 = vmul.f32 %v5384_v39, %v4234_v36 }
 0x14a   : > { %v1564_v55 = vadd.f32 %v1532_v3, %v1463_v38  ;;  %v1749_v62 = vadd.f32 %v4178_v63, %v1649_v1  ;;  %v1347_v17 = vadd.f32 %v1315_v18, %v1247_v12  ;;  %v1162_v23 = vadd.f32 %v1130_v52, %v1062_v57  ;;  %v4265_v18 = vld [vmem:[#allocation2 + $0xfa] sm:$0xff] }
 0x14b   : > { %v1014_v45 = vmul.f32 %v5385_v9, %v4242_v15  ;;  %v1114_v3 = vmul.f32 %v5379_v42, %v4246_v32  ;;  %v1214_v58 = vmul.f32 %v3584_v10, %v4133_v0  ;;  %v1314_v2 = vmul.f32 %v3586_v11, %v4144_v29 }
 0x14c   : > { %v1664_v43 = vadd.f32 %v1632_v30, %v1564_v55  ;;  %3002 = vmatpush3.msra.mxu1 %v1749_v62  ;;  %v1447_v28 = vadd.f32 %v1415_v35, %v1347_v17  ;;  %v1262_v21 = vadd.f32 %v1230_v37, %v1162_v23  ;;  %v1414_v63 = vmul.f32 %v3599_v27, %v4146_v14  ;;  %v5417_v37 = vld [vmem:[#allocation14_spill] sm:$0xff]  ;;  %v5418_v55 = vld [vmem:[#allocation15_spill] sm:$0xff] }
 0x14d   : > { %v1046_v33 = vadd.f32 %v1014_v45, %v914_v60  ;;  %v1515_v30 = vmul.f32 %v3590_v16, %v4057_v20  ;;  %v1615_v38 = vmul.f32 %v3594_v22, %v4059_v47  ;;  %v1715_v1 = vmul.f32 %v3604_v34, %v4061_v26  ;;  %v4275_v62 = vld [vmem:[#allocation2 + $0x38] sm:$0xff] }
 0x14e   : > { %v1764_v52 = vadd.f32 %v1732_v48, %v1664_v43  ;;  %v1548_v12 = vadd.f32 %v1516_v40, %v1447_v28  ;;  %v1362_v57 = vadd.f32 %v1330_v25, %v1262_v21  ;;  %v1061_v60 = vadd.f32 %v5418_v55, %v5417_v37  ;;  %v4285_v40 = vld [vmem:[#allocation2 + $0x39] sm:$0xff]  ;;  %v5419_v28 = vld [vmem:[#allocation22_spill] sm:$0xff] }
 0x14f   : > { %v1146_v35 = vadd.f32 %v1114_v3, %v1046_v33  ;;  %v1129_v48 = vmul.f32 %v5379_v42, %v4265_v18  ;;  %v1229_v20 = vmul.f32 %v3584_v10, %v4164_v54  ;;  %v1329_v47 = vmul.f32 %v3586_v11, %v4166_v8  ;;  %v4289_v43 = vld [vmem:[#allocation2 + $0x3a] sm:$0xff] }
 0x150   : > { %3003 = vmatprep.subr.mxu1 %v1764_v52  ;;  %v1429_v26 = vmul.f32 %v3599_v27, %v4170_v50  ;;  %v1648_v25 = vadd.f32 %v1616_v4, %v1548_v12  ;;  %v1462_v17 = vadd.f32 %v1430_v61, %v1362_v57  ;;  %v1530_v45 = vmul.f32 %v3590_v16, %v5412_v13 }
 0x151   : > { %v1246_v23 = vadd.f32 %v1214_v58, %v1146_v35  ;;  %v1161_v3 = vadd.f32 %v1129_v48, %v1061_v60  ;;  %v1630_v21 = vmul.f32 %v3594_v22, %v5419_v28  ;;  %v1730_v33 = vmul.f32 %v3604_v34, %v5414_v31  ;;  %v5423_v28 = vld [vmem:[#allocation11_spill] sm:$0xff] }
 0x152   : > { %v913_v52 = vmul.f32 %v5384_v39, %v4275_v62  ;;  %v1748_v37 = vadd.f32 %v1716_v7, %v1648_v25  ;;  %v1563_v55 = vadd.f32 %v1531_v49, %v1462_v17  ;;  %v1013_v61 = vmul.f32 %v5385_v9, %v4285_v40  ;;  %v4307_v49 = vld [vmem:[#allocation2 + $0xf2] sm:$0xff] }
 0x153   : > { %v1346_v4 = vadd.f32 %v1314_v2, %v1246_v23  ;;  %v1261_v58 = vadd.f32 %v1229_v20, %v1161_v3  ;;  %v1113_v13 = vmul.f32 %v5379_v42, %v4289_v43  ;;  %v1213_v12 = vmul.f32 %v3584_v10, %v4190_v6  ;;  %5420 = vst [vmem:[#allocation50_spill] sm:$0xff] %v4307_v49  ;;  %v5421_v20 = vld [vmem:[#allocation13_spill] sm:$0xff]  ;;  %v5422_v17 = vld [vmem:[#allocation7_spill] sm:$0xff] }
 0x154   : > { %v1313_v57 = vmul.f32 %v3586_v11, %v4194_v5  ;;  %3004 = vmatpush3.msra.mxu1 %v1748_v37  ;;  %v1663_v31 = vadd.f32 %v1631_v41, %v1563_v55  ;;  %v1045_v60 = vadd.f32 %v1013_v61, %v913_v52  ;;  %v1413_v7 = vmul.f32 %v3599_v27, %v4196_v51  ;;  %v5424_v52 = vld [vmem:[#allocation12_spill] sm:$0xff]  ;;  %v4325_v61 = vld [vmem:[#allocation2 + $0x31] sm:$0xff] }
 0x155   : > { %v1446_v35 = vadd.f32 %v1414_v63, %v1346_v4  ;;  %v1361_v2 = vadd.f32 %v1329_v47, %v1261_v58  ;;  %v1514_v48 = vmul.f32 %v3590_v16, %v5415_v46  ;;  %v1614_v25 = vmul.f32 %v3594_v22, %v5421_v20  ;;  %5425 = vst [vmem:[#allocation17_spill] sm:$0xff] %v4325_v61  ;;  %v4327_v58 = vld [vmem:[#allocation2 + $0x32] sm:$0xff] }
 0x156   : > { %v4315_v23 = vmul.f32 %v3604_v34, %v5422_v17  ;;  %v1763_v3 = vadd.f32 %v1731_v53, %v1663_v31  ;;  %v1145_v63 = vadd.f32 %v1113_v13, %v1045_v60  ;;  %v1060_v37 = vadd.f32 %v5424_v52, %v5423_v28  ;;  %5426 = vst [vmem:[#allocation9_spill] sm:$0xff] %v4327_v58  ;;  %v4346_v52 = vld [vmem:[#allocation2 + $0xe1] sm:$0xff] }
 0x157   : > { %v1547_v41 = vadd.f32 %v1515_v30, %v1446_v35  ;;  %v1461_v55 = vadd.f32 %v1429_v26, %v1361_v2  ;;  %v1128_v47 = vmul.f32 %v5379_v42, %v4307_v49  ;;  %v1228_v46 = vmul.f32 %v3584_v10, %v4212_v24  ;;  %v3162_v26 = vld [vmem:[#allocation2 + $0x120] sm:$0xff] }
 0x158   : > { %v1328_v4 = vmul.f32 %v3586_v11, %v4218_v59  ;;  %3005 = vmatprep.subr.mxu1 %v1763_v3  ;;  %v1245_v30 = vadd.f32 %v1213_v12, %v1145_v63  ;;  %v1428_v13 = vmul.f32 %v3599_v27, %v4220_v44  ;;  %v1529_v31 = vmul.f32 %v3162_v26, %v3590_v16 }
 0x159   : > { %v1647_v53 = vadd.f32 %v1615_v38, %v1547_v41  ;;  %v1562_v35 = vadd.f32 %v1530_v45, %v1461_v55  ;;  %v1160_v60 = vadd.f32 %v1128_v47, %v1060_v37  ;;  %v1629_v2 = vmul.f32 %v3594_v22, %v4118_v19  ;;  %v4344_v19 = vld [vmem:[#allocation2 + $0xe0] sm:$0xff] }
 0x15a   : > { %v1729_v20 = vmul.f32 %v3604_v34, %v4123_v56  ;;  %v1345_v28 = vadd.f32 %v1313_v57, %v1245_v30  ;;  %v1012_v38 = vmul.f32 %v5385_v9, %v4325_v61  ;;  %v1112_v12 = vmul.f32 %v5379_v42, %v4327_v58  ;;  %v4353_v55 = vld [vmem:[#allocation2 + $0xe2] sm:$0xff] }
 0x15b   : > { %v1747_v17 = vadd.f32 %v1715_v1, %v1647_v53  ;;  %v1662_v3 = vadd.f32 %v1630_v21, %v1562_v35  ;;  %v1260_v41 = vadd.f32 %v1228_v46, %v1160_v60  ;;  %v1212_v45 = vmul.f32 %v3584_v10, %v4234_v36  ;;  %v5427_v1 = vld [vmem:[#allocation10_spill] sm:$0xff] }
 0x15c   : > { %v1312_v63 = vmul.f32 %v3586_v11, %v4242_v15  ;;  %v1445_v56 = vadd.f32 %v1413_v7, %v1345_v28  ;;  %v1044_v57 = vadd.f32 %v1012_v38, %v5427_v1  ;;  %v1412_v37 = vmul.f32 %v3599_v27, %v4246_v32 }
 0x15d   : > { %3006 = vmatpush3.msra.mxu1 %v1747_v17  ;;  %v1513_v21 = vmul.f32 %v3590_v16, %v4133_v0  ;;  %v1762_v47 = vadd.f32 %v1730_v33, %v1662_v3  ;;  %v1360_v46 = vadd.f32 %v1328_v4, %v1260_v41  ;;  %v1613_v53 = vmul.f32 %v3594_v22, %v4144_v29  ;;  %v4367_v4 = vld [vmem:[#allocation2 + $0xf8] sm:$0xff]  ;;  %v4375_v17 = vld [vmem:[#allocation2 + $0x20] sm:$0xff] }
 0x15e   : > { %v4359_v30 = vmul.f32 %v3604_v34, %v4146_v14  ;;  %v1546_v7 = vadd.f32 %v1514_v48, %v1445_v56  ;;  %v1144_v26 = vadd.f32 %v1112_v12, %v1044_v57  ;;  %v927_v35 = vmul.f32 %v5384_v39, %v4344_v19  ;;  %v4371_v14 = vld [vmem:[#allocation2 + $0xf9] sm:$0xff]  ;;  %v4379_v3 = vld [vmem:[#allocation2 + $0x21] sm:$0xff] }
 0x15f   : > { %v1027_v60 = vmul.f32 %v5385_v9, %v4346_v52  ;;  %3007 = vmatprep.subr.mxu1 %v1762_v47  ;;  %v1460_v0 = vadd.f32 %v1428_v13, %v1360_v46  ;;  %v1127_v33 = vmul.f32 %v5379_v42, %v4353_v55  ;;  %v1227_v29 = vmul.f32 %v4367_v4, %v3584_v10  ;;  %v4381_v41 = vld [vmem:[#allocation2 + $0x22] sm:$0xff] }
 0x160   : > { %v1327_v48 = vmul.f32 %v4371_v14, %v3586_v11  ;;  %v1646_v28 = vadd.f32 %v1614_v25, %v1546_v7  ;;  %v1244_v38 = vadd.f32 %v1212_v45, %v1144_v26  ;;  %v1427_v13 = vmul.f32 %v3599_v27, %v4265_v18 }
 0x161   : > { %v1059_v12 = vadd.f32 %v1027_v60, %v927_v35  ;;  %v1561_v56 = vadd.f32 %v1529_v31, %v1460_v0  ;;  %v1528_v1 = vmul.f32 %v3590_v16, %v4164_v54  ;;  %v1628_v57 = vmul.f32 %v3594_v22, %v4166_v8  ;;  %v4400_v35 = vld [vmem:[#allocation2 + $0xd8] sm:$0xff] }
 0x162   : > { %v4389_v47 = vmul.f32 %v3604_v34, %v4170_v50  ;;  %v1746_v25 = vadd.f32 %v4315_v23, %v1646_v28  ;;  %v1344_v45 = vadd.f32 %v1312_v63, %v1244_v38  ;;  %v911_v7 = vmul.f32 %v5384_v39, %v4375_v17  ;;  %v4406_v60 = vld [vmem:[#allocation2 + $0xd9] sm:$0xff] }
 0x163   : > { %v1159_v46 = vadd.f32 %v1127_v33, %v1059_v12  ;;  %v1661_v26 = vadd.f32 %v1629_v2, %v1561_v56  ;;  %v1011_v31 = vmul.f32 %v5385_v9, %v4379_v3  ;;  %v1111_v54 = vmul.f32 %v5379_v42, %v4381_v41  ;;  %v4408_v0 = vld [vmem:[#allocation2 + $0xda] sm:$0xff] }
 0x164   : > { %v1211_v8 = vmul.f32 %v3584_v10, %v4275_v62  ;;  %3008 = vmatpush3.msra.mxu1 %v1746_v25  ;;  %v1444_v50 = vadd.f32 %v1412_v37, %v1344_v45  ;;  %v1311_v63 = vmul.f32 %v3586_v11, %v4285_v40  ;;  %v1411_v2 = vmul.f32 %v3599_v27, %v4289_v43 }
 0x165   : > { %v1259_v23 = vadd.f32 %v1227_v29, %v1159_v46  ;;  %v1761_v33 = vadd.f32 %v1729_v20, %v1661_v26  ;;  %v1043_v28 = vadd.f32 %v1011_v31, %v911_v7  ;;  %v1512_v38 = vmul.f32 %v3590_v16, %v4190_v6  ;;  %v4424_v46 = vld [vmem:[#allocation2 + $0xf0] sm:$0xff] }
 0x166   : > { %v1612_v12 = vmul.f32 %v3594_v22, %v4194_v5  ;;  %v1545_v37 = vadd.f32 %v1513_v21, %v1444_v50  ;;  %v4416_v56 = vmul.f32 %v3604_v34, %v4196_v51  ;;  %v926_v25 = vmul.f32 %v5384_v39, %v4400_v35  ;;  %5428 = vst [vmem:[#allocation18_spill] sm:$0xff] %v4424_v46  ;;  %v4428_v21 = vld [vmem:[#allocation2 + $0x18] sm:$0xff] }
 0x167   : > { %v1359_v29 = vadd.f32 %v1327_v48, %v1259_v23  ;;  %3009 = vmatprep.subr.mxu1 %v1761_v33  ;;  %v1143_v45 = vadd.f32 %v1111_v54, %v1043_v28  ;;  %v1026_v20 = vmul.f32 %v5385_v9, %v4406_v60  ;;  %v1126_v6 = vmul.f32 %v5379_v42, %v4408_v0  ;;  %v4430_v7 = vld [vmem:[#allocation2 + $0xf1] sm:$0xff]  ;;  %v4436_v54 = vld [vmem:[#allocation2 + $0x19] sm:$0xff] }
 0x168   : > { %v1226_v5 = vmul.f32 %v4424_v46, %v3584_v10  ;;  %v1645_v51 = vadd.f32 %v1613_v53, %v1545_v37  ;;  %5429 = vst [vmem:[#allocation8_spill] sm:$0xff] %v4430_v7  ;;  %v1326_v26 = vmul.f32 %v4430_v7, %v3586_v11  ;;  %v1426_v31 = vmul.f32 %v3599_v27, %v4307_v49  ;;  %v4438_v50 = vld [vmem:[#allocation2 + $0x1a] sm:$0xff] }
 0x169   : > { %v1459_v48 = vadd.f32 %v1427_v13, %v1359_v29  ;;  %v1243_v23 = vadd.f32 %v1211_v8, %v1143_v45  ;;  %v1058_v33 = vadd.f32 %v1026_v20, %v926_v25  ;;  %v1527_v28 = vmul.f32 %v3590_v16, %v4212_v24  ;;  %v889_v25 = vld [vmem:[#allocation2 + $0xc8] sm:$0xff] }
 0x16a   : > { %v1627_v53 = vmul.f32 %v3594_v22, %v4218_v59  ;;  %v1745_v13 = vadd.f32 %v4359_v30, %v1645_v51  ;;  %v4447_v29 = vmul.f32 %v3604_v34, %v4220_v44  ;;  %v910_v49 = vmul.f32 %v5384_v39, %v4428_v21  ;;  %v4455_v30 = vld [vmem:[#allocation2 + $0x30] sm:$0xff] }
 0x16b   : > { %v1560_v37 = vadd.f32 %v1528_v1, %v1459_v48  ;;  %v1343_v7 = vadd.f32 %v1311_v63, %v1243_v23  ;;  %v1158_v46 = vadd.f32 %v1126_v6, %v1058_v33  ;;  %v1010_v8 = vmul.f32 %v5385_v9, %v4436_v54  ;;  %5430 = vst [vmem:[#allocation52_spill] sm:$0xff] %v4455_v30  ;;  %v989_v45 = vld [vmem:[#allocation2 + $0xc9] sm:$0xff] }
 0x16c   : > { %v1110_v24 = vmul.f32 %v5379_v42, %v4438_v50  ;;  %3010 = vmatpush3.msra.mxu1 %v1745_v13  ;;  %v1210_v44 = vmul.f32 %v4455_v30, %v3584_v10  ;;  %v1310_v1 = vmul.f32 %v3586_v11, %v4325_v61  ;;  %v1410_v63 = vmul.f32 %v3599_v27, %v4327_v58  ;;  %v1089_v23 = vld [vmem:[#allocation2 + $0xca] sm:$0xff] }
 0x16d   : > { %v1660_v59 = vadd.f32 %v1628_v57, %v1560_v37  ;;  %v1443_v20 = vadd.f32 %v1411_v2, %v1343_v7  ;;  %v1258_v6 = vadd.f32 %v1226_v5, %v1158_v46  ;;  %v1042_v51 = vadd.f32 %v1010_v8, %v910_v49  ;;  %v873_v49 = vld [vmem:[#allocation2 + $0x8] sm:$0xff] }
 0x16e   : > { %v1511_v48 = vmul.f32 %v3590_v16, %v4234_v36  ;;  %v1611_v33 = vmul.f32 %v3594_v22, %v4242_v15  ;;  %v1711_v13 = vmul.f32 %v3604_v34, %v4246_v32  ;;  %v925_v37 = vmul.f32 %v5384_v39, %v889_v25  ;;  %v1073_v8 = vld [vmem:[#allocation2 + $0xa] sm:$0xff] }
 0x16f   : > { %v1760_v57 = vadd.f32 %v4389_v47, %v1660_v59  ;;  %v1544_v61 = vadd.f32 %v1512_v38, %v1443_v20  ;;  %v1358_v58 = vadd.f32 %v1326_v26, %v1258_v6  ;;  %v1142_v30 = vadd.f32 %v1110_v24, %v1042_v51  ;;  %v973_v26 = vld [vmem:[#allocation2 + $0x9] sm:$0xff] }
 0x170   : > { %v1025_v2 = vmul.f32 %v5385_v9, %v989_v45  ;;  %v1125_v36 = vmul.f32 %v5379_v42, %v1089_v23  ;;  %v1225_v47 = vmul.f32 %v3584_v10, %v4344_v19  ;;  %v1325_v15 = vmul.f32 %v3586_v11, %v4346_v52 }
 0x171   : > { %3011 = vmatprep.subr.mxu1 %v1760_v57  ;;  %v1425_v32 = vmul.f32 %v3599_v27, %v4353_v55  ;;  %v1644_v46 = vadd.f32 %v1612_v12, %v1544_v61  ;;  %v1458_v5 = vadd.f32 %v1426_v31, %v1358_v58  ;;  %v1242_v38 = vadd.f32 %v1210_v44, %v1142_v30  ;;  %v888_v30 = vld [vmem:[#allocation2 + $0xc0] sm:$0xff] }
 0x172   : > { %v1057_v7 = vadd.f32 %v1025_v2, %v925_v37  ;;  %v1526_v24 = vmul.f32 %v4367_v4, %v3590_v16  ;;  %v1626_v25 = vmul.f32 %v4371_v14, %v3594_v22  ;;  %v4485_v19 = vmul.f32 %v3604_v34, %v4265_v18 }
 0x173   : > { %v909_v52 = vmul.f32 %v5384_v39, %v873_v49  ;;  %v1744_v55 = vadd.f32 %v4416_v56, %v1644_v46  ;;  %v1559_v61 = vadd.f32 %v1527_v28, %v1458_v5  ;;  %v1342_v58 = vadd.f32 %v1310_v1, %v1242_v38  ;;  %v988_v28 = vld [vmem:[#allocation2 + $0xc1] sm:$0xff]  ;;  %v5431_v46 = vld [vmem:[#allocation18_spill] sm:$0xff] }
 0x174   : > { %v1157_v12 = vadd.f32 %v1125_v36, %v1057_v7  ;;  %v1009_v31 = vmul.f32 %v5385_v9, %v973_v26  ;;  %v1109_v59 = vmul.f32 %v5379_v42, %v1073_v8  ;;  %v1209_v4 = vmul.f32 %v3584_v10, %v4375_v17  ;;  %v1088_v1 = vld [vmem:[#allocation2 + $0xc2] sm:$0xff]  ;;  %v5433_v7 = vld [vmem:[#allocation50_spill] sm:$0xff] }
 0x175   : > { %v1309_v14 = vmul.f32 %v3586_v11, %v4379_v3  ;;  %3012 = vmatpush3.msra.mxu1 %v1744_v55  ;;  %v1659_v18 = vadd.f32 %v1627_v53, %v1559_v61  ;;  %v1442_v44 = vadd.f32 %v1410_v63, %v1342_v58  ;;  %v1409_v56 = vmul.f32 %v3599_v27, %v4381_v41  ;;  %v1072_v36 = vld [vmem:[#allocation2 + $0x2] sm:$0xff] }
 0x176   : > { %v1257_v45 = vadd.f32 %v1225_v47, %v1157_v12  ;;  %v1041_v20 = vadd.f32 %v1009_v31, %v909_v52  ;;  %v1510_v6 = vmul.f32 %v3590_v16, %v4275_v62  ;;  %v4501_v17 = vmul.f32 %v3594_v22, %v4285_v40  ;;  %v872_v40 = vld [vmem:[#allocation2] sm:$0xff] }
 0x177   : > { %v4505_v3 = vmul.f32 %v3604_v34, %v4289_v43  ;;  %v1759_v53 = vadd.f32 %v4447_v29, %v1659_v18  ;;  %v1543_v63 = vadd.f32 %v1511_v48, %v1442_v44  ;;  %v924_v41 = vmul.f32 %v5384_v39, %v888_v30  ;;  %v972_v48 = vld [vmem:[#allocation2 + $0x1] sm:$0xff] }
 0x178   : > { %v1357_v51 = vadd.f32 %v1325_v15, %v1257_v45  ;;  %v1141_v23 = vadd.f32 %v1109_v59, %v1041_v20  ;;  %v1024_v57 = vmul.f32 %v5385_v9, %v988_v28  ;;  %v1124_v37 = vmul.f32 %v5379_v42, %v1088_v1  ;;  %v4530_v26 = vld [vmem:[#allocation3 + $0x170] sm:$0xff]  ;;  %v5436_v28 = vld [vmem:[#allocation9_spill] sm:$0xff]  ;;  %v4575_v1 = vld [vmem:[#allocation3 + $0x188] sm:$0xff] }
 0x179   : > { %v1224_v62 = vmul.f32 %v3584_v10, %v4400_v35  ;;  %3013 = vmatprep.subr.mxu1 %v1759_v53  ;;  %v1643_v2 = vadd.f32 %v1611_v33, %v1543_v63  ;;  %v1324_v43 = vmul.f32 %v3586_v11, %v4406_v60  ;;  %v1424_v29 = vmul.f32 %v3599_v27, %v4408_v0  ;;  %v5432_v35 = vld [vmem:[#allocation8_spill] sm:$0xff] }
 0x17a   : > { %v1457_v49 = vadd.f32 %v1425_v32, %v1357_v51  ;;  %v1241_v47 = vadd.f32 %v1209_v4, %v1141_v23  ;;  %v1056_v15 = vadd.f32 %v1024_v57, %v924_v41  ;;  %v4519_v5 = vmul.f32 %v5431_v46, %v3590_v16  ;;  %v4532_v8 = vld [vmem:[#allocation3 + $0x171] sm:$0xff]  ;;  %v4585_v23 = vld [vmem:[#allocation3 + $0x15a] sm:$0xff]  ;;  %v4588_v57 = vld [vmem:[#allocation3 + $0xc8] sm:$0xff] }
 0x17b   : > { %v4523_v38 = vmul.f32 %v5432_v35, %v3594_v22  ;;  %v1743_v33 = vadd.f32 %v1711_v13, %v1643_v2  ;;  %v4527_v60 = vmul.f32 %v3604_v34, %v5433_v7  ;;  %v908_v0 = vmul.f32 %v5384_v39, %v872_v40  ;;  %v4536_v12 = vld [vmem:[#allocation3 + $0x172] sm:$0xff]  ;;  %v4581_v41 = vld [vmem:[#allocation3 + $0x16a] sm:$0xff]  ;;  %5437 = vst [vmem:[#allocation56_spill] sm:$0xff] %v4588_v57 }
 0x17c   : > { %v1558_v32 = vadd.f32 %v1526_v24, %v1457_v49  ;;  %v1341_v52 = vadd.f32 %v1309_v14, %v1241_v47  ;;  %v1156_v55 = vadd.f32 %v1124_v37, %v1056_v15  ;;  %v1008_v61 = vmul.f32 %v5385_v9, %v972_v48  ;;  %v4538_v13 = vld [vmem:[#allocation3 + $0xb0] sm:$0xff]  ;;  %v4548_v9 = vld [vmem:[#allocation3 + $0x168] sm:$0xff]  ;;  %v4602_v47 = vld [vmem:[#allocation3 + $0xc0] sm:$0xff] }
 0x17d   : > { %v1108_v58 = vmul.f32 %v5379_v42, %v1072_v36  ;;  %v4540_v24 = vld [vmem:[#allocation3 + $0xb1] sm:$0xff]  ;;  %3014 = vmatpush3.msra.mxu1 %v1743_v33  ;;  %v1208_v39 = vmul.f32 %v3584_v10, %v4428_v21  ;;  %v1308_v59 = vmul.f32 %v3586_v11, %v4436_v54  ;;  %v1408_v4 = vmul.f32 %v3599_v27, %v4438_v50  ;;  %v4550_v42 = vld [vmem:[#allocation3 + $0x169] sm:$0xff]  ;;  %v4562_v11 = vld [vmem:[#allocation3 + $0x159] sm:$0xff] }
 0x17e   : > { %v1658_v31 = vadd.f32 %v1626_v25, %v1558_v32  ;;  %v4552_v14 = vld [vmem:[#allocation3 + $0xa8] sm:$0xff]  ;;  %v1441_v30 = vadd.f32 %v1409_v56, %v1341_v52  ;;  %v1256_v18 = vadd.f32 %v1224_v62, %v1156_v55  ;;  %v1040_v44 = vadd.f32 %v1008_v61, %v908_v0  ;;  %v5434_v25 = vld [vmem:[#allocation52_spill] sm:$0xff]  ;;  %v4560_v21 = vld [vmem:[#allocation3 + $0x158] sm:$0xff]  ;;  %5438 = vst [vmem:[#allocation51_spill] sm:$0xff] %v4602_v47 }
 0x17f   : > { %v4556_v45 = vmul.f32 %v5434_v25, %v3590_v16  ;;  %v4558_v10 = vld [vmem:[#allocation3 + $0xa9] sm:$0xff]  ;;  %v5435_v54 = vld [vmem:[#allocation17_spill] sm:$0xff]  ;;  %v4571_v56 = vmul.f32 %v3604_v34, %v5436_v28  ;;  %v2255_v16 = vadd.f32 %v4532_v8, %v4530_v26  ;;  %v2254_v37 = vadd.f32 %v4550_v42, %v4548_v9  ;;  %v4600_v36 = vld [vmem:[#allocation3 + $0x180] sm:$0xff] }
 0x180   : > { %v1758_v27 = vadd.f32 %v4485_v19, %v1658_v31  ;;  %v4567_v50 = vmul.f32 %v3594_v22, %v5435_v54  ;;  %v4577_v20 = vld [vmem:[#allocation3 + $0xb2] sm:$0xff]  ;;  %v1542_v53 = vadd.f32 %v1510_v6, %v1441_v30  ;;  %v1356_v63 = vadd.f32 %v1324_v43, %v1256_v18  ;;  %v4583_v22 = vld [vmem:[#allocation3 + $0xaa] sm:$0xff]  ;;  %v4621_v31 = vld [vmem:[#allocation3 + $0xc1] sm:$0xff] }
 0x181   : > { %v1140_v51 = vadd.f32 %v1108_v58, %v1040_v44  ;;  %v2239_v19 = vadd.f32 %v4540_v24, %v4538_v13  ;;  %v2319_v34 = vadd.f32 %v4536_v12, %v2255_v16  ;;  %v2238_v6 = vadd.f32 %v4558_v10, %v4552_v14  ;;  %v4597_v43 = vld [vmem:[#allocation3 + $0x189] sm:$0xff]  ;;  %v4612_v32 = vld [vmem:[#allocation3 + $0x99] sm:$0xff]  ;;  %v4619_v58 = vld [vmem:[#allocation3 + $0x181] sm:$0xff]  ;;  %5440 = vst [vmem:[#allocation46_spill] sm:$0xff] %v4621_v31 }
 0x182   : > { %3015 = vmatprep.subr.mxu1 %v1758_v27  ;;  %v2253_v62 = vadd.f32 %v4562_v11, %v4560_v21  ;;  %v1642_v40 = vadd.f32 %v4501_v17, %v1542_v53  ;;  %v1456_v2 = vadd.f32 %v1424_v29, %v1356_v63  ;;  %v4605_v46 = vld [vmem:[#allocation3 + $0xc9] sm:$0xff]  ;;  %v2318_v35 = vadd.f32 %v4581_v41, %v2254_v37  ;;  %v4610_v29 = vld [vmem:[#allocation3 + $0x98] sm:$0xff]  ;;  %v2544_v30 = vld [vmem:[#allocation3 + $0x1a0] sm:$0xff] }
 0x183   : > { %v1240_v49 = vadd.f32 %v1208_v39, %v1140_v51  ;;  %v2303_v48 = vadd.f32 %v4577_v20, %v2239_v19  ;;  %v2383_v15 = vadd.f32 %v4575_v1, %v2319_v34  ;;  %5439 = vst [vmem:[#allocation58_spill] sm:$0xff] %v4605_v46  ;;  %v2302_v33 = vadd.f32 %v4583_v22, %v2238_v6  ;;  %v4616_v55 = vld [vmem:[#allocation3 + $0x18a] sm:$0xff]  ;;  %v2608_v54 = vld [vmem:[#allocation3 + $0x1a1] sm:$0xff] }
 0x184   : > { %v2317_v17 = vadd.f32 %v4585_v23, %v2253_v62  ;;  %v1742_v7 = vadd.f32 %v4505_v3, %v1642_v40  ;;  %v1557_v0 = vadd.f32 %v4519_v5, %v1456_v2  ;;  %v4624_v18 = vld [vmem:[#allocation3 + $0xca] sm:$0xff]  ;;  %v2382_v44 = vadd.f32 %v4600_v36, %v2318_v35  ;;  %v4633_v16 = vld [vmem:[#allocation3 + $0x182] sm:$0xff] }
 0x185   : > { %v1340_v52 = vadd.f32 %v1308_v59, %v1240_v49  ;;  %v2367_v61 = vadd.f32 %v4588_v57, %v2303_v48  ;;  %v2447_v39 = vadd.f32 %v4597_v43, %v2383_v15  ;;  %5441 = vst [vmem:[#allocation47_spill] sm:$0xff] %v4624_v18  ;;  %v2366_v3 = vadd.f32 %v4602_v47, %v2302_v33  ;;  %v4629_v59 = vld [vmem:[#allocation3 + $0x9a] sm:$0xff]  ;;  %v4635_v53 = vld [vmem:[#allocation3 + $0xc2] sm:$0xff]  ;;  %v4647_v6 = vld [vmem:[#allocation3 + $0x151] sm:$0xff] }
 0x186   : > { %v2381_v5 = vadd.f32 %v2317_v17, %v4530_v26  ;;  %3016 = vmatpush3.msra.mxu1 %v1742_v7  ;;  %v1657_v25 = vadd.f32 %v4523_v38, %v1557_v0  ;;  %5442 = vst [vmem:[#allocation55_spill] sm:$0xff] %v4635_v53  ;;  %v2237_v63 = vadd.f32 %v4612_v32, %v4610_v29  ;;  %v4640_v19 = vld [vmem:[#allocation3 + $0xe0] sm:$0xff]  ;;  %v2543_v48 = vld [vmem:[#allocation3 + $0x198] sm:$0xff] }
 0x187   : > { %v1440_v27 = vadd.f32 %v1408_v4, %v1340_v52  ;;  %v2431_v28 = vadd.f32 %v4605_v46, %v2367_v61  ;;  %v2511_v51 = vadd.f32 %v4616_v55, %v2447_v39  ;;  %5443 = vst [vmem:[#allocation48_spill] sm:$0xff] %v4640_v19  ;;  %v2446_v34 = vadd.f32 %v4619_v58, %v2382_v44  ;;  %v4645_v4 = vld [vmem:[#allocation3 + $0x150] sm:$0xff]  ;;  %v2672_v2 = vld [vmem:[#allocation3 + $0x1a2] sm:$0xff]  ;;  %v4652_v15 = vld [vmem:[#allocation3 + $0xd8] sm:$0xff] }
 0x188   : > { %v2430_v37 = vadd.f32 %v4621_v31, %v2366_v3  ;;  %v2445_v38 = vadd.f32 %v2381_v5, %v4532_v8  ;;  %v1757_v62 = vadd.f32 %v4527_v60, %v1657_v25  ;;  %5444 = vst [vmem:[#allocation49_spill] sm:$0xff] %v4652_v15  ;;  %v2301_v35 = vadd.f32 %v4629_v59, %v2237_v63  ;;  %v4655_v17 = vld [vmem:[#allocation3 + $0xe1] sm:$0xff]  ;;  %v4668_v39 = vld [vmem:[%s5198_s10] sm:$0xff]  ;;  %v2607_v44 = vld [vmem:[#allocation3 + $0x199] sm:$0xff] }
 0x189   : > { %v1541_v40 = vadd.f32 %v4556_v45, %v1440_v27  ;;  %v2495_v49 = vadd.f32 %v4624_v18, %v2431_v28  ;;  %v2576_v33 = vadd.f32 %v2544_v30, %v2511_v51  ;;  %5445 = vst [vmem:[#allocation6_spill] sm:$0xff] %v4655_v17  ;;  %v4657_v7 = vld [vmem:[#allocation3 + $0xe2] sm:$0xff]  ;;  %v2510_v0 = vadd.f32 %v4633_v16, %v2446_v34  ;;  %v4662_v45 = vld [vmem:[#allocation3 + $0x152] sm:$0xff]  ;;  %v2671_v3 = vld [vmem:[#allocation3 + $0x19a] sm:$0xff] }
 0x18a   : > { %5446 = vst [vmem:[#allocation39_spill] sm:$0xff] %v4657_v7  ;;  %v2494_v52 = vadd.f32 %v4635_v53, %v2430_v37  ;;  %v2509_v60 = vadd.f32 %v2445_v38, %v4536_v12  ;;  %3017 = vmatprep.subr.mxu1 %v1757_v62  ;;  %5447 = vst [vmem:[#allocation40_spill] sm:$0xff] %v4668_v39  ;;  %v4671_v5 = vld [vmem:[#allocation3 + $0xd9] sm:$0xff]  ;;  %v2365_v25 = vadd.f32 %v2301_v35, %v4538_v13  ;;  %v4685_v38 = vld [vmem:[#allocation3 + $0x90] sm:$0xff] }
 0x18b   : > { %v1641_v61 = vadd.f32 %v4567_v50, %v1541_v40  ;;  %v2560_v30 = vadd.f32 %v4640_v19, %v2495_v49  ;;  %5448 = vst [vmem:[#allocation41_spill] sm:$0xff] %v4671_v5  ;;  %v2252_v27 = vadd.f32 %v4647_v6, %v4645_v4  ;;  %v4679_v50 = vld [vmem:[%s5198_s10 + $0x18] sm:$0xff]  ;;  %v2640_v28 = vadd.f32 %v2608_v54, %v2576_v33  ;;  %v4682_v34 = vld [vmem:[#allocation3 + $0xda] sm:$0xff]  ;;  %v4687_v62 = vld [vmem:[#allocation3 + $0x91] sm:$0xff] }
 0x18c   : > { %5449 = vst [vmem:[#allocation57_spill] sm:$0xff] %v4679_v50  ;;  %v2575_v63 = vadd.f32 %v2543_v48, %v2510_v0  ;;  %v2559_v51 = vadd.f32 %v4652_v15, %v2494_v52  ;;  %5450 = vst [vmem:[#allocation4_spill] sm:$0xff] %v4682_v34  ;;  %v2574_v37 = vadd.f32 %v2509_v60, %v4575_v1  ;;  %v4693_v54 = vld [vmem:[#allocation3 + $0x92] sm:$0xff]  ;;  %v4695_v48 = vld [vmem:[#allocation3 + $0x140] sm:$0xff] }
 0x18d   : > { %v1741_v40 = vadd.f32 %v4571_v56, %v1641_v61  ;;  %v2624_v49 = vadd.f32 %v4655_v17, %v2560_v30  ;;  %v2429_v35 = vadd.f32 %v2365_v25, %v4540_v24  ;;  %v2316_v19 = vadd.f32 %v4662_v45, %v2252_v27  ;;  %v4697_v33 = vld [vmem:[#allocation3 + $0x141] sm:$0xff]  ;;  %v4705_v61 = vld [vmem:[#allocation3 + $0x138] sm:$0xff] }
 0x18e   : > { %v2704_v0 = vadd.f32 %v2672_v2, %v2640_v28  ;;  %v2639_v1 = vadd.f32 %v2607_v44, %v2575_v63  ;;  %v2623_v52 = vadd.f32 %v4671_v5, %v2559_v51  ;;  %v2638_v60 = vadd.f32 %v2574_v37, %v4597_v43  ;;  %v4701_v15 = vld [vmem:[#allocation3 + $0x80] sm:$0xff]  ;;  %v4714_v28 = vld [vmem:[#allocation3 + $0x78] sm:$0xff] }
 0x18f   : > { %v4703_v56 = vld [vmem:[#allocation3 + $0x81] sm:$0xff]  ;;  %3018 = vmatpush3.msra.mxu1 %v1741_v40  ;;  %v2688_v30 = vadd.f32 %v4657_v7, %v2624_v49  ;;  %v2493_v25 = vadd.f32 %v2429_v35, %v4577_v20  ;;  %v2380_v27 = vadd.f32 %v2316_v19, %v4548_v9  ;;  %v2236_v2 = vadd.f32 %v4687_v62, %v4685_v38  ;;  %v4712_v44 = vld [vmem:[#allocation3 + $0x139] sm:$0xff]  ;;  %v4728_v49 = vld [vmem:[#allocation3 + $0x129] sm:$0xff] }
 0x190   : > { %v4716_v43 = vld [vmem:[#allocation3 + $0x79] sm:$0xff]  ;;  %1838 = vmatmul.mubr.f32.vlgmr.msra.gmra.mxu1 %v4668_v39  ;;  %3048 = vmatprep.subr.mxu0 %v2704_v0  ;;  %v2703_v51 = vadd.f32 %v2671_v3, %v2639_v1  ;;  %v2687_v19 = vadd.f32 %v4682_v34, %v2623_v52  ;;  %v2702_v37 = vadd.f32 %v2638_v60, %v4616_v55  ;;  %v4726_v40 = vld [vmem:[#allocation3 + $0x128] sm:$0xff] }
 0x191   : > { %5451 = vst [vmem:[#allocation5_spill] sm:$0xff] %v4716_v43  ;;  %v4722_v63 = vld [vmem:[%s5198_s10 + $0x10] sm:$0xff]  ;;  %5453 = vst [vmem:[#allocation35_spill] sm:$0xff] %v4728_v49  ;;  %1842 = vmatprep.mubr.f32.mxu1 %v4679_v50  ;;  %3049 = vmatpush3.msra.mxu0 %v2688_v30  ;;  %v2558_v35 = vadd.f32 %v2493_v25, %v4588_v57  ;;  %v2444_v39 = vadd.f32 %v2380_v27, %v4550_v42  ;;  %v4743_v55 = vld [vmem:[%s5198_s10 + $0x28] sm:$0xff] }
 0x192   : > { %5452 = vst [vmem:[#allocation34_spill] sm:$0xff] %v4722_v63  ;;  %v2300_v7 = vadd.f32 %v4693_v54, %v2236_v2  ;;  %v4734_v5 = vld [vmem:[#allocation3 + $0x142] sm:$0xff]  ;;  %v4738_v0 = vld [vmem:[#allocation3 + $0x13a] sm:$0xff]  ;;  %5454 = vst [vmem:[#allocation36_spill] sm:$0xff] %v4743_v55  ;;  %3050 = vmatprep.subr.mxu0 %v2703_v51  ;;  %v2251_v1 = vadd.f32 %v4697_v33, %v4695_v48  ;;  %v2235_v52 = vadd.f32 %v4703_v56, %v4701_v15 }
 0x193   : > { %v4736_v3 = vld [vmem:[#allocation3 + $0x82] sm:$0xff]  ;;  %v2250_v60 = vadd.f32 %v4712_v44, %v4705_v61  ;;  %v2234_v30 = vadd.f32 %v4716_v43, %v4714_v28  ;;  %v4753_v25 = vld [vmem:[#allocation3 + $0x7a] sm:$0xff]  ;;  %3051 = vmatpush3.msra.mxu0 %v2687_v19  ;;  %v2622_v27 = vadd.f32 %v2558_v35, %v4605_v46  ;;  %v2508_v2 = vadd.f32 %v2444_v39, %v4581_v41  ;;  %v4760_v57 = vld [vmem:[#allocation3 + $0x12a] sm:$0xff] }
 0x194   : > { %v2364_v51 = vadd.f32 %v2300_v7, %v4552_v14  ;;  %v2249_v50 = vadd.f32 %v4728_v49, %v4726_v40  ;;  %1843 = vmatmul.mubr.f32.gmra.mxu1 %v4722_v63  ;;  %3052 = vmatprep.subr.mxu0 %v2702_v37  ;;  %v2315_v34 = vadd.f32 %v4734_v5, %v2251_v1  ;;  %v4766_v43 = vld [vmem:[#allocation3 + $0x68] sm:$0xff]  ;;  %v4774_v7 = vld [vmem:[%s5198_s10 + $0x20] sm:$0xff] }
 0x195   : > { %v2299_v17 = vadd.f32 %v4736_v3, %v2235_v52  ;;  %v2314_v19 = vadd.f32 %v4738_v0, %v2250_v60  ;;  %v4768_v35 = vld [vmem:[#allocation3 + $0x69] sm:$0xff]  ;;  %1847 = vmatprep.mubr.f32.mxu1 %v4743_v55  ;;  %5455 = vst [vmem:[#allocation37_spill] sm:$0xff] %v4774_v7  ;;  %v2686_v39 = vadd.f32 %v2622_v27, %v4624_v18 }
 0x196   : > { %v2573_v37 = vadd.f32 %v2508_v2, %v4600_v36  ;;  %v2428_v1 = vadd.f32 %v2364_v51, %v4558_v10  ;;  %v2298_v52 = vadd.f32 %v4753_v25, %v2234_v30  ;;  %v4783_v60 = vld [vmem:[%s5198_s10 + $0x38] sm:$0xff]  ;;  %v2379_v55 = vadd.f32 %v2315_v34, %v4560_v21 }
 0x197   : > { %5456 = vst [vmem:[#allocation38_spill] sm:$0xff] %v4783_v60  ;;  %v2363_v63 = vadd.f32 %v2299_v17, %v4610_v29  ;;  %v2378_v46 = vadd.f32 %v2314_v19, %v4645_v4  ;;  %v2313_v49 = vadd.f32 %v4760_v57, %v2249_v50  ;;  %v4789_v27 = vld [vmem:[#allocation3 + $0x6a] sm:$0xff]  ;;  %3053 = vmatpush3.msra.mxu0 %v2686_v39  ;;  %v4801_v39 = vld [vmem:[#allocation3 + $0x120] sm:$0xff] }
 0x198   : > { %v2637_v36 = vadd.f32 %v2573_v37, %v4619_v58  ;;  %v2492_v30 = vadd.f32 %v2428_v1, %v4583_v22  ;;  %v2362_v2 = vadd.f32 %v2298_v52, %v4685_v38  ;;  %v2233_v51 = vadd.f32 %v4768_v35, %v4766_v43  ;;  %1848 = vmatmul.mubr.f32.gmra.mxu1 %v4774_v7  ;;  %v4803_v58 = vld [vmem:[#allocation3 + $0x121] sm:$0xff] }
 0x199   : > { %v2443_v17 = vadd.f32 %v2379_v55, %v4562_v11  ;;  %v2427_v34 = vadd.f32 %v2363_v63, %v4612_v32  ;;  %v2442_v50 = vadd.f32 %v2378_v46, %v4647_v6  ;;  %v2377_v19 = vadd.f32 %v2313_v49, %v4695_v48  ;;  %1852 = vmatprep.mubr.f32.mxu1 %v4783_v60  ;;  %v4809_v37 = vld [vmem:[%s5198_s10 + $0x30] sm:$0xff]  ;;  %v4818_v49 = vld [vmem:[%s5198_s10 + $0x48] sm:$0xff] }
 0x19a   : > { %5457 = vst [vmem:[#allocation30_spill] sm:$0xff] %v4809_v37  ;;  %v2701_v1 = vadd.f32 %v2637_v36, %v4633_v16  ;;  %v2557_v55 = vadd.f32 %v2492_v30, %v4602_v47  ;;  %v2426_v63 = vadd.f32 %v2362_v2, %v4687_v62  ;;  %v2297_v46 = vadd.f32 %v4789_v27, %v2233_v51  ;;  %v4824_v16 = vld [vmem:[#allocation3 + $0x122] sm:$0xff]  ;;  %v4863_v47 = vld [vmem:[#allocation3 + $0x111] sm:$0xff] }
 0x19b   : > { %5458 = vst [vmem:[#allocation31_spill] sm:$0xff] %v4818_v49  ;;  %v2507_v52 = vadd.f32 %v2443_v17, %v4585_v23  ;;  %v2491_v60 = vadd.f32 %v2427_v34, %v4629_v59  ;;  %v2506_v7 = vadd.f32 %v2442_v50, %v4662_v45  ;;  %v2441_v18 = vadd.f32 %v2377_v19, %v4697_v33 }
 0x19c   : > { %3054 = vmatprep.subr.mxu0 %v2701_v1  ;;  %v2621_v36 = vadd.f32 %v2557_v55, %v4621_v31  ;;  %v2490_v30 = vadd.f32 %v2426_v63, %v4693_v54  ;;  %v2361_v2 = vadd.f32 %v2297_v46, %v4701_v15  ;;  %v2248_v51 = vadd.f32 %v4803_v58, %v4801_v39  ;;  %v4836_v1 = vld [vmem:[#allocation3 + $0x60] sm:$0xff]  ;;  %v4844_v63 = vld [vmem:[%s5198_s10 + $0x40] sm:$0xff] }
 0x19d   : > { %1853 = vmatmul.mubr.f32.gmra.mxu1 %v4809_v37  ;;  %v2572_v17 = vadd.f32 %v2507_v52, %v4530_v26  ;;  %v2556_v34 = vadd.f32 %v2491_v60, %v4538_v13  ;;  %v2571_v50 = vadd.f32 %v2506_v7, %v4548_v9  ;;  %v2505_v19 = vadd.f32 %v2441_v18, %v4734_v5  ;;  %v4838_v55 = vld [vmem:[#allocation3 + $0x61] sm:$0xff]  ;;  %v4861_v31 = vld [vmem:[#allocation3 + $0x110] sm:$0xff] }
 0x19e   : > { %5459 = vst [vmem:[#allocation42_spill] sm:$0xff] %v4836_v1  ;;  %1857 = vmatprep.mubr.f32.mxu1 %v4818_v49  ;;  %5460 = vst [vmem:[#allocation53_spill] sm:$0xff] %v4844_v63  ;;  %v4849_v26 = vld [vmem:[%s5198_s10 + $0x58] sm:$0xff]  ;;  %v2685_v13 = vadd.f32 %v2621_v36, %v4635_v53  ;;  %v2555_v9 = vadd.f32 %v2490_v30, %v4552_v14  ;;  %v2425_v18 = vadd.f32 %v2361_v2, %v4703_v56  ;;  %v4865_v36 = vld [vmem:[#allocation3 + $0x50] sm:$0xff] }
 0x19f   : > { %5461 = vst [vmem:[#allocation54_spill] sm:$0xff] %v4849_v26  ;;  %v2312_v7 = vadd.f32 %v4824_v16, %v2248_v51  ;;  %v4855_v60 = vld [vmem:[#allocation3 + $0x62] sm:$0xff]  ;;  %v2636_v46 = vadd.f32 %v2572_v17, %v4532_v8  ;;  %v2620_v52 = vadd.f32 %v2556_v34, %v4540_v24  ;;  %v2635_v49 = vadd.f32 %v2571_v50, %v4550_v42  ;;  %v4872_v24 = vld [vmem:[#allocation3 + $0x51] sm:$0xff]  ;;  %v4952_v53 = vld [vmem:[#allocation3 + $0xfa] sm:$0xff] }
 0x1a0   : > { %v2570_v37 = vadd.f32 %v2505_v19, %v4560_v21  ;;  %3055 = vmatpush3.msra.mxu0 %v2685_v13  ;;  %v2619_v14 = vadd.f32 %v2555_v9, %v4558_v10  ;;  %v2489_v30 = vadd.f32 %v2425_v18, %v4736_v3  ;;  %v2232_v8 = vadd.f32 %v4838_v55, %v4836_v1  ;;  %v4874_v42 = vld [vmem:[#allocation3 + $0x108] sm:$0xff]  ;;  %v4882_v51 = vld [vmem:[%s5198_s10 + $0x50] sm:$0xff] }
 0x1a1   : > { %v2376_v2 = vadd.f32 %v2312_v7, %v4705_v61  ;;  %v4876_v21 = vld [vmem:[#allocation3 + $0x109] sm:$0xff]  ;;  %1858 = vmatmul.mubr.f32.gmra.mxu1 %v4844_v63  ;;  %5462 = vst [vmem:[#allocation27_spill] sm:$0xff] %v4882_v51  ;;  %v2700_v10 = vadd.f32 %v2636_v46, %v4536_v12  ;;  %v2684_v17 = vadd.f32 %v2620_v52, %v4577_v20  ;;  %v4897_v46 = vld [vmem:[#allocation3 + $0x112] sm:$0xff] }
 0x1a2   : > { %v2699_v34 = vadd.f32 %v2635_v49, %v4581_v41  ;;  %v2634_v50 = vadd.f32 %v2570_v37, %v4562_v11  ;;  %v4888_v19 = vld [vmem:[#allocation3 + $0x48] sm:$0xff]  ;;  %1862 = vmatprep.mubr.f32.mxu1 %v4849_v26  ;;  %v2683_v9 = vadd.f32 %v2619_v14, %v4583_v22  ;;  %v2554_v18 = vadd.f32 %v2489_v30, %v4610_v29  ;;  %v4899_v20 = vld [vmem:[#allocation3 + $0x52] sm:$0xff] }
 0x1a3   : > { %v4890_v13 = vld [vmem:[#allocation3 + $0x49] sm:$0xff]  ;;  %v2440_v7 = vadd.f32 %v2376_v2, %v4712_v44  ;;  %v2296_v12 = vadd.f32 %v4855_v60, %v2232_v8  ;;  %v4906_v11 = vld [vmem:[%s5198_s10 + $0x68] sm:$0xff]  ;;  %3056 = vmatprep.subr.mxu0 %v2700_v10  ;;  %v2247_v29 = vadd.f32 %v4863_v47, %v4861_v31  ;;  %v2231_v37 = vadd.f32 %v4872_v24, %v4865_v36 }
 0x1a4   : > { %v4901_v41 = vld [vmem:[#allocation3 + $0x10a] sm:$0xff]  ;;  %5463 = vst [vmem:[#allocation25_spill] sm:$0xff] %v4906_v11  ;;  %v2698_v22 = vadd.f32 %v2634_v50, %v4585_v23  ;;  %v2246_v49 = vadd.f32 %v4876_v21, %v4874_v42  ;;  %3057 = vmatpush3.msra.mxu0 %v2684_v17  ;;  %v2618_v52 = vadd.f32 %v2554_v18, %v4612_v32  ;;  %v4922_v8 = vld [vmem:[#allocation3 + $0xf8] sm:$0xff] }
 0x1a5   : > { %v2504_v14 = vadd.f32 %v2440_v7, %v4738_v0  ;;  %v2360_v30 = vadd.f32 %v2296_v12, %v4714_v28  ;;  %v2230_v2 = vadd.f32 %v4890_v13, %v4888_v19  ;;  %v4920_v23 = vld [vmem:[#allocation3 + $0x4a] sm:$0xff]  ;;  %1863 = vmatmul.mubr.f32.gmra.mxu1 %v4882_v51  ;;  %3058 = vmatprep.subr.mxu0 %v2699_v34  ;;  %v4928_v50 = vld [vmem:[#allocation3 + $0xf9] sm:$0xff] }
 0x1a6   : > { %v2311_v10 = vadd.f32 %v4897_v46, %v2247_v29  ;;  %v2295_v17 = vadd.f32 %v4899_v20, %v2231_v37  ;;  %v2310_v32 = vadd.f32 %v4901_v41, %v2246_v49  ;;  %5464 = vst [vmem:[#allocation26_spill] sm:$0xff] %v4928_v50  ;;  %v4930_v18 = vld [vmem:[#allocation3 + $0x38] sm:$0xff]  ;;  %1867 = vmatprep.mubr.f32.mxu1 %v4906_v11  ;;  %v4938_v12 = vld [vmem:[%s5198_s10 + $0x60] sm:$0xff]  ;;  %v4946_v51 = vld [vmem:[%s5198_s10 + $0x78] sm:$0xff] }
 0x1a7   : > { %v4932_v7 = vld [vmem:[#allocation3 + $0x39] sm:$0xff]  ;;  %5466 = vst [vmem:[#allocation45_spill] sm:$0xff] %v4938_v12  ;;  %3059 = vmatpush3.msra.mxu0 %v2683_v9  ;;  %v2682_v34 = vadd.f32 %v2618_v52, %v4629_v59  ;;  %v2569_v29 = vadd.f32 %v2504_v14, %v4645_v4  ;;  %5468 = vst [vmem:[#allocation29_spill] sm:$0xff] %v4946_v51  ;;  %v2294_v9 = vadd.f32 %v4920_v23, %v2230_v2 }
 0x1a8   : > { %5465 = vst [vmem:[#allocation44_spill] sm:$0xff] %v4932_v7  ;;  %v5467_v37 = vld [vmem:[#allocation5_spill] sm:$0xff]  ;;  %3060 = vmatprep.subr.mxu0 %v2698_v22  ;;  %v2375_v11 = vadd.f32 %v2311_v10, %v4726_v40  ;;  %v2359_v26 = vadd.f32 %v2295_v17, %v4766_v43  ;;  %v2374_v63 = vadd.f32 %v2310_v32, %v4801_v39 }
 0x1a9   : > { %v2424_v49 = vadd.f32 %v2360_v30, %v5467_v37  ;;  %v4954_v59 = vld [vmem:[#allocation3 + $0x3a] sm:$0xff]  ;;  %3061 = vmatpush3.msra.mxu0 %v2682_v34  ;;  %v2633_v4 = vadd.f32 %v2569_v29, %v4647_v6  ;;  %v2245_v22 = vadd.f32 %v4928_v50, %v4922_v8  ;;  %v2229_v14 = vadd.f32 %v4932_v7, %v4930_v18  ;;  %v5469_v30 = vld [vmem:[#allocation35_spill] sm:$0xff]  ;;  %v4967_v34 = vld [vmem:[#allocation3 + $0xf0] sm:$0xff] }
 0x1aa   : > { %1868 = vmatmul.mubr.f32.gmra.mxu1 %v4938_v12  ;;  %v2439_v10 = vadd.f32 %v2375_v11, %v5469_v30  ;;  %v2423_v2 = vadd.f32 %v2359_v26, %v4768_v35  ;;  %v2438_v17 = vadd.f32 %v2374_v63, %v4803_v58  ;;  %v2358_v32 = vadd.f32 %v2294_v9, %v4836_v1  ;;  %v4969_v6 = vld [vmem:[#allocation3 + $0xf1] sm:$0xff]  ;;  %v4975_v29 = vld [vmem:[%s5198_s10 + $0x70] sm:$0xff] }
 0x1ab   : > { %v2488_v52 = vadd.f32 %v2424_v49, %v4753_v25  ;;  %1872 = vmatprep.mubr.f32.mxu1 %v4946_v51  ;;  %5470 = vst [vmem:[#allocation24_spill] sm:$0xff] %v4975_v29  ;;  %v2697_v49 = vadd.f32 %v2633_v4, %v4662_v45  ;;  %v2309_v26 = vadd.f32 %v4952_v53, %v2245_v22  ;;  %v4985_v7 = vld [vmem:[#allocation3 + $0xf2] sm:$0xff] }
 0x1ac   : > { %v2293_v63 = vadd.f32 %v4954_v59, %v2229_v14  ;;  %v2503_v9 = vadd.f32 %v2439_v10, %v4760_v57  ;;  %v2487_v12 = vadd.f32 %v2423_v2, %v4789_v27  ;;  %v2502_v1 = vadd.f32 %v2438_v17, %v4824_v16  ;;  %v4997_v2 = vld [vmem:[#allocation3 + $0x30] sm:$0xff] }
 0x1ad   : > { %v2553_v11 = vadd.f32 %v2488_v52, %v4685_v38  ;;  %v2422_v51 = vadd.f32 %v2358_v32, %v4838_v55  ;;  %3062 = vmatprep.subr.mxu0 %v2697_v49  ;;  %v2373_v45 = vadd.f32 %v2309_v26, %v4861_v31  ;;  %v2244_v4 = vadd.f32 %v4969_v6, %v4967_v34 }
 0x1ae   : > { %v2357_v38 = vadd.f32 %v2293_v63, %v4865_v36  ;;  %1873 = vmatmul.mubr.f32.gmra.mxu1 %v4975_v29  ;;  %v2568_v52 = vadd.f32 %v2503_v9, %v4695_v48  ;;  %v2552_v22 = vadd.f32 %v2487_v12, %v4701_v15  ;;  %v2567_v14 = vadd.f32 %v2502_v1, %v4705_v61  ;;  %v2131_v63 = vld [vmem:[#allocation3 + $0x20] sm:$0xff] }
 0x1af   : > { %v2617_v50 = vadd.f32 %v2553_v11, %v4687_v62  ;;  %v2486_v10 = vadd.f32 %v2422_v51, %v4855_v60  ;;  %v4999_v62 = vld [vmem:[#allocation3 + $0x31] sm:$0xff]  ;;  %v2437_v32 = vadd.f32 %v2373_v45, %v4863_v47  ;;  %v2308_v11 = vadd.f32 %v4985_v7, %v2244_v4 }
 0x1b0   : > { %v2421_v49 = vadd.f32 %v2357_v38, %v4872_v24  ;;  %v2632_v48 = vadd.f32 %v2568_v52, %v4697_v33  ;;  %v2616_v15 = vadd.f32 %v2552_v22, %v4703_v56  ;;  %v2631_v61 = vadd.f32 %v2567_v14, %v4712_v44  ;;  %v5009_v51 = vld [vmem:[#allocation3 + $0x32] sm:$0xff]  ;;  %v5016_v33 = vld [vmem:[#allocation3 + $0x21] sm:$0xff] }
 0x1b1   : > { %v2681_v17 = vadd.f32 %v2617_v50, %v4693_v54  ;;  %v2551_v1 = vadd.f32 %v2486_v10, %v4714_v28  ;;  %v2501_v12 = vadd.f32 %v2437_v32, %v4897_v46  ;;  %v2372_v50 = vadd.f32 %v2308_v11, %v4874_v42  ;;  %v5026_v22 = vld [vmem:[#allocation3 + $0x22] sm:$0xff]  ;;  %v5028_v14 = vld [vmem:[#allocation3 + $0x18] sm:$0xff] }
 0x1b2   : > { %v2485_v54 = vadd.f32 %v2421_v49, %v4899_v20  ;;  %v2228_v26 = vadd.f32 %v4999_v62, %v4997_v2  ;;  %v2696_v56 = vadd.f32 %v2632_v48, %v4734_v5  ;;  %v2680_v44 = vadd.f32 %v2616_v15, %v4736_v3  ;;  %v5030_v10 = vld [vmem:[#allocation3 + $0x19] sm:$0xff]  ;;  %v5471_v3 = vld [vmem:[#allocation48_spill] sm:$0xff] }
 0x1b3   : > { %3063 = vmatpush3.msra.mxu0 %v2681_v17  ;;  %v2695_v28 = vadd.f32 %v2631_v61, %v4738_v0  ;;  %v2615_v9 = vadd.f32 %v2551_v1, %v5467_v37  ;;  %v2566_v45 = vadd.f32 %v2501_v12, %v4726_v40  ;;  %v2436_v4 = vadd.f32 %v2372_v50, %v4876_v21  ;;  %v5472_v0 = vld [vmem:[#allocation6_spill] sm:$0xff]  ;;  %v5473_v17 = vld [vmem:[#allocation49_spill] sm:$0xff] }
 0x1b4   : > { %v2550_v38 = vadd.f32 %v2485_v54, %v4766_v43  ;;  %v2292_v52 = vadd.f32 %v5009_v51, %v2228_v26  ;;  %3064 = vmatprep.subr.mxu0 %v2696_v56  ;;  %v2243_v37 = vadd.f32 %v5472_v0, %v5471_v3  ;;  %v2227_v40 = vadd.f32 %v5016_v33, %v2131_v63  ;;  %v5474_v43 = vld [vmem:[#allocation41_spill] sm:$0xff]  ;;  %v5476_v54 = vld [vmem:[#allocation4_spill] sm:$0xff]  ;;  %v2129_v56 = vld [vmem:[#allocation3 + $0x8] sm:$0xff] }
 0x1b5   : > { %v2679_v5 = vadd.f32 %v2615_v9, %v4753_v25  ;;  %v2242_v32 = vadd.f32 %v5474_v43, %v5473_v17  ;;  %3065 = vmatpush3.msra.mxu0 %v2680_v44  ;;  %v2630_v49 = vadd.f32 %v2566_v45, %v5469_v30  ;;  %v2500_v48 = vadd.f32 %v2436_v4, %v4901_v41  ;;  %v5042_v61 = vld [vmem:[#allocation3 + $0x1a] sm:$0xff]  ;;  %v5475_v25 = vld [vmem:[#allocation39_spill] sm:$0xff] }
 0x1b6   : > { %v2614_v11 = vadd.f32 %v2550_v38, %v4768_v35  ;;  %v2356_v15 = vadd.f32 %v2292_v52, %v4888_v19  ;;  %3066 = vmatprep.subr.mxu0 %v2695_v28  ;;  %v2307_v1 = vadd.f32 %v5475_v25, %v2243_v37  ;;  %v2291_v12 = vadd.f32 %v5026_v22, %v2227_v40  ;;  %v2193_v30 = vld [vmem:[#allocation3 + $0x9] sm:$0xff] }
 0x1b7   : > { %v2306_v50 = vadd.f32 %v5476_v54, %v2242_v32  ;;  %v2226_v26 = vadd.f32 %v5030_v10, %v5028_v14  ;;  %3067 = vmatpush3.msra.mxu0 %v2679_v5  ;;  %v2694_v35 = vadd.f32 %v2630_v49, %v4760_v57  ;;  %v2565_v9 = vadd.f32 %v2500_v48, %v4801_v39  ;;  %v2257_v37 = vld [vmem:[#allocation3 + $0xa] sm:$0xff]  ;;  %v5479_v49 = vld [vmem:[#allocation26_spill] sm:$0xff] }
 0x1b8   : > { %v2678_v44 = vadd.f32 %v2614_v11, %v4789_v27  ;;  %v2420_v28 = vadd.f32 %v2356_v15, %v4890_v13  ;;  %v2371_v45 = vadd.f32 %v2307_v1, %v4922_v8  ;;  %v2355_v38 = vadd.f32 %v2291_v12, %v4930_v18  ;;  %v5477_v40 = vld [vmem:[#allocation56_spill] sm:$0xff]  ;;  %v5478_v27 = vld [vmem:[#allocation58_spill] sm:$0xff] }
 0x1b9   : > { %v2370_v4 = vadd.f32 %v2306_v50, %v4967_v34  ;;  %v2290_v52 = vadd.f32 %v5042_v61, %v2226_v26  ;;  %3068 = vmatprep.subr.mxu0 %v2694_v35  ;;  %v2629_v5 = vadd.f32 %v2565_v9, %v4803_v58  ;;  %v2241_v32 = vadd.f32 %v5478_v27, %v5477_v40  ;;  %v5480_v48 = vld [vmem:[#allocation44_spill] sm:$0xff]  ;;  %v5481_v26 = vld [vmem:[#allocation42_spill] sm:$0xff]  ;;  %v5482_v58 = vld [vmem:[#allocation47_spill] sm:$0xff] }
 0x1ba   : > { %v2484_v57 = vadd.f32 %v2420_v28, %v4920_v23  ;;  %v2225_v39 = vadd.f32 %v2193_v30, %v2129_v56  ;;  %3069 = vmatpush3.msra.mxu0 %v2678_v44  ;;  %v2435_v11 = vadd.f32 %v2371_v45, %v5479_v49  ;;  %v2419_v15 = vadd.f32 %v2355_v38, %v5480_v48 }
 0x1bb   : > { %v2434_v1 = vadd.f32 %v2370_v4, %v4969_v6  ;;  %v2354_v12 = vadd.f32 %v2290_v52, %v4997_v2  ;;  %v2693_v50 = vadd.f32 %v2629_v5, %v4824_v16  ;;  %v2305_v9 = vadd.f32 %v5482_v58, %v2241_v32  ;;  %v5483_v16 = vld [vmem:[#allocation51_spill] sm:$0xff]  ;;  %v5484_v52 = vld [vmem:[#allocation46_spill] sm:$0xff] }
 0x1bc   : > { %v2549_v35 = vadd.f32 %v2484_v57, %v5481_v26  ;;  %v2289_v28 = vadd.f32 %v2257_v37, %v2225_v39  ;;  %v2499_v29 = vadd.f32 %v2435_v11, %v4952_v53  ;;  %v2483_v56 = vadd.f32 %v2419_v15, %v4954_v59  ;;  %v2128_v32 = vld [vmem:[#allocation3] sm:$0xff]  ;;  %v5493_v58 = vld [vmem:[#allocation31_spill] sm:$0xff] }
 0x1bd   : > { %v2498_v30 = vadd.f32 %v2434_v1, %v4985_v7  ;;  %v2418_v44 = vadd.f32 %v2354_v12, %v4999_v62  ;;  %3070 = vmatprep.subr.mxu0 %v2693_v50  ;;  %v2369_v38 = vadd.f32 %v5471_v3, %v2305_v9  ;;  %v2240_v5 = vadd.f32 %v5484_v52, %v5483_v16  ;;  %v2192_v39 = vld [vmem:[#allocation3 + $0x1] sm:$0xff]  ;;  %v5494_v9 = vld [vmem:[#allocation53_spill] sm:$0xff]  ;;  %v2958_v52 = vld [vmem:[%s5193_s5] ss:$0 sm:$0xff] }
 0x1be   : > { %v2613_v45 = vadd.f32 %v2549_v35, %v4838_v55  ;;  %v2353_v4 = vadd.f32 %v2289_v28, %v2131_v63  ;;  %v2564_v57 = vadd.f32 %v2499_v29, %v4861_v31  ;;  %v2548_v37 = vadd.f32 %v2483_v56, %v4865_v36  ;;  %v5485_v63 = vld [vmem:[#allocation55_spill] sm:$0xff]  ;;  %v5495_v28 = vld [vmem:[#allocation54_spill] sm:$0xff] }
 0x1bf   : > { %v2563_v40 = vadd.f32 %v2498_v30, %v4874_v42  ;;  %v2482_v27 = vadd.f32 %v2418_v44, %v5009_v51  ;;  %v2433_v55 = vadd.f32 %v5472_v0, %v2369_v38  ;;  %v2304_v15 = vadd.f32 %v5485_v63, %v2240_v5  ;;  %v2256_v29 = vld [vmem:[#allocation3 + $0x2] sm:$0xff]  ;;  %v5497_v30 = vld [vmem:[#allocation25_spill] sm:$0xff]  ;;  %v5500_v38 = vld [vmem:[#allocation24_spill] sm:$0xff] }
 0x1c0   : > { %v2677_v11 = vadd.f32 %v2613_v45, %v4855_v60  ;;  %v2417_v3 = vadd.f32 %v2353_v4, %v5016_v33  ;;  %v2628_v1 = vadd.f32 %v2564_v57, %v4863_v47  ;;  %v2612_v31 = vadd.f32 %v2548_v37, %v4872_v24  ;;  %v5496_v56 = vld [vmem:[#allocation27_spill] sm:$0xff]  ;;  %v5498_v44 = vld [vmem:[#allocation45_spill] sm:$0xff] }
 0x1c1   : > { %v2627_v36 = vadd.f32 %v2563_v40, %v4876_v21  ;;  %v2547_v42 = vadd.f32 %v2482_v27, %v4888_v19  ;;  %v2497_v12 = vadd.f32 %v5475_v25, %v2433_v55  ;;  %v2368_v0 = vadd.f32 %v5473_v17, %v2304_v15  ;;  %v5499_v45 = vld [vmem:[#allocation29_spill] sm:$0xff]  ;;  %v2959_v40 = vld [vmem:[%s5194_s6] ss:$0 sm:$0xff] }
 0x1c2   : > { %3071 = vmatpush3.msra.mxu0 %v2677_v11  ;;  %v2481_v60 = vadd.f32 %v2417_v3, %v5026_v22  ;;  %v2224_v50 = vadd.f32 %v2192_v39, %v2128_v32  ;;  %v2692_v33 = vadd.f32 %v2628_v1, %v4897_v46  ;;  %v2676_v26 = vadd.f32 %v2612_v31, %v4899_v20 }
 0x1c3   : > { %v2691_v47 = vadd.f32 %v2627_v36, %v4901_v41  ;;  %v2611_v24 = vadd.f32 %v2547_v42, %v4890_v13  ;;  %v2562_v21 = vadd.f32 %v2497_v12, %v4922_v8  ;;  %v2432_v35 = vadd.f32 %v5474_v43, %v2368_v0 }
 0x1c4   : > { %v2546_v19 = vadd.f32 %v2481_v60, %v4930_v18  ;;  %v2288_v25 = vadd.f32 %v2256_v29, %v2224_v50  ;;  %3072 = vmatprep.subr.mxu0 %v2692_v33 }
 0x1c5   : > { %v2675_v22 = vadd.f32 %v2611_v24, %v4920_v23  ;;  %3073 = vmatpush3.msra.mxu0 %v2676_v26  ;;  %v2626_v17 = vadd.f32 %v2562_v21, %v5479_v49  ;;  %v2496_v20 = vadd.f32 %v5476_v54, %v2432_v35 }
 0x1c6   : > { %v2610_v46 = vadd.f32 %v2546_v19, %v5480_v48  ;;  %v2352_v41 = vadd.f32 %v2288_v25, %v5028_v14  ;;  %3074 = vmatprep.subr.mxu0 %v2691_v47 }
 0x1c7   : > { %3075 = vmatpush3.msra.mxu0 %v2675_v22  ;;  %v2690_v13 = vadd.f32 %v2626_v17, %v4952_v53  ;;  %v2561_v18 = vadd.f32 %v2496_v20, %v4967_v34  ;;  %v1920_v34 = vld [vmem:[%s5195_s7] sm:$0x3] }
 0x1c8   : > { %v2674_v8 = vadd.f32 %v2610_v46, %v4954_v59  ;;  %v2416_v43 = vadd.f32 %v2352_v41, %v5030_v10  ;;  %v5486_v59 = vld [vmem:[#allocation40_spill] sm:$0xff]  ;;  %3150 = vmatprep.subr.msk.bf16.mxu1 %vm1933_vm4, %v1920_v34  ;;  %v5488_v10 = vld [vmem:[#allocation34_spill] sm:$0xff] }
 0x1c9   : > { %3076 = vmatprep.subr.mxu0 %v2690_v13  ;;  %v2625_v23 = vadd.f32 %v2561_v18, %v4969_v6  ;;  %v5487_v6 = vld [vmem:[#allocation57_spill] sm:$0xff] }
 0x1ca   : > { %v2480_v49 = vadd.f32 %v2416_v43, %v5042_v61  ;;  %3077 = vmatpush3.msra.mxu0 %v2674_v8  ;;  %v5492_v61 = vld [vmem:[#allocation30_spill] sm:$0xff] }
 0x1cb   : > { %v2689_v54 = vadd.f32 %v2625_v23, %v4985_v7  ;;  %v5489_v7 = vld [vmem:[#allocation36_spill] sm:$0xff] }
 0x1cc   : > { %v2545_v14 = vadd.f32 %v2480_v49, %v4997_v2  ;;  %v5490_v2 = vld [vmem:[#allocation37_spill] sm:$0xff] }
 0x1cd   : > { %3078 = vmatprep.subr.mxu0 %v2689_v54 }
 0x1ce   : > { %v2609_v48 = vadd.f32 %v2545_v14, %v4999_v62  ;;  %v5491_v62 = vld [vmem:[#allocation38_spill] sm:$0xff] }
 0x1d0   : > { %v2673_v53 = vadd.f32 %v2609_v48, %v5009_v51  ;;  %v1935_v51 = vsel %vm1933_vm4, %v1920_v34, 0 }
 0x1d1   : > { %3139 = vmatpush3.bf16.msra.mxu1 %v1935_v51 }
 0x1d2   : > { %3079 = vmatpush3.msra.mxu0 %v2673_v53 }
 0x1d3   : > { %2770 = vmatmul.mubr.f32.vlgmr.msra.gmra.mxu0 %v5486_v59 }
 0x1d4   : > { %2774 = vmatprep.mubr.f32.mxu0 %v5487_v6 }
 0x1d7   : > { %2775 = vmatmul.mubr.f32.gmra.mxu0 %v5488_v10 }
 0x1d8   : > { %2779 = vmatprep.mubr.f32.mxu0 %v5489_v7 }
 0x1db   : > { %2780 = vmatmul.mubr.f32.gmra.mxu0 %v5490_v2 }
 0x1dc   : > { %2784 = vmatprep.mubr.f32.mxu0 %v5491_v62 }
 0x1df   : > { %2785 = vmatmul.mubr.f32.gmra.mxu0 %v5492_v61 }
 0x1e0   : > { %2789 = vmatprep.mubr.f32.mxu0 %v5493_v58 }
 0x1e3   : > { %2790 = vmatmul.mubr.f32.gmra.mxu0 %v5494_v9 }
 0x1e4   : > { %2794 = vmatprep.mubr.f32.mxu0 %v5495_v28 }
 0x1e7   : > { %2795 = vmatmul.mubr.f32.gmra.mxu0 %v5496_v56 }
 0x1e8   : > { %2799 = vmatprep.mubr.f32.mxu0 %v5497_v30 }
 0x1eb   : > { %2800 = vmatmul.mubr.f32.gmra.mxu0 %v5498_v44 }
 0x1ec   : > { %2804 = vmatprep.mubr.f32.mxu0 %v5499_v45 }
 0x1ef   : > { %2805 = vmatmul.mubr.f32.gmra.mxu0 %v5500_v38 }
 0x250   : > { %v3019_v4 = vpop.f32.mrf.mxu1 }
 0x252   : > { %v3020_v16 = vpop.f32.mrf.mxu1 }
 0x253   : > { %v3021_v5 = vadd.f32 %v3020_v16, %v3019_v4 }
 0x254   : > { %v3022_v57 = vpop.f32.mrf.mxu1 }
 0x255   : > { %v1885_v37 = vmul.f32 %v3021_v5, %v2958_v52 }
 0x256   : > { %v3023_v27 = vpop.f32.mrf.mxu1 }
 0x257   : > { %v3024_v32 = vadd.f32 %v3023_v27, %v3022_v57  ;;  %v1900_v11 = vadd.f32 %v2959_v40, %v1885_v37 }
 0x258   : > { %v3025_v39 = vpop.f32.mrf.mxu1 }
 0x259   : > { %v1886_v55 = vmul.f32 %v3024_v32, %v2958_v52  ;;  %v1908_v31 = vmax.f32 %v1900_v11, 0.0 }
 0x25a   : > { %v3026_v3 = vpop.f32.mrf.mxu1 }
 0x25b   : > { %v1901_v63 = vadd.f32 %v2959_v40, %v1886_v55  ;;  %v3027_v15 = vadd.f32 %v3026_v3, %v3025_v39 }
 0x25d   : > { %v3028_v1 = vpop.f32.mrf.mxu1  ;;  %v1909_v36 = vmax.f32 %v1901_v63, 0.0  ;;  %v1887_v42 = vmul.f32 %v3027_v15, %v2958_v52 }
 0x25f   : > { %v3029_v29 = vpop.f32.mrf.mxu1  ;;  %v1916_v12 = vpack.c.bf16 %v1909_v36, %v1908_v31  ;;  %v1902_v50 = vadd.f32 %v2959_v40, %v1887_v42 }
 0x260   : > { %v3030_v60 = vadd.f32 %v3029_v29, %v3028_v1 }
 0x261   : > { %v3031_v0 = vpop.f32.mrf.mxu1  ;;  %3140 = vmatprep.mubr.msk.bf16.mxu1 %vm780_vm2, %v1916_v12  ;;  %v1910_v19 = vmax.f32 %v1902_v50, 0.0 }
 0x262   : > { %v1888_v33 = vmul.f32 %v3030_v60, %v2958_v52 }
 0x263   : > { %v3032_v26 = vpop.f32.mrf.mxu1 }
 0x264   : > { %v1903_v47 = vadd.f32 %v2959_v40, %v1888_v33  ;;  %v3033_v24 = vadd.f32 %v3032_v26, %v3031_v0 }
 0x265   : > { %v3034_v21 = vpop.f32.mrf.mxu1 }
 0x266   : > { %v1911_v35 = vmax.f32 %v1903_v47, 0.0  ;;  %v1889_v25 = vmul.f32 %v3033_v24, %v2958_v52 }
 0x267   : > { %v3035_v22 = vpop.f32.mrf.mxu1 }
 0x268   : > { %v1917_v17 = vpack.c.bf16 %v1911_v35, %v1910_v19  ;;  %v3036_v46 = vadd.f32 %v3035_v22, %v3034_v21  ;;  %v1904_v41 = vadd.f32 %v2959_v40, %v1889_v25  ;;  %v2964_v35 = vld [vmem:[%s5196_s8] ss:$0 sm:$0xff] }
 0x269   : > { %v2965_v22 = vld [vmem:[%s5197_s9] ss:$0 sm:$0xff] }
 0x26a   : > { %v3037_v20 = vpop.f32.mrf.mxu1  ;;  %v1890_v13 = vmul.f32 %v3036_v46, %v2958_v52  ;;  %3141 = vmatmul.mubr.msk.bf16.vlgmr.msra.gmra.mxu1 %vm780_vm2, %v1917_v17  ;;  %v1912_v49 = vmax.f32 %v1904_v41, 0.0 }
 0x26c   : > { %v3038_v8 = vpop.f32.mrf.mxu1  ;;  %v1905_v18 = vadd.f32 %v2959_v40, %v1890_v13 }
 0x26d   : > { %v3039_v43 = vadd.f32 %v3038_v8, %v3037_v20 }
 0x26e   : > { %v3040_v23 = vpop.f32.mrf.mxu1  ;;  %v1913_v54 = vmax.f32 %v1905_v18, 0.0 }
 0x26f   : > { %v1891_v14 = vmul.f32 %v3039_v43, %v2958_v52 }
 0x270   : > { %v3041_v48 = vpop.f32.mrf.mxu1  ;;  %v1918_v53 = vpack.c.bf16 %v1913_v54, %v1912_v49 }
 0x271   : > { %v3042_v59 = vadd.f32 %v3041_v48, %v3040_v23  ;;  %v1906_v34 = vadd.f32 %v2959_v40, %v1891_v14 }
 0x272   : > { %3144 = vmatprep.mubr.msk.bf16.mxu1 %vm780_vm2, %v1918_v53 }
 0x273   : > { %v1892_v6 = vmul.f32 %v3042_v59, %v2958_v52  ;;  %v1914_v7 = vmax.f32 %v1906_v34, 0.0 }
 0x275   : > { %v1907_v10 = vadd.f32 %v2959_v40, %v1892_v6 }
 0x277   : > { %v1915_v2 = vmax.f32 %v1907_v10, 0.0 }
 0x279   : > { %v1919_v62 = vpack.c.bf16 %v1915_v2, %v1914_v7 }
 0x27b   : > { %3145 = vmatmul.mubr.msk.bf16.gmra.mxu1 %vm780_vm2, %v1919_v62 }
 0x293   : > { %v3080_v51 = vpop.f32.mrf.mxu0 }
 0x295   : > { %v3081_v61 = vpop.f32.mrf.mxu0 }
 0x296   : > { %v3082_v58 = vadd.f32 %v3081_v61, %v3080_v51 }
 0x297   : > { %v3083_v9 = vpop.f32.mrf.mxu0 }
 0x298   : > { %v2810_v28 = vmul.f32 0.11111111, %v3082_v58 }
 0x299   : > { %v3084_v56 = vpop.f32.mrf.mxu0 }
 0x29a   : > { %v3085_v30 = vadd.f32 %v3084_v56, %v3083_v9  ;;  %v2818_v44 = vmax.f32 %v2810_v28, 0.0 }
 0x29b   : > { %v3086_v45 = vpop.f32.mrf.mxu0 }
 0x29c   : > { %v2811_v38 = vmul.f32 0.11111111, %v3085_v30  ;;  %2834 = vrot.lane.b32.xlu0 %v2818_v44, %s3177_s22 }
 0x29d   : > { %v3087_v4 = vpop.f32.mrf.mxu0 }
 0x29e   : > { %v2819_v16 = vmax.f32 %v2811_v38, 0.0  ;;  %v3088_v52 = vadd.f32 %v3087_v4, %v3086_v45 }
 0x29f   : > { %v3089_v5 = vpop.f32.mrf.mxu0 }
 0x2a0   : > { %v2812_v57 = vmul.f32 0.11111111, %v3088_v52  ;;  %2836 = vrot.lane.b32.xlu0 %v2819_v16, %s3177_s22 }
 0x2a1   : > { %v3090_v37 = vpop.f32.mrf.mxu0 }
 0x2a2   : > { %v3091_v40 = vadd.f32 %v3090_v37, %v3089_v5  ;;  %v2820_v27 = vmax.f32 %v2812_v57, 0.0 }
 0x2a3   : > { %v3092_v32 = vpop.f32.mrf.mxu0 }
 0x2a4   : > { %v2813_v39 = vmul.f32 0.11111111, %v3091_v40  ;;  %2838 = vrot.lane.b32.xlu1 %v2820_v27, %s3177_s22 }
 0x2a5   : > { %v3093_v11 = vpop.f32.mrf.mxu0 }
 0x2a6   : > { %v2821_v55 = vmax.f32 %v2813_v39, 0.0  ;;  %v3094_v3 = vadd.f32 %v3093_v11, %v3092_v32 }
 0x2a7   : > { %v3095_v63 = vpop.f32.mrf.mxu0 }
 0x2a8   : > { %v2814_v15 = vmul.f32 0.11111111, %v3094_v3  ;;  %2840 = vrot.lane.b32.xlu1 %v2821_v55, %s3177_s22 }
 0x2a9   : > { %v3096_v1 = vpop.f32.mrf.mxu0 }
 0x2aa   : > { %v2822_v31 = vmax.f32 %v2814_v15, 0.0  ;;  %v3097_v36 = vadd.f32 %v3096_v1, %v3095_v63 }
 0x2ab   : > { %v3098_v42 = vpop.f32.mrf.mxu0 }
 0x2ac   : > { %v2815_v29 = vmul.f32 0.11111111, %v3097_v36  ;;  %2842 = vrot.lane.b32.xlu0 %v2822_v31, %s3177_s22 }
 0x2ad   : > { %v3099_v12 = vpop.f32.mrf.mxu0 }
 0x2ae   : > { %v2823_v60 = vmax.f32 %v2815_v29, 0.0  ;;  %v3100_v0 = vadd.f32 %v3099_v12, %v3098_v42 }
 0x2af   : > { %v3101_v50 = vpop.f32.mrf.mxu0 }
 0x2b0   : > { %v2816_v33 = vmul.f32 0.11111111, %v3100_v0  ;;  %2844 = vrot.lane.b32.xlu1 %v2823_v60, %s3177_s22 }
 0x2b1   : > { %v3102_v26 = vpop.f32.mrf.mxu0 }
 0x2b2   : > { %v2824_v47 = vmax.f32 %v2816_v33, 0.0  ;;  %v3103_v24 = vadd.f32 %v3102_v26, %v3101_v50 }
 0x2b4   : > { %v2817_v21 = vmul.f32 0.11111111, %v3103_v24  ;;  %2846 = vrot.lane.b32.xlu0 %v2824_v47, %s3177_s22 }
 0x2b6   : > { %v2825_v19 = vmax.f32 %v2817_v21, 0.0 }
 0x2b8   : > { %2848 = vrot.lane.b32.xlu1 %v2825_v19, %s3177_s22 }
 0x30e   : > { %v2835_v49 = vpop.permute.xlu0 %2834 }
 0x312   : > { %v2837_v51 = vpop.permute.xlu0 %2836 }
 0x316   : > { %v2839_v20 = vpop.permute.xlu1 %2838 }
 0x31a   : > { %v2841_v34 = vpop.permute.xlu1 %2840 }
 0x31e   : > { %v2843_v58 = vpop.permute.xlu0 %2842 }
 0x322   : > { %v2845_v45 = vpop.permute.xlu1 %2844 }
 0x326   : > { %v2847_v4 = vpop.permute.xlu0 %2846 }
 0x32a   : > { %v3142_v25 = vpop.f32.mrf.mxu1  ;;  %v2849_v39 = vpop.permute.xlu1 %2848 }
 0x32b   : > { %v2011_v17 = vmul.f32 %v3142_v25, %v2964_v35 }
 0x32c   : > { %v1971_v46 = vpop.f32.mrf.mxu1 }
 0x32d   : > { %v2026_v41 = vadd.f32 %v2965_v22, %v2011_v17  ;;  %v2009_v13 = vmul.f32 %v2964_v35, %v1971_v46 }
 0x32e   : > { %v3143_v8 = vpop.f32.mrf.mxu1 }
 0x32f   : > { %v2034_v18 = vmax.f32 %v2026_v41, 0.0  ;;  %v2024_v43 = vadd.f32 %v2965_v22, %v2009_v13  ;;  %v2012_v23 = vmul.f32 %v3143_v8, %v2964_v35 }
 0x330   : > { %v1974_v54 = vpop.f32.mrf.mxu1 }
 0x331   : > { %v2032_v14 = vmax.f32 %v2024_v43, 0.0  ;;  %v2027_v48 = vadd.f32 %v2965_v22, %v2012_v23  ;;  %v2860_v53 = vsel %vm460_vm0, %v2034_v18, %v2839_v20  ;;  %v2010_v59 = vmul.f32 %v2964_v35, %v1974_v54 }
 0x332   : > { %2869 = vst.msk [vmem:[%s5159_s30 + $0x10] sm:$0xff] %vm2866_vm5, %v2860_v53 }
 0x333   : > { %v2858_v6 = vsel %vm460_vm0, %v2032_v14, %v2835_v49  ;;  %v2035_v10 = vmax.f32 %v2027_v48, 0.0  ;;  %v2025_v7 = vadd.f32 %v2965_v22, %v2010_v59 }
 0x334   : > { %2867 = vst.msk [vmem:[%s5159_s30] sm:$0xff] %vm2866_vm5, %v2858_v6 }
 0x335   : > { %v2033_v2 = vmax.f32 %v2025_v7, 0.0  ;;  %v2861_v62 = vsel %vm460_vm0, %v2035_v10, %v2841_v34 }
 0x336   : > { %2870 = vst.msk [vmem:[%s5159_s30 + $0x18] sm:$0xff] %vm2866_vm5, %v2861_v62 }
 0x337   : > { %v2859_v61 = vsel %vm460_vm0, %v2033_v2, %v2837_v51 }
 0x338   : > { %2868 = vst.msk [vmem:[%s5159_s30 + $0x8] sm:$0xff] %vm2866_vm5, %v2859_v61 }
 0x33b   : > { %v3146_v9 = vpop.f32.mrf.mxu1 }
 0x33c   : > { %v2015_v28 = vmul.f32 %v3146_v9, %v2964_v35 }
 0x33d   : > { %v1987_v56 = vpop.f32.mrf.mxu1 }
 0x33e   : > { %v2030_v30 = vadd.f32 %v2965_v22, %v2015_v28  ;;  %v2013_v44 = vmul.f32 %v2964_v35, %v1987_v56 }
 0x33f   : > { %v3147_v38 = vpop.f32.mrf.mxu1 }
 0x340   : > { %v2038_v16 = vmax.f32 %v2030_v30, 0.0  ;;  %v2028_v52 = vadd.f32 %v2965_v22, %v2013_v44  ;;  %v2016_v5 = vmul.f32 %v3147_v38, %v2964_v35 }
 0x341   : > { %v1990_v57 = vpop.f32.mrf.mxu1 }
 0x342   : > { %v2036_v37 = vmax.f32 %v2028_v52, 0.0  ;;  %v2031_v40 = vadd.f32 %v2965_v22, %v2016_v5  ;;  %v2864_v27 = vsel %vm460_vm0, %v2038_v16, %v2847_v4  ;;  %v2014_v32 = vmul.f32 %v2964_v35, %v1990_v57 }
 0x343   : > { %2873 = vst.msk [vmem:[%s5159_s30 + $0x30] sm:$0xff] %vm2866_vm5, %v2864_v27 }
 0x344   : > { %v2862_v11 = vsel %vm460_vm0, %v2036_v37, %v2843_v58  ;;  %v2039_v55 = vmax.f32 %v2031_v40, 0.0  ;;  %v2029_v3 = vadd.f32 %v2965_v22, %v2014_v32 }
 0x345   : > { %2871 = vst.msk [vmem:[%s5159_s30 + $0x20] sm:$0xff] %vm2866_vm5, %v2862_v11 }
 0x346   : > { %v2037_v63 = vmax.f32 %v2029_v3, 0.0  ;;  %v2865_v15 = vsel %vm460_vm0, %v2039_v55, %v2849_v39 }
 0x347   : > { %2874 = vst.msk [vmem:[%s5159_s30 + $0x38] sm:$0xff] %vm2866_vm5, %v2865_v15 }
 0x348   : > { %v2863_v1 = vsel %vm460_vm0, %v2037_v63, %v2845_v45 }
 0x349   : > { %2872 = vst.msk [vmem:[%s5159_s30 + $0x28] sm:$0xff] %vm2866_vm5, %v2863_v1 }
 0x34a PF: > { %s21_s17 = sadd.s32 1, %s3174_s17  }
 0x34b   : > { %p18_p4 = scmp.ge.s32.totalorder %s21_s17, 4  }
 0x34d   :  { %20 = sbr.rel (!%p18_p4) target bundleno = 1 (0x1), region = 98 }

// kernel: _lambda_.11
= control target key start
LH: loop header
LB: loop body
LE: loop exit
PB: predicated region body
PF: predicated region fallthrough
CT: control target
= control target key end

     0   :  { %v202_v1 = vmov 0.0   ;;  %vm203_vm0 = vmmov 0   ;;  %vm20_vm1 = vcmask 517120   ;;  %s255_s0 = inlined_call_operand.vmem [shape: f32[2,2,2,64], index: 0, kind: input, shape index: {}]   ;;  %s256_s1 = inlined_call_operand.vmem [shape: bf16[64,10], index: 1, kind: input, shape index: {}]   ;;  %s257_s2 = inlined_call_operand.vmem [shape: f32[1,10], index: 2, kind: input, shape index: {}]   ;;  %s258_s3 = inlined_call_operand.hbm [shape: f32[2,10], index: 3, kind: output, shape index: {}]  }
   0x1   :  { %v176_v0 = vld [vmem:[%s256_s1 + $0x18] sm:$0xff]   ;;  %161 = vmatprep.subr.bf16.mxu0 %v202_v1  ;;  %v177_v2 = vld [vmem:[%s256_s1 + $0x10] sm:$0xff]   ;;  %169 = vmatprep.mubr.msk.bf16.mxu0 %vm203_vm0, %v202_v1  ;;  %v16_v3 = vld [vmem:[%s255_s0] sm:$0x3] }
   0x2   :  { %162 = vmatpush3.bf16.msra.mxu0 %v176_v0  ;;  %v17_v4 = vld [vmem:[%s255_s0 + $0x2] sm:$0x3]  ;;  %v18_v5 = vld [vmem:[%s255_s0 + $0x4] sm:$0x3]  ;;  %v19_v6 = vld [vmem:[%s255_s0 + $0x6] sm:$0x3] }
   0x3   :  { %163 = vmatprep.subr.bf16.mxu0 %v202_v1  ;;  %v21_v7 = vsel %vm20_vm1, %v16_v3, 0.0  ;;  %v22_v8 = vsel %vm20_vm1, %v17_v4, 0.0  ;;  %v30_v9 = vsel %vm20_vm1, %v18_v5, 0.0  ;;  %v178_v10 = vld [vmem:[%s256_s1 + $0x8] sm:$0xff]   ;;  %v31_v12 = vsel %vm20_vm1, %v19_v6, 0.0 }
   0x4   :  { %v23_v11 = vadd.f32 %v22_v8, %v21_v7 }
   0x6   :  { %164 = vmatpush3.bf16.msra.mxu0 %v177_v2 }
   0x7   :  { %8 = vsyncpa [#allocation3], 0  ;;  %165 = vmatprep.subr.bf16.mxu0 %v202_v1  ;;  %v32_v13 = vadd.f32 %v31_v12, %v30_v9  ;;  %v24_v14 = vrot.slane %v23_v11, 4  ;;  %v179_v16 = vld [vmem:[%s256_s1] sm:$0xff]   ;;  %vm63_vm2 = vcmask 1041409   ;;  %vm90_vm3 = vcmask 523264  }
   0x8   :  { %v150_v35 = vld [vmem:[%s257_s2] ss:$0 sm:$0xff]  ;;  %s204_s28 = smov [#allocation2]   ;;  %vm134_vm4 = vcmask 74752  }
   0x9   :  { %v33_v15 = vrot.slane %v32_v13, 4  ;;  %v25_v17 = vadd.f32 %v24_v14, %v23_v11  ;;  %s142_s29 = sshll.u32 %s204_s28, 4  ;;  %s143_s29 = int_to_ptr.vmem [resolvable:$true] %s142_s29 }
   0xa   :  { %166 = vmatpush3.bf16.msra.mxu0 %v178_v10  ;;  %s180_s30 = scalar_lea.vmem %s143_s29, 32  ;;  %p185_p1 = scmp.lt.s32.totalorder %s143_s29, %s143_s29 }
   0xb   :  { %167 = vmatprep.subr.bf16.mxu0 %v202_v1  ;;  %v34_v18 = vadd.f32 %v33_v15, %v32_v13  ;;  %v26_v19 = vrot.slane %v25_v17, 2  ;;  %p181_p0 = scmp.ne.s32.totalorder %s143_s29, %s180_s30  ;;  %p186_p2 = scmp.lt.s32.totalorder %s180_s30, %s180_s30 }
   0xd   :  { %v35_v20 = vrot.slane %v34_v18, 2  ;;  %v27_v21 = vadd.f32 %v26_v19, %v25_v17  ;;  %p187_p3 = por %p186_p2, %p185_p1 }
   0xe   :  { %168 = vmatpush3.bf16.msra.mxu0 %v179_v16 }
   0xf   :  { %v36_v22 = vadd.f32 %v35_v20, %v34_v18  ;;  %v28_v23 = vrot.slane %v27_v21, 1  ;;  %p188_p4 = pnand %p187_p3, %p181_p0 }
  0x11   :  { %v37_v24 = vrot.slane %v36_v22, 1  ;;  %v29_v25 = vadd.f32 %v28_v23, %v27_v21 }
  0x13   :  { %v38_v26 = vadd.f32 %v37_v24, %v36_v22  ;;  %v40_v27 = vmul.f32 0.25, %v29_v25 }
  0x15   :  { %v41_v28 = vmul.f32 0.25, %v38_v26  ;;  %v42_v29 = vpack.c.bf16 %v40_v27, %v40_v27 }
  0x17   :  { %v43_v30 = vpack.c.bf16 %v41_v28, %v41_v28  ;;  %v61_v31 = vunpack.c.l.b16 %v42_v29 }
  0x19   :  { %v62_v32 = vunpack.c.l.b16 %v43_v30 }
  0x1b   :  { %v64_v33 = vsel %vm63_vm2, %v62_v32, %v61_v31 }
  0x1c   :  { %v65_v34 = vpack.c.b16 %v64_v33, %v64_v33 }
  0x1e   :  { %170 = vmatmul.mubr.msk.bf16.vlgmr.msra.gmra.mxu0 %vm90_vm3, %v65_v34 }
  0xde   :  { %v128_v36 = vpop.f32.mrf.mxu0 }
  0xdf   :  { %v129_v37 = vadd.f32 %v150_v35, %v128_v36 }
  0xe0   :  { %v171_v38 = vpop.f32.mrf.mxu0 }
  0xe1   :  { %135 = vst.msk [vmem:[#allocation2] sm:$0x3] %vm134_vm4, %v129_v37 }
  0xe2   :  { %v131_v39 = vpop.f32.mrf.mxu0 }
  0xe3   :  { %191 = shalt.err (!%p188_p4)
}
  0xe4   :  { %145 = dma.vmem_to_hbm [thread:$0]  %s143_s29, 32, %s258_s3, [#allocation3]   ;;  %v172_v40 = vpop.f32.mrf.mxu0 }
  0xe5   :  { %200 = dma.done.wait [#allocation3], 32  }
  0xe6   :  { %201 = vsyncadd [#allocation3], 4294967264 }
  0xe7   :  { %149 = vsyncpa [#allocation3], 1 }

// kernel: _lambda_.10
= control target key start
LH: loop header
LB: loop body
LE: loop exit
PB: predicated region body
PF: predicated region fallthrough
CT: control target
= control target key end

     0   :  { %s1221_s17 = smov 0   ;;  %s1349_s0 = inlined_call_operand.vmem [shape: f32[2,4,4,48], index: 0, kind: input, shape index: {}]   ;;  %s1350_s1 = inlined_call_operand.vmem [shape: bf16[48,4], index: 1, kind: input, shape index: {}]   ;;  %s1351_s2 = inlined_call_operand.vmem [shape: f32[1,4], index: 2, kind: input, shape index: {}]   ;;  %s1352_s3 = inlined_call_operand.vmem [shape: f32[1,4], index: 3, kind: input, shape index: {}]   ;;  %s1353_s4 = inlined_call_operand.vmem [shape: f32[3,3,4], index: 4, kind: input, shape index: {}]   ;;  %s1354_s5 = inlined_call_operand.vmem [shape: f32[1,4], index: 5, kind: input, shape index: {}]   ;;  %s1355_s6 = inlined_call_operand.vmem [shape: f32[1,4], index: 6, kind: input, shape index: {}]   ;;  %s1356_s7 = inlined_call_operand.vmem [shape: bf16[4,16], index: 7, kind: input, shape index: {}]   ;;  %s1357_s8 = inlined_call_operand.vmem [shape: f32[1,16], index: 8, kind: input, shape index: {}]   ;;  %s1358_s9 = inlined_call_operand.vmem [shape: f32[1,16], index: 9, kind: input, shape index: {}]   ;;  %s1359_s10 = inlined_call_operand.vmem [shape: f32[4,16], index: 10, kind: input, shape index: {}]   ;;  %s1360_s11 = inlined_call_operand.vmem [shape: f32[2,2,2,64], index: 11, kind: output, shape index: {}]  }
   0x1 LB: > { %s1064_s18 = sadd.s32 4294967295, %s1155_s17   ;;  %p1068_p0 = scmp.ge.s32.totalorder %s1155_s17, 1  ;;  %s1155_s17 = sphi %s1221_s17, %s21_s17  }
   0x2   : > { %p337_p1 = scmp.lt.s32.totalorder %s1155_s17, 3 }
   0x4   : > { %p338_p2 = pnand %p1068_p0, %p337_p1 }
   0x5   : > { %p377_p3 = scmp.lt.s32.totalorder (!%p338_p2), %s1064_s18, 1  ;;  %s1159_s30 = smov (!%p338_p2), 16  }
   0x6   : > { %341 = sbr.rel (%p338_p2) target bundleno = 786 (0x312), region = 64 }
   0xb   : > { %v1144_v0 = vld [vmem:[%s1350_s1 + $0x10] sm:$0xff]   ;;  %v1157_v1 = vmov 0.0   ;;  %v1145_v2 = vld [vmem:[%s1350_s1 + $0x8] sm:$0xff]   ;;  %vm1158_vm0 = vmmov 0   ;;  %vm824_vm1 = vcmask 390144   ;;  %s1362_s18 = smov (!%p377_p3, %s1064_s18), 1  ;;  %v517_v11 = vlaneseq }
   0xc   : > { %1102 = vmatprep.subr.bf16.mxu0 %v1157_v1  ;;  %1112 = vmatprep.subr.mxu1 %v1157_v1  ;;  %825 = vst.msk [vmem:[#allocation3] sm:$0x3f] %vm824_vm1, %v1157_v1  ;;  %826 = vst.msk [vmem:[#allocation3 + $0x8] sm:$0x3f] %vm824_vm1, %v1157_v1  ;;  %v1146_v3 = vld [vmem:[%s1350_s1] sm:$0xff]   ;;  %s1088_s25 = sshll.u32 %s1362_s18, 4 }
   0xd   : > { %1103 = vmatpush3.bf16.msra.mxu0 %v1144_v0  ;;  %1108 = vmatprep.mubr.msk.bf16.mxu0 %vm1158_vm0, %v1157_v1  ;;  %827 = vst.msk [vmem:[#allocation3 + $0x10] sm:$0x3f] %vm824_vm1, %v1157_v1  ;;  %828 = vst.msk [vmem:[#allocation3 + $0x18] sm:$0x3f] %vm824_vm1, %v1157_v1  ;;  %vm832_vm2 = vcmask 388096   ;;  %s381_s28 = scalar_lea.vmem %s1349_s0, %s1088_s25  ;;  %vm426_vm3 = vcmask 392192  }
   0xe   : > { %1104 = vmatprep.subr.bf16.mxu0 %v1157_v1  ;;  %1116 = vmatprep.mubr.msk.f32.mxu1 %vm1158_vm0, %v1157_v1  ;;  %829 = vst.msk [vmem:[#allocation3 + $0x20] sm:$0x3f] %vm824_vm1, %v1157_v1  ;;  %830 = vst.msk [vmem:[#allocation3 + $0x28] sm:$0x3f] %vm824_vm1, %v1157_v1  ;;  %v388_v4 = vld [vmem:[%s381_s28] sm:$0xf] }
   0xf   : > { %v389_v5 = vld [vmem:[%s381_s28 + $0x4] sm:$0xf]  ;;  %v390_v6 = vld [vmem:[%s381_s28 + $0x8] sm:$0xf]  ;;  %v391_v7 = vld [vmem:[%s381_s28 + $0xc] sm:$0xf] }
  0x10   : > { %v397_v8 = vcombine.low %v388_v4, %v389_v5  ;;  %833 = vst.msk [vmem:[#allocation3 + $0x9] sm:$0xf] %vm832_vm2, %v388_v4  ;;  %834 = vst.msk [vmem:[#allocation3 + $0x11] sm:$0xf] %vm832_vm2, %v389_v5  ;;  %v398_v9 = vcombine.low %v390_v6, %v391_v7  ;;  %vm491_vm4 = vcmask 29696   ;;  %v1264_v12 = vshrl.u32 %v517_v11, 7 }
  0x11   : > { %1105 = vmatpush3.bf16.msra.mxu0 %v1145_v2  ;;  %835 = vst.msk [vmem:[#allocation3 + $0x19] sm:$0xf] %vm832_vm2, %v390_v6  ;;  %836 = vst.msk [vmem:[#allocation3 + $0x21] sm:$0xf] %vm832_vm2, %v391_v7  ;;  %v1077_v13 = vld [vmem:[%s1351_s2] ss:$0 sm:$0xff] }
  0x12   : > { %1106 = vmatprep.subr.bf16.mxu0 %v1157_v1  ;;  %v401_v10 = vpack.c.bf16 %v398_v9, %v397_v8  ;;  %492 = vst.msk [vmem:[#allocation2] sm:$0x3f] %vm491_vm4, %v1157_v1  ;;  %493 = vst.msk [vmem:[#allocation2 + $0x8] sm:$0x3f] %vm491_vm4, %v1157_v1  ;;  %v1270_v14 = vsub.s32 0, %v1264_v12  ;;  %v1273_v15 = vsub.s32 1, %v1264_v12 }
  0x13   : > { %494 = vst.msk [vmem:[#allocation2 + $0x10] sm:$0x3f] %vm491_vm4, %v1157_v1  ;;  %497 = vst.msk [vmem:[#allocation2 + $0x28] sm:$0x3f] %vm491_vm4, %v1157_v1  ;;  %v1078_v17 = vld [vmem:[%s1352_s3] ss:$0 sm:$0xff] }
  0x14   : > { %495 = vst.msk [vmem:[#allocation2 + $0x18] sm:$0x3f] %vm491_vm4, %v1157_v1  ;;  %496 = vst.msk [vmem:[#allocation2 + $0x20] sm:$0x3f] %vm491_vm4, %v1157_v1  ;;  %v510_v18 = vld [vmem:[%s1353_s4] sm:$0x7] }
  0x15   : > { %1107 = vmatpush3.bf16.msra.mxu0 %v1146_v3  ;;  %v1282_v21 = vsub.s32 2, %v1264_v12  ;;  %v520_v23 = vrot.slane %v510_v18, %v1270_v14  ;;  %v536_v24 = vrot.slane %v510_v18, %v1273_v15  ;;  %vm505_vm5 = vcmask 27648   ;;  %v511_v38 = vld [vmem:[%s1353_s4 + $0x4] sm:$0x7]  ;;  %v1298_v45 = vld [vmem:[%s1353_s4 + $0x8] sm:$0x7] }
  0x16   : > { %v568_v42 = vrot.slane %v511_v38, %v1270_v14  ;;  %v584_v54 = vrot.slane %v511_v38, %v1273_v15  ;;  %vm666_vm6 = vcmask 130048   ;;  %vm763_vm7 = vcmask 1041408   ;;  %s1089_s16 = sshll.u32 %s1362_s18, 2 }
  0x17   : > { %v552_v31 = vrot.slane %v510_v18, %v1282_v21  ;;  %v600_v3 = vrot.slane %v511_v38, %v1282_v21  ;;  %vm759_vm8 = vcmask 31744   ;;  %s386_s21 = scalar_lea.vmem %s1360_s11, %s1089_s16  ;;  %vm1006_vm9 = vcmask 517120  }
  0x18   : > { %1109 = vmatmul.mubr.msk.bf16.vlgmr.msra.gmra.mxu0 %vm426_vm3, %v401_v10 }
  0x19   : > { %v513_v26 = vld [vmem:[#allocation2] sm:$0xf] }
  0x1a   : > { %v529_v27 = vld [vmem:[#allocation2 + $0x1] sm:$0xf]  ;;  %v521_v34 = vmul.f32 %v520_v23, %v513_v26 }
  0x1b   : > { %v537_v35 = vmul.f32 %v536_v24, %v529_v27  ;;  %v545_v36 = vld [vmem:[#allocation2 + $0x2] sm:$0xf] }
  0x1c   : > { %v553_v41 = vmul.f32 %v552_v31, %v545_v36 }
  0x1d   : > { %v541_v40 = vadd.f32 %v537_v35, %v521_v34 }
  0x1f   : > { %v557_v49 = vadd.f32 %v553_v41, %v541_v40 }
  0xd8   : > { %v464_v16 = vpop.f32.mrf.mxu0 }
  0xd9   : > { %v478_v19 = vmul.f32 %v1077_v13, %v464_v16  ;;  %v617_v16 = vrot.slane %v1298_v45, %v1270_v14 }
  0xda   : > { %v1110_v20 = vpop.f32.mrf.mxu0 }
  0xdb   : > { %v487_v22 = vadd.f32 %v1078_v17, %v478_v19 }
  0xdc   : > { %v467_v25 = vpop.f32.mrf.mxu0 }
  0xdd   : > { %v489_v28 = vmax.f32 %v487_v22, 0.0  ;;  %v479_v29 = vmul.f32 %v1077_v13, %v467_v25 }
  0xde   : > { %v1111_v30 = vpop.f32.mrf.mxu0 }
  0xdf   : > { %v500_v32 = vcombine.high %v489_v28, %v489_v28  ;;  %506 = vst.msk [vmem:[#allocation2 + $0x9] sm:$0xf] %vm505_vm5, %v489_v28  ;;  %v488_v33 = vadd.f32 %v1078_v17, %v479_v29  ;;  %v613_v30 = vld [vmem:[#allocation2 + $0x28] sm:$0xf] }
  0xe1   : > { %507 = vst.msk [vmem:[#allocation2 + $0x11] sm:$0xf] %vm505_vm5, %v500_v32  ;;  %v490_v37 = vmax.f32 %v488_v33, 0.0 }
  0xe3   : > { %v501_v39 = vcombine.high %v490_v37, %v490_v37  ;;  %508 = vst.msk [vmem:[#allocation2 + $0x19] sm:$0xf] %vm505_vm5, %v490_v37 }
  0xe5   : > { %509 = vst.msk [vmem:[#allocation2 + $0x21] sm:$0xf] %vm505_vm5, %v501_v39 }
  0xe6   : > { %v514_v43 = vld [vmem:[#allocation2 + $0x8] sm:$0xf] }
  0xe7   : > { %v530_v44 = vld [vmem:[#allocation2 + $0x9] sm:$0xf]  ;;  %v522_v46 = vmul.f32 %v520_v23, %v514_v43 }
  0xe8   : > { %v538_v47 = vmul.f32 %v536_v24, %v530_v44  ;;  %v546_v48 = vld [vmem:[#allocation2 + $0xa] sm:$0xf]  ;;  %v515_v51 = vld [vmem:[#allocation2 + $0x10] sm:$0xf] }
  0xe9   : > { %v561_v50 = vld [vmem:[#allocation2 + $0x8] sm:$0xf]  ;;  %v531_v52 = vld [vmem:[#allocation2 + $0x11] sm:$0xf]  ;;  %v523_v56 = vmul.f32 %v520_v23, %v515_v51  ;;  %v554_v4 = vmul.f32 %v552_v31, %v546_v48 }
  0xea   : > { %v547_v53 = vld [vmem:[#allocation2 + $0x12] sm:$0xf]  ;;  %v569_v55 = vmul.f32 %v568_v42, %v561_v50  ;;  %v539_v57 = vmul.f32 %v536_v24, %v531_v52  ;;  %v542_v58 = vadd.f32 %v538_v47, %v522_v46  ;;  %v577_v60 = vld [vmem:[#allocation2 + $0x9] sm:$0xf]  ;;  %v516_v62 = vld [vmem:[#allocation2 + $0x18] sm:$0xf] }
  0xeb   : > { %v562_v59 = vld [vmem:[#allocation2 + $0x10] sm:$0xf]  ;;  %v593_v61 = vld [vmem:[#allocation2 + $0xa] sm:$0xf]  ;;  %v532_v63 = vld [vmem:[#allocation2 + $0x19] sm:$0xf]  ;;  %v555_v2 = vmul.f32 %v552_v31, %v547_v53  ;;  %v524_v5 = vmul.f32 %v520_v23, %v516_v62  ;;  %v585_v19 = vmul.f32 %v584_v54, %v577_v60  ;;  %v649_v62 = vrot.slane %v1298_v45, %v1282_v21 }
  0xec   : > { %v548_v0 = vld [vmem:[#allocation2 + $0x1a] sm:$0xf]  ;;  %v540_v6 = vmul.f32 %v536_v24, %v532_v63  ;;  %v543_v7 = vadd.f32 %v539_v57, %v523_v56  ;;  %v573_v10 = vadd.f32 %v569_v55, %v557_v49  ;;  %v578_v11 = vld [vmem:[#allocation2 + $0x11] sm:$0xf]  ;;  %v564_v13 = vld [vmem:[#allocation2 + $0x20] sm:$0xf]  ;;  %v558_v17 = vadd.f32 %v554_v4, %v542_v58 }
  0xed   : > { %v563_v8 = vld [vmem:[#allocation2 + $0x18] sm:$0xf]  ;;  %v570_v18 = vmul.f32 %v568_v42, %v562_v59  ;;  %v556_v22 = vmul.f32 %v552_v31, %v548_v0  ;;  %v580_v27 = vld [vmem:[#allocation2 + $0x21] sm:$0xf]  ;;  %v594_v23 = vld [vmem:[#allocation2 + $0x12] sm:$0xf]  ;;  %v572_v24 = vmul.f32 %v568_v42, %v564_v13  ;;  %v586_v32 = vmul.f32 %v584_v54, %v578_v11 }
  0xee   : > { %v579_v9 = vld [vmem:[#allocation2 + $0x19] sm:$0xf]  ;;  %v544_v20 = vadd.f32 %v540_v6, %v524_v5  ;;  %v559_v25 = vadd.f32 %v555_v2, %v543_v7  ;;  %v571_v26 = vmul.f32 %v568_v42, %v563_v8  ;;  %v601_v33 = vmul.f32 %v600_v3, %v593_v61  ;;  %v596_v36 = vld [vmem:[#allocation2 + $0x22] sm:$0xf]  ;;  %v610_v39 = vld [vmem:[#allocation2 + $0x10] sm:$0xf] }
  0xef   : > { %v595_v28 = vld [vmem:[#allocation2 + $0x1a] sm:$0xf]  ;;  %v587_v29 = vmul.f32 %v584_v54, %v579_v9  ;;  %v612_v37 = vld [vmem:[#allocation2 + $0x20] sm:$0xf]  ;;  %v574_v14 = vadd.f32 %v570_v18, %v558_v17  ;;  %v589_v38 = vadd.f32 %v585_v19, %v573_v10  ;;  %v588_v40 = vmul.f32 %v584_v54, %v580_v27  ;;  %v629_v48 = vld [vmem:[#allocation2 + $0x29] sm:$0xf] }
  0xf0   : > { %v560_v34 = vadd.f32 %v556_v22, %v544_v20  ;;  %v575_v35 = vadd.f32 %v571_v26, %v559_v25  ;;  %v603_v41 = vmul.f32 %v600_v3, %v595_v28  ;;  %v633_v31 = vrot.slane %v1298_v45, %v1273_v15  ;;  %v611_v44 = vld [vmem:[#allocation2 + $0x18] sm:$0xf]  ;;  %v628_v47 = vld [vmem:[#allocation2 + $0x21] sm:$0xf]  ;;  %v645_v54 = vld [vmem:[#allocation2 + $0x2a] sm:$0xf] }
  0xf1   : > { %v602_v43 = vmul.f32 %v600_v3, %v594_v23  ;;  %v590_v49 = vadd.f32 %v586_v32, %v574_v14  ;;  %v605_v50 = vadd.f32 %v601_v33, %v589_v38  ;;  %v627_v51 = vld [vmem:[#allocation2 + $0x19] sm:$0xf]  ;;  %v604_v52 = vmul.f32 %v600_v3, %v596_v36  ;;  %v626_v63 = vld [vmem:[#allocation2 + $0x11] sm:$0xf]  ;;  %v644_v3 = vld [vmem:[#allocation2 + $0x22] sm:$0xf] }
  0xf2   : > { %v576_v46 = vadd.f32 %v572_v24, %v560_v34  ;;  %v591_v42 = vadd.f32 %v587_v29, %v575_v35  ;;  %v620_v53 = vmul.f32 %v617_v16, %v612_v37  ;;  %v621_v55 = vmul.f32 %v617_v16, %v613_v30  ;;  %v643_v8 = vld [vmem:[#allocation2 + $0x1a] sm:$0xf]  ;;  %v642_v17 = vld [vmem:[#allocation2 + $0x12] sm:$0xf]  ;;  %v1311_v23 = vld [vmem:[%s1359_s10] sm:$0xf] }
  0xf3   : > { %v618_v56 = vmul.f32 %v617_v16, %v610_v39  ;;  %v606_v59 = vadd.f32 %v602_v43, %v590_v49  ;;  %v619_v60 = vmul.f32 %v617_v16, %v611_v44  ;;  %v636_v61 = vmul.f32 %v633_v31, %v628_v47  ;;  %v758_v24 = vld [vmem:[%s1356_s7] sm:$0x3]  ;;  %v840_v32 = vld [vmem:[#allocation3 + $0x18] sm:$0xf]  ;;  %v837_v35 = vld [vmem:[#allocation3] sm:$0xf] }
  0xf4   : > { %v592_v57 = vadd.f32 %v588_v40, %v576_v46  ;;  %v607_v58 = vadd.f32 %v603_v41, %v591_v42  ;;  %v637_v15 = vmul.f32 %v633_v31, %v629_v48  ;;  %v635_v0 = vmul.f32 %v633_v31, %v627_v51  ;;  %v839_v30 = vld [vmem:[#allocation3 + $0x10] sm:$0xf]  ;;  %v848_v34 = vld [vmem:[#allocation3 + $0x19] sm:$0xf]  ;;  %v838_v36 = vld [vmem:[#allocation3 + $0x8] sm:$0xf] }
  0xf5   : > { %v622_v5 = vadd.f32 %v618_v56, %v605_v50  ;;  %v623_v6 = vadd.f32 %v619_v60, %v606_v59  ;;  %v653_v7 = vmul.f32 %v649_v62, %v645_v54  ;;  %v634_v11 = vmul.f32 %v633_v31, %v626_v63  ;;  %v847_v33 = vld [vmem:[#allocation3 + $0x11] sm:$0xf]  ;;  %v845_v37 = vld [vmem:[#allocation3 + $0x1] sm:$0xf]  ;;  %v846_v14 = vld [vmem:[#allocation3 + $0x9] sm:$0xf] }
  0xf6   : > { %v608_v2 = vadd.f32 %v604_v52, %v592_v57  ;;  %v624_v4 = vadd.f32 %v620_v53, %v607_v58  ;;  %v652_v18 = vmul.f32 %v649_v62, %v644_v3  ;;  %v651_v20 = vmul.f32 %v649_v62, %v643_v8  ;;  %v855_v40 = vld [vmem:[#allocation3 + $0x12] sm:$0xf]  ;;  %v856_v41 = vld [vmem:[#allocation3 + $0x1a] sm:$0xf]  ;;  %v853_v44 = vld [vmem:[#allocation3 + $0x2] sm:$0xf] }
  0xf7   : > { %v639_v13 = vadd.f32 %v635_v0, %v623_v6  ;;  %v638_v19 = vadd.f32 %v634_v11, %v622_v5  ;;  %v650_v45 = vmul.f32 %v649_v62, %v642_v17  ;;  %v765_v29 = vsel %vm763_vm7, %v758_v24, 0  ;;  %v854_v46 = vld [vmem:[#allocation3 + $0xa] sm:$0xf]  ;;  %v863_v48 = vld [vmem:[#allocation3 + $0x18] sm:$0xf] }
  0xf8   : > { %v625_v9 = vadd.f32 %v621_v55, %v608_v2  ;;  %v640_v10 = vadd.f32 %v636_v61, %v624_v4  ;;  %v851_v38 = vadd.f32 %v847_v33, %v839_v30  ;;  %v852_v39 = vadd.f32 %v848_v34, %v840_v32  ;;  %v864_v49 = vld [vmem:[#allocation3 + $0x20] sm:$0xf]  ;;  %v861_v52 = vld [vmem:[#allocation3 + $0x8] sm:$0xf]  ;;  %v862_v53 = vld [vmem:[#allocation3 + $0x10] sm:$0xf] }
  0xf9   : > { %v655_v25 = vadd.f32 %v651_v20, %v639_v13  ;;  %v654_v27 = vadd.f32 %v650_v45, %v638_v19  ;;  %v849_v31 = vadd.f32 %v845_v37, %v837_v35  ;;  %v850_v43 = vadd.f32 %v846_v14, %v838_v36  ;;  %v871_v57 = vld [vmem:[#allocation3 + $0x19] sm:$0xf]  ;;  %v872_v58 = vld [vmem:[#allocation3 + $0x21] sm:$0xf]  ;;  %v869_v60 = vld [vmem:[#allocation3 + $0x9] sm:$0xf] }
  0xfa   : > { %v641_v16 = vadd.f32 %v637_v15, %v625_v9  ;;  %v656_v22 = vadd.f32 %v652_v18, %v640_v10  ;;  %v859_v42 = vadd.f32 %v855_v40, %v851_v38  ;;  %v860_v47 = vadd.f32 %v856_v41, %v852_v39  ;;  %v870_v61 = vld [vmem:[#allocation3 + $0x11] sm:$0xf]  ;;  %v879_v63 = vld [vmem:[#allocation3 + $0x1a] sm:$0xf]  ;;  %v880_v0 = vld [vmem:[#allocation3 + $0x22] sm:$0xf] }
  0xfb   : > { %v662_v28 = vcombine.low %v654_v27, %v655_v25  ;;  %v857_v50 = vadd.f32 %v853_v44, %v849_v31  ;;  %v858_v51 = vadd.f32 %v854_v46, %v850_v43  ;;  %v877_v5 = vld [vmem:[#allocation3 + $0xa] sm:$0xf]  ;;  %v878_v6 = vld [vmem:[#allocation3 + $0x12] sm:$0xf]  ;;  %v888_v8 = vld [vmem:[#allocation3 + $0x20] sm:$0xf] }
  0xfc   : > { %v657_v21 = vadd.f32 %v653_v7, %v641_v16  ;;  %v867_v55 = vadd.f32 %v863_v48, %v859_v42  ;;  %v868_v56 = vadd.f32 %v864_v49, %v860_v47  ;;  %v889_v9 = vld [vmem:[#allocation3 + $0x28] sm:$0xf]  ;;  %v886_v13 = vld [vmem:[#allocation3 + $0x10] sm:$0xf]  ;;  %v887_v17 = vld [vmem:[#allocation3 + $0x18] sm:$0xf] }
  0xfd   : > { %v865_v54 = vadd.f32 %v861_v52, %v857_v50  ;;  %v866_v59 = vadd.f32 %v862_v53, %v858_v51  ;;  %v896_v19 = vld [vmem:[#allocation3 + $0x21] sm:$0xf]  ;;  %v897_v20 = vld [vmem:[#allocation3 + $0x29] sm:$0xf]  ;;  %v894_v45 = vld [vmem:[#allocation3 + $0x11] sm:$0xf] }
  0xfe   : > { %v663_v26 = vcombine.low %v656_v22, %v657_v21  ;;  %v875_v15 = vadd.f32 %v871_v57, %v867_v55  ;;  %v876_v62 = vadd.f32 %v872_v58, %v868_v56  ;;  %v895_v25 = vld [vmem:[#allocation3 + $0x19] sm:$0xf]  ;;  %v904_v24 = vld [vmem:[#allocation3 + $0x22] sm:$0xf]  ;;  %v1081_v32 = vld [vmem:[%s1355_s6] ss:$0 sm:$0xff] }
  0xff   : > { %v873_v2 = vadd.f32 %v869_v60, %v865_v54  ;;  %v874_v4 = vadd.f32 %v870_v61, %v866_v59  ;;  %v902_v36 = vld [vmem:[#allocation3 + $0x12] sm:$0xf]  ;;  %v903_v37 = vld [vmem:[#allocation3 + $0x1a] sm:$0xf]  ;;  %v1083_v56 = vld [vmem:[%s1357_s8] ss:$0 sm:$0xff] }
 0x100   : > { %1113 = vmatpush3.msra.mxu1 %v663_v26  ;;  %v883_v3 = vadd.f32 %v879_v63, %v875_v15  ;;  %v884_v7 = vadd.f32 %v880_v0, %v876_v62  ;;  %v1080_v26 = vld [vmem:[%s1354_s5] ss:$0 sm:$0xff] }
 0x101   : > { %1114 = vmatprep.subr.mxu1 %v1157_v1  ;;  %v881_v10 = vadd.f32 %v877_v5, %v873_v2  ;;  %v882_v11 = vadd.f32 %v878_v6, %v874_v4 }
 0x102   : > { %1115 = vmatpush3.msra.mxu1 %v662_v28  ;;  %v892_v16 = vadd.f32 %v888_v8, %v883_v3  ;;  %v893_v18 = vadd.f32 %v889_v9, %v884_v7 }
 0x103   : > { %1117 = vmatmul.mubr.msk.f32.vlgmr.msra.gmra.mxu1 %vm666_vm6, %v1311_v23  ;;  %1119 = vmatprep.subr.bf16.mxu1 %v1157_v1  ;;  %v890_v22 = vadd.f32 %v886_v13, %v881_v10  ;;  %v891_v21 = vadd.f32 %v887_v17, %v882_v11 }
 0x104   : > { %1121 = vmatprep.mubr.msk.bf16.mxu1 %vm1158_vm0, %v1157_v1  ;;  %1120 = vmatpush3.bf16.msra.mxu1 %v765_v29  ;;  %v900_v27 = vadd.f32 %v896_v19, %v892_v16  ;;  %v901_v28 = vadd.f32 %v897_v20, %v893_v18  ;;  %v905_v29 = vld [vmem:[#allocation3 + $0x2a] sm:$0xf] }
 0x105   : > { %1125 = vmatprep.subr.mxu1 %v1157_v1  ;;  %v898_v33 = vadd.f32 %v894_v45, %v890_v22  ;;  %v899_v34 = vadd.f32 %v895_v25, %v891_v21 }
 0x106   : > { %v908_v38 = vadd.f32 %v904_v24, %v900_v27  ;;  %v909_v39 = vadd.f32 %v905_v29, %v901_v28 }
 0x107   : > { %v906_v41 = vadd.f32 %v902_v36, %v898_v33  ;;  %v907_v31 = vadd.f32 %v903_v37, %v899_v34 }
 0x108   : > { %v915_v44 = vcombine.low %v908_v38, %v909_v39 }
 0x109   : > { %v914_v42 = vcombine.low %v906_v41, %v907_v31 }
 0x1c3   : > { %v736_v30 = vpop.f32.mrf.mxu1 }
 0x1c4   : > { %v747_v35 = vmul.f32 %v1080_v26, %v736_v30 }
 0x1c5   : > { %v1118_v14 = vpop.f32.mrf.mxu1 }
 0x1c6   : > { %v755_v40 = vadd.f32 %v1081_v32, %v747_v35 }
 0x1c8   : > { %v756_v43 = vmax.f32 %v755_v40, 0.0 }
 0x1ca   : > { %v757_v46 = vpack.c.bf16 %v756_v43, %v756_v43 }
 0x1cc   : > { %1122 = vmatmul.mubr.msk.bf16.vlgmr.msra.gmra.mxu1 %vm759_vm8, %v757_v46 }
 0x1cd   : > { %1126 = vmatpush3.msra.mxu1 %v915_v44  ;;  %1129 = vmatprep.mubr.msk.f32.mxu1 %vm1158_vm0, %v1157_v1 }
 0x1ce   : > { %1127 = vmatprep.subr.mxu1 %v1157_v1  ;;  %v1160_v1 = vmov 1983009808  }
 0x1cf   : > { %1128 = vmatpush3.msra.mxu1 %v914_v42  ;;  %v997_v57 = vunpack.c.l.s4 %v1160_v1 }
 0x1d1   : > { %v998_v54 = vunpack.c.0.s8 %v997_v57 }
 0x1d3   : > { %v1001_v60 = vsub.s32 %v998_v54, %v1264_v12 }
 0x1d4   : > { %1130 = vmatmul.mubr.msk.f32.vlgmr.msra.gmra.mxu1 %vm666_vm6, %v1311_v23  ;;  %v1084_v23 = vld [vmem:[%s1358_s9] ss:$0 sm:$0xff] }
 0x28c   : > { %v801_v47 = vpop.f32.mrf.mxu1 }
 0x28d   : > { %v814_v58 = vmul.f32 %v1083_v56, %v801_v47 }
 0x28e   : > { %v1123_v48 = vpop.f32.mrf.mxu1 }
 0x28f   : > { %v822_v59 = vadd.f32 %v1084_v23, %v814_v58 }
 0x290   : > { %v804_v49 = vpop.f32.mrf.mxu1 }
 0x291   : > { %v823_v61 = vmax.f32 %v822_v59, 0.0 }
 0x292   : > { %v1124_v50 = vpop.f32.mrf.mxu1 }
 0x294   : > { %v984_v51 = vpop.f32.mrf.mxu1 }
 0x295   : > { %v988_v52 = vmul.f32 0.11111111, %v984_v51 }
 0x296   : > { %v1131_v53 = vpop.f32.mrf.mxu1 }
 0x297   : > { %v989_v55 = vmax.f32 %v988_v52, 0.0 }
 0x299   : > { %991 = vrot.lane.b32.xlu0 %v989_v55, %s1159_s30 }
 0x30b   : > { %v992_v15 = vpop.permute.xlu0 %991 }
 0x30c   : > { %v994_v62 = vsel %vm666_vm6, %v823_v61, %v992_v15 }
 0x30d   : > { %v1002_v63 = vrot.slane %v994_v62, %v1001_v60 }
 0x30f   : > { %v1003_v0 = vcombine.high %v1002_v63, %v1002_v63  ;;  %1007 = vst.msk [vmem:[%s386_s21] sm:$0x3] %vm1006_vm9, %v1002_v63 }
 0x311   : > { %1008 = vst.msk [vmem:[%s386_s21 + $0x2] sm:$0x3] %vm1006_vm9, %v1003_v0 }
 0x312 PF: > { %s21_s17 = sadd.s32 1, %s1155_s17  }
 0x313   : > { %p18_p4 = scmp.ge.s32.totalorder %s21_s17, 4  }
 0x315   :  { %20 = sbr.rel (!%p18_p4) target bundleno = 1 (0x1), region = 98 }

</bundles_post_ra>
